<compile_context>
chip_gen: v7x
topology: tpu7x:2x2x1
jax: 0.10.0
libtpu: 0.0.40
codegen_flags: <defaults>
</compile_context>

<pallas_src>
import math

import jax
import jax.numpy as jnp
from jax import lax
from jax.experimental import pallas as pl
from jax.experimental.pallas import tpu as pltpu

# ----------------------------- model dims (small, synthetic) -----------------
VOCAB = 64
D = 32          # hidden size
NH = 4          # attention heads
DH = D // NH    # head dim
FF = 64         # feed-forward size
MAX_POS = 16
N_ENC = 2
N_DEC = 2
B = 2
S_SRC = 8
T_TGT = 8
BS = B * S_SRC  # flattened tokens per stream

NEG_INF = -1e9
SCALE = 1.0 / math.sqrt(DH)
EPS_BERT = 1e-12
EPS_DEC = 1e-6

# ----------------------------- packed-slab layout constants -------------------
# Weight slab (bf16, 128 lanes wide):
#   attention block i (i in 0..5) -> rows [i*D, (i+1)*D): cols 0:3D = Wqkv, 3D:4D = Wo
#   order: enc0, enc1, dec0.self, dec0.cross, dec1.self, dec1.cross
#   FFN block j (j in 0..3)       -> rows [FFN_W_BASE + j*(D+FF), ...):
#       first D rows:  W1 (D,FF) in cols 0:FF
#       next FF rows:  W2 (FF,D) in cols 0:D
#   order: enc0, enc1, dec0, dec1
N_ATT = N_ENC + 2 * N_DEC          # 6
N_FFN = N_ENC + N_DEC              # 4
FFN_W_BASE = N_ATT * D             # 192
W_ROWS = FFN_W_BASE + N_FFN * (D + FF)   # 576

# Param slab (f32, 128 lanes wide):
#   rows 0..5   : attention biases   [bq|bk|bv (0:3D)] [bo (3D:4D)]
#   rows 6..9   : FFN biases         [b1 (0:FF)] [b2 (FF:FF+D)]
#   rows 10..21 : LayerNorm params   [gamma (0:D)] [beta (D:2D)]
EMB_LN_ROW = N_ATT + N_FFN          # 10
ENC_LN_BASE = EMB_LN_ROW + 1        # 11  (2 rows / enc layer: ln1, ln2)
DEC_LN_BASE = ENC_LN_BASE + 2 * N_ENC   # 15 (3 rows / dec layer)
FINAL_LN_ROW = DEC_LN_BASE + 3 * N_DEC  # 21
P_ROWS = 24                          # padded to a multiple of 8

# Activation slab (f32): (BS, 2*D + 3*BS) = (16, 112)
#   cols 0:D        src token+pos+type embeddings (pre-LN)
#   cols D:2D       tgt token+pos+type embeddings (pre-LN)
#   cols 2D+0*BS..  enc self-attn additive bias   (BS, BS)
#   cols 2D+1*BS..  cross-attn additive bias      (BS, BS)
#   cols 2D+2*BS..  tgt self-attn additive bias   (BS, BS)

ENC_ATT = (0, 1)
DEC_SELF_ATT = (2, 4)
DEC_CROSS_ATT = (3, 5)
ENC_FFN = (0, 1)
DEC_FFN = (2, 3)


# ----------------------------- in-kernel helpers ------------------------------
def _ln_var(x, g, b, eps):
    """nn.LayerNorm style: biased variance, rsqrt(var + eps)."""
    mu = jnp.mean(x, axis=-1, keepdims=True)
    var = jnp.mean(jnp.square(x - mu), axis=-1, keepdims=True)
    return (x - mu) * lax.rsqrt(var + eps) * g + b


def _ln_std(x, g, b):
    """Annotated-transformer LayerNorm: a2*(x-mean)/(unbiased_std+eps)+b2."""
    mu = jnp.mean(x, axis=-1, keepdims=True)
    var = jnp.sum(jnp.square(x - mu), axis=-1, keepdims=True) * (1.0 / (D - 1))
    return g * (x - mu) / (jnp.sqrt(var) + EPS_DEC) + b


def _gelu(x):  # BERT tanh-approx GELU
    c = 0.7978845608028654  # sqrt(2/pi)
    return 0.5 * x * (1.0 + jnp.tanh(c * (x + 0.044715 * x * x * x)))


# ----------------------------- fused forward kernel ---------------------------
def _fused_kernel(w_ref, p_ref, x_ref, out_ref):
    x_all = x_ref[...]                                   # (BS, 2D + 3*BS) f32
    enc_bias = x_all[:, 2 * D + 0 * BS: 2 * D + 1 * BS]  # (BS, BS)
    cross_bias = x_all[:, 2 * D + 1 * BS: 2 * D + 2 * BS]
    tgt_bias = x_all[:, 2 * D + 2 * BS: 2 * D + 3 * BS]

    def ln_params(row):
        r = p_ref[row:row + 1, :]
        return r[:, 0:D], r[:, D:2 * D]

    def attn(x_q, x_kv, att_idx, bias, self_attn):
        """MHA on flattened (BS, D) slabs; `bias` is the (BS, BS) additive mask
        (user mask + cross-batch block-diagonal structure)."""
        base = att_idx * D
        brow = p_ref[att_idx:att_idx + 1, :]
        bqkv = brow[:, 0:3 * D]                          # (1, 3D) f32
        bo = brow[:, 3 * D:4 * D]                        # (1, D)  f32
        wqkv = w_ref[base:base + D, 0:3 * D]             # (D, 3D) bf16
        wo = w_ref[base:base + D, 3 * D:4 * D]           # (D, D)  bf16

        if self_attn:
            qkv = jnp.dot(x_q.astype(jnp.bfloat16), wqkv,
                          preferred_element_type=jnp.float32) + bqkv
            q_all = qkv[:, 0:D]
            k_all = qkv[:, D:2 * D]
            v_all = qkv[:, 2 * D:3 * D]
        else:
            q_all = jnp.dot(x_q.astype(jnp.bfloat16), wqkv[:, 0:D],
                            preferred_element_type=jnp.float32) + bqkv[:, 0:D]
            kv = jnp.dot(x_kv.astype(jnp.bfloat16), wqkv[:, D:3 * D],
                         preferred_element_type=jnp.float32) + bqkv[:, D:3 * D]
            k_all = kv[:, 0:D]
            v_all = kv[:, D:2 * D]

        # Per-head attention; output projection accumulated in registers
        # (no VMEM scratch, no masked partial stores).
        acc = jnp.zeros((BS, D), jnp.float32)
        for h in range(NH):
            c0 = h * DH
            qh = q_all[:, c0:c0 + DH].astype(jnp.bfloat16)
            kh = k_all[:, c0:c0 + DH].astype(jnp.bfloat16)
            vh = v_all[:, c0:c0 + DH].astype(jnp.bfloat16)
            s = lax.dot_general(qh, kh, (((1,), (1,)), ((), ())),
                                preferred_element_type=jnp.float32)
            s = s * SCALE + bias                         # f32 mask math
            s = s - jnp.max(s, axis=-1, keepdims=True)
            p = jnp.exp(s)
            p = p / jnp.sum(p, axis=-1, keepdims=True)   # exact softmax
            ctx_h = jnp.dot(p.astype(jnp.bfloat16), vh,
                            preferred_element_type=jnp.float32)
            acc = acc + jnp.dot(ctx_h.astype(jnp.bfloat16), wo[c0:c0 + DH, :],
                                preferred_element_type=jnp.float32)
        return acc + bo

    def ffn(x, ffn_idx, act):
        fb = FFN_W_BASE + ffn_idx * (D + FF)
        brow = p_ref[N_ATT + ffn_idx:N_ATT + ffn_idx + 1, :]
        b1 = brow[:, 0:FF]
        b2 = brow[:, FF:FF + D]
        w1 = w_ref[fb:fb + D, 0:FF]                      # (D, FF) bf16
        w2 = w_ref[fb + D:fb + D + FF, 0:D]              # (FF, D) bf16
        h = jnp.dot(x.astype(jnp.bfloat16), w1,
                    preferred_element_type=jnp.float32) + b1
        h = act(h)
        return jnp.dot(h.astype(jnp.bfloat16), w2,
                       preferred_element_type=jnp.float32) + b2

    emb_g, emb_b = ln_params(EMB_LN_ROW)

    # ---- BERT embeddings LN + encoder stack (post-LN) -------------------------
    x = _ln_var(x_all[:, 0:D], emb_g, emb_b, EPS_BERT)
    for l in range(N_ENC):
        a = attn(x, x, ENC_ATT[l], enc_bias, True)
        g1, bb1 = ln_params(ENC_LN_BASE + 2 * l)
        x = _ln_var(x + a, g1, bb1, EPS_BERT)
        f = ffn(x, ENC_FFN[l], _gelu)
        g2, bb2 = ln_params(ENC_LN_BASE + 2 * l + 1)
        x = _ln_var(x + f, g2, bb2, EPS_BERT)
    memory = x                                           # (BS, D)

    # ---- tgt embeddings (shared BERT embedding module) + decoder (pre-LN) -----
    y = _ln_var(x_all[:, D:2 * D], emb_g, emb_b, EPS_BERT)
    for l in range(N_DEC):
        g, bb = ln_params(DEC_LN_BASE + 3 * l)
        h = _ln_std(y, g, bb)
        y = y + attn(h, h, DEC_SELF_ATT[l], tgt_bias, True)
        g, bb = ln_params(DEC_LN_BASE + 3 * l + 1)
        h = _ln_std(y, g, bb)
        y = y + attn(h, memory, DEC_CROSS_ATT[l], cross_bias, False)
        g, bb = ln_params(DEC_LN_BASE + 3 * l + 2)
        h = _ln_std(y, g, bb)
        y = y + ffn(h, DEC_FFN[l], lambda v: jnp.maximum(v, 0.0))

    # ---- final decoder LayerNorm ----------------------------------------------
    gf, bf = ln_params(FINAL_LN_ROW)
    out_ref[...] = _ln_std(y, gf, bf)


# ----------------------------- wrapper (plain-JAX glue) ------------------------
def _block_bias(mask_bqk):
    """(B, Sq, Sk) 0/1 mask -> (B*Sq, B*Sk) additive bias with cross-batch
    blocks disabled (so batch-flattened attention stays per-example)."""
    Bm, Sq, Sk = mask_bqk.shape
    same_batch = (jnp.arange(Bm)[:, None, None, None]
                  == jnp.arange(Bm)[None, None, :, None])            # (B,1,B,1)
    keep = jnp.logical_and(same_batch, mask_bqk[:, :, None, :] > 0)  # (B,Sq,B,Sk)
    return jnp.where(keep, 0.0, NEG_INF).reshape(Bm * Sq, Bm * Sk).astype(
        jnp.float32)


def bert_encoder_decoder(packed, src, tgt, src_mask, tgt_mask):
    """forward(src, tgt, src_mask, tgt_mask) -> decoder hidden states (B,T,D)."""
    Bx, S = src.shape
    T = tgt.shape[1]
    assert S == T  # TODO(synk): pass separate positional slabs if src/tgt lengths differ

    # TODO(synk): embedding-table gather stays in plain JAX (jnp.take), not in-kernel.
    src_emb = jnp.take(packed["emb_word"], src.reshape(-1), axis=0)   # (B*S, D)
    tgt_emb = jnp.take(packed["emb_word"], tgt.reshape(-1), axis=0)   # (B*T, D)
    pos_type = jnp.tile(packed["emb_pos"][:S] + packed["emb_type"][0][None, :],
                        (Bx, 1))                                      # (B*S, D)

    enc_bias = _block_bias(jnp.broadcast_to(src_mask[:, None, :], (Bx, S, S)))
    cross_bias = _block_bias(jnp.broadcast_to(src_mask[:, None, :], (Bx, T, S)))
    tgt_bias = _block_bias(tgt_mask)

    # Single activation+mask slab (one DMA): (B*S, 2D + 3*B*S)
    xslab = jnp.concatenate(
        [src_emb + pos_type, tgt_emb + pos_type, enc_bias, cross_bias, tgt_bias],
        axis=1).astype(jnp.float32)

    out2d = pl.pallas_call(
        _fused_kernel,
        out_shape=jax.ShapeDtypeStruct((Bx * T, D), jnp.float32),
        in_specs=[pl.BlockSpec(memory_space=pltpu.MemorySpace.VMEM)] * 3,
        out_specs=pl.BlockSpec(memory_space=pltpu.MemorySpace.VMEM),
    )(packed["wslab"], packed["pslab"], xslab)
    return out2d.reshape(Bx, T, D)


# ----------------------------- deterministic parameter init --------------------
def _dense(key, din, dout):
    w = 0.02 * jax.random.normal(key, (din, dout), jnp.float32)
    return w, jnp.zeros((dout,), jnp.float32)


def _attn_params(keys):
    p = {}
    for nm in ("wq", "wk", "wv", "wo"):
        w, bb = _dense(next(keys), D, D)
        p[nm] = w
        p["b" + nm[1]] = bb
    return p


def init_params(key):
    keys = iter(jax.random.split(key, 256))
    params = {
        "emb": {
            "word": 0.02 * jax.random.normal(next(keys), (VOCAB, D), jnp.float32),
            "pos": 0.02 * jax.random.normal(next(keys), (MAX_POS, D), jnp.float32),
            "type": 0.02 * jax.random.normal(next(keys), (2, D), jnp.float32),
            "ln_g": jnp.ones((D,), jnp.float32),
            "ln_b": jnp.zeros((D,), jnp.float32),
        }
    }
    enc_layers = []
    for _ in range(N_ENC):
        w1, b1 = _dense(next(keys), D, FF)
        w2, b2 = _dense(next(keys), FF, D)
        enc_layers.append({
            "attn": _attn_params(keys),
            "w1": w1, "b1": b1, "w2": w2, "b2": b2,
            "ln1_g": jnp.ones((D,)), "ln1_b": jnp.zeros((D,)),
            "ln2_g": jnp.ones((D,)), "ln2_b": jnp.zeros((D,)),
        })
    params["enc_layers"] = enc_layers

    dec_layers = []
    for _ in range(N_DEC):
        w1, b1 = _dense(next(keys), D, FF)
        w2, b2 = _dense(next(keys), FF, D)
        dec_layers.append({
            "self": _attn_params(keys),
            "cross": _attn_params(keys),
            "w1": w1, "b1": b1, "w2": w2, "b2": b2,
            "ln1_g": jnp.ones((D,)), "ln1_b": jnp.zeros((D,)),
            "ln2_g": jnp.ones((D,)), "ln2_b": jnp.zeros((D,)),
            "ln3_g": jnp.ones((D,)), "ln3_b": jnp.zeros((D,)),
        })
    params["dec_layers"] = dec_layers
    params["dec_ln_g"] = jnp.ones((D,), jnp.float32)
    params["dec_ln_b"] = jnp.zeros((D,), jnp.float32)
    return params


def pack_params(params):
    """Pack all weights / biases / LN params into 2 lane-dense slabs."""
    emb = params["emb"]

    att_blocks = [params["enc_layers"][l]["attn"] for l in range(N_ENC)]
    for lp in params["dec_layers"]:
        att_blocks += [lp["self"], lp["cross"]]
    ffn_blocks = ([params["enc_layers"][l] for l in range(N_ENC)]
                  + [params["dec_layers"][l] for l in range(N_DEC)])

    # ---- weight slab (bf16, 128 lanes) ----
    w_rows = []
    for ap in att_blocks:
        wqkv = jnp.concatenate([ap["wq"], ap["wk"], ap["wv"]], axis=1)  # (D,3D)
        w_rows.append(jnp.concatenate([wqkv, ap["wo"]], axis=1))        # (D,4D)=(32,128)
    for lp in ffn_blocks:
        w_rows.append(jnp.pad(lp["w1"], ((0, 0), (0, 128 - FF))))       # (32,128)
        w_rows.append(jnp.pad(lp["w2"], ((0, 0), (0, 128 - D))))        # (64,128)
    wslab = jnp.concatenate(w_rows, axis=0).astype(jnp.bfloat16)        # (576,128)

    # ---- param slab (f32, 128 lanes): biases + LN params ----
    p_rows = []
    for ap in att_blocks:
        p_rows.append(jnp.concatenate(
            [ap["bq"], ap["bk"], ap["bv"], ap["bo"]])[None, :])         # (1,128)
    for lp in ffn_blocks:
        p_rows.append(jnp.concatenate(
            [lp["b1"], lp["b2"], jnp.zeros((128 - FF - D,))])[None, :])

    def ln_row(g, b):
        return jnp.concatenate([g, b, jnp.zeros((128 - 2 * D,))])[None, :]

    p_rows.append(ln_row(emb["ln_g"], emb["ln_b"]))
    for lp in params["enc_layers"]:
        p_rows += [ln_row(lp["ln1_g"], lp["ln1_b"]),
                   ln_row(lp["ln2_g"], lp["ln2_b"])]
    for lp in params["dec_layers"]:
        p_rows += [ln_row(lp["ln1_g"], lp["ln1_b"]),
                   ln_row(lp["ln2_g"], lp["ln2_b"]),
                   ln_row(lp["ln3_g"], lp["ln3_b"])]
    p_rows.append(ln_row(params["dec_ln_g"], params["dec_ln_b"]))
    p_rows.append(jnp.zeros((P_ROWS - (len(p_rows)), 128)))             # pad rows
    pslab = jnp.concatenate(p_rows, axis=0).astype(jnp.float32)         # (24,128)

    assert wslab.shape == (W_ROWS, 128) and pslab.shape == (P_ROWS, 128)

    return dict(
        emb_word=emb["word"],
        emb_pos=emb["pos"],
        emb_type=emb["type"],
        wslab=wslab,
        pslab=pslab,
    )


# ----------------------------- main --------------------------------------------
if __name__ == "__main__":
    key = jax.random.PRNGKey(0)
    pkey, skey, tkey = jax.random.split(key, 3)
    params = init_params(pkey)
    packed = pack_params(params)

    src = jax.random.randint(skey, (B, S_SRC), 0, VOCAB, dtype=jnp.int32)
    tgt = jax.random.randint(tkey, (B, T_TGT), 0, VOCAB, dtype=jnp.int32)
    # src padding mask: second batch element has 2 padded positions
    src_lens = jnp.array([S_SRC, S_SRC - 2])
    src_mask = (jnp.arange(S_SRC)[None, :] < src_lens[:, None]).astype(jnp.float32)
    # tgt mask: causal (subsequent) mask, broadcast over batch
    causal = jnp.tril(jnp.ones((T_TGT, T_TGT), jnp.float32))
    tgt_mask = jnp.broadcast_to(causal, (B, T_TGT, T_TGT))

    fwd = jax.jit(bert_encoder_decoder)
    out = fwd(packed, src, tgt, src_mask, tgt_mask)
    jax.block_until_ready(out)
    assert out.shape == (B, T_TGT, D) and out.dtype == jnp.float32
    print("KERNEL_OK")
</pallas_src>

<mosaic_0001>
module attributes {stable_mosaic.version = 11 : i64} {
  func.func @_fused_kernel(%arg0: memref<576x128xbf16, #tpu.memory_space<vmem>>, %arg1: memref<24x128xf32, #tpu.memory_space<vmem>>, %arg2: memref<16x112xf32, #tpu.memory_space<vmem>>, %arg3: memref<16x32xf32, #tpu.memory_space<vmem>>) attributes {dimension_semantics = [], scalar_prefetch = 0 : i64, scratch_operands = 0 : i64, tpu.core_type = #tpu.core_type<tc>} {
    %c0 = arith.constant 0 : index
    %c0_0 = arith.constant 0 : index
    %0 = vector.load %arg2[%c0, %c0_0] : memref<16x112xf32, #tpu.memory_space<vmem>>, vector<16x112xf32>
    %1 = vector.extract_strided_slice %0 {offsets = [0, 64], sizes = [16, 16], strides = [1, 1]} : vector<16x112xf32> to vector<16x16xf32>
    %2 = vector.extract_strided_slice %0 {offsets = [0, 80], sizes = [16, 16], strides = [1, 1]} : vector<16x112xf32> to vector<16x16xf32>
    %3 = vector.extract_strided_slice %0 {offsets = [0, 96], sizes = [16, 16], strides = [1, 1]} : vector<16x112xf32> to vector<16x16xf32>
    %c10 = arith.constant 10 : index
    %c0_1 = arith.constant 0 : index
    %4 = vector.load %arg1[%c10, %c0_1] : memref<24x128xf32, #tpu.memory_space<vmem>>, vector<1x128xf32>
    %5 = vector.extract_strided_slice %4 {offsets = [0, 0], sizes = [1, 32], strides = [1, 1]} : vector<1x128xf32> to vector<1x32xf32>
    %6 = vector.extract_strided_slice %4 {offsets = [0, 32], sizes = [1, 32], strides = [1, 1]} : vector<1x128xf32> to vector<1x32xf32>
    %7 = vector.extract_strided_slice %0 {offsets = [0, 0], sizes = [16, 32], strides = [1, 1]} : vector<16x112xf32> to vector<16x32xf32>
    %cst = arith.constant dense<0.000000e+00> : vector<16xf32>
    %8 = vector.multi_reduction <add>, %7, %cst [1] : vector<16x32xf32> to vector<16xf32>
    %9 = vector.shape_cast %8 : vector<16xf32> to vector<16x1xf32>
    %cst_2 = arith.constant 3.200000e+01 : f32
    %10 = vector.broadcast %cst_2 : f32 to vector<16x1xf32>
    %11 = arith.divf %9, %10 : vector<16x1xf32>
    %12 = vector.broadcast %11 : vector<16x1xf32> to vector<16x32xf32>
    %13 = arith.subf %7, %12 : vector<16x32xf32>
    %14 = arith.mulf %13, %13 : vector<16x32xf32>
    %cst_3 = arith.constant dense<0.000000e+00> : vector<16xf32>
    %15 = vector.multi_reduction <add>, %14, %cst_3 [1] : vector<16x32xf32> to vector<16xf32>
    %16 = vector.shape_cast %15 : vector<16xf32> to vector<16x1xf32>
    %cst_4 = arith.constant 3.200000e+01 : f32
    %17 = vector.broadcast %cst_4 : f32 to vector<16x1xf32>
    %18 = arith.divf %16, %17 : vector<16x1xf32>
    %19 = vector.broadcast %11 : vector<16x1xf32> to vector<16x32xf32>
    %20 = arith.subf %7, %19 : vector<16x32xf32>
    %cst_5 = arith.constant 9.99999996E-13 : f32
    %21 = vector.broadcast %cst_5 : f32 to vector<16x1xf32>
    %22 = arith.addf %18, %21 : vector<16x1xf32>
    %23 = math.rsqrt %22 : vector<16x1xf32>
    %24 = vector.broadcast %23 : vector<16x1xf32> to vector<16x32xf32>
    %25 = arith.mulf %20, %24 : vector<16x32xf32>
    %26 = vector.broadcast %5 : vector<1x32xf32> to vector<16x32xf32>
    %27 = arith.mulf %25, %26 : vector<16x32xf32>
    %28 = vector.broadcast %6 : vector<1x32xf32> to vector<16x32xf32>
    %29 = arith.addf %27, %28 : vector<16x32xf32>
    %c0_6 = arith.constant 0 : index
    %c0_7 = arith.constant 0 : index
    %30 = vector.load %arg1[%c0_6, %c0_7] : memref<24x128xf32, #tpu.memory_space<vmem>>, vector<1x128xf32>
    %31 = vector.extract_strided_slice %30 {offsets = [0, 0], sizes = [1, 96], strides = [1, 1]} : vector<1x128xf32> to vector<1x96xf32>
    %32 = vector.extract_strided_slice %30 {offsets = [0, 96], sizes = [1, 32], strides = [1, 1]} : vector<1x128xf32> to vector<1x32xf32>
    %c0_8 = arith.constant 0 : index
    %c0_9 = arith.constant 0 : index
    %33 = vector.load %arg0[%c0_8, %c0_9] : memref<576x128xbf16, #tpu.memory_space<vmem>>, vector<32x96xbf16>
    %c0_10 = arith.constant 0 : index
    %c96 = arith.constant 96 : index
    %34 = vector.load %arg0[%c0_10, %c96] : memref<576x128xbf16, #tpu.memory_space<vmem>>, vector<32x32xbf16>
    %35 = arith.truncf %29 : vector<16x32xf32> to vector<16x32xbf16>
    %cst_11 = arith.constant dense<0.000000e+00> : vector<16x96xf32>
    %36 = tpu.matmul %35, %33, %cst_11 {dimension_numbers = #tpu.dot_dimension_numbers<[1], [0], [0], [1], [0, 0, 1, 1], [], []>} : vector<16x32xbf16>, vector<32x96xbf16>, vector<16x96xf32> -> vector<16x96xf32>
    %37 = vector.broadcast %31 : vector<1x96xf32> to vector<16x96xf32>
    %38 = arith.addf %36, %37 : vector<16x96xf32>
    %39 = vector.extract_strided_slice %38 {offsets = [0, 0], sizes = [16, 32], strides = [1, 1]} : vector<16x96xf32> to vector<16x32xf32>
    %40 = vector.extract_strided_slice %38 {offsets = [0, 32], sizes = [16, 32], strides = [1, 1]} : vector<16x96xf32> to vector<16x32xf32>
    %41 = vector.extract_strided_slice %38 {offsets = [0, 64], sizes = [16, 32], strides = [1, 1]} : vector<16x96xf32> to vector<16x32xf32>
    %cst_12 = arith.constant 0.000000e+00 : f32
    %42 = vector.broadcast %cst_12 : f32 to vector<16x32xf32>
    %43 = vector.extract_strided_slice %39 {offsets = [0, 0], sizes = [16, 8], strides = [1, 1]} : vector<16x32xf32> to vector<16x8xf32>
    %44 = arith.truncf %43 : vector<16x8xf32> to vector<16x8xbf16>
    %45 = vector.extract_strided_slice %40 {offsets = [0, 0], sizes = [16, 8], strides = [1, 1]} : vector<16x32xf32> to vector<16x8xf32>
    %46 = arith.truncf %45 : vector<16x8xf32> to vector<16x8xbf16>
    %47 = vector.extract_strided_slice %41 {offsets = [0, 0], sizes = [16, 8], strides = [1, 1]} : vector<16x32xf32> to vector<16x8xf32>
    %48 = arith.truncf %47 : vector<16x8xf32> to vector<16x8xbf16>
    %cst_13 = arith.constant dense<0.000000e+00> : vector<16x16xf32>
    %49 = tpu.matmul %44, %46, %cst_13 {dimension_numbers = #tpu.dot_dimension_numbers<[1], [1], [0], [0], [0, 0, 1, 0], [], []>} : vector<16x8xbf16>, vector<16x8xbf16>, vector<16x16xf32> -> vector<16x16xf32>
    %cst_14 = arith.constant 0.353553385 : f32
    %50 = vector.broadcast %cst_14 : f32 to vector<16x16xf32>
    %51 = arith.mulf %49, %50 : vector<16x16xf32>
    %52 = arith.addf %51, %1 : vector<16x16xf32>
    %cst_15 = arith.constant dense<0xFF800000> : vector<16xf32>
    %53 = vector.multi_reduction <maximumf>, %52, %cst_15 [1] : vector<16x16xf32> to vector<16xf32>
    %54 = vector.shape_cast %53 : vector<16xf32> to vector<16x1xf32>
    %55 = vector.broadcast %54 : vector<16x1xf32> to vector<16x16xf32>
    %56 = arith.subf %52, %55 : vector<16x16xf32>
    %57 = math.exp %56 : vector<16x16xf32>
    %cst_16 = arith.constant dense<0.000000e+00> : vector<16xf32>
    %58 = vector.multi_reduction <add>, %57, %cst_16 [1] : vector<16x16xf32> to vector<16xf32>
    %59 = vector.shape_cast %58 : vector<16xf32> to vector<16x1xf32>
    %60 = vector.broadcast %59 : vector<16x1xf32> to vector<16x16xf32>
    %61 = arith.divf %57, %60 : vector<16x16xf32>
    %62 = arith.truncf %61 : vector<16x16xf32> to vector<16x16xbf16>
    %cst_17 = arith.constant dense<0.000000e+00> : vector<16x8xf32>
    %63 = tpu.matmul %62, %48, %cst_17 {dimension_numbers = #tpu.dot_dimension_numbers<[1], [0], [0], [1], [0, 0, 1, 1], [], []>} : vector<16x16xbf16>, vector<16x8xbf16>, vector<16x8xf32> -> vector<16x8xf32>
    %64 = arith.truncf %63 : vector<16x8xf32> to vector<16x8xbf16>
    %65 = vector.extract_strided_slice %34 {offsets = [0, 0], sizes = [8, 32], strides = [1, 1]} : vector<32x32xbf16> to vector<8x32xbf16>
    %cst_18 = arith.constant dense<0.000000e+00> : vector<16x32xf32>
    %66 = tpu.matmul %64, %65, %cst_18 {dimension_numbers = #tpu.dot_dimension_numbers<[1], [0], [0], [1], [0, 0, 1, 1], [], []>} : vector<16x8xbf16>, vector<8x32xbf16>, vector<16x32xf32> -> vector<16x32xf32>
    %67 = arith.addf %42, %66 : vector<16x32xf32>
    %68 = vector.extract_strided_slice %39 {offsets = [0, 8], sizes = [16, 8], strides = [1, 1]} : vector<16x32xf32> to vector<16x8xf32>
    %69 = arith.truncf %68 : vector<16x8xf32> to vector<16x8xbf16>
    %70 = vector.extract_strided_slice %40 {offsets = [0, 8], sizes = [16, 8], strides = [1, 1]} : vector<16x32xf32> to vector<16x8xf32>
    %71 = arith.truncf %70 : vector<16x8xf32> to vector<16x8xbf16>
    %72 = vector.extract_strided_slice %41 {offsets = [0, 8], sizes = [16, 8], strides = [1, 1]} : vector<16x32xf32> to vector<16x8xf32>
    %73 = arith.truncf %72 : vector<16x8xf32> to vector<16x8xbf16>
    %cst_19 = arith.constant dense<0.000000e+00> : vector<16x16xf32>
    %74 = tpu.matmul %69, %71, %cst_19 {dimension_numbers = #tpu.dot_dimension_numbers<[1], [1], [0], [0], [0, 0, 1, 0], [], []>} : vector<16x8xbf16>, vector<16x8xbf16>, vector<16x16xf32> -> vector<16x16xf32>
    %cst_20 = arith.constant 0.353553385 : f32
    %75 = vector.broadcast %cst_20 : f32 to vector<16x16xf32>
    %76 = arith.mulf %74, %75 : vector<16x16xf32>
    %77 = arith.addf %76, %1 : vector<16x16xf32>
    %cst_21 = arith.constant dense<0xFF800000> : vector<16xf32>
    %78 = vector.multi_reduction <maximumf>, %77, %cst_21 [1] : vector<16x16xf32> to vector<16xf32>
    %79 = vector.shape_cast %78 : vector<16xf32> to vector<16x1xf32>
    %80 = vector.broadcast %79 : vector<16x1xf32> to vector<16x16xf32>
    %81 = arith.subf %77, %80 : vector<16x16xf32>
    %82 = math.exp %81 : vector<16x16xf32>
    %cst_22 = arith.constant dense<0.000000e+00> : vector<16xf32>
    %83 = vector.multi_reduction <add>, %82, %cst_22 [1] : vector<16x16xf32> to vector<16xf32>
    %84 = vector.shape_cast %83 : vector<16xf32> to vector<16x1xf32>
    %85 = vector.broadcast %84 : vector<16x1xf32> to vector<16x16xf32>
    %86 = arith.divf %82, %85 : vector<16x16xf32>
    %87 = arith.truncf %86 : vector<16x16xf32> to vector<16x16xbf16>
    %cst_23 = arith.constant dense<0.000000e+00> : vector<16x8xf32>
    %88 = tpu.matmul %87, %73, %cst_23 {dimension_numbers = #tpu.dot_dimension_numbers<[1], [0], [0], [1], [0, 0, 1, 1], [], []>} : vector<16x16xbf16>, vector<16x8xbf16>, vector<16x8xf32> -> vector<16x8xf32>
    %89 = arith.truncf %88 : vector<16x8xf32> to vector<16x8xbf16>
    %90 = vector.extract_strided_slice %34 {offsets = [8, 0], sizes = [8, 32], strides = [1, 1]} : vector<32x32xbf16> to vector<8x32xbf16>
    %cst_24 = arith.constant dense<0.000000e+00> : vector<16x32xf32>
    %91 = tpu.matmul %89, %90, %cst_24 {dimension_numbers = #tpu.dot_dimension_numbers<[1], [0], [0], [1], [0, 0, 1, 1], [], []>} : vector<16x8xbf16>, vector<8x32xbf16>, vector<16x32xf32> -> vector<16x32xf32>
    %92 = arith.addf %67, %91 : vector<16x32xf32>
    %93 = vector.extract_strided_slice %39 {offsets = [0, 16], sizes = [16, 8], strides = [1, 1]} : vector<16x32xf32> to vector<16x8xf32>
    %94 = arith.truncf %93 : vector<16x8xf32> to vector<16x8xbf16>
    %95 = vector.extract_strided_slice %40 {offsets = [0, 16], sizes = [16, 8], strides = [1, 1]} : vector<16x32xf32> to vector<16x8xf32>
    %96 = arith.truncf %95 : vector<16x8xf32> to vector<16x8xbf16>
    %97 = vector.extract_strided_slice %41 {offsets = [0, 16], sizes = [16, 8], strides = [1, 1]} : vector<16x32xf32> to vector<16x8xf32>
    %98 = arith.truncf %97 : vector<16x8xf32> to vector<16x8xbf16>
    %cst_25 = arith.constant dense<0.000000e+00> : vector<16x16xf32>
    %99 = tpu.matmul %94, %96, %cst_25 {dimension_numbers = #tpu.dot_dimension_numbers<[1], [1], [0], [0], [0, 0, 1, 0], [], []>} : vector<16x8xbf16>, vector<16x8xbf16>, vector<16x16xf32> -> vector<16x16xf32>
    %cst_26 = arith.constant 0.353553385 : f32
    %100 = vector.broadcast %cst_26 : f32 to vector<16x16xf32>
    %101 = arith.mulf %99, %100 : vector<16x16xf32>
    %102 = arith.addf %101, %1 : vector<16x16xf32>
    %cst_27 = arith.constant dense<0xFF800000> : vector<16xf32>
    %103 = vector.multi_reduction <maximumf>, %102, %cst_27 [1] : vector<16x16xf32> to vector<16xf32>
    %104 = vector.shape_cast %103 : vector<16xf32> to vector<16x1xf32>
    %105 = vector.broadcast %104 : vector<16x1xf32> to vector<16x16xf32>
    %106 = arith.subf %102, %105 : vector<16x16xf32>
    %107 = math.exp %106 : vector<16x16xf32>
    %cst_28 = arith.constant dense<0.000000e+00> : vector<16xf32>
    %108 = vector.multi_reduction <add>, %107, %cst_28 [1] : vector<16x16xf32> to vector<16xf32>
    %109 = vector.shape_cast %108 : vector<16xf32> to vector<16x1xf32>
    %110 = vector.broadcast %109 : vector<16x1xf32> to vector<16x16xf32>
    %111 = arith.divf %107, %110 : vector<16x16xf32>
    %112 = arith.truncf %111 : vector<16x16xf32> to vector<16x16xbf16>
    %cst_29 = arith.constant dense<0.000000e+00> : vector<16x8xf32>
    %113 = tpu.matmul %112, %98, %cst_29 {dimension_numbers = #tpu.dot_dimension_numbers<[1], [0], [0], [1], [0, 0, 1, 1], [], []>} : vector<16x16xbf16>, vector<16x8xbf16>, vector<16x8xf32> -> vector<16x8xf32>
    %114 = arith.truncf %113 : vector<16x8xf32> to vector<16x8xbf16>
    %115 = vector.extract_strided_slice %34 {offsets = [16, 0], sizes = [8, 32], strides = [1, 1]} : vector<32x32xbf16> to vector<8x32xbf16>
    %cst_30 = arith.constant dense<0.000000e+00> : vector<16x32xf32>
    %116 = tpu.matmul %114, %115, %cst_30 {dimension_numbers = #tpu.dot_dimension_numbers<[1], [0], [0], [1], [0, 0, 1, 1], [], []>} : vector<16x8xbf16>, vector<8x32xbf16>, vector<16x32xf32> -> vector<16x32xf32>
    %117 = arith.addf %92, %116 : vector<16x32xf32>
    %118 = vector.extract_strided_slice %39 {offsets = [0, 24], sizes = [16, 8], strides = [1, 1]} : vector<16x32xf32> to vector<16x8xf32>
    %119 = arith.truncf %118 : vector<16x8xf32> to vector<16x8xbf16>
    %120 = vector.extract_strided_slice %40 {offsets = [0, 24], sizes = [16, 8], strides = [1, 1]} : vector<16x32xf32> to vector<16x8xf32>
    %121 = arith.truncf %120 : vector<16x8xf32> to vector<16x8xbf16>
    %122 = vector.extract_strided_slice %41 {offsets = [0, 24], sizes = [16, 8], strides = [1, 1]} : vector<16x32xf32> to vector<16x8xf32>
    %123 = arith.truncf %122 : vector<16x8xf32> to vector<16x8xbf16>
    %cst_31 = arith.constant dense<0.000000e+00> : vector<16x16xf32>
    %124 = tpu.matmul %119, %121, %cst_31 {dimension_numbers = #tpu.dot_dimension_numbers<[1], [1], [0], [0], [0, 0, 1, 0], [], []>} : vector<16x8xbf16>, vector<16x8xbf16>, vector<16x16xf32> -> vector<16x16xf32>
    %cst_32 = arith.constant 0.353553385 : f32
    %125 = vector.broadcast %cst_32 : f32 to vector<16x16xf32>
    %126 = arith.mulf %124, %125 : vector<16x16xf32>
    %127 = arith.addf %126, %1 : vector<16x16xf32>
    %cst_33 = arith.constant dense<0xFF800000> : vector<16xf32>
    %128 = vector.multi_reduction <maximumf>, %127, %cst_33 [1] : vector<16x16xf32> to vector<16xf32>
    %129 = vector.shape_cast %128 : vector<16xf32> to vector<16x1xf32>
    %130 = vector.broadcast %129 : vector<16x1xf32> to vector<16x16xf32>
    %131 = arith.subf %127, %130 : vector<16x16xf32>
    %132 = math.exp %131 : vector<16x16xf32>
    %cst_34 = arith.constant dense<0.000000e+00> : vector<16xf32>
    %133 = vector.multi_reduction <add>, %132, %cst_34 [1] : vector<16x16xf32> to vector<16xf32>
    %134 = vector.shape_cast %133 : vector<16xf32> to vector<16x1xf32>
    %135 = vector.broadcast %134 : vector<16x1xf32> to vector<16x16xf32>
    %136 = arith.divf %132, %135 : vector<16x16xf32>
    %137 = arith.truncf %136 : vector<16x16xf32> to vector<16x16xbf16>
    %cst_35 = arith.constant dense<0.000000e+00> : vector<16x8xf32>
    %138 = tpu.matmul %137, %123, %cst_35 {dimension_numbers = #tpu.dot_dimension_numbers<[1], [0], [0], [1], [0, 0, 1, 1], [], []>} : vector<16x16xbf16>, vector<16x8xbf16>, vector<16x8xf32> -> vector<16x8xf32>
    %139 = arith.truncf %138 : vector<16x8xf32> to vector<16x8xbf16>
    %140 = vector.extract_strided_slice %34 {offsets = [24, 0], sizes = [8, 32], strides = [1, 1]} : vector<32x32xbf16> to vector<8x32xbf16>
    %cst_36 = arith.constant dense<0.000000e+00> : vector<16x32xf32>
    %141 = tpu.matmul %139, %140, %cst_36 {dimension_numbers = #tpu.dot_dimension_numbers<[1], [0], [0], [1], [0, 0, 1, 1], [], []>} : vector<16x8xbf16>, vector<8x32xbf16>, vector<16x32xf32> -> vector<16x32xf32>
    %142 = arith.addf %117, %141 : vector<16x32xf32>
    %143 = vector.broadcast %32 : vector<1x32xf32> to vector<16x32xf32>
    %144 = arith.addf %142, %143 : vector<16x32xf32>
    %c11 = arith.constant 11 : index
    %c0_37 = arith.constant 0 : index
    %145 = vector.load %arg1[%c11, %c0_37] : memref<24x128xf32, #tpu.memory_space<vmem>>, vector<1x128xf32>
    %146 = vector.extract_strided_slice %145 {offsets = [0, 0], sizes = [1, 32], strides = [1, 1]} : vector<1x128xf32> to vector<1x32xf32>
    %147 = vector.extract_strided_slice %145 {offsets = [0, 32], sizes = [1, 32], strides = [1, 1]} : vector<1x128xf32> to vector<1x32xf32>
    %148 = arith.addf %29, %144 : vector<16x32xf32>
    %cst_38 = arith.constant dense<0.000000e+00> : vector<16xf32>
    %149 = vector.multi_reduction <add>, %148, %cst_38 [1] : vector<16x32xf32> to vector<16xf32>
    %150 = vector.shape_cast %149 : vector<16xf32> to vector<16x1xf32>
    %cst_39 = arith.constant 3.200000e+01 : f32
    %151 = vector.broadcast %cst_39 : f32 to vector<16x1xf32>
    %152 = arith.divf %150, %151 : vector<16x1xf32>
    %153 = vector.broadcast %152 : vector<16x1xf32> to vector<16x32xf32>
    %154 = arith.subf %148, %153 : vector<16x32xf32>
    %155 = arith.mulf %154, %154 : vector<16x32xf32>
    %cst_40 = arith.constant dense<0.000000e+00> : vector<16xf32>
    %156 = vector.multi_reduction <add>, %155, %cst_40 [1] : vector<16x32xf32> to vector<16xf32>
    %157 = vector.shape_cast %156 : vector<16xf32> to vector<16x1xf32>
    %cst_41 = arith.constant 3.200000e+01 : f32
    %158 = vector.broadcast %cst_41 : f32 to vector<16x1xf32>
    %159 = arith.divf %157, %158 : vector<16x1xf32>
    %160 = vector.broadcast %152 : vector<16x1xf32> to vector<16x32xf32>
    %161 = arith.subf %148, %160 : vector<16x32xf32>
    %cst_42 = arith.constant 9.99999996E-13 : f32
    %162 = vector.broadcast %cst_42 : f32 to vector<16x1xf32>
    %163 = arith.addf %159, %162 : vector<16x1xf32>
    %164 = math.rsqrt %163 : vector<16x1xf32>
    %165 = vector.broadcast %164 : vector<16x1xf32> to vector<16x32xf32>
    %166 = arith.mulf %161, %165 : vector<16x32xf32>
    %167 = vector.broadcast %146 : vector<1x32xf32> to vector<16x32xf32>
    %168 = arith.mulf %166, %167 : vector<16x32xf32>
    %169 = vector.broadcast %147 : vector<1x32xf32> to vector<16x32xf32>
    %170 = arith.addf %168, %169 : vector<16x32xf32>
    %c6 = arith.constant 6 : index
    %c0_43 = arith.constant 0 : index
    %171 = vector.load %arg1[%c6, %c0_43] : memref<24x128xf32, #tpu.memory_space<vmem>>, vector<1x128xf32>
    %172 = vector.extract_strided_slice %171 {offsets = [0, 0], sizes = [1, 64], strides = [1, 1]} : vector<1x128xf32> to vector<1x64xf32>
    %173 = vector.extract_strided_slice %171 {offsets = [0, 64], sizes = [1, 32], strides = [1, 1]} : vector<1x128xf32> to vector<1x32xf32>
    %c192 = arith.constant 192 : index
    %c0_44 = arith.constant 0 : index
    %174 = vector.load %arg0[%c192, %c0_44] : memref<576x128xbf16, #tpu.memory_space<vmem>>, vector<32x64xbf16>
    %c224 = arith.constant 224 : index
    %c0_45 = arith.constant 0 : index
    %175 = vector.load %arg0[%c224, %c0_45] : memref<576x128xbf16, #tpu.memory_space<vmem>>, vector<64x32xbf16>
    %176 = arith.truncf %170 : vector<16x32xf32> to vector<16x32xbf16>
    %cst_46 = arith.constant dense<0.000000e+00> : vector<16x64xf32>
    %177 = tpu.matmul %176, %174, %cst_46 {dimension_numbers = #tpu.dot_dimension_numbers<[1], [0], [0], [1], [0, 0, 1, 1], [], []>} : vector<16x32xbf16>, vector<32x64xbf16>, vector<16x64xf32> -> vector<16x64xf32>
    %178 = vector.broadcast %172 : vector<1x64xf32> to vector<16x64xf32>
    %179 = arith.addf %177, %178 : vector<16x64xf32>
    %cst_47 = arith.constant 5.000000e-01 : f32
    %180 = vector.broadcast %cst_47 : f32 to vector<16x64xf32>
    %181 = arith.mulf %180, %179 : vector<16x64xf32>
    %cst_48 = arith.constant 4.471500e-02 : f32
    %182 = vector.broadcast %cst_48 : f32 to vector<16x64xf32>
    %183 = arith.mulf %182, %179 : vector<16x64xf32>
    %184 = arith.mulf %183, %179 : vector<16x64xf32>
    %185 = arith.mulf %184, %179 : vector<16x64xf32>
    %186 = arith.addf %179, %185 : vector<16x64xf32>
    %cst_49 = arith.constant 0.797884583 : f32
    %187 = vector.broadcast %cst_49 : f32 to vector<16x64xf32>
    %188 = arith.mulf %187, %186 : vector<16x64xf32>
    %189 = math.tanh %188 : vector<16x64xf32>
    %cst_50 = arith.constant 1.000000e+00 : f32
    %190 = vector.broadcast %cst_50 : f32 to vector<16x64xf32>
    %191 = arith.addf %190, %189 : vector<16x64xf32>
    %192 = arith.mulf %181, %191 : vector<16x64xf32>
    %193 = arith.truncf %192 : vector<16x64xf32> to vector<16x64xbf16>
    %cst_51 = arith.constant dense<0.000000e+00> : vector<16x32xf32>
    %194 = tpu.matmul %193, %175, %cst_51 {dimension_numbers = #tpu.dot_dimension_numbers<[1], [0], [0], [1], [0, 0, 1, 1], [], []>} : vector<16x64xbf16>, vector<64x32xbf16>, vector<16x32xf32> -> vector<16x32xf32>
    %195 = vector.broadcast %173 : vector<1x32xf32> to vector<16x32xf32>
    %196 = arith.addf %194, %195 : vector<16x32xf32>
    %c12 = arith.constant 12 : index
    %c0_52 = arith.constant 0 : index
    %197 = vector.load %arg1[%c12, %c0_52] : memref<24x128xf32, #tpu.memory_space<vmem>>, vector<1x128xf32>
    %198 = vector.extract_strided_slice %197 {offsets = [0, 0], sizes = [1, 32], strides = [1, 1]} : vector<1x128xf32> to vector<1x32xf32>
    %199 = vector.extract_strided_slice %197 {offsets = [0, 32], sizes = [1, 32], strides = [1, 1]} : vector<1x128xf32> to vector<1x32xf32>
    %200 = arith.addf %170, %196 : vector<16x32xf32>
    %cst_53 = arith.constant dense<0.000000e+00> : vector<16xf32>
    %201 = vector.multi_reduction <add>, %200, %cst_53 [1] : vector<16x32xf32> to vector<16xf32>
    %202 = vector.shape_cast %201 : vector<16xf32> to vector<16x1xf32>
    %cst_54 = arith.constant 3.200000e+01 : f32
    %203 = vector.broadcast %cst_54 : f32 to vector<16x1xf32>
    %204 = arith.divf %202, %203 : vector<16x1xf32>
    %205 = vector.broadcast %204 : vector<16x1xf32> to vector<16x32xf32>
    %206 = arith.subf %200, %205 : vector<16x32xf32>
    %207 = arith.mulf %206, %206 : vector<16x32xf32>
    %cst_55 = arith.constant dense<0.000000e+00> : vector<16xf32>
    %208 = vector.multi_reduction <add>, %207, %cst_55 [1] : vector<16x32xf32> to vector<16xf32>
    %209 = vector.shape_cast %208 : vector<16xf32> to vector<16x1xf32>
    %cst_56 = arith.constant 3.200000e+01 : f32
    %210 = vector.broadcast %cst_56 : f32 to vector<16x1xf32>
    %211 = arith.divf %209, %210 : vector<16x1xf32>
    %212 = vector.broadcast %204 : vector<16x1xf32> to vector<16x32xf32>
    %213 = arith.subf %200, %212 : vector<16x32xf32>
    %cst_57 = arith.constant 9.99999996E-13 : f32
    %214 = vector.broadcast %cst_57 : f32 to vector<16x1xf32>
    %215 = arith.addf %211, %214 : vector<16x1xf32>
    %216 = math.rsqrt %215 : vector<16x1xf32>
    %217 = vector.broadcast %216 : vector<16x1xf32> to vector<16x32xf32>
    %218 = arith.mulf %213, %217 : vector<16x32xf32>
    %219 = vector.broadcast %198 : vector<1x32xf32> to vector<16x32xf32>
    %220 = arith.mulf %218, %219 : vector<16x32xf32>
    %221 = vector.broadcast %199 : vector<1x32xf32> to vector<16x32xf32>
    %222 = arith.addf %220, %221 : vector<16x32xf32>
    %c1 = arith.constant 1 : index
    %c0_58 = arith.constant 0 : index
    %223 = vector.load %arg1[%c1, %c0_58] : memref<24x128xf32, #tpu.memory_space<vmem>>, vector<1x128xf32>
    %224 = vector.extract_strided_slice %223 {offsets = [0, 0], sizes = [1, 96], strides = [1, 1]} : vector<1x128xf32> to vector<1x96xf32>
    %225 = vector.extract_strided_slice %223 {offsets = [0, 96], sizes = [1, 32], strides = [1, 1]} : vector<1x128xf32> to vector<1x32xf32>
    %c32 = arith.constant 32 : index
    %c0_59 = arith.constant 0 : index
    %226 = vector.load %arg0[%c32, %c0_59] : memref<576x128xbf16, #tpu.memory_space<vmem>>, vector<32x96xbf16>
    %c32_60 = arith.constant 32 : index
    %c96_61 = arith.constant 96 : index
    %227 = vector.load %arg0[%c32_60, %c96_61] : memref<576x128xbf16, #tpu.memory_space<vmem>>, vector<32x32xbf16>
    %228 = arith.truncf %222 : vector<16x32xf32> to vector<16x32xbf16>
    %cst_62 = arith.constant dense<0.000000e+00> : vector<16x96xf32>
    %229 = tpu.matmul %228, %226, %cst_62 {dimension_numbers = #tpu.dot_dimension_numbers<[1], [0], [0], [1], [0, 0, 1, 1], [], []>} : vector<16x32xbf16>, vector<32x96xbf16>, vector<16x96xf32> -> vector<16x96xf32>
    %230 = vector.broadcast %224 : vector<1x96xf32> to vector<16x96xf32>
    %231 = arith.addf %229, %230 : vector<16x96xf32>
    %232 = vector.extract_strided_slice %231 {offsets = [0, 0], sizes = [16, 32], strides = [1, 1]} : vector<16x96xf32> to vector<16x32xf32>
    %233 = vector.extract_strided_slice %231 {offsets = [0, 32], sizes = [16, 32], strides = [1, 1]} : vector<16x96xf32> to vector<16x32xf32>
    %234 = vector.extract_strided_slice %231 {offsets = [0, 64], sizes = [16, 32], strides = [1, 1]} : vector<16x96xf32> to vector<16x32xf32>
    %cst_63 = arith.constant 0.000000e+00 : f32
    %235 = vector.broadcast %cst_63 : f32 to vector<16x32xf32>
    %236 = vector.extract_strided_slice %232 {offsets = [0, 0], sizes = [16, 8], strides = [1, 1]} : vector<16x32xf32> to vector<16x8xf32>
    %237 = arith.truncf %236 : vector<16x8xf32> to vector<16x8xbf16>
    %238 = vector.extract_strided_slice %233 {offsets = [0, 0], sizes = [16, 8], strides = [1, 1]} : vector<16x32xf32> to vector<16x8xf32>
    %239 = arith.truncf %238 : vector<16x8xf32> to vector<16x8xbf16>
    %240 = vector.extract_strided_slice %234 {offsets = [0, 0], sizes = [16, 8], strides = [1, 1]} : vector<16x32xf32> to vector<16x8xf32>
    %241 = arith.truncf %240 : vector<16x8xf32> to vector<16x8xbf16>
    %cst_64 = arith.constant dense<0.000000e+00> : vector<16x16xf32>
    %242 = tpu.matmul %237, %239, %cst_64 {dimension_numbers = #tpu.dot_dimension_numbers<[1], [1], [0], [0], [0, 0, 1, 0], [], []>} : vector<16x8xbf16>, vector<16x8xbf16>, vector<16x16xf32> -> vector<16x16xf32>
    %cst_65 = arith.constant 0.353553385 : f32
    %243 = vector.broadcast %cst_65 : f32 to vector<16x16xf32>
    %244 = arith.mulf %242, %243 : vector<16x16xf32>
    %245 = arith.addf %244, %1 : vector<16x16xf32>
    %cst_66 = arith.constant dense<0xFF800000> : vector<16xf32>
    %246 = vector.multi_reduction <maximumf>, %245, %cst_66 [1] : vector<16x16xf32> to vector<16xf32>
    %247 = vector.shape_cast %246 : vector<16xf32> to vector<16x1xf32>
    %248 = vector.broadcast %247 : vector<16x1xf32> to vector<16x16xf32>
    %249 = arith.subf %245, %248 : vector<16x16xf32>
    %250 = math.exp %249 : vector<16x16xf32>
    %cst_67 = arith.constant dense<0.000000e+00> : vector<16xf32>
    %251 = vector.multi_reduction <add>, %250, %cst_67 [1] : vector<16x16xf32> to vector<16xf32>
    %252 = vector.shape_cast %251 : vector<16xf32> to vector<16x1xf32>
    %253 = vector.broadcast %252 : vector<16x1xf32> to vector<16x16xf32>
    %254 = arith.divf %250, %253 : vector<16x16xf32>
    %255 = arith.truncf %254 : vector<16x16xf32> to vector<16x16xbf16>
    %cst_68 = arith.constant dense<0.000000e+00> : vector<16x8xf32>
    %256 = tpu.matmul %255, %241, %cst_68 {dimension_numbers = #tpu.dot_dimension_numbers<[1], [0], [0], [1], [0, 0, 1, 1], [], []>} : vector<16x16xbf16>, vector<16x8xbf16>, vector<16x8xf32> -> vector<16x8xf32>
    %257 = arith.truncf %256 : vector<16x8xf32> to vector<16x8xbf16>
    %258 = vector.extract_strided_slice %227 {offsets = [0, 0], sizes = [8, 32], strides = [1, 1]} : vector<32x32xbf16> to vector<8x32xbf16>
    %cst_69 = arith.constant dense<0.000000e+00> : vector<16x32xf32>
    %259 = tpu.matmul %257, %258, %cst_69 {dimension_numbers = #tpu.dot_dimension_numbers<[1], [0], [0], [1], [0, 0, 1, 1], [], []>} : vector<16x8xbf16>, vector<8x32xbf16>, vector<16x32xf32> -> vector<16x32xf32>
    %260 = arith.addf %235, %259 : vector<16x32xf32>
    %261 = vector.extract_strided_slice %232 {offsets = [0, 8], sizes = [16, 8], strides = [1, 1]} : vector<16x32xf32> to vector<16x8xf32>
    %262 = arith.truncf %261 : vector<16x8xf32> to vector<16x8xbf16>
    %263 = vector.extract_strided_slice %233 {offsets = [0, 8], sizes = [16, 8], strides = [1, 1]} : vector<16x32xf32> to vector<16x8xf32>
    %264 = arith.truncf %263 : vector<16x8xf32> to vector<16x8xbf16>
    %265 = vector.extract_strided_slice %234 {offsets = [0, 8], sizes = [16, 8], strides = [1, 1]} : vector<16x32xf32> to vector<16x8xf32>
    %266 = arith.truncf %265 : vector<16x8xf32> to vector<16x8xbf16>
    %cst_70 = arith.constant dense<0.000000e+00> : vector<16x16xf32>
    %267 = tpu.matmul %262, %264, %cst_70 {dimension_numbers = #tpu.dot_dimension_numbers<[1], [1], [0], [0], [0, 0, 1, 0], [], []>} : vector<16x8xbf16>, vector<16x8xbf16>, vector<16x16xf32> -> vector<16x16xf32>
    %cst_71 = arith.constant 0.353553385 : f32
    %268 = vector.broadcast %cst_71 : f32 to vector<16x16xf32>
    %269 = arith.mulf %267, %268 : vector<16x16xf32>
    %270 = arith.addf %269, %1 : vector<16x16xf32>
    %cst_72 = arith.constant dense<0xFF800000> : vector<16xf32>
    %271 = vector.multi_reduction <maximumf>, %270, %cst_72 [1] : vector<16x16xf32> to vector<16xf32>
    %272 = vector.shape_cast %271 : vector<16xf32> to vector<16x1xf32>
    %273 = vector.broadcast %272 : vector<16x1xf32> to vector<16x16xf32>
    %274 = arith.subf %270, %273 : vector<16x16xf32>
    %275 = math.exp %274 : vector<16x16xf32>
    %cst_73 = arith.constant dense<0.000000e+00> : vector<16xf32>
    %276 = vector.multi_reduction <add>, %275, %cst_73 [1] : vector<16x16xf32> to vector<16xf32>
    %277 = vector.shape_cast %276 : vector<16xf32> to vector<16x1xf32>
    %278 = vector.broadcast %277 : vector<16x1xf32> to vector<16x16xf32>
    %279 = arith.divf %275, %278 : vector<16x16xf32>
    %280 = arith.truncf %279 : vector<16x16xf32> to vector<16x16xbf16>
    %cst_74 = arith.constant dense<0.000000e+00> : vector<16x8xf32>
    %281 = tpu.matmul %280, %266, %cst_74 {dimension_numbers = #tpu.dot_dimension_numbers<[1], [0], [0], [1], [0, 0, 1, 1], [], []>} : vector<16x16xbf16>, vector<16x8xbf16>, vector<16x8xf32> -> vector<16x8xf32>
    %282 = arith.truncf %281 : vector<16x8xf32> to vector<16x8xbf16>
    %283 = vector.extract_strided_slice %227 {offsets = [8, 0], sizes = [8, 32], strides = [1, 1]} : vector<32x32xbf16> to vector<8x32xbf16>
    %cst_75 = arith.constant dense<0.000000e+00> : vector<16x32xf32>
    %284 = tpu.matmul %282, %283, %cst_75 {dimension_numbers = #tpu.dot_dimension_numbers<[1], [0], [0], [1], [0, 0, 1, 1], [], []>} : vector<16x8xbf16>, vector<8x32xbf16>, vector<16x32xf32> -> vector<16x32xf32>
    %285 = arith.addf %260, %284 : vector<16x32xf32>
    %286 = vector.extract_strided_slice %232 {offsets = [0, 16], sizes = [16, 8], strides = [1, 1]} : vector<16x32xf32> to vector<16x8xf32>
    %287 = arith.truncf %286 : vector<16x8xf32> to vector<16x8xbf16>
    %288 = vector.extract_strided_slice %233 {offsets = [0, 16], sizes = [16, 8], strides = [1, 1]} : vector<16x32xf32> to vector<16x8xf32>
    %289 = arith.truncf %288 : vector<16x8xf32> to vector<16x8xbf16>
    %290 = vector.extract_strided_slice %234 {offsets = [0, 16], sizes = [16, 8], strides = [1, 1]} : vector<16x32xf32> to vector<16x8xf32>
    %291 = arith.truncf %290 : vector<16x8xf32> to vector<16x8xbf16>
    %cst_76 = arith.constant dense<0.000000e+00> : vector<16x16xf32>
    %292 = tpu.matmul %287, %289, %cst_76 {dimension_numbers = #tpu.dot_dimension_numbers<[1], [1], [0], [0], [0, 0, 1, 0], [], []>} : vector<16x8xbf16>, vector<16x8xbf16>, vector<16x16xf32> -> vector<16x16xf32>
    %cst_77 = arith.constant 0.353553385 : f32
    %293 = vector.broadcast %cst_77 : f32 to vector<16x16xf32>
    %294 = arith.mulf %292, %293 : vector<16x16xf32>
    %295 = arith.addf %294, %1 : vector<16x16xf32>
    %cst_78 = arith.constant dense<0xFF800000> : vector<16xf32>
    %296 = vector.multi_reduction <maximumf>, %295, %cst_78 [1] : vector<16x16xf32> to vector<16xf32>
    %297 = vector.shape_cast %296 : vector<16xf32> to vector<16x1xf32>
    %298 = vector.broadcast %297 : vector<16x1xf32> to vector<16x16xf32>
    %299 = arith.subf %295, %298 : vector<16x16xf32>
    %300 = math.exp %299 : vector<16x16xf32>
    %cst_79 = arith.constant dense<0.000000e+00> : vector<16xf32>
    %301 = vector.multi_reduction <add>, %300, %cst_79 [1] : vector<16x16xf32> to vector<16xf32>
    %302 = vector.shape_cast %301 : vector<16xf32> to vector<16x1xf32>
    %303 = vector.broadcast %302 : vector<16x1xf32> to vector<16x16xf32>
    %304 = arith.divf %300, %303 : vector<16x16xf32>
    %305 = arith.truncf %304 : vector<16x16xf32> to vector<16x16xbf16>
    %cst_80 = arith.constant dense<0.000000e+00> : vector<16x8xf32>
    %306 = tpu.matmul %305, %291, %cst_80 {dimension_numbers = #tpu.dot_dimension_numbers<[1], [0], [0], [1], [0, 0, 1, 1], [], []>} : vector<16x16xbf16>, vector<16x8xbf16>, vector<16x8xf32> -> vector<16x8xf32>
    %307 = arith.truncf %306 : vector<16x8xf32> to vector<16x8xbf16>
    %308 = vector.extract_strided_slice %227 {offsets = [16, 0], sizes = [8, 32], strides = [1, 1]} : vector<32x32xbf16> to vector<8x32xbf16>
    %cst_81 = arith.constant dense<0.000000e+00> : vector<16x32xf32>
    %309 = tpu.matmul %307, %308, %cst_81 {dimension_numbers = #tpu.dot_dimension_numbers<[1], [0], [0], [1], [0, 0, 1, 1], [], []>} : vector<16x8xbf16>, vector<8x32xbf16>, vector<16x32xf32> -> vector<16x32xf32>
    %310 = arith.addf %285, %309 : vector<16x32xf32>
    %311 = vector.extract_strided_slice %232 {offsets = [0, 24], sizes = [16, 8], strides = [1, 1]} : vector<16x32xf32> to vector<16x8xf32>
    %312 = arith.truncf %311 : vector<16x8xf32> to vector<16x8xbf16>
    %313 = vector.extract_strided_slice %233 {offsets = [0, 24], sizes = [16, 8], strides = [1, 1]} : vector<16x32xf32> to vector<16x8xf32>
    %314 = arith.truncf %313 : vector<16x8xf32> to vector<16x8xbf16>
    %315 = vector.extract_strided_slice %234 {offsets = [0, 24], sizes = [16, 8], strides = [1, 1]} : vector<16x32xf32> to vector<16x8xf32>
    %316 = arith.truncf %315 : vector<16x8xf32> to vector<16x8xbf16>
    %cst_82 = arith.constant dense<0.000000e+00> : vector<16x16xf32>
    %317 = tpu.matmul %312, %314, %cst_82 {dimension_numbers = #tpu.dot_dimension_numbers<[1], [1], [0], [0], [0, 0, 1, 0], [], []>} : vector<16x8xbf16>, vector<16x8xbf16>, vector<16x16xf32> -> vector<16x16xf32>
    %cst_83 = arith.constant 0.353553385 : f32
    %318 = vector.broadcast %cst_83 : f32 to vector<16x16xf32>
    %319 = arith.mulf %317, %318 : vector<16x16xf32>
    %320 = arith.addf %319, %1 : vector<16x16xf32>
    %cst_84 = arith.constant dense<0xFF800000> : vector<16xf32>
    %321 = vector.multi_reduction <maximumf>, %320, %cst_84 [1] : vector<16x16xf32> to vector<16xf32>
    %322 = vector.shape_cast %321 : vector<16xf32> to vector<16x1xf32>
    %323 = vector.broadcast %322 : vector<16x1xf32> to vector<16x16xf32>
    %324 = arith.subf %320, %323 : vector<16x16xf32>
    %325 = math.exp %324 : vector<16x16xf32>
    %cst_85 = arith.constant dense<0.000000e+00> : vector<16xf32>
    %326 = vector.multi_reduction <add>, %325, %cst_85 [1] : vector<16x16xf32> to vector<16xf32>
    %327 = vector.shape_cast %326 : vector<16xf32> to vector<16x1xf32>
    %328 = vector.broadcast %327 : vector<16x1xf32> to vector<16x16xf32>
    %329 = arith.divf %325, %328 : vector<16x16xf32>
    %330 = arith.truncf %329 : vector<16x16xf32> to vector<16x16xbf16>
    %cst_86 = arith.constant dense<0.000000e+00> : vector<16x8xf32>
    %331 = tpu.matmul %330, %316, %cst_86 {dimension_numbers = #tpu.dot_dimension_numbers<[1], [0], [0], [1], [0, 0, 1, 1], [], []>} : vector<16x16xbf16>, vector<16x8xbf16>, vector<16x8xf32> -> vector<16x8xf32>
    %332 = arith.truncf %331 : vector<16x8xf32> to vector<16x8xbf16>
    %333 = vector.extract_strided_slice %227 {offsets = [24, 0], sizes = [8, 32], strides = [1, 1]} : vector<32x32xbf16> to vector<8x32xbf16>
    %cst_87 = arith.constant dense<0.000000e+00> : vector<16x32xf32>
    %334 = tpu.matmul %332, %333, %cst_87 {dimension_numbers = #tpu.dot_dimension_numbers<[1], [0], [0], [1], [0, 0, 1, 1], [], []>} : vector<16x8xbf16>, vector<8x32xbf16>, vector<16x32xf32> -> vector<16x32xf32>
    %335 = arith.addf %310, %334 : vector<16x32xf32>
    %336 = vector.broadcast %225 : vector<1x32xf32> to vector<16x32xf32>
    %337 = arith.addf %335, %336 : vector<16x32xf32>
    %c13 = arith.constant 13 : index
    %c0_88 = arith.constant 0 : index
    %338 = vector.load %arg1[%c13, %c0_88] : memref<24x128xf32, #tpu.memory_space<vmem>>, vector<1x128xf32>
    %339 = vector.extract_strided_slice %338 {offsets = [0, 0], sizes = [1, 32], strides = [1, 1]} : vector<1x128xf32> to vector<1x32xf32>
    %340 = vector.extract_strided_slice %338 {offsets = [0, 32], sizes = [1, 32], strides = [1, 1]} : vector<1x128xf32> to vector<1x32xf32>
    %341 = arith.addf %222, %337 : vector<16x32xf32>
    %cst_89 = arith.constant dense<0.000000e+00> : vector<16xf32>
    %342 = vector.multi_reduction <add>, %341, %cst_89 [1] : vector<16x32xf32> to vector<16xf32>
    %343 = vector.shape_cast %342 : vector<16xf32> to vector<16x1xf32>
    %cst_90 = arith.constant 3.200000e+01 : f32
    %344 = vector.broadcast %cst_90 : f32 to vector<16x1xf32>
    %345 = arith.divf %343, %344 : vector<16x1xf32>
    %346 = vector.broadcast %345 : vector<16x1xf32> to vector<16x32xf32>
    %347 = arith.subf %341, %346 : vector<16x32xf32>
    %348 = arith.mulf %347, %347 : vector<16x32xf32>
    %cst_91 = arith.constant dense<0.000000e+00> : vector<16xf32>
    %349 = vector.multi_reduction <add>, %348, %cst_91 [1] : vector<16x32xf32> to vector<16xf32>
    %350 = vector.shape_cast %349 : vector<16xf32> to vector<16x1xf32>
    %cst_92 = arith.constant 3.200000e+01 : f32
    %351 = vector.broadcast %cst_92 : f32 to vector<16x1xf32>
    %352 = arith.divf %350, %351 : vector<16x1xf32>
    %353 = vector.broadcast %345 : vector<16x1xf32> to vector<16x32xf32>
    %354 = arith.subf %341, %353 : vector<16x32xf32>
    %cst_93 = arith.constant 9.99999996E-13 : f32
    %355 = vector.broadcast %cst_93 : f32 to vector<16x1xf32>
    %356 = arith.addf %352, %355 : vector<16x1xf32>
    %357 = math.rsqrt %356 : vector<16x1xf32>
    %358 = vector.broadcast %357 : vector<16x1xf32> to vector<16x32xf32>
    %359 = arith.mulf %354, %358 : vector<16x32xf32>
    %360 = vector.broadcast %339 : vector<1x32xf32> to vector<16x32xf32>
    %361 = arith.mulf %359, %360 : vector<16x32xf32>
    %362 = vector.broadcast %340 : vector<1x32xf32> to vector<16x32xf32>
    %363 = arith.addf %361, %362 : vector<16x32xf32>
    %c7 = arith.constant 7 : index
    %c0_94 = arith.constant 0 : index
    %364 = vector.load %arg1[%c7, %c0_94] : memref<24x128xf32, #tpu.memory_space<vmem>>, vector<1x128xf32>
    %365 = vector.extract_strided_slice %364 {offsets = [0, 0], sizes = [1, 64], strides = [1, 1]} : vector<1x128xf32> to vector<1x64xf32>
    %366 = vector.extract_strided_slice %364 {offsets = [0, 64], sizes = [1, 32], strides = [1, 1]} : vector<1x128xf32> to vector<1x32xf32>
    %c288 = arith.constant 288 : index
    %c0_95 = arith.constant 0 : index
    %367 = vector.load %arg0[%c288, %c0_95] : memref<576x128xbf16, #tpu.memory_space<vmem>>, vector<32x64xbf16>
    %c320 = arith.constant 320 : index
    %c0_96 = arith.constant 0 : index
    %368 = vector.load %arg0[%c320, %c0_96] : memref<576x128xbf16, #tpu.memory_space<vmem>>, vector<64x32xbf16>
    %369 = arith.truncf %363 : vector<16x32xf32> to vector<16x32xbf16>
    %cst_97 = arith.constant dense<0.000000e+00> : vector<16x64xf32>
    %370 = tpu.matmul %369, %367, %cst_97 {dimension_numbers = #tpu.dot_dimension_numbers<[1], [0], [0], [1], [0, 0, 1, 1], [], []>} : vector<16x32xbf16>, vector<32x64xbf16>, vector<16x64xf32> -> vector<16x64xf32>
    %371 = vector.broadcast %365 : vector<1x64xf32> to vector<16x64xf32>
    %372 = arith.addf %370, %371 : vector<16x64xf32>
    %cst_98 = arith.constant 5.000000e-01 : f32
    %373 = vector.broadcast %cst_98 : f32 to vector<16x64xf32>
    %374 = arith.mulf %373, %372 : vector<16x64xf32>
    %cst_99 = arith.constant 4.471500e-02 : f32
    %375 = vector.broadcast %cst_99 : f32 to vector<16x64xf32>
    %376 = arith.mulf %375, %372 : vector<16x64xf32>
    %377 = arith.mulf %376, %372 : vector<16x64xf32>
    %378 = arith.mulf %377, %372 : vector<16x64xf32>
    %379 = arith.addf %372, %378 : vector<16x64xf32>
    %cst_100 = arith.constant 0.797884583 : f32
    %380 = vector.broadcast %cst_100 : f32 to vector<16x64xf32>
    %381 = arith.mulf %380, %379 : vector<16x64xf32>
    %382 = math.tanh %381 : vector<16x64xf32>
    %cst_101 = arith.constant 1.000000e+00 : f32
    %383 = vector.broadcast %cst_101 : f32 to vector<16x64xf32>
    %384 = arith.addf %383, %382 : vector<16x64xf32>
    %385 = arith.mulf %374, %384 : vector<16x64xf32>
    %386 = arith.truncf %385 : vector<16x64xf32> to vector<16x64xbf16>
    %cst_102 = arith.constant dense<0.000000e+00> : vector<16x32xf32>
    %387 = tpu.matmul %386, %368, %cst_102 {dimension_numbers = #tpu.dot_dimension_numbers<[1], [0], [0], [1], [0, 0, 1, 1], [], []>} : vector<16x64xbf16>, vector<64x32xbf16>, vector<16x32xf32> -> vector<16x32xf32>
    %388 = vector.broadcast %366 : vector<1x32xf32> to vector<16x32xf32>
    %389 = arith.addf %387, %388 : vector<16x32xf32>
    %c14 = arith.constant 14 : index
    %c0_103 = arith.constant 0 : index
    %390 = vector.load %arg1[%c14, %c0_103] : memref<24x128xf32, #tpu.memory_space<vmem>>, vector<1x128xf32>
    %391 = vector.extract_strided_slice %390 {offsets = [0, 0], sizes = [1, 32], strides = [1, 1]} : vector<1x128xf32> to vector<1x32xf32>
    %392 = vector.extract_strided_slice %390 {offsets = [0, 32], sizes = [1, 32], strides = [1, 1]} : vector<1x128xf32> to vector<1x32xf32>
    %393 = arith.addf %363, %389 : vector<16x32xf32>
    %cst_104 = arith.constant dense<0.000000e+00> : vector<16xf32>
    %394 = vector.multi_reduction <add>, %393, %cst_104 [1] : vector<16x32xf32> to vector<16xf32>
    %395 = vector.shape_cast %394 : vector<16xf32> to vector<16x1xf32>
    %cst_105 = arith.constant 3.200000e+01 : f32
    %396 = vector.broadcast %cst_105 : f32 to vector<16x1xf32>
    %397 = arith.divf %395, %396 : vector<16x1xf32>
    %398 = vector.broadcast %397 : vector<16x1xf32> to vector<16x32xf32>
    %399 = arith.subf %393, %398 : vector<16x32xf32>
    %400 = arith.mulf %399, %399 : vector<16x32xf32>
    %cst_106 = arith.constant dense<0.000000e+00> : vector<16xf32>
    %401 = vector.multi_reduction <add>, %400, %cst_106 [1] : vector<16x32xf32> to vector<16xf32>
    %402 = vector.shape_cast %401 : vector<16xf32> to vector<16x1xf32>
    %cst_107 = arith.constant 3.200000e+01 : f32
    %403 = vector.broadcast %cst_107 : f32 to vector<16x1xf32>
    %404 = arith.divf %402, %403 : vector<16x1xf32>
    %405 = vector.broadcast %397 : vector<16x1xf32> to vector<16x32xf32>
    %406 = arith.subf %393, %405 : vector<16x32xf32>
    %cst_108 = arith.constant 9.99999996E-13 : f32
    %407 = vector.broadcast %cst_108 : f32 to vector<16x1xf32>
    %408 = arith.addf %404, %407 : vector<16x1xf32>
    %409 = math.rsqrt %408 : vector<16x1xf32>
    %410 = vector.broadcast %409 : vector<16x1xf32> to vector<16x32xf32>
    %411 = arith.mulf %406, %410 : vector<16x32xf32>
    %412 = vector.broadcast %391 : vector<1x32xf32> to vector<16x32xf32>
    %413 = arith.mulf %411, %412 : vector<16x32xf32>
    %414 = vector.broadcast %392 : vector<1x32xf32> to vector<16x32xf32>
    %415 = arith.addf %413, %414 : vector<16x32xf32>
    %416 = vector.extract_strided_slice %0 {offsets = [0, 32], sizes = [16, 32], strides = [1, 1]} : vector<16x112xf32> to vector<16x32xf32>
    %cst_109 = arith.constant dense<0.000000e+00> : vector<16xf32>
    %417 = vector.multi_reduction <add>, %416, %cst_109 [1] : vector<16x32xf32> to vector<16xf32>
    %418 = vector.shape_cast %417 : vector<16xf32> to vector<16x1xf32>
    %cst_110 = arith.constant 3.200000e+01 : f32
    %419 = vector.broadcast %cst_110 : f32 to vector<16x1xf32>
    %420 = arith.divf %418, %419 : vector<16x1xf32>
    %421 = vector.broadcast %420 : vector<16x1xf32> to vector<16x32xf32>
    %422 = arith.subf %416, %421 : vector<16x32xf32>
    %423 = arith.mulf %422, %422 : vector<16x32xf32>
    %cst_111 = arith.constant dense<0.000000e+00> : vector<16xf32>
    %424 = vector.multi_reduction <add>, %423, %cst_111 [1] : vector<16x32xf32> to vector<16xf32>
    %425 = vector.shape_cast %424 : vector<16xf32> to vector<16x1xf32>
    %cst_112 = arith.constant 3.200000e+01 : f32
    %426 = vector.broadcast %cst_112 : f32 to vector<16x1xf32>
    %427 = arith.divf %425, %426 : vector<16x1xf32>
    %428 = vector.broadcast %420 : vector<16x1xf32> to vector<16x32xf32>
    %429 = arith.subf %416, %428 : vector<16x32xf32>
    %cst_113 = arith.constant 9.99999996E-13 : f32
    %430 = vector.broadcast %cst_113 : f32 to vector<16x1xf32>
    %431 = arith.addf %427, %430 : vector<16x1xf32>
    %432 = math.rsqrt %431 : vector<16x1xf32>
    %433 = vector.broadcast %432 : vector<16x1xf32> to vector<16x32xf32>
    %434 = arith.mulf %429, %433 : vector<16x32xf32>
    %435 = vector.broadcast %5 : vector<1x32xf32> to vector<16x32xf32>
    %436 = arith.mulf %434, %435 : vector<16x32xf32>
    %437 = vector.broadcast %6 : vector<1x32xf32> to vector<16x32xf32>
    %438 = arith.addf %436, %437 : vector<16x32xf32>
    %c15 = arith.constant 15 : index
    %c0_114 = arith.constant 0 : index
    %439 = vector.load %arg1[%c15, %c0_114] : memref<24x128xf32, #tpu.memory_space<vmem>>, vector<1x128xf32>
    %440 = vector.extract_strided_slice %439 {offsets = [0, 0], sizes = [1, 32], strides = [1, 1]} : vector<1x128xf32> to vector<1x32xf32>
    %441 = vector.extract_strided_slice %439 {offsets = [0, 32], sizes = [1, 32], strides = [1, 1]} : vector<1x128xf32> to vector<1x32xf32>
    %cst_115 = arith.constant dense<0.000000e+00> : vector<16xf32>
    %442 = vector.multi_reduction <add>, %438, %cst_115 [1] : vector<16x32xf32> to vector<16xf32>
    %443 = vector.shape_cast %442 : vector<16xf32> to vector<16x1xf32>
    %cst_116 = arith.constant 3.200000e+01 : f32
    %444 = vector.broadcast %cst_116 : f32 to vector<16x1xf32>
    %445 = arith.divf %443, %444 : vector<16x1xf32>
    %446 = vector.broadcast %445 : vector<16x1xf32> to vector<16x32xf32>
    %447 = arith.subf %438, %446 : vector<16x32xf32>
    %448 = arith.mulf %447, %447 : vector<16x32xf32>
    %cst_117 = arith.constant dense<0.000000e+00> : vector<16xf32>
    %449 = vector.multi_reduction <add>, %448, %cst_117 [1] : vector<16x32xf32> to vector<16xf32>
    %450 = vector.shape_cast %449 : vector<16xf32> to vector<16x1xf32>
    %cst_118 = arith.constant 0.0322580636 : f32
    %451 = vector.broadcast %cst_118 : f32 to vector<16x1xf32>
    %452 = arith.mulf %450, %451 : vector<16x1xf32>
    %453 = vector.broadcast %445 : vector<16x1xf32> to vector<16x32xf32>
    %454 = arith.subf %438, %453 : vector<16x32xf32>
    %455 = vector.broadcast %440 : vector<1x32xf32> to vector<16x32xf32>
    %456 = arith.mulf %455, %454 : vector<16x32xf32>
    %457 = math.sqrt %452 : vector<16x1xf32>
    %cst_119 = arith.constant 9.99999997E-7 : f32
    %458 = vector.broadcast %cst_119 : f32 to vector<16x1xf32>
    %459 = arith.addf %457, %458 : vector<16x1xf32>
    %460 = vector.broadcast %459 : vector<16x1xf32> to vector<16x32xf32>
    %461 = arith.divf %456, %460 : vector<16x32xf32>
    %462 = vector.broadcast %441 : vector<1x32xf32> to vector<16x32xf32>
    %463 = arith.addf %461, %462 : vector<16x32xf32>
    %c2 = arith.constant 2 : index
    %c0_120 = arith.constant 0 : index
    %464 = vector.load %arg1[%c2, %c0_120] : memref<24x128xf32, #tpu.memory_space<vmem>>, vector<1x128xf32>
    %465 = vector.extract_strided_slice %464 {offsets = [0, 0], sizes = [1, 96], strides = [1, 1]} : vector<1x128xf32> to vector<1x96xf32>
    %466 = vector.extract_strided_slice %464 {offsets = [0, 96], sizes = [1, 32], strides = [1, 1]} : vector<1x128xf32> to vector<1x32xf32>
    %c64 = arith.constant 64 : index
    %c0_121 = arith.constant 0 : index
    %467 = vector.load %arg0[%c64, %c0_121] : memref<576x128xbf16, #tpu.memory_space<vmem>>, vector<32x96xbf16>
    %c64_122 = arith.constant 64 : index
    %c96_123 = arith.constant 96 : index
    %468 = vector.load %arg0[%c64_122, %c96_123] : memref<576x128xbf16, #tpu.memory_space<vmem>>, vector<32x32xbf16>
    %469 = arith.truncf %463 : vector<16x32xf32> to vector<16x32xbf16>
    %cst_124 = arith.constant dense<0.000000e+00> : vector<16x96xf32>
    %470 = tpu.matmul %469, %467, %cst_124 {dimension_numbers = #tpu.dot_dimension_numbers<[1], [0], [0], [1], [0, 0, 1, 1], [], []>} : vector<16x32xbf16>, vector<32x96xbf16>, vector<16x96xf32> -> vector<16x96xf32>
    %471 = vector.broadcast %465 : vector<1x96xf32> to vector<16x96xf32>
    %472 = arith.addf %470, %471 : vector<16x96xf32>
    %473 = vector.extract_strided_slice %472 {offsets = [0, 0], sizes = [16, 32], strides = [1, 1]} : vector<16x96xf32> to vector<16x32xf32>
    %474 = vector.extract_strided_slice %472 {offsets = [0, 32], sizes = [16, 32], strides = [1, 1]} : vector<16x96xf32> to vector<16x32xf32>
    %475 = vector.extract_strided_slice %472 {offsets = [0, 64], sizes = [16, 32], strides = [1, 1]} : vector<16x96xf32> to vector<16x32xf32>
    %cst_125 = arith.constant 0.000000e+00 : f32
    %476 = vector.broadcast %cst_125 : f32 to vector<16x32xf32>
    %477 = vector.extract_strided_slice %473 {offsets = [0, 0], sizes = [16, 8], strides = [1, 1]} : vector<16x32xf32> to vector<16x8xf32>
    %478 = arith.truncf %477 : vector<16x8xf32> to vector<16x8xbf16>
    %479 = vector.extract_strided_slice %474 {offsets = [0, 0], sizes = [16, 8], strides = [1, 1]} : vector<16x32xf32> to vector<16x8xf32>
    %480 = arith.truncf %479 : vector<16x8xf32> to vector<16x8xbf16>
    %481 = vector.extract_strided_slice %475 {offsets = [0, 0], sizes = [16, 8], strides = [1, 1]} : vector<16x32xf32> to vector<16x8xf32>
    %482 = arith.truncf %481 : vector<16x8xf32> to vector<16x8xbf16>
    %cst_126 = arith.constant dense<0.000000e+00> : vector<16x16xf32>
    %483 = tpu.matmul %478, %480, %cst_126 {dimension_numbers = #tpu.dot_dimension_numbers<[1], [1], [0], [0], [0, 0, 1, 0], [], []>} : vector<16x8xbf16>, vector<16x8xbf16>, vector<16x16xf32> -> vector<16x16xf32>
    %cst_127 = arith.constant 0.353553385 : f32
    %484 = vector.broadcast %cst_127 : f32 to vector<16x16xf32>
    %485 = arith.mulf %483, %484 : vector<16x16xf32>
    %486 = arith.addf %485, %3 : vector<16x16xf32>
    %cst_128 = arith.constant dense<0xFF800000> : vector<16xf32>
    %487 = vector.multi_reduction <maximumf>, %486, %cst_128 [1] : vector<16x16xf32> to vector<16xf32>
    %488 = vector.shape_cast %487 : vector<16xf32> to vector<16x1xf32>
    %489 = vector.broadcast %488 : vector<16x1xf32> to vector<16x16xf32>
    %490 = arith.subf %486, %489 : vector<16x16xf32>
    %491 = math.exp %490 : vector<16x16xf32>
    %cst_129 = arith.constant dense<0.000000e+00> : vector<16xf32>
    %492 = vector.multi_reduction <add>, %491, %cst_129 [1] : vector<16x16xf32> to vector<16xf32>
    %493 = vector.shape_cast %492 : vector<16xf32> to vector<16x1xf32>
    %494 = vector.broadcast %493 : vector<16x1xf32> to vector<16x16xf32>
    %495 = arith.divf %491, %494 : vector<16x16xf32>
    %496 = arith.truncf %495 : vector<16x16xf32> to vector<16x16xbf16>
    %cst_130 = arith.constant dense<0.000000e+00> : vector<16x8xf32>
    %497 = tpu.matmul %496, %482, %cst_130 {dimension_numbers = #tpu.dot_dimension_numbers<[1], [0], [0], [1], [0, 0, 1, 1], [], []>} : vector<16x16xbf16>, vector<16x8xbf16>, vector<16x8xf32> -> vector<16x8xf32>
    %498 = arith.truncf %497 : vector<16x8xf32> to vector<16x8xbf16>
    %499 = vector.extract_strided_slice %468 {offsets = [0, 0], sizes = [8, 32], strides = [1, 1]} : vector<32x32xbf16> to vector<8x32xbf16>
    %cst_131 = arith.constant dense<0.000000e+00> : vector<16x32xf32>
    %500 = tpu.matmul %498, %499, %cst_131 {dimension_numbers = #tpu.dot_dimension_numbers<[1], [0], [0], [1], [0, 0, 1, 1], [], []>} : vector<16x8xbf16>, vector<8x32xbf16>, vector<16x32xf32> -> vector<16x32xf32>
    %501 = arith.addf %476, %500 : vector<16x32xf32>
    %502 = vector.extract_strided_slice %473 {offsets = [0, 8], sizes = [16, 8], strides = [1, 1]} : vector<16x32xf32> to vector<16x8xf32>
    %503 = arith.truncf %502 : vector<16x8xf32> to vector<16x8xbf16>
    %504 = vector.extract_strided_slice %474 {offsets = [0, 8], sizes = [16, 8], strides = [1, 1]} : vector<16x32xf32> to vector<16x8xf32>
    %505 = arith.truncf %504 : vector<16x8xf32> to vector<16x8xbf16>
    %506 = vector.extract_strided_slice %475 {offsets = [0, 8], sizes = [16, 8], strides = [1, 1]} : vector<16x32xf32> to vector<16x8xf32>
    %507 = arith.truncf %506 : vector<16x8xf32> to vector<16x8xbf16>
    %cst_132 = arith.constant dense<0.000000e+00> : vector<16x16xf32>
    %508 = tpu.matmul %503, %505, %cst_132 {dimension_numbers = #tpu.dot_dimension_numbers<[1], [1], [0], [0], [0, 0, 1, 0], [], []>} : vector<16x8xbf16>, vector<16x8xbf16>, vector<16x16xf32> -> vector<16x16xf32>
    %cst_133 = arith.constant 0.353553385 : f32
    %509 = vector.broadcast %cst_133 : f32 to vector<16x16xf32>
    %510 = arith.mulf %508, %509 : vector<16x16xf32>
    %511 = arith.addf %510, %3 : vector<16x16xf32>
    %cst_134 = arith.constant dense<0xFF800000> : vector<16xf32>
    %512 = vector.multi_reduction <maximumf>, %511, %cst_134 [1] : vector<16x16xf32> to vector<16xf32>
    %513 = vector.shape_cast %512 : vector<16xf32> to vector<16x1xf32>
    %514 = vector.broadcast %513 : vector<16x1xf32> to vector<16x16xf32>
    %515 = arith.subf %511, %514 : vector<16x16xf32>
    %516 = math.exp %515 : vector<16x16xf32>
    %cst_135 = arith.constant dense<0.000000e+00> : vector<16xf32>
    %517 = vector.multi_reduction <add>, %516, %cst_135 [1] : vector<16x16xf32> to vector<16xf32>
    %518 = vector.shape_cast %517 : vector<16xf32> to vector<16x1xf32>
    %519 = vector.broadcast %518 : vector<16x1xf32> to vector<16x16xf32>
    %520 = arith.divf %516, %519 : vector<16x16xf32>
    %521 = arith.truncf %520 : vector<16x16xf32> to vector<16x16xbf16>
    %cst_136 = arith.constant dense<0.000000e+00> : vector<16x8xf32>
    %522 = tpu.matmul %521, %507, %cst_136 {dimension_numbers = #tpu.dot_dimension_numbers<[1], [0], [0], [1], [0, 0, 1, 1], [], []>} : vector<16x16xbf16>, vector<16x8xbf16>, vector<16x8xf32> -> vector<16x8xf32>
    %523 = arith.truncf %522 : vector<16x8xf32> to vector<16x8xbf16>
    %524 = vector.extract_strided_slice %468 {offsets = [8, 0], sizes = [8, 32], strides = [1, 1]} : vector<32x32xbf16> to vector<8x32xbf16>
    %cst_137 = arith.constant dense<0.000000e+00> : vector<16x32xf32>
    %525 = tpu.matmul %523, %524, %cst_137 {dimension_numbers = #tpu.dot_dimension_numbers<[1], [0], [0], [1], [0, 0, 1, 1], [], []>} : vector<16x8xbf16>, vector<8x32xbf16>, vector<16x32xf32> -> vector<16x32xf32>
    %526 = arith.addf %501, %525 : vector<16x32xf32>
    %527 = vector.extract_strided_slice %473 {offsets = [0, 16], sizes = [16, 8], strides = [1, 1]} : vector<16x32xf32> to vector<16x8xf32>
    %528 = arith.truncf %527 : vector<16x8xf32> to vector<16x8xbf16>
    %529 = vector.extract_strided_slice %474 {offsets = [0, 16], sizes = [16, 8], strides = [1, 1]} : vector<16x32xf32> to vector<16x8xf32>
    %530 = arith.truncf %529 : vector<16x8xf32> to vector<16x8xbf16>
    %531 = vector.extract_strided_slice %475 {offsets = [0, 16], sizes = [16, 8], strides = [1, 1]} : vector<16x32xf32> to vector<16x8xf32>
    %532 = arith.truncf %531 : vector<16x8xf32> to vector<16x8xbf16>
    %cst_138 = arith.constant dense<0.000000e+00> : vector<16x16xf32>
    %533 = tpu.matmul %528, %530, %cst_138 {dimension_numbers = #tpu.dot_dimension_numbers<[1], [1], [0], [0], [0, 0, 1, 0], [], []>} : vector<16x8xbf16>, vector<16x8xbf16>, vector<16x16xf32> -> vector<16x16xf32>
    %cst_139 = arith.constant 0.353553385 : f32
    %534 = vector.broadcast %cst_139 : f32 to vector<16x16xf32>
    %535 = arith.mulf %533, %534 : vector<16x16xf32>
    %536 = arith.addf %535, %3 : vector<16x16xf32>
    %cst_140 = arith.constant dense<0xFF800000> : vector<16xf32>
    %537 = vector.multi_reduction <maximumf>, %536, %cst_140 [1] : vector<16x16xf32> to vector<16xf32>
    %538 = vector.shape_cast %537 : vector<16xf32> to vector<16x1xf32>
    %539 = vector.broadcast %538 : vector<16x1xf32> to vector<16x16xf32>
    %540 = arith.subf %536, %539 : vector<16x16xf32>
    %541 = math.exp %540 : vector<16x16xf32>
    %cst_141 = arith.constant dense<0.000000e+00> : vector<16xf32>
    %542 = vector.multi_reduction <add>, %541, %cst_141 [1] : vector<16x16xf32> to vector<16xf32>
    %543 = vector.shape_cast %542 : vector<16xf32> to vector<16x1xf32>
    %544 = vector.broadcast %543 : vector<16x1xf32> to vector<16x16xf32>
    %545 = arith.divf %541, %544 : vector<16x16xf32>
    %546 = arith.truncf %545 : vector<16x16xf32> to vector<16x16xbf16>
    %cst_142 = arith.constant dense<0.000000e+00> : vector<16x8xf32>
    %547 = tpu.matmul %546, %532, %cst_142 {dimension_numbers = #tpu.dot_dimension_numbers<[1], [0], [0], [1], [0, 0, 1, 1], [], []>} : vector<16x16xbf16>, vector<16x8xbf16>, vector<16x8xf32> -> vector<16x8xf32>
    %548 = arith.truncf %547 : vector<16x8xf32> to vector<16x8xbf16>
    %549 = vector.extract_strided_slice %468 {offsets = [16, 0], sizes = [8, 32], strides = [1, 1]} : vector<32x32xbf16> to vector<8x32xbf16>
    %cst_143 = arith.constant dense<0.000000e+00> : vector<16x32xf32>
    %550 = tpu.matmul %548, %549, %cst_143 {dimension_numbers = #tpu.dot_dimension_numbers<[1], [0], [0], [1], [0, 0, 1, 1], [], []>} : vector<16x8xbf16>, vector<8x32xbf16>, vector<16x32xf32> -> vector<16x32xf32>
    %551 = arith.addf %526, %550 : vector<16x32xf32>
    %552 = vector.extract_strided_slice %473 {offsets = [0, 24], sizes = [16, 8], strides = [1, 1]} : vector<16x32xf32> to vector<16x8xf32>
    %553 = arith.truncf %552 : vector<16x8xf32> to vector<16x8xbf16>
    %554 = vector.extract_strided_slice %474 {offsets = [0, 24], sizes = [16, 8], strides = [1, 1]} : vector<16x32xf32> to vector<16x8xf32>
    %555 = arith.truncf %554 : vector<16x8xf32> to vector<16x8xbf16>
    %556 = vector.extract_strided_slice %475 {offsets = [0, 24], sizes = [16, 8], strides = [1, 1]} : vector<16x32xf32> to vector<16x8xf32>
    %557 = arith.truncf %556 : vector<16x8xf32> to vector<16x8xbf16>
    %cst_144 = arith.constant dense<0.000000e+00> : vector<16x16xf32>
    %558 = tpu.matmul %553, %555, %cst_144 {dimension_numbers = #tpu.dot_dimension_numbers<[1], [1], [0], [0], [0, 0, 1, 0], [], []>} : vector<16x8xbf16>, vector<16x8xbf16>, vector<16x16xf32> -> vector<16x16xf32>
    %cst_145 = arith.constant 0.353553385 : f32
    %559 = vector.broadcast %cst_145 : f32 to vector<16x16xf32>
    %560 = arith.mulf %558, %559 : vector<16x16xf32>
    %561 = arith.addf %560, %3 : vector<16x16xf32>
    %cst_146 = arith.constant dense<0xFF800000> : vector<16xf32>
    %562 = vector.multi_reduction <maximumf>, %561, %cst_146 [1] : vector<16x16xf32> to vector<16xf32>
    %563 = vector.shape_cast %562 : vector<16xf32> to vector<16x1xf32>
    %564 = vector.broadcast %563 : vector<16x1xf32> to vector<16x16xf32>
    %565 = arith.subf %561, %564 : vector<16x16xf32>
    %566 = math.exp %565 : vector<16x16xf32>
    %cst_147 = arith.constant dense<0.000000e+00> : vector<16xf32>
    %567 = vector.multi_reduction <add>, %566, %cst_147 [1] : vector<16x16xf32> to vector<16xf32>
    %568 = vector.shape_cast %567 : vector<16xf32> to vector<16x1xf32>
    %569 = vector.broadcast %568 : vector<16x1xf32> to vector<16x16xf32>
    %570 = arith.divf %566, %569 : vector<16x16xf32>
    %571 = arith.truncf %570 : vector<16x16xf32> to vector<16x16xbf16>
    %cst_148 = arith.constant dense<0.000000e+00> : vector<16x8xf32>
    %572 = tpu.matmul %571, %557, %cst_148 {dimension_numbers = #tpu.dot_dimension_numbers<[1], [0], [0], [1], [0, 0, 1, 1], [], []>} : vector<16x16xbf16>, vector<16x8xbf16>, vector<16x8xf32> -> vector<16x8xf32>
    %573 = arith.truncf %572 : vector<16x8xf32> to vector<16x8xbf16>
    %574 = vector.extract_strided_slice %468 {offsets = [24, 0], sizes = [8, 32], strides = [1, 1]} : vector<32x32xbf16> to vector<8x32xbf16>
    %cst_149 = arith.constant dense<0.000000e+00> : vector<16x32xf32>
    %575 = tpu.matmul %573, %574, %cst_149 {dimension_numbers = #tpu.dot_dimension_numbers<[1], [0], [0], [1], [0, 0, 1, 1], [], []>} : vector<16x8xbf16>, vector<8x32xbf16>, vector<16x32xf32> -> vector<16x32xf32>
    %576 = arith.addf %551, %575 : vector<16x32xf32>
    %577 = vector.broadcast %466 : vector<1x32xf32> to vector<16x32xf32>
    %578 = arith.addf %576, %577 : vector<16x32xf32>
    %579 = arith.addf %438, %578 : vector<16x32xf32>
    %c16 = arith.constant 16 : index
    %c0_150 = arith.constant 0 : index
    %580 = vector.load %arg1[%c16, %c0_150] : memref<24x128xf32, #tpu.memory_space<vmem>>, vector<1x128xf32>
    %581 = vector.extract_strided_slice %580 {offsets = [0, 0], sizes = [1, 32], strides = [1, 1]} : vector<1x128xf32> to vector<1x32xf32>
    %582 = vector.extract_strided_slice %580 {offsets = [0, 32], sizes = [1, 32], strides = [1, 1]} : vector<1x128xf32> to vector<1x32xf32>
    %cst_151 = arith.constant dense<0.000000e+00> : vector<16xf32>
    %583 = vector.multi_reduction <add>, %579, %cst_151 [1] : vector<16x32xf32> to vector<16xf32>
    %584 = vector.shape_cast %583 : vector<16xf32> to vector<16x1xf32>
    %cst_152 = arith.constant 3.200000e+01 : f32
    %585 = vector.broadcast %cst_152 : f32 to vector<16x1xf32>
    %586 = arith.divf %584, %585 : vector<16x1xf32>
    %587 = vector.broadcast %586 : vector<16x1xf32> to vector<16x32xf32>
    %588 = arith.subf %579, %587 : vector<16x32xf32>
    %589 = arith.mulf %588, %588 : vector<16x32xf32>
    %cst_153 = arith.constant dense<0.000000e+00> : vector<16xf32>
    %590 = vector.multi_reduction <add>, %589, %cst_153 [1] : vector<16x32xf32> to vector<16xf32>
    %591 = vector.shape_cast %590 : vector<16xf32> to vector<16x1xf32>
    %cst_154 = arith.constant 0.0322580636 : f32
    %592 = vector.broadcast %cst_154 : f32 to vector<16x1xf32>
    %593 = arith.mulf %591, %592 : vector<16x1xf32>
    %594 = vector.broadcast %586 : vector<16x1xf32> to vector<16x32xf32>
    %595 = arith.subf %579, %594 : vector<16x32xf32>
    %596 = vector.broadcast %581 : vector<1x32xf32> to vector<16x32xf32>
    %597 = arith.mulf %596, %595 : vector<16x32xf32>
    %598 = math.sqrt %593 : vector<16x1xf32>
    %cst_155 = arith.constant 9.99999997E-7 : f32
    %599 = vector.broadcast %cst_155 : f32 to vector<16x1xf32>
    %600 = arith.addf %598, %599 : vector<16x1xf32>
    %601 = vector.broadcast %600 : vector<16x1xf32> to vector<16x32xf32>
    %602 = arith.divf %597, %601 : vector<16x32xf32>
    %603 = vector.broadcast %582 : vector<1x32xf32> to vector<16x32xf32>
    %604 = arith.addf %602, %603 : vector<16x32xf32>
    %c3 = arith.constant 3 : index
    %c0_156 = arith.constant 0 : index
    %605 = vector.load %arg1[%c3, %c0_156] : memref<24x128xf32, #tpu.memory_space<vmem>>, vector<1x128xf32>
    %606 = vector.extract_strided_slice %605 {offsets = [0, 0], sizes = [1, 96], strides = [1, 1]} : vector<1x128xf32> to vector<1x96xf32>
    %607 = vector.extract_strided_slice %605 {offsets = [0, 96], sizes = [1, 32], strides = [1, 1]} : vector<1x128xf32> to vector<1x32xf32>
    %c96_157 = arith.constant 96 : index
    %c0_158 = arith.constant 0 : index
    %608 = vector.load %arg0[%c96_157, %c0_158] : memref<576x128xbf16, #tpu.memory_space<vmem>>, vector<32x96xbf16>
    %c96_159 = arith.constant 96 : index
    %c96_160 = arith.constant 96 : index
    %609 = vector.load %arg0[%c96_159, %c96_160] : memref<576x128xbf16, #tpu.memory_space<vmem>>, vector<32x32xbf16>
    %610 = arith.truncf %604 : vector<16x32xf32> to vector<16x32xbf16>
    %611 = vector.extract_strided_slice %608 {offsets = [0, 0], sizes = [32, 32], strides = [1, 1]} : vector<32x96xbf16> to vector<32x32xbf16>
    %cst_161 = arith.constant dense<0.000000e+00> : vector<16x32xf32>
    %612 = tpu.matmul %610, %611, %cst_161 {dimension_numbers = #tpu.dot_dimension_numbers<[1], [0], [0], [1], [0, 0, 1, 1], [], []>} : vector<16x32xbf16>, vector<32x32xbf16>, vector<16x32xf32> -> vector<16x32xf32>
    %613 = vector.extract_strided_slice %606 {offsets = [0, 0], sizes = [1, 32], strides = [1, 1]} : vector<1x96xf32> to vector<1x32xf32>
    %614 = vector.broadcast %613 : vector<1x32xf32> to vector<16x32xf32>
    %615 = arith.addf %612, %614 : vector<16x32xf32>
    %616 = arith.truncf %415 : vector<16x32xf32> to vector<16x32xbf16>
    %617 = vector.extract_strided_slice %608 {offsets = [0, 32], sizes = [32, 64], strides = [1, 1]} : vector<32x96xbf16> to vector<32x64xbf16>
    %cst_162 = arith.constant dense<0.000000e+00> : vector<16x64xf32>
    %618 = tpu.matmul %616, %617, %cst_162 {dimension_numbers = #tpu.dot_dimension_numbers<[1], [0], [0], [1], [0, 0, 1, 1], [], []>} : vector<16x32xbf16>, vector<32x64xbf16>, vector<16x64xf32> -> vector<16x64xf32>
    %619 = vector.extract_strided_slice %606 {offsets = [0, 32], sizes = [1, 64], strides = [1, 1]} : vector<1x96xf32> to vector<1x64xf32>
    %620 = vector.broadcast %619 : vector<1x64xf32> to vector<16x64xf32>
    %621 = arith.addf %618, %620 : vector<16x64xf32>
    %622 = vector.extract_strided_slice %621 {offsets = [0, 0], sizes = [16, 32], strides = [1, 1]} : vector<16x64xf32> to vector<16x32xf32>
    %623 = vector.extract_strided_slice %621 {offsets = [0, 32], sizes = [16, 32], strides = [1, 1]} : vector<16x64xf32> to vector<16x32xf32>
    %cst_163 = arith.constant 0.000000e+00 : f32
    %624 = vector.broadcast %cst_163 : f32 to vector<16x32xf32>
    %625 = vector.extract_strided_slice %615 {offsets = [0, 0], sizes = [16, 8], strides = [1, 1]} : vector<16x32xf32> to vector<16x8xf32>
    %626 = arith.truncf %625 : vector<16x8xf32> to vector<16x8xbf16>
    %627 = vector.extract_strided_slice %622 {offsets = [0, 0], sizes = [16, 8], strides = [1, 1]} : vector<16x32xf32> to vector<16x8xf32>
    %628 = arith.truncf %627 : vector<16x8xf32> to vector<16x8xbf16>
    %629 = vector.extract_strided_slice %623 {offsets = [0, 0], sizes = [16, 8], strides = [1, 1]} : vector<16x32xf32> to vector<16x8xf32>
    %630 = arith.truncf %629 : vector<16x8xf32> to vector<16x8xbf16>
    %cst_164 = arith.constant dense<0.000000e+00> : vector<16x16xf32>
    %631 = tpu.matmul %626, %628, %cst_164 {dimension_numbers = #tpu.dot_dimension_numbers<[1], [1], [0], [0], [0, 0, 1, 0], [], []>} : vector<16x8xbf16>, vector<16x8xbf16>, vector<16x16xf32> -> vector<16x16xf32>
    %cst_165 = arith.constant 0.353553385 : f32
    %632 = vector.broadcast %cst_165 : f32 to vector<16x16xf32>
    %633 = arith.mulf %631, %632 : vector<16x16xf32>
    %634 = arith.addf %633, %2 : vector<16x16xf32>
    %cst_166 = arith.constant dense<0xFF800000> : vector<16xf32>
    %635 = vector.multi_reduction <maximumf>, %634, %cst_166 [1] : vector<16x16xf32> to vector<16xf32>
    %636 = vector.shape_cast %635 : vector<16xf32> to vector<16x1xf32>
    %637 = vector.broadcast %636 : vector<16x1xf32> to vector<16x16xf32>
    %638 = arith.subf %634, %637 : vector<16x16xf32>
    %639 = math.exp %638 : vector<16x16xf32>
    %cst_167 = arith.constant dense<0.000000e+00> : vector<16xf32>
    %640 = vector.multi_reduction <add>, %639, %cst_167 [1] : vector<16x16xf32> to vector<16xf32>
    %641 = vector.shape_cast %640 : vector<16xf32> to vector<16x1xf32>
    %642 = vector.broadcast %641 : vector<16x1xf32> to vector<16x16xf32>
    %643 = arith.divf %639, %642 : vector<16x16xf32>
    %644 = arith.truncf %643 : vector<16x16xf32> to vector<16x16xbf16>
    %cst_168 = arith.constant dense<0.000000e+00> : vector<16x8xf32>
    %645 = tpu.matmul %644, %630, %cst_168 {dimension_numbers = #tpu.dot_dimension_numbers<[1], [0], [0], [1], [0, 0, 1, 1], [], []>} : vector<16x16xbf16>, vector<16x8xbf16>, vector<16x8xf32> -> vector<16x8xf32>
    %646 = arith.truncf %645 : vector<16x8xf32> to vector<16x8xbf16>
    %647 = vector.extract_strided_slice %609 {offsets = [0, 0], sizes = [8, 32], strides = [1, 1]} : vector<32x32xbf16> to vector<8x32xbf16>
    %cst_169 = arith.constant dense<0.000000e+00> : vector<16x32xf32>
    %648 = tpu.matmul %646, %647, %cst_169 {dimension_numbers = #tpu.dot_dimension_numbers<[1], [0], [0], [1], [0, 0, 1, 1], [], []>} : vector<16x8xbf16>, vector<8x32xbf16>, vector<16x32xf32> -> vector<16x32xf32>
    %649 = arith.addf %624, %648 : vector<16x32xf32>
    %650 = vector.extract_strided_slice %615 {offsets = [0, 8], sizes = [16, 8], strides = [1, 1]} : vector<16x32xf32> to vector<16x8xf32>
    %651 = arith.truncf %650 : vector<16x8xf32> to vector<16x8xbf16>
    %652 = vector.extract_strided_slice %622 {offsets = [0, 8], sizes = [16, 8], strides = [1, 1]} : vector<16x32xf32> to vector<16x8xf32>
    %653 = arith.truncf %652 : vector<16x8xf32> to vector<16x8xbf16>
    %654 = vector.extract_strided_slice %623 {offsets = [0, 8], sizes = [16, 8], strides = [1, 1]} : vector<16x32xf32> to vector<16x8xf32>
    %655 = arith.truncf %654 : vector<16x8xf32> to vector<16x8xbf16>
    %cst_170 = arith.constant dense<0.000000e+00> : vector<16x16xf32>
    %656 = tpu.matmul %651, %653, %cst_170 {dimension_numbers = #tpu.dot_dimension_numbers<[1], [1], [0], [0], [0, 0, 1, 0], [], []>} : vector<16x8xbf16>, vector<16x8xbf16>, vector<16x16xf32> -> vector<16x16xf32>
    %cst_171 = arith.constant 0.353553385 : f32
    %657 = vector.broadcast %cst_171 : f32 to vector<16x16xf32>
    %658 = arith.mulf %656, %657 : vector<16x16xf32>
    %659 = arith.addf %658, %2 : vector<16x16xf32>
    %cst_172 = arith.constant dense<0xFF800000> : vector<16xf32>
    %660 = vector.multi_reduction <maximumf>, %659, %cst_172 [1] : vector<16x16xf32> to vector<16xf32>
    %661 = vector.shape_cast %660 : vector<16xf32> to vector<16x1xf32>
    %662 = vector.broadcast %661 : vector<16x1xf32> to vector<16x16xf32>
    %663 = arith.subf %659, %662 : vector<16x16xf32>
    %664 = math.exp %663 : vector<16x16xf32>
    %cst_173 = arith.constant dense<0.000000e+00> : vector<16xf32>
    %665 = vector.multi_reduction <add>, %664, %cst_173 [1] : vector<16x16xf32> to vector<16xf32>
    %666 = vector.shape_cast %665 : vector<16xf32> to vector<16x1xf32>
    %667 = vector.broadcast %666 : vector<16x1xf32> to vector<16x16xf32>
    %668 = arith.divf %664, %667 : vector<16x16xf32>
    %669 = arith.truncf %668 : vector<16x16xf32> to vector<16x16xbf16>
    %cst_174 = arith.constant dense<0.000000e+00> : vector<16x8xf32>
    %670 = tpu.matmul %669, %655, %cst_174 {dimension_numbers = #tpu.dot_dimension_numbers<[1], [0], [0], [1], [0, 0, 1, 1], [], []>} : vector<16x16xbf16>, vector<16x8xbf16>, vector<16x8xf32> -> vector<16x8xf32>
    %671 = arith.truncf %670 : vector<16x8xf32> to vector<16x8xbf16>
    %672 = vector.extract_strided_slice %609 {offsets = [8, 0], sizes = [8, 32], strides = [1, 1]} : vector<32x32xbf16> to vector<8x32xbf16>
    %cst_175 = arith.constant dense<0.000000e+00> : vector<16x32xf32>
    %673 = tpu.matmul %671, %672, %cst_175 {dimension_numbers = #tpu.dot_dimension_numbers<[1], [0], [0], [1], [0, 0, 1, 1], [], []>} : vector<16x8xbf16>, vector<8x32xbf16>, vector<16x32xf32> -> vector<16x32xf32>
    %674 = arith.addf %649, %673 : vector<16x32xf32>
    %675 = vector.extract_strided_slice %615 {offsets = [0, 16], sizes = [16, 8], strides = [1, 1]} : vector<16x32xf32> to vector<16x8xf32>
    %676 = arith.truncf %675 : vector<16x8xf32> to vector<16x8xbf16>
    %677 = vector.extract_strided_slice %622 {offsets = [0, 16], sizes = [16, 8], strides = [1, 1]} : vector<16x32xf32> to vector<16x8xf32>
    %678 = arith.truncf %677 : vector<16x8xf32> to vector<16x8xbf16>
    %679 = vector.extract_strided_slice %623 {offsets = [0, 16], sizes = [16, 8], strides = [1, 1]} : vector<16x32xf32> to vector<16x8xf32>
    %680 = arith.truncf %679 : vector<16x8xf32> to vector<16x8xbf16>
    %cst_176 = arith.constant dense<0.000000e+00> : vector<16x16xf32>
    %681 = tpu.matmul %676, %678, %cst_176 {dimension_numbers = #tpu.dot_dimension_numbers<[1], [1], [0], [0], [0, 0, 1, 0], [], []>} : vector<16x8xbf16>, vector<16x8xbf16>, vector<16x16xf32> -> vector<16x16xf32>
    %cst_177 = arith.constant 0.353553385 : f32
    %682 = vector.broadcast %cst_177 : f32 to vector<16x16xf32>
    %683 = arith.mulf %681, %682 : vector<16x16xf32>
    %684 = arith.addf %683, %2 : vector<16x16xf32>
    %cst_178 = arith.constant dense<0xFF800000> : vector<16xf32>
    %685 = vector.multi_reduction <maximumf>, %684, %cst_178 [1] : vector<16x16xf32> to vector<16xf32>
    %686 = vector.shape_cast %685 : vector<16xf32> to vector<16x1xf32>
    %687 = vector.broadcast %686 : vector<16x1xf32> to vector<16x16xf32>
    %688 = arith.subf %684, %687 : vector<16x16xf32>
    %689 = math.exp %688 : vector<16x16xf32>
    %cst_179 = arith.constant dense<0.000000e+00> : vector<16xf32>
    %690 = vector.multi_reduction <add>, %689, %cst_179 [1] : vector<16x16xf32> to vector<16xf32>
    %691 = vector.shape_cast %690 : vector<16xf32> to vector<16x1xf32>
    %692 = vector.broadcast %691 : vector<16x1xf32> to vector<16x16xf32>
    %693 = arith.divf %689, %692 : vector<16x16xf32>
    %694 = arith.truncf %693 : vector<16x16xf32> to vector<16x16xbf16>
    %cst_180 = arith.constant dense<0.000000e+00> : vector<16x8xf32>
    %695 = tpu.matmul %694, %680, %cst_180 {dimension_numbers = #tpu.dot_dimension_numbers<[1], [0], [0], [1], [0, 0, 1, 1], [], []>} : vector<16x16xbf16>, vector<16x8xbf16>, vector<16x8xf32> -> vector<16x8xf32>
    %696 = arith.truncf %695 : vector<16x8xf32> to vector<16x8xbf16>
    %697 = vector.extract_strided_slice %609 {offsets = [16, 0], sizes = [8, 32], strides = [1, 1]} : vector<32x32xbf16> to vector<8x32xbf16>
    %cst_181 = arith.constant dense<0.000000e+00> : vector<16x32xf32>
    %698 = tpu.matmul %696, %697, %cst_181 {dimension_numbers = #tpu.dot_dimension_numbers<[1], [0], [0], [1], [0, 0, 1, 1], [], []>} : vector<16x8xbf16>, vector<8x32xbf16>, vector<16x32xf32> -> vector<16x32xf32>
    %699 = arith.addf %674, %698 : vector<16x32xf32>
    %700 = vector.extract_strided_slice %615 {offsets = [0, 24], sizes = [16, 8], strides = [1, 1]} : vector<16x32xf32> to vector<16x8xf32>
    %701 = arith.truncf %700 : vector<16x8xf32> to vector<16x8xbf16>
    %702 = vector.extract_strided_slice %622 {offsets = [0, 24], sizes = [16, 8], strides = [1, 1]} : vector<16x32xf32> to vector<16x8xf32>
    %703 = arith.truncf %702 : vector<16x8xf32> to vector<16x8xbf16>
    %704 = vector.extract_strided_slice %623 {offsets = [0, 24], sizes = [16, 8], strides = [1, 1]} : vector<16x32xf32> to vector<16x8xf32>
    %705 = arith.truncf %704 : vector<16x8xf32> to vector<16x8xbf16>
    %cst_182 = arith.constant dense<0.000000e+00> : vector<16x16xf32>
    %706 = tpu.matmul %701, %703, %cst_182 {dimension_numbers = #tpu.dot_dimension_numbers<[1], [1], [0], [0], [0, 0, 1, 0], [], []>} : vector<16x8xbf16>, vector<16x8xbf16>, vector<16x16xf32> -> vector<16x16xf32>
    %cst_183 = arith.constant 0.353553385 : f32
    %707 = vector.broadcast %cst_183 : f32 to vector<16x16xf32>
    %708 = arith.mulf %706, %707 : vector<16x16xf32>
    %709 = arith.addf %708, %2 : vector<16x16xf32>
    %cst_184 = arith.constant dense<0xFF800000> : vector<16xf32>
    %710 = vector.multi_reduction <maximumf>, %709, %cst_184 [1] : vector<16x16xf32> to vector<16xf32>
    %711 = vector.shape_cast %710 : vector<16xf32> to vector<16x1xf32>
    %712 = vector.broadcast %711 : vector<16x1xf32> to vector<16x16xf32>
    %713 = arith.subf %709, %712 : vector<16x16xf32>
    %714 = math.exp %713 : vector<16x16xf32>
    %cst_185 = arith.constant dense<0.000000e+00> : vector<16xf32>
    %715 = vector.multi_reduction <add>, %714, %cst_185 [1] : vector<16x16xf32> to vector<16xf32>
    %716 = vector.shape_cast %715 : vector<16xf32> to vector<16x1xf32>
    %717 = vector.broadcast %716 : vector<16x1xf32> to vector<16x16xf32>
    %718 = arith.divf %714, %717 : vector<16x16xf32>
    %719 = arith.truncf %718 : vector<16x16xf32> to vector<16x16xbf16>
    %cst_186 = arith.constant dense<0.000000e+00> : vector<16x8xf32>
    %720 = tpu.matmul %719, %705, %cst_186 {dimension_numbers = #tpu.dot_dimension_numbers<[1], [0], [0], [1], [0, 0, 1, 1], [], []>} : vector<16x16xbf16>, vector<16x8xbf16>, vector<16x8xf32> -> vector<16x8xf32>
    %721 = arith.truncf %720 : vector<16x8xf32> to vector<16x8xbf16>
    %722 = vector.extract_strided_slice %609 {offsets = [24, 0], sizes = [8, 32], strides = [1, 1]} : vector<32x32xbf16> to vector<8x32xbf16>
    %cst_187 = arith.constant dense<0.000000e+00> : vector<16x32xf32>
    %723 = tpu.matmul %721, %722, %cst_187 {dimension_numbers = #tpu.dot_dimension_numbers<[1], [0], [0], [1], [0, 0, 1, 1], [], []>} : vector<16x8xbf16>, vector<8x32xbf16>, vector<16x32xf32> -> vector<16x32xf32>
    %724 = arith.addf %699, %723 : vector<16x32xf32>
    %725 = vector.broadcast %607 : vector<1x32xf32> to vector<16x32xf32>
    %726 = arith.addf %724, %725 : vector<16x32xf32>
    %727 = arith.addf %579, %726 : vector<16x32xf32>
    %c17 = arith.constant 17 : index
    %c0_188 = arith.constant 0 : index
    %728 = vector.load %arg1[%c17, %c0_188] : memref<24x128xf32, #tpu.memory_space<vmem>>, vector<1x128xf32>
    %729 = vector.extract_strided_slice %728 {offsets = [0, 0], sizes = [1, 32], strides = [1, 1]} : vector<1x128xf32> to vector<1x32xf32>
    %730 = vector.extract_strided_slice %728 {offsets = [0, 32], sizes = [1, 32], strides = [1, 1]} : vector<1x128xf32> to vector<1x32xf32>
    %cst_189 = arith.constant dense<0.000000e+00> : vector<16xf32>
    %731 = vector.multi_reduction <add>, %727, %cst_189 [1] : vector<16x32xf32> to vector<16xf32>
    %732 = vector.shape_cast %731 : vector<16xf32> to vector<16x1xf32>
    %cst_190 = arith.constant 3.200000e+01 : f32
    %733 = vector.broadcast %cst_190 : f32 to vector<16x1xf32>
    %734 = arith.divf %732, %733 : vector<16x1xf32>
    %735 = vector.broadcast %734 : vector<16x1xf32> to vector<16x32xf32>
    %736 = arith.subf %727, %735 : vector<16x32xf32>
    %737 = arith.mulf %736, %736 : vector<16x32xf32>
    %cst_191 = arith.constant dense<0.000000e+00> : vector<16xf32>
    %738 = vector.multi_reduction <add>, %737, %cst_191 [1] : vector<16x32xf32> to vector<16xf32>
    %739 = vector.shape_cast %738 : vector<16xf32> to vector<16x1xf32>
    %cst_192 = arith.constant 0.0322580636 : f32
    %740 = vector.broadcast %cst_192 : f32 to vector<16x1xf32>
    %741 = arith.mulf %739, %740 : vector<16x1xf32>
    %742 = vector.broadcast %734 : vector<16x1xf32> to vector<16x32xf32>
    %743 = arith.subf %727, %742 : vector<16x32xf32>
    %744 = vector.broadcast %729 : vector<1x32xf32> to vector<16x32xf32>
    %745 = arith.mulf %744, %743 : vector<16x32xf32>
    %746 = math.sqrt %741 : vector<16x1xf32>
    %cst_193 = arith.constant 9.99999997E-7 : f32
    %747 = vector.broadcast %cst_193 : f32 to vector<16x1xf32>
    %748 = arith.addf %746, %747 : vector<16x1xf32>
    %749 = vector.broadcast %748 : vector<16x1xf32> to vector<16x32xf32>
    %750 = arith.divf %745, %749 : vector<16x32xf32>
    %751 = vector.broadcast %730 : vector<1x32xf32> to vector<16x32xf32>
    %752 = arith.addf %750, %751 : vector<16x32xf32>
    %c8 = arith.constant 8 : index
    %c0_194 = arith.constant 0 : index
    %753 = vector.load %arg1[%c8, %c0_194] : memref<24x128xf32, #tpu.memory_space<vmem>>, vector<1x128xf32>
    %754 = vector.extract_strided_slice %753 {offsets = [0, 0], sizes = [1, 64], strides = [1, 1]} : vector<1x128xf32> to vector<1x64xf32>
    %755 = vector.extract_strided_slice %753 {offsets = [0, 64], sizes = [1, 32], strides = [1, 1]} : vector<1x128xf32> to vector<1x32xf32>
    %c384 = arith.constant 384 : index
    %c0_195 = arith.constant 0 : index
    %756 = vector.load %arg0[%c384, %c0_195] : memref<576x128xbf16, #tpu.memory_space<vmem>>, vector<32x64xbf16>
    %c416 = arith.constant 416 : index
    %c0_196 = arith.constant 0 : index
    %757 = vector.load %arg0[%c416, %c0_196] : memref<576x128xbf16, #tpu.memory_space<vmem>>, vector<64x32xbf16>
    %758 = arith.truncf %752 : vector<16x32xf32> to vector<16x32xbf16>
    %cst_197 = arith.constant dense<0.000000e+00> : vector<16x64xf32>
    %759 = tpu.matmul %758, %756, %cst_197 {dimension_numbers = #tpu.dot_dimension_numbers<[1], [0], [0], [1], [0, 0, 1, 1], [], []>} : vector<16x32xbf16>, vector<32x64xbf16>, vector<16x64xf32> -> vector<16x64xf32>
    %760 = vector.broadcast %754 : vector<1x64xf32> to vector<16x64xf32>
    %761 = arith.addf %759, %760 : vector<16x64xf32>
    %cst_198 = arith.constant 0.000000e+00 : f32
    %762 = vector.broadcast %cst_198 : f32 to vector<16x64xf32>
    %763 = arith.maximumf %761, %762 : vector<16x64xf32>
    %764 = arith.truncf %763 : vector<16x64xf32> to vector<16x64xbf16>
    %cst_199 = arith.constant dense<0.000000e+00> : vector<16x32xf32>
    %765 = tpu.matmul %764, %757, %cst_199 {dimension_numbers = #tpu.dot_dimension_numbers<[1], [0], [0], [1], [0, 0, 1, 1], [], []>} : vector<16x64xbf16>, vector<64x32xbf16>, vector<16x32xf32> -> vector<16x32xf32>
    %766 = vector.broadcast %755 : vector<1x32xf32> to vector<16x32xf32>
    %767 = arith.addf %765, %766 : vector<16x32xf32>
    %768 = arith.addf %727, %767 : vector<16x32xf32>
    %c18 = arith.constant 18 : index
    %c0_200 = arith.constant 0 : index
    %769 = vector.load %arg1[%c18, %c0_200] : memref<24x128xf32, #tpu.memory_space<vmem>>, vector<1x128xf32>
    %770 = vector.extract_strided_slice %769 {offsets = [0, 0], sizes = [1, 32], strides = [1, 1]} : vector<1x128xf32> to vector<1x32xf32>
    %771 = vector.extract_strided_slice %769 {offsets = [0, 32], sizes = [1, 32], strides = [1, 1]} : vector<1x128xf32> to vector<1x32xf32>
    %cst_201 = arith.constant dense<0.000000e+00> : vector<16xf32>
    %772 = vector.multi_reduction <add>, %768, %cst_201 [1] : vector<16x32xf32> to vector<16xf32>
    %773 = vector.shape_cast %772 : vector<16xf32> to vector<16x1xf32>
    %cst_202 = arith.constant 3.200000e+01 : f32
    %774 = vector.broadcast %cst_202 : f32 to vector<16x1xf32>
    %775 = arith.divf %773, %774 : vector<16x1xf32>
    %776 = vector.broadcast %775 : vector<16x1xf32> to vector<16x32xf32>
    %777 = arith.subf %768, %776 : vector<16x32xf32>
    %778 = arith.mulf %777, %777 : vector<16x32xf32>
    %cst_203 = arith.constant dense<0.000000e+00> : vector<16xf32>
    %779 = vector.multi_reduction <add>, %778, %cst_203 [1] : vector<16x32xf32> to vector<16xf32>
    %780 = vector.shape_cast %779 : vector<16xf32> to vector<16x1xf32>
    %cst_204 = arith.constant 0.0322580636 : f32
    %781 = vector.broadcast %cst_204 : f32 to vector<16x1xf32>
    %782 = arith.mulf %780, %781 : vector<16x1xf32>
    %783 = vector.broadcast %775 : vector<16x1xf32> to vector<16x32xf32>
    %784 = arith.subf %768, %783 : vector<16x32xf32>
    %785 = vector.broadcast %770 : vector<1x32xf32> to vector<16x32xf32>
    %786 = arith.mulf %785, %784 : vector<16x32xf32>
    %787 = math.sqrt %782 : vector<16x1xf32>
    %cst_205 = arith.constant 9.99999997E-7 : f32
    %788 = vector.broadcast %cst_205 : f32 to vector<16x1xf32>
    %789 = arith.addf %787, %788 : vector<16x1xf32>
    %790 = vector.broadcast %789 : vector<16x1xf32> to vector<16x32xf32>
    %791 = arith.divf %786, %790 : vector<16x32xf32>
    %792 = vector.broadcast %771 : vector<1x32xf32> to vector<16x32xf32>
    %793 = arith.addf %791, %792 : vector<16x32xf32>
    %c4 = arith.constant 4 : index
    %c0_206 = arith.constant 0 : index
    %794 = vector.load %arg1[%c4, %c0_206] : memref<24x128xf32, #tpu.memory_space<vmem>>, vector<1x128xf32>
    %795 = vector.extract_strided_slice %794 {offsets = [0, 0], sizes = [1, 96], strides = [1, 1]} : vector<1x128xf32> to vector<1x96xf32>
    %796 = vector.extract_strided_slice %794 {offsets = [0, 96], sizes = [1, 32], strides = [1, 1]} : vector<1x128xf32> to vector<1x32xf32>
    %c128 = arith.constant 128 : index
    %c0_207 = arith.constant 0 : index
    %797 = vector.load %arg0[%c128, %c0_207] : memref<576x128xbf16, #tpu.memory_space<vmem>>, vector<32x96xbf16>
    %c128_208 = arith.constant 128 : index
    %c96_209 = arith.constant 96 : index
    %798 = vector.load %arg0[%c128_208, %c96_209] : memref<576x128xbf16, #tpu.memory_space<vmem>>, vector<32x32xbf16>
    %799 = arith.truncf %793 : vector<16x32xf32> to vector<16x32xbf16>
    %cst_210 = arith.constant dense<0.000000e+00> : vector<16x96xf32>
    %800 = tpu.matmul %799, %797, %cst_210 {dimension_numbers = #tpu.dot_dimension_numbers<[1], [0], [0], [1], [0, 0, 1, 1], [], []>} : vector<16x32xbf16>, vector<32x96xbf16>, vector<16x96xf32> -> vector<16x96xf32>
    %801 = vector.broadcast %795 : vector<1x96xf32> to vector<16x96xf32>
    %802 = arith.addf %800, %801 : vector<16x96xf32>
    %803 = vector.extract_strided_slice %802 {offsets = [0, 0], sizes = [16, 32], strides = [1, 1]} : vector<16x96xf32> to vector<16x32xf32>
    %804 = vector.extract_strided_slice %802 {offsets = [0, 32], sizes = [16, 32], strides = [1, 1]} : vector<16x96xf32> to vector<16x32xf32>
    %805 = vector.extract_strided_slice %802 {offsets = [0, 64], sizes = [16, 32], strides = [1, 1]} : vector<16x96xf32> to vector<16x32xf32>
    %cst_211 = arith.constant 0.000000e+00 : f32
    %806 = vector.broadcast %cst_211 : f32 to vector<16x32xf32>
    %807 = vector.extract_strided_slice %803 {offsets = [0, 0], sizes = [16, 8], strides = [1, 1]} : vector<16x32xf32> to vector<16x8xf32>
    %808 = arith.truncf %807 : vector<16x8xf32> to vector<16x8xbf16>
    %809 = vector.extract_strided_slice %804 {offsets = [0, 0], sizes = [16, 8], strides = [1, 1]} : vector<16x32xf32> to vector<16x8xf32>
    %810 = arith.truncf %809 : vector<16x8xf32> to vector<16x8xbf16>
    %811 = vector.extract_strided_slice %805 {offsets = [0, 0], sizes = [16, 8], strides = [1, 1]} : vector<16x32xf32> to vector<16x8xf32>
    %812 = arith.truncf %811 : vector<16x8xf32> to vector<16x8xbf16>
    %cst_212 = arith.constant dense<0.000000e+00> : vector<16x16xf32>
    %813 = tpu.matmul %808, %810, %cst_212 {dimension_numbers = #tpu.dot_dimension_numbers<[1], [1], [0], [0], [0, 0, 1, 0], [], []>} : vector<16x8xbf16>, vector<16x8xbf16>, vector<16x16xf32> -> vector<16x16xf32>
    %cst_213 = arith.constant 0.353553385 : f32
    %814 = vector.broadcast %cst_213 : f32 to vector<16x16xf32>
    %815 = arith.mulf %813, %814 : vector<16x16xf32>
    %816 = arith.addf %815, %3 : vector<16x16xf32>
    %cst_214 = arith.constant dense<0xFF800000> : vector<16xf32>
    %817 = vector.multi_reduction <maximumf>, %816, %cst_214 [1] : vector<16x16xf32> to vector<16xf32>
    %818 = vector.shape_cast %817 : vector<16xf32> to vector<16x1xf32>
    %819 = vector.broadcast %818 : vector<16x1xf32> to vector<16x16xf32>
    %820 = arith.subf %816, %819 : vector<16x16xf32>
    %821 = math.exp %820 : vector<16x16xf32>
    %cst_215 = arith.constant dense<0.000000e+00> : vector<16xf32>
    %822 = vector.multi_reduction <add>, %821, %cst_215 [1] : vector<16x16xf32> to vector<16xf32>
    %823 = vector.shape_cast %822 : vector<16xf32> to vector<16x1xf32>
    %824 = vector.broadcast %823 : vector<16x1xf32> to vector<16x16xf32>
    %825 = arith.divf %821, %824 : vector<16x16xf32>
    %826 = arith.truncf %825 : vector<16x16xf32> to vector<16x16xbf16>
    %cst_216 = arith.constant dense<0.000000e+00> : vector<16x8xf32>
    %827 = tpu.matmul %826, %812, %cst_216 {dimension_numbers = #tpu.dot_dimension_numbers<[1], [0], [0], [1], [0, 0, 1, 1], [], []>} : vector<16x16xbf16>, vector<16x8xbf16>, vector<16x8xf32> -> vector<16x8xf32>
    %828 = arith.truncf %827 : vector<16x8xf32> to vector<16x8xbf16>
    %829 = vector.extract_strided_slice %798 {offsets = [0, 0], sizes = [8, 32], strides = [1, 1]} : vector<32x32xbf16> to vector<8x32xbf16>
    %cst_217 = arith.constant dense<0.000000e+00> : vector<16x32xf32>
    %830 = tpu.matmul %828, %829, %cst_217 {dimension_numbers = #tpu.dot_dimension_numbers<[1], [0], [0], [1], [0, 0, 1, 1], [], []>} : vector<16x8xbf16>, vector<8x32xbf16>, vector<16x32xf32> -> vector<16x32xf32>
    %831 = arith.addf %806, %830 : vector<16x32xf32>
    %832 = vector.extract_strided_slice %803 {offsets = [0, 8], sizes = [16, 8], strides = [1, 1]} : vector<16x32xf32> to vector<16x8xf32>
    %833 = arith.truncf %832 : vector<16x8xf32> to vector<16x8xbf16>
    %834 = vector.extract_strided_slice %804 {offsets = [0, 8], sizes = [16, 8], strides = [1, 1]} : vector<16x32xf32> to vector<16x8xf32>
    %835 = arith.truncf %834 : vector<16x8xf32> to vector<16x8xbf16>
    %836 = vector.extract_strided_slice %805 {offsets = [0, 8], sizes = [16, 8], strides = [1, 1]} : vector<16x32xf32> to vector<16x8xf32>
    %837 = arith.truncf %836 : vector<16x8xf32> to vector<16x8xbf16>
    %cst_218 = arith.constant dense<0.000000e+00> : vector<16x16xf32>
    %838 = tpu.matmul %833, %835, %cst_218 {dimension_numbers = #tpu.dot_dimension_numbers<[1], [1], [0], [0], [0, 0, 1, 0], [], []>} : vector<16x8xbf16>, vector<16x8xbf16>, vector<16x16xf32> -> vector<16x16xf32>
    %cst_219 = arith.constant 0.353553385 : f32
    %839 = vector.broadcast %cst_219 : f32 to vector<16x16xf32>
    %840 = arith.mulf %838, %839 : vector<16x16xf32>
    %841 = arith.addf %840, %3 : vector<16x16xf32>
    %cst_220 = arith.constant dense<0xFF800000> : vector<16xf32>
    %842 = vector.multi_reduction <maximumf>, %841, %cst_220 [1] : vector<16x16xf32> to vector<16xf32>
    %843 = vector.shape_cast %842 : vector<16xf32> to vector<16x1xf32>
    %844 = vector.broadcast %843 : vector<16x1xf32> to vector<16x16xf32>
    %845 = arith.subf %841, %844 : vector<16x16xf32>
    %846 = math.exp %845 : vector<16x16xf32>
    %cst_221 = arith.constant dense<0.000000e+00> : vector<16xf32>
    %847 = vector.multi_reduction <add>, %846, %cst_221 [1] : vector<16x16xf32> to vector<16xf32>
    %848 = vector.shape_cast %847 : vector<16xf32> to vector<16x1xf32>
    %849 = vector.broadcast %848 : vector<16x1xf32> to vector<16x16xf32>
    %850 = arith.divf %846, %849 : vector<16x16xf32>
    %851 = arith.truncf %850 : vector<16x16xf32> to vector<16x16xbf16>
    %cst_222 = arith.constant dense<0.000000e+00> : vector<16x8xf32>
    %852 = tpu.matmul %851, %837, %cst_222 {dimension_numbers = #tpu.dot_dimension_numbers<[1], [0], [0], [1], [0, 0, 1, 1], [], []>} : vector<16x16xbf16>, vector<16x8xbf16>, vector<16x8xf32> -> vector<16x8xf32>
    %853 = arith.truncf %852 : vector<16x8xf32> to vector<16x8xbf16>
    %854 = vector.extract_strided_slice %798 {offsets = [8, 0], sizes = [8, 32], strides = [1, 1]} : vector<32x32xbf16> to vector<8x32xbf16>
    %cst_223 = arith.constant dense<0.000000e+00> : vector<16x32xf32>
    %855 = tpu.matmul %853, %854, %cst_223 {dimension_numbers = #tpu.dot_dimension_numbers<[1], [0], [0], [1], [0, 0, 1, 1], [], []>} : vector<16x8xbf16>, vector<8x32xbf16>, vector<16x32xf32> -> vector<16x32xf32>
    %856 = arith.addf %831, %855 : vector<16x32xf32>
    %857 = vector.extract_strided_slice %803 {offsets = [0, 16], sizes = [16, 8], strides = [1, 1]} : vector<16x32xf32> to vector<16x8xf32>
    %858 = arith.truncf %857 : vector<16x8xf32> to vector<16x8xbf16>
    %859 = vector.extract_strided_slice %804 {offsets = [0, 16], sizes = [16, 8], strides = [1, 1]} : vector<16x32xf32> to vector<16x8xf32>
    %860 = arith.truncf %859 : vector<16x8xf32> to vector<16x8xbf16>
    %861 = vector.extract_strided_slice %805 {offsets = [0, 16], sizes = [16, 8], strides = [1, 1]} : vector<16x32xf32> to vector<16x8xf32>
    %862 = arith.truncf %861 : vector<16x8xf32> to vector<16x8xbf16>
    %cst_224 = arith.constant dense<0.000000e+00> : vector<16x16xf32>
    %863 = tpu.matmul %858, %860, %cst_224 {dimension_numbers = #tpu.dot_dimension_numbers<[1], [1], [0], [0], [0, 0, 1, 0], [], []>} : vector<16x8xbf16>, vector<16x8xbf16>, vector<16x16xf32> -> vector<16x16xf32>
    %cst_225 = arith.constant 0.353553385 : f32
    %864 = vector.broadcast %cst_225 : f32 to vector<16x16xf32>
    %865 = arith.mulf %863, %864 : vector<16x16xf32>
    %866 = arith.addf %865, %3 : vector<16x16xf32>
    %cst_226 = arith.constant dense<0xFF800000> : vector<16xf32>
    %867 = vector.multi_reduction <maximumf>, %866, %cst_226 [1] : vector<16x16xf32> to vector<16xf32>
    %868 = vector.shape_cast %867 : vector<16xf32> to vector<16x1xf32>
    %869 = vector.broadcast %868 : vector<16x1xf32> to vector<16x16xf32>
    %870 = arith.subf %866, %869 : vector<16x16xf32>
    %871 = math.exp %870 : vector<16x16xf32>
    %cst_227 = arith.constant dense<0.000000e+00> : vector<16xf32>
    %872 = vector.multi_reduction <add>, %871, %cst_227 [1] : vector<16x16xf32> to vector<16xf32>
    %873 = vector.shape_cast %872 : vector<16xf32> to vector<16x1xf32>
    %874 = vector.broadcast %873 : vector<16x1xf32> to vector<16x16xf32>
    %875 = arith.divf %871, %874 : vector<16x16xf32>
    %876 = arith.truncf %875 : vector<16x16xf32> to vector<16x16xbf16>
    %cst_228 = arith.constant dense<0.000000e+00> : vector<16x8xf32>
    %877 = tpu.matmul %876, %862, %cst_228 {dimension_numbers = #tpu.dot_dimension_numbers<[1], [0], [0], [1], [0, 0, 1, 1], [], []>} : vector<16x16xbf16>, vector<16x8xbf16>, vector<16x8xf32> -> vector<16x8xf32>
    %878 = arith.truncf %877 : vector<16x8xf32> to vector<16x8xbf16>
    %879 = vector.extract_strided_slice %798 {offsets = [16, 0], sizes = [8, 32], strides = [1, 1]} : vector<32x32xbf16> to vector<8x32xbf16>
    %cst_229 = arith.constant dense<0.000000e+00> : vector<16x32xf32>
    %880 = tpu.matmul %878, %879, %cst_229 {dimension_numbers = #tpu.dot_dimension_numbers<[1], [0], [0], [1], [0, 0, 1, 1], [], []>} : vector<16x8xbf16>, vector<8x32xbf16>, vector<16x32xf32> -> vector<16x32xf32>
    %881 = arith.addf %856, %880 : vector<16x32xf32>
    %882 = vector.extract_strided_slice %803 {offsets = [0, 24], sizes = [16, 8], strides = [1, 1]} : vector<16x32xf32> to vector<16x8xf32>
    %883 = arith.truncf %882 : vector<16x8xf32> to vector<16x8xbf16>
    %884 = vector.extract_strided_slice %804 {offsets = [0, 24], sizes = [16, 8], strides = [1, 1]} : vector<16x32xf32> to vector<16x8xf32>
    %885 = arith.truncf %884 : vector<16x8xf32> to vector<16x8xbf16>
    %886 = vector.extract_strided_slice %805 {offsets = [0, 24], sizes = [16, 8], strides = [1, 1]} : vector<16x32xf32> to vector<16x8xf32>
    %887 = arith.truncf %886 : vector<16x8xf32> to vector<16x8xbf16>
    %cst_230 = arith.constant dense<0.000000e+00> : vector<16x16xf32>
    %888 = tpu.matmul %883, %885, %cst_230 {dimension_numbers = #tpu.dot_dimension_numbers<[1], [1], [0], [0], [0, 0, 1, 0], [], []>} : vector<16x8xbf16>, vector<16x8xbf16>, vector<16x16xf32> -> vector<16x16xf32>
    %cst_231 = arith.constant 0.353553385 : f32
    %889 = vector.broadcast %cst_231 : f32 to vector<16x16xf32>
    %890 = arith.mulf %888, %889 : vector<16x16xf32>
    %891 = arith.addf %890, %3 : vector<16x16xf32>
    %cst_232 = arith.constant dense<0xFF800000> : vector<16xf32>
    %892 = vector.multi_reduction <maximumf>, %891, %cst_232 [1] : vector<16x16xf32> to vector<16xf32>
    %893 = vector.shape_cast %892 : vector<16xf32> to vector<16x1xf32>
    %894 = vector.broadcast %893 : vector<16x1xf32> to vector<16x16xf32>
    %895 = arith.subf %891, %894 : vector<16x16xf32>
    %896 = math.exp %895 : vector<16x16xf32>
    %cst_233 = arith.constant dense<0.000000e+00> : vector<16xf32>
    %897 = vector.multi_reduction <add>, %896, %cst_233 [1] : vector<16x16xf32> to vector<16xf32>
    %898 = vector.shape_cast %897 : vector<16xf32> to vector<16x1xf32>
    %899 = vector.broadcast %898 : vector<16x1xf32> to vector<16x16xf32>
    %900 = arith.divf %896, %899 : vector<16x16xf32>
    %901 = arith.truncf %900 : vector<16x16xf32> to vector<16x16xbf16>
    %cst_234 = arith.constant dense<0.000000e+00> : vector<16x8xf32>
    %902 = tpu.matmul %901, %887, %cst_234 {dimension_numbers = #tpu.dot_dimension_numbers<[1], [0], [0], [1], [0, 0, 1, 1], [], []>} : vector<16x16xbf16>, vector<16x8xbf16>, vector<16x8xf32> -> vector<16x8xf32>
    %903 = arith.truncf %902 : vector<16x8xf32> to vector<16x8xbf16>
    %904 = vector.extract_strided_slice %798 {offsets = [24, 0], sizes = [8, 32], strides = [1, 1]} : vector<32x32xbf16> to vector<8x32xbf16>
    %cst_235 = arith.constant dense<0.000000e+00> : vector<16x32xf32>
    %905 = tpu.matmul %903, %904, %cst_235 {dimension_numbers = #tpu.dot_dimension_numbers<[1], [0], [0], [1], [0, 0, 1, 1], [], []>} : vector<16x8xbf16>, vector<8x32xbf16>, vector<16x32xf32> -> vector<16x32xf32>
    %906 = arith.addf %881, %905 : vector<16x32xf32>
    %907 = vector.broadcast %796 : vector<1x32xf32> to vector<16x32xf32>
    %908 = arith.addf %906, %907 : vector<16x32xf32>
    %909 = arith.addf %768, %908 : vector<16x32xf32>
    %c19 = arith.constant 19 : index
    %c0_236 = arith.constant 0 : index
    %910 = vector.load %arg1[%c19, %c0_236] : memref<24x128xf32, #tpu.memory_space<vmem>>, vector<1x128xf32>
    %911 = vector.extract_strided_slice %910 {offsets = [0, 0], sizes = [1, 32], strides = [1, 1]} : vector<1x128xf32> to vector<1x32xf32>
    %912 = vector.extract_strided_slice %910 {offsets = [0, 32], sizes = [1, 32], strides = [1, 1]} : vector<1x128xf32> to vector<1x32xf32>
    %cst_237 = arith.constant dense<0.000000e+00> : vector<16xf32>
    %913 = vector.multi_reduction <add>, %909, %cst_237 [1] : vector<16x32xf32> to vector<16xf32>
    %914 = vector.shape_cast %913 : vector<16xf32> to vector<16x1xf32>
    %cst_238 = arith.constant 3.200000e+01 : f32
    %915 = vector.broadcast %cst_238 : f32 to vector<16x1xf32>
    %916 = arith.divf %914, %915 : vector<16x1xf32>
    %917 = vector.broadcast %916 : vector<16x1xf32> to vector<16x32xf32>
    %918 = arith.subf %909, %917 : vector<16x32xf32>
    %919 = arith.mulf %918, %918 : vector<16x32xf32>
    %cst_239 = arith.constant dense<0.000000e+00> : vector<16xf32>
    %920 = vector.multi_reduction <add>, %919, %cst_239 [1] : vector<16x32xf32> to vector<16xf32>
    %921 = vector.shape_cast %920 : vector<16xf32> to vector<16x1xf32>
    %cst_240 = arith.constant 0.0322580636 : f32
    %922 = vector.broadcast %cst_240 : f32 to vector<16x1xf32>
    %923 = arith.mulf %921, %922 : vector<16x1xf32>
    %924 = vector.broadcast %916 : vector<16x1xf32> to vector<16x32xf32>
    %925 = arith.subf %909, %924 : vector<16x32xf32>
    %926 = vector.broadcast %911 : vector<1x32xf32> to vector<16x32xf32>
    %927 = arith.mulf %926, %925 : vector<16x32xf32>
    %928 = math.sqrt %923 : vector<16x1xf32>
    %cst_241 = arith.constant 9.99999997E-7 : f32
    %929 = vector.broadcast %cst_241 : f32 to vector<16x1xf32>
    %930 = arith.addf %928, %929 : vector<16x1xf32>
    %931 = vector.broadcast %930 : vector<16x1xf32> to vector<16x32xf32>
    %932 = arith.divf %927, %931 : vector<16x32xf32>
    %933 = vector.broadcast %912 : vector<1x32xf32> to vector<16x32xf32>
    %934 = arith.addf %932, %933 : vector<16x32xf32>
    %c5 = arith.constant 5 : index
    %c0_242 = arith.constant 0 : index
    %935 = vector.load %arg1[%c5, %c0_242] : memref<24x128xf32, #tpu.memory_space<vmem>>, vector<1x128xf32>
    %936 = vector.extract_strided_slice %935 {offsets = [0, 0], sizes = [1, 96], strides = [1, 1]} : vector<1x128xf32> to vector<1x96xf32>
    %937 = vector.extract_strided_slice %935 {offsets = [0, 96], sizes = [1, 32], strides = [1, 1]} : vector<1x128xf32> to vector<1x32xf32>
    %c160 = arith.constant 160 : index
    %c0_243 = arith.constant 0 : index
    %938 = vector.load %arg0[%c160, %c0_243] : memref<576x128xbf16, #tpu.memory_space<vmem>>, vector<32x96xbf16>
    %c160_244 = arith.constant 160 : index
    %c96_245 = arith.constant 96 : index
    %939 = vector.load %arg0[%c160_244, %c96_245] : memref<576x128xbf16, #tpu.memory_space<vmem>>, vector<32x32xbf16>
    %940 = arith.truncf %934 : vector<16x32xf32> to vector<16x32xbf16>
    %941 = vector.extract_strided_slice %938 {offsets = [0, 0], sizes = [32, 32], strides = [1, 1]} : vector<32x96xbf16> to vector<32x32xbf16>
    %cst_246 = arith.constant dense<0.000000e+00> : vector<16x32xf32>
    %942 = tpu.matmul %940, %941, %cst_246 {dimension_numbers = #tpu.dot_dimension_numbers<[1], [0], [0], [1], [0, 0, 1, 1], [], []>} : vector<16x32xbf16>, vector<32x32xbf16>, vector<16x32xf32> -> vector<16x32xf32>
    %943 = vector.extract_strided_slice %936 {offsets = [0, 0], sizes = [1, 32], strides = [1, 1]} : vector<1x96xf32> to vector<1x32xf32>
    %944 = vector.broadcast %943 : vector<1x32xf32> to vector<16x32xf32>
    %945 = arith.addf %942, %944 : vector<16x32xf32>
    %946 = arith.truncf %415 : vector<16x32xf32> to vector<16x32xbf16>
    %947 = vector.extract_strided_slice %938 {offsets = [0, 32], sizes = [32, 64], strides = [1, 1]} : vector<32x96xbf16> to vector<32x64xbf16>
    %cst_247 = arith.constant dense<0.000000e+00> : vector<16x64xf32>
    %948 = tpu.matmul %946, %947, %cst_247 {dimension_numbers = #tpu.dot_dimension_numbers<[1], [0], [0], [1], [0, 0, 1, 1], [], []>} : vector<16x32xbf16>, vector<32x64xbf16>, vector<16x64xf32> -> vector<16x64xf32>
    %949 = vector.extract_strided_slice %936 {offsets = [0, 32], sizes = [1, 64], strides = [1, 1]} : vector<1x96xf32> to vector<1x64xf32>
    %950 = vector.broadcast %949 : vector<1x64xf32> to vector<16x64xf32>
    %951 = arith.addf %948, %950 : vector<16x64xf32>
    %952 = vector.extract_strided_slice %951 {offsets = [0, 0], sizes = [16, 32], strides = [1, 1]} : vector<16x64xf32> to vector<16x32xf32>
    %953 = vector.extract_strided_slice %951 {offsets = [0, 32], sizes = [16, 32], strides = [1, 1]} : vector<16x64xf32> to vector<16x32xf32>
    %cst_248 = arith.constant 0.000000e+00 : f32
    %954 = vector.broadcast %cst_248 : f32 to vector<16x32xf32>
    %955 = vector.extract_strided_slice %945 {offsets = [0, 0], sizes = [16, 8], strides = [1, 1]} : vector<16x32xf32> to vector<16x8xf32>
    %956 = arith.truncf %955 : vector<16x8xf32> to vector<16x8xbf16>
    %957 = vector.extract_strided_slice %952 {offsets = [0, 0], sizes = [16, 8], strides = [1, 1]} : vector<16x32xf32> to vector<16x8xf32>
    %958 = arith.truncf %957 : vector<16x8xf32> to vector<16x8xbf16>
    %959 = vector.extract_strided_slice %953 {offsets = [0, 0], sizes = [16, 8], strides = [1, 1]} : vector<16x32xf32> to vector<16x8xf32>
    %960 = arith.truncf %959 : vector<16x8xf32> to vector<16x8xbf16>
    %cst_249 = arith.constant dense<0.000000e+00> : vector<16x16xf32>
    %961 = tpu.matmul %956, %958, %cst_249 {dimension_numbers = #tpu.dot_dimension_numbers<[1], [1], [0], [0], [0, 0, 1, 0], [], []>} : vector<16x8xbf16>, vector<16x8xbf16>, vector<16x16xf32> -> vector<16x16xf32>
    %cst_250 = arith.constant 0.353553385 : f32
    %962 = vector.broadcast %cst_250 : f32 to vector<16x16xf32>
    %963 = arith.mulf %961, %962 : vector<16x16xf32>
    %964 = arith.addf %963, %2 : vector<16x16xf32>
    %cst_251 = arith.constant dense<0xFF800000> : vector<16xf32>
    %965 = vector.multi_reduction <maximumf>, %964, %cst_251 [1] : vector<16x16xf32> to vector<16xf32>
    %966 = vector.shape_cast %965 : vector<16xf32> to vector<16x1xf32>
    %967 = vector.broadcast %966 : vector<16x1xf32> to vector<16x16xf32>
    %968 = arith.subf %964, %967 : vector<16x16xf32>
    %969 = math.exp %968 : vector<16x16xf32>
    %cst_252 = arith.constant dense<0.000000e+00> : vector<16xf32>
    %970 = vector.multi_reduction <add>, %969, %cst_252 [1] : vector<16x16xf32> to vector<16xf32>
    %971 = vector.shape_cast %970 : vector<16xf32> to vector<16x1xf32>
    %972 = vector.broadcast %971 : vector<16x1xf32> to vector<16x16xf32>
    %973 = arith.divf %969, %972 : vector<16x16xf32>
    %974 = arith.truncf %973 : vector<16x16xf32> to vector<16x16xbf16>
    %cst_253 = arith.constant dense<0.000000e+00> : vector<16x8xf32>
    %975 = tpu.matmul %974, %960, %cst_253 {dimension_numbers = #tpu.dot_dimension_numbers<[1], [0], [0], [1], [0, 0, 1, 1], [], []>} : vector<16x16xbf16>, vector<16x8xbf16>, vector<16x8xf32> -> vector<16x8xf32>
    %976 = arith.truncf %975 : vector<16x8xf32> to vector<16x8xbf16>
    %977 = vector.extract_strided_slice %939 {offsets = [0, 0], sizes = [8, 32], strides = [1, 1]} : vector<32x32xbf16> to vector<8x32xbf16>
    %cst_254 = arith.constant dense<0.000000e+00> : vector<16x32xf32>
    %978 = tpu.matmul %976, %977, %cst_254 {dimension_numbers = #tpu.dot_dimension_numbers<[1], [0], [0], [1], [0, 0, 1, 1], [], []>} : vector<16x8xbf16>, vector<8x32xbf16>, vector<16x32xf32> -> vector<16x32xf32>
    %979 = arith.addf %954, %978 : vector<16x32xf32>
    %980 = vector.extract_strided_slice %945 {offsets = [0, 8], sizes = [16, 8], strides = [1, 1]} : vector<16x32xf32> to vector<16x8xf32>
    %981 = arith.truncf %980 : vector<16x8xf32> to vector<16x8xbf16>
    %982 = vector.extract_strided_slice %952 {offsets = [0, 8], sizes = [16, 8], strides = [1, 1]} : vector<16x32xf32> to vector<16x8xf32>
    %983 = arith.truncf %982 : vector<16x8xf32> to vector<16x8xbf16>
    %984 = vector.extract_strided_slice %953 {offsets = [0, 8], sizes = [16, 8], strides = [1, 1]} : vector<16x32xf32> to vector<16x8xf32>
    %985 = arith.truncf %984 : vector<16x8xf32> to vector<16x8xbf16>
    %cst_255 = arith.constant dense<0.000000e+00> : vector<16x16xf32>
    %986 = tpu.matmul %981, %983, %cst_255 {dimension_numbers = #tpu.dot_dimension_numbers<[1], [1], [0], [0], [0, 0, 1, 0], [], []>} : vector<16x8xbf16>, vector<16x8xbf16>, vector<16x16xf32> -> vector<16x16xf32>
    %cst_256 = arith.constant 0.353553385 : f32
    %987 = vector.broadcast %cst_256 : f32 to vector<16x16xf32>
    %988 = arith.mulf %986, %987 : vector<16x16xf32>
    %989 = arith.addf %988, %2 : vector<16x16xf32>
    %cst_257 = arith.constant dense<0xFF800000> : vector<16xf32>
    %990 = vector.multi_reduction <maximumf>, %989, %cst_257 [1] : vector<16x16xf32> to vector<16xf32>
    %991 = vector.shape_cast %990 : vector<16xf32> to vector<16x1xf32>
    %992 = vector.broadcast %991 : vector<16x1xf32> to vector<16x16xf32>
    %993 = arith.subf %989, %992 : vector<16x16xf32>
    %994 = math.exp %993 : vector<16x16xf32>
    %cst_258 = arith.constant dense<0.000000e+00> : vector<16xf32>
    %995 = vector.multi_reduction <add>, %994, %cst_258 [1] : vector<16x16xf32> to vector<16xf32>
    %996 = vector.shape_cast %995 : vector<16xf32> to vector<16x1xf32>
    %997 = vector.broadcast %996 : vector<16x1xf32> to vector<16x16xf32>
    %998 = arith.divf %994, %997 : vector<16x16xf32>
    %999 = arith.truncf %998 : vector<16x16xf32> to vector<16x16xbf16>
    %cst_259 = arith.constant dense<0.000000e+00> : vector<16x8xf32>
    %1000 = tpu.matmul %999, %985, %cst_259 {dimension_numbers = #tpu.dot_dimension_numbers<[1], [0], [0], [1], [0, 0, 1, 1], [], []>} : vector<16x16xbf16>, vector<16x8xbf16>, vector<16x8xf32> -> vector<16x8xf32>
    %1001 = arith.truncf %1000 : vector<16x8xf32> to vector<16x8xbf16>
    %1002 = vector.extract_strided_slice %939 {offsets = [8, 0], sizes = [8, 32], strides = [1, 1]} : vector<32x32xbf16> to vector<8x32xbf16>
    %cst_260 = arith.constant dense<0.000000e+00> : vector<16x32xf32>
    %1003 = tpu.matmul %1001, %1002, %cst_260 {dimension_numbers = #tpu.dot_dimension_numbers<[1], [0], [0], [1], [0, 0, 1, 1], [], []>} : vector<16x8xbf16>, vector<8x32xbf16>, vector<16x32xf32> -> vector<16x32xf32>
    %1004 = arith.addf %979, %1003 : vector<16x32xf32>
    %1005 = vector.extract_strided_slice %945 {offsets = [0, 16], sizes = [16, 8], strides = [1, 1]} : vector<16x32xf32> to vector<16x8xf32>
    %1006 = arith.truncf %1005 : vector<16x8xf32> to vector<16x8xbf16>
    %1007 = vector.extract_strided_slice %952 {offsets = [0, 16], sizes = [16, 8], strides = [1, 1]} : vector<16x32xf32> to vector<16x8xf32>
    %1008 = arith.truncf %1007 : vector<16x8xf32> to vector<16x8xbf16>
    %1009 = vector.extract_strided_slice %953 {offsets = [0, 16], sizes = [16, 8], strides = [1, 1]} : vector<16x32xf32> to vector<16x8xf32>
    %1010 = arith.truncf %1009 : vector<16x8xf32> to vector<16x8xbf16>
    %cst_261 = arith.constant dense<0.000000e+00> : vector<16x16xf32>
    %1011 = tpu.matmul %1006, %1008, %cst_261 {dimension_numbers = #tpu.dot_dimension_numbers<[1], [1], [0], [0], [0, 0, 1, 0], [], []>} : vector<16x8xbf16>, vector<16x8xbf16>, vector<16x16xf32> -> vector<16x16xf32>
    %cst_262 = arith.constant 0.353553385 : f32
    %1012 = vector.broadcast %cst_262 : f32 to vector<16x16xf32>
    %1013 = arith.mulf %1011, %1012 : vector<16x16xf32>
    %1014 = arith.addf %1013, %2 : vector<16x16xf32>
    %cst_263 = arith.constant dense<0xFF800000> : vector<16xf32>
    %1015 = vector.multi_reduction <maximumf>, %1014, %cst_263 [1] : vector<16x16xf32> to vector<16xf32>
    %1016 = vector.shape_cast %1015 : vector<16xf32> to vector<16x1xf32>
    %1017 = vector.broadcast %1016 : vector<16x1xf32> to vector<16x16xf32>
    %1018 = arith.subf %1014, %1017 : vector<16x16xf32>
    %1019 = math.exp %1018 : vector<16x16xf32>
    %cst_264 = arith.constant dense<0.000000e+00> : vector<16xf32>
    %1020 = vector.multi_reduction <add>, %1019, %cst_264 [1] : vector<16x16xf32> to vector<16xf32>
    %1021 = vector.shape_cast %1020 : vector<16xf32> to vector<16x1xf32>
    %1022 = vector.broadcast %1021 : vector<16x1xf32> to vector<16x16xf32>
    %1023 = arith.divf %1019, %1022 : vector<16x16xf32>
    %1024 = arith.truncf %1023 : vector<16x16xf32> to vector<16x16xbf16>
    %cst_265 = arith.constant dense<0.000000e+00> : vector<16x8xf32>
    %1025 = tpu.matmul %1024, %1010, %cst_265 {dimension_numbers = #tpu.dot_dimension_numbers<[1], [0], [0], [1], [0, 0, 1, 1], [], []>} : vector<16x16xbf16>, vector<16x8xbf16>, vector<16x8xf32> -> vector<16x8xf32>
    %1026 = arith.truncf %1025 : vector<16x8xf32> to vector<16x8xbf16>
    %1027 = vector.extract_strided_slice %939 {offsets = [16, 0], sizes = [8, 32], strides = [1, 1]} : vector<32x32xbf16> to vector<8x32xbf16>
    %cst_266 = arith.constant dense<0.000000e+00> : vector<16x32xf32>
    %1028 = tpu.matmul %1026, %1027, %cst_266 {dimension_numbers = #tpu.dot_dimension_numbers<[1], [0], [0], [1], [0, 0, 1, 1], [], []>} : vector<16x8xbf16>, vector<8x32xbf16>, vector<16x32xf32> -> vector<16x32xf32>
    %1029 = arith.addf %1004, %1028 : vector<16x32xf32>
    %1030 = vector.extract_strided_slice %945 {offsets = [0, 24], sizes = [16, 8], strides = [1, 1]} : vector<16x32xf32> to vector<16x8xf32>
    %1031 = arith.truncf %1030 : vector<16x8xf32> to vector<16x8xbf16>
    %1032 = vector.extract_strided_slice %952 {offsets = [0, 24], sizes = [16, 8], strides = [1, 1]} : vector<16x32xf32> to vector<16x8xf32>
    %1033 = arith.truncf %1032 : vector<16x8xf32> to vector<16x8xbf16>
    %1034 = vector.extract_strided_slice %953 {offsets = [0, 24], sizes = [16, 8], strides = [1, 1]} : vector<16x32xf32> to vector<16x8xf32>
    %1035 = arith.truncf %1034 : vector<16x8xf32> to vector<16x8xbf16>
    %cst_267 = arith.constant dense<0.000000e+00> : vector<16x16xf32>
    %1036 = tpu.matmul %1031, %1033, %cst_267 {dimension_numbers = #tpu.dot_dimension_numbers<[1], [1], [0], [0], [0, 0, 1, 0], [], []>} : vector<16x8xbf16>, vector<16x8xbf16>, vector<16x16xf32> -> vector<16x16xf32>
    %cst_268 = arith.constant 0.353553385 : f32
    %1037 = vector.broadcast %cst_268 : f32 to vector<16x16xf32>
    %1038 = arith.mulf %1036, %1037 : vector<16x16xf32>
    %1039 = arith.addf %1038, %2 : vector<16x16xf32>
    %cst_269 = arith.constant dense<0xFF800000> : vector<16xf32>
    %1040 = vector.multi_reduction <maximumf>, %1039, %cst_269 [1] : vector<16x16xf32> to vector<16xf32>
    %1041 = vector.shape_cast %1040 : vector<16xf32> to vector<16x1xf32>
    %1042 = vector.broadcast %1041 : vector<16x1xf32> to vector<16x16xf32>
    %1043 = arith.subf %1039, %1042 : vector<16x16xf32>
    %1044 = math.exp %1043 : vector<16x16xf32>
    %cst_270 = arith.constant dense<0.000000e+00> : vector<16xf32>
    %1045 = vector.multi_reduction <add>, %1044, %cst_270 [1] : vector<16x16xf32> to vector<16xf32>
    %1046 = vector.shape_cast %1045 : vector<16xf32> to vector<16x1xf32>
    %1047 = vector.broadcast %1046 : vector<16x1xf32> to vector<16x16xf32>
    %1048 = arith.divf %1044, %1047 : vector<16x16xf32>
    %1049 = arith.truncf %1048 : vector<16x16xf32> to vector<16x16xbf16>
    %cst_271 = arith.constant dense<0.000000e+00> : vector<16x8xf32>
    %1050 = tpu.matmul %1049, %1035, %cst_271 {dimension_numbers = #tpu.dot_dimension_numbers<[1], [0], [0], [1], [0, 0, 1, 1], [], []>} : vector<16x16xbf16>, vector<16x8xbf16>, vector<16x8xf32> -> vector<16x8xf32>
    %1051 = arith.truncf %1050 : vector<16x8xf32> to vector<16x8xbf16>
    %1052 = vector.extract_strided_slice %939 {offsets = [24, 0], sizes = [8, 32], strides = [1, 1]} : vector<32x32xbf16> to vector<8x32xbf16>
    %cst_272 = arith.constant dense<0.000000e+00> : vector<16x32xf32>
    %1053 = tpu.matmul %1051, %1052, %cst_272 {dimension_numbers = #tpu.dot_dimension_numbers<[1], [0], [0], [1], [0, 0, 1, 1], [], []>} : vector<16x8xbf16>, vector<8x32xbf16>, vector<16x32xf32> -> vector<16x32xf32>
    %1054 = arith.addf %1029, %1053 : vector<16x32xf32>
    %1055 = vector.broadcast %937 : vector<1x32xf32> to vector<16x32xf32>
    %1056 = arith.addf %1054, %1055 : vector<16x32xf32>
    %1057 = arith.addf %909, %1056 : vector<16x32xf32>
    %c20 = arith.constant 20 : index
    %c0_273 = arith.constant 0 : index
    %1058 = vector.load %arg1[%c20, %c0_273] : memref<24x128xf32, #tpu.memory_space<vmem>>, vector<1x128xf32>
    %1059 = vector.extract_strided_slice %1058 {offsets = [0, 0], sizes = [1, 32], strides = [1, 1]} : vector<1x128xf32> to vector<1x32xf32>
    %1060 = vector.extract_strided_slice %1058 {offsets = [0, 32], sizes = [1, 32], strides = [1, 1]} : vector<1x128xf32> to vector<1x32xf32>
    %cst_274 = arith.constant dense<0.000000e+00> : vector<16xf32>
    %1061 = vector.multi_reduction <add>, %1057, %cst_274 [1] : vector<16x32xf32> to vector<16xf32>
    %1062 = vector.shape_cast %1061 : vector<16xf32> to vector<16x1xf32>
    %cst_275 = arith.constant 3.200000e+01 : f32
    %1063 = vector.broadcast %cst_275 : f32 to vector<16x1xf32>
    %1064 = arith.divf %1062, %1063 : vector<16x1xf32>
    %1065 = vector.broadcast %1064 : vector<16x1xf32> to vector<16x32xf32>
    %1066 = arith.subf %1057, %1065 : vector<16x32xf32>
    %1067 = arith.mulf %1066, %1066 : vector<16x32xf32>
    %cst_276 = arith.constant dense<0.000000e+00> : vector<16xf32>
    %1068 = vector.multi_reduction <add>, %1067, %cst_276 [1] : vector<16x32xf32> to vector<16xf32>
    %1069 = vector.shape_cast %1068 : vector<16xf32> to vector<16x1xf32>
    %cst_277 = arith.constant 0.0322580636 : f32
    %1070 = vector.broadcast %cst_277 : f32 to vector<16x1xf32>
    %1071 = arith.mulf %1069, %1070 : vector<16x1xf32>
    %1072 = vector.broadcast %1064 : vector<16x1xf32> to vector<16x32xf32>
    %1073 = arith.subf %1057, %1072 : vector<16x32xf32>
    %1074 = vector.broadcast %1059 : vector<1x32xf32> to vector<16x32xf32>
    %1075 = arith.mulf %1074, %1073 : vector<16x32xf32>
    %1076 = math.sqrt %1071 : vector<16x1xf32>
    %cst_278 = arith.constant 9.99999997E-7 : f32
    %1077 = vector.broadcast %cst_278 : f32 to vector<16x1xf32>
    %1078 = arith.addf %1076, %1077 : vector<16x1xf32>
    %1079 = vector.broadcast %1078 : vector<16x1xf32> to vector<16x32xf32>
    %1080 = arith.divf %1075, %1079 : vector<16x32xf32>
    %1081 = vector.broadcast %1060 : vector<1x32xf32> to vector<16x32xf32>
    %1082 = arith.addf %1080, %1081 : vector<16x32xf32>
    %c9 = arith.constant 9 : index
    %c0_279 = arith.constant 0 : index
    %1083 = vector.load %arg1[%c9, %c0_279] : memref<24x128xf32, #tpu.memory_space<vmem>>, vector<1x128xf32>
    %1084 = vector.extract_strided_slice %1083 {offsets = [0, 0], sizes = [1, 64], strides = [1, 1]} : vector<1x128xf32> to vector<1x64xf32>
    %1085 = vector.extract_strided_slice %1083 {offsets = [0, 64], sizes = [1, 32], strides = [1, 1]} : vector<1x128xf32> to vector<1x32xf32>
    %c480 = arith.constant 480 : index
    %c0_280 = arith.constant 0 : index
    %1086 = vector.load %arg0[%c480, %c0_280] : memref<576x128xbf16, #tpu.memory_space<vmem>>, vector<32x64xbf16>
    %c512 = arith.constant 512 : index
    %c0_281 = arith.constant 0 : index
    %1087 = vector.load %arg0[%c512, %c0_281] : memref<576x128xbf16, #tpu.memory_space<vmem>>, vector<64x32xbf16>
    %1088 = arith.truncf %1082 : vector<16x32xf32> to vector<16x32xbf16>
    %cst_282 = arith.constant dense<0.000000e+00> : vector<16x64xf32>
    %1089 = tpu.matmul %1088, %1086, %cst_282 {dimension_numbers = #tpu.dot_dimension_numbers<[1], [0], [0], [1], [0, 0, 1, 1], [], []>} : vector<16x32xbf16>, vector<32x64xbf16>, vector<16x64xf32> -> vector<16x64xf32>
    %1090 = vector.broadcast %1084 : vector<1x64xf32> to vector<16x64xf32>
    %1091 = arith.addf %1089, %1090 : vector<16x64xf32>
    %cst_283 = arith.constant 0.000000e+00 : f32
    %1092 = vector.broadcast %cst_283 : f32 to vector<16x64xf32>
    %1093 = arith.maximumf %1091, %1092 : vector<16x64xf32>
    %1094 = arith.truncf %1093 : vector<16x64xf32> to vector<16x64xbf16>
    %cst_284 = arith.constant dense<0.000000e+00> : vector<16x32xf32>
    %1095 = tpu.matmul %1094, %1087, %cst_284 {dimension_numbers = #tpu.dot_dimension_numbers<[1], [0], [0], [1], [0, 0, 1, 1], [], []>} : vector<16x64xbf16>, vector<64x32xbf16>, vector<16x32xf32> -> vector<16x32xf32>
    %1096 = vector.broadcast %1085 : vector<1x32xf32> to vector<16x32xf32>
    %1097 = arith.addf %1095, %1096 : vector<16x32xf32>
    %1098 = arith.addf %1057, %1097 : vector<16x32xf32>
    %c21 = arith.constant 21 : index
    %c0_285 = arith.constant 0 : index
    %1099 = vector.load %arg1[%c21, %c0_285] : memref<24x128xf32, #tpu.memory_space<vmem>>, vector<1x128xf32>
    %1100 = vector.extract_strided_slice %1099 {offsets = [0, 0], sizes = [1, 32], strides = [1, 1]} : vector<1x128xf32> to vector<1x32xf32>
    %1101 = vector.extract_strided_slice %1099 {offsets = [0, 32], sizes = [1, 32], strides = [1, 1]} : vector<1x128xf32> to vector<1x32xf32>
    %cst_286 = arith.constant dense<0.000000e+00> : vector<16xf32>
    %1102 = vector.multi_reduction <add>, %1098, %cst_286 [1] : vector<16x32xf32> to vector<16xf32>
    %1103 = vector.shape_cast %1102 : vector<16xf32> to vector<16x1xf32>
    %cst_287 = arith.constant 3.200000e+01 : f32
    %1104 = vector.broadcast %cst_287 : f32 to vector<16x1xf32>
    %1105 = arith.divf %1103, %1104 : vector<16x1xf32>
    %1106 = vector.broadcast %1105 : vector<16x1xf32> to vector<16x32xf32>
    %1107 = arith.subf %1098, %1106 : vector<16x32xf32>
    %1108 = arith.mulf %1107, %1107 : vector<16x32xf32>
    %cst_288 = arith.constant dense<0.000000e+00> : vector<16xf32>
    %1109 = vector.multi_reduction <add>, %1108, %cst_288 [1] : vector<16x32xf32> to vector<16xf32>
    %1110 = vector.shape_cast %1109 : vector<16xf32> to vector<16x1xf32>
    %cst_289 = arith.constant 0.0322580636 : f32
    %1111 = vector.broadcast %cst_289 : f32 to vector<16x1xf32>
    %1112 = arith.mulf %1110, %1111 : vector<16x1xf32>
    %1113 = vector.broadcast %1105 : vector<16x1xf32> to vector<16x32xf32>
    %1114 = arith.subf %1098, %1113 : vector<16x32xf32>
    %1115 = vector.broadcast %1100 : vector<1x32xf32> to vector<16x32xf32>
    %1116 = arith.mulf %1115, %1114 : vector<16x32xf32>
    %1117 = math.sqrt %1112 : vector<16x1xf32>
    %cst_290 = arith.constant 9.99999997E-7 : f32
    %1118 = vector.broadcast %cst_290 : f32 to vector<16x1xf32>
    %1119 = arith.addf %1117, %1118 : vector<16x1xf32>
    %1120 = vector.broadcast %1119 : vector<16x1xf32> to vector<16x32xf32>
    %1121 = arith.divf %1116, %1120 : vector<16x32xf32>
    %1122 = vector.broadcast %1101 : vector<1x32xf32> to vector<16x32xf32>
    %1123 = arith.addf %1121, %1122 : vector<16x32xf32>
    %c0_291 = arith.constant 0 : index
    %c0_292 = arith.constant 0 : index
    %1124 = vector.load %arg3[%c0_291, %c0_292] : memref<16x32xf32, #tpu.memory_space<vmem>>, vector<16x32xf32>
    tpu.vector_store %arg3[%c0_291, %c0_292], %1123 {strides = array<i32>} : memref<16x32xf32, #tpu.memory_space<vmem>>, vector<16x32xf32>,
    return
  }
}

</mosaic_0001>

<bundles_post_ra>
// kernel: bert_encoder_decoder.1
= control target key start
LH: loop header
LB: loop body
LE: loop exit
PB: predicated region body
PF: predicated region fallthrough
CT: control target
= control target key end

     0   :  { %vm19_vm0 = vcmask 261120   ;;  %s9204_s0 = inlined_call_operand.vmem [shape: bf16[576,128], index: 0, kind: input, shape index: {}]   ;;  %s9205_s1 = inlined_call_operand.vmem [shape: f32[24,128], index: 1, kind: input, shape index: {}]   ;;  %s9206_s2 = inlined_call_operand.vmem [shape: f32[16,112], index: 2, kind: input, shape index: {}]   ;;  %s9207_s3 = inlined_call_operand.hbm [shape: f32[16,32], index: 3, kind: output, shape index: {}]  }
   0x1   :  { %v7695_v0 = vld [vmem:[%s9206_s2] sm:$0xff]  ;;  %v7700_v1 = vld [vmem:[%s9206_s2 + $0x8] sm:$0xff] }
   0x2   :  { %v20_v2 = vsel %vm19_vm0, %v7695_v0, 0.0  ;;  %v23_v3 = vsel %vm19_vm0, %v7700_v1, 0.0 }
   0x3   :  { %21 = vadd.xlane.f32.xlu0 %v20_v2 }
   0x7   :  { %24 = vadd.xlane.f32.xlu0 %v23_v3 }
   0x8   :  { %8 = vsyncpa [#allocation3], 0  ;;  %v6323_v4 = vld [vmem:[%s9205_s1 + $0xa] ss:$0 sm:$0xff]  ;;  %s7655_s18 = smov 96   ;;  %v7656_v18 = vmov 0.0  }
   0x9   :  { %v7717_v15 = vld [vmem:[%s9204_s0] sm:$0xf]  ;;  %v7722_v16 = vld [vmem:[%s9204_s0 + $0x4] sm:$0xf]  ;;  %6693 = vmatprep.subr.bf16.mxu1 %v7656_v18  ;;  %6707 = vmatprep.subr.bf16.mxu0 %v7656_v18  ;;  %v7732_v19 = vld [vmem:[%s9204_s0 + $0x8] sm:$0xf] }
   0xa   :  { %v6325_v17 = vcombine.low %v7717_v15, %v7722_v16  ;;  %v7737_v20 = vld [vmem:[%s9204_s0 + $0xc] sm:$0xf]  ;;  %vm7657_vm1 = vmmov 0   ;;  %v7758_v38 = vld [vmem:[%s9205_s1] ss:$0 sm:$0xff]  ;;  %s7658_s29 = smov 88  }
   0xb   :  { %v6326_v21 = vcombine.low %v7732_v19, %v7737_v20  ;;  %6697 = vmatprep.mubr.msk.bf16.mxu1 %vm7657_vm1, %v7656_v18  ;;  %6709 = vmatprep.mubr.msk.bf16.mxu0 %vm7657_vm1, %v7656_v18  ;;  %s7659_s30 = smov 64   ;;  %s7660_s4 = smov 120   ;;  %vm129_vm2 = vcmask 64512   ;;  %vm189_vm3 = vcmask 130048   ;;  %vm393_vm4 = vcmask 1043456  }
   0xc   :  { %6694 = vmatpush3.bf16.msra.mxu1 %v6325_v17  ;;  %s7661_s5 = smov 56   ;;  %s7662_s6 = smov 32   ;;  %vm1012_vm5 = vcmask 523264  }
   0xd   :  { %6695 = vmatprep.subr.bf16.mxu1 %v7656_v18  ;;  %s7663_s7 = smov 112   ;;  %s7664_s8 = smov 80  }
   0xe   :  { %s7665_s9 = smov 72   ;;  %s7666_s10 = smov 104  }
   0xf   :  { %s7667_s11 = smov 48   ;;  %s7668_s12 = smov 40  }
  0x10   :  { %6696 = vmatpush3.bf16.msra.mxu1 %v6326_v21 }
  0x11   :  { %6701 = vmatprep.subr.bf16.mxu1 %v7656_v18 }
  0x1d   :  { %54 = vrot.lane.b32.xlu0 %v6323_v4, %s7655_s18 }
  0x21   :  { %181 = vrot.lane.b32.xlu0 %v7695_v0, %s7659_s30 }
  0x90   :  { %v22_v5 = vpop.xlane.xlu0 %21 }
  0x91   :  { %v27_v6 = vmul.f32 0.03125, %v22_v5 }
  0x93   :  { %v29_v7 = vsub.f32 %v7695_v0, %v27_v6 }
  0x94   :  { %v25_v8 = vpop.xlane.xlu0 %24 }
  0x95   :  { %v28_v9 = vmul.f32 0.03125, %v25_v8  ;;  %v31_v10 = vmul.f32 %v29_v7, %v29_v7 }
  0x97   :  { %v30_v11 = vsub.f32 %v7700_v1, %v28_v9  ;;  %v33_v12 = vsel %vm19_vm0, %v31_v10, 0.0 }
  0x98   :  { %34 = vadd.xlane.f32.xlu1 %v33_v12  ;;  %v55_v33 = vpop.permute.xlu0 %54 }
  0x99   :  { %v32_v13 = vmul.f32 %v30_v11, %v30_v11 }
  0x9b   :  { %v36_v14 = vsel %vm19_vm0, %v32_v13, 0.0 }
  0x9c   :  { %37 = vadd.xlane.f32.xlu1 %v36_v14  ;;  %v7785_v52 = vpop.permute.xlu0 %181 }
 0x125   :  { %v35_v22 = vpop.xlane.xlu1 %34 }
 0x126   :  { %v39_v23 = vmul.f32 0.03125, %v35_v22 }
 0x128   :  { %v41_v24 = vadd.f32 1e-12, %v39_v23 }
 0x129   :  { %v38_v25 = vpop.xlane.xlu1 %37 }
 0x12a   :  { %7346 = vrsqrt.f32 %v41_v24  ;;  %v40_v26 = vmul.f32 0.03125, %v38_v25 }
 0x12c   :  { %v42_v27 = vadd.f32 1e-12, %v40_v26 }
 0x12e   :  { %7348 = vrsqrt.f32 %v42_v27 }
 0x134   :  { %v7347_v28 = vpop.eup %7346 }
 0x135   :  { %v45_v29 = vmul.f32 %v7347_v28, %v29_v7 }
 0x137   :  { %v51_v32 = vmul.f32 %v6323_v4, %v45_v29 }
 0x138   :  { %v7349_v30 = vpop.eup %7348 }
 0x139   :  { %v46_v31 = vmul.f32 %v7349_v30, %v30_v11  ;;  %v7746_v35 = vadd.f32 %v55_v33, %v51_v32 }
 0x13b   :  { %v52_v34 = vmul.f32 %v6323_v4, %v46_v31 }
 0x13d   :  { %v7748_v36 = vadd.f32 %v55_v33, %v52_v34  ;;  %v6332_v34 = vcombine.low %v7722_v16, %v7722_v16 }
 0x13f   :  { %v64_v37 = vpack.c.bf16 %v7748_v36, %v7746_v35 }
 0x141   :  { %6698 = vmatmul.mubr.msk.bf16.vlgmr.msra.gmra.mrb[0].mxu1 %vm19_vm0, %v64_v37 }
 0x142   :  { %6703 = vmatprep.mubr.msk.bf16.mxu1 %vm7657_vm1, %v7656_v18 }
 0x214   :  { %v118_v39 = vpop.f32.mrb[0].mxu1 }
 0x215   :  { %v6699_v40 = vpop.f32.mrb[1].mxu1  ;;  %v119_v42 = vadd.f32 %v7758_v38, %v118_v39 }
 0x216   :  { %v121_v41 = vpop.f32.mrb[2].mxu1 }
 0x217   :  { %v122_v43 = vadd.f32 %v7758_v38, %v121_v41  ;;  %v6700_v44 = vpop.f32.mrb[3].mxu1 }
 0x219   :  { %v7762_v45 = vpack.c.bf16 %v122_v43, %v119_v42 }
 0x21b   :  { %127 = vrot.lane.b32.xlu1 %v7762_v45, %s7655_s18 }
 0x21f   :  { %263 = vrot.lane.b32.xlu1 %v7762_v45, %s7658_s29 }
 0x223   :  { %261 = vrot.lane.b32.xlu1 %v7762_v45, %s7660_s4 }
 0x227   :  { %183 = vrot.lane.b32.xlu1 %v7700_v1, %s7659_s30 }
 0x28d   :  { %v128_v46 = vpop.permute.xlu1 %127 }
 0x28e   :  { %v134_v47 = vsel %vm129_vm2, %v128_v46, 0 }
 0x28f   :  { %6702 = vmatpush3.bf16.xpose.msra.mxu1 %v134_v47 }
 0x290   :  { %6713 = vmatprep.subr.bf16.mxu1 %v7656_v18 }
 0x291   :  { %v264_v48 = vpop.permute.xlu1 %263 }
 0x292   :  { %v269_v49 = vsel %vm129_vm2, %v264_v48, 0 }
 0x295   :  { %v262_v50 = vpop.permute.xlu1 %261 }
 0x296   :  { %6704 = vmatmul.mubr.msk.bf16.vlgmr.msra.gmra.mrb[4].mxu1 %vm129_vm2, %v7762_v45 }
 0x297   :  { %6714 = vmatpush3.bf16.xpose.msra.mxu1 %v269_v49  ;;  %6715 = vmatprep.mubr.msk.bf16.mxu1 %vm7657_vm1, %v7656_v18 }
 0x298   :  { %6725 = vmatprep.subr.bf16.mxu1 %v7656_v18 }
 0x299   :  { %v7787_v56 = vpop.permute.xlu1 %183 }
 0x29e   :  { %6716 = vmatmul.mubr.msk.bf16.vlgmr.msra.gmra.mrb[8].mxu1 %vm129_vm2, %v262_v50 }
 0x29f   :  { %6727 = vmatprep.mubr.msk.bf16.mxu1 %vm7657_vm1, %v7656_v18 }
 0x369   :  { %v170_v51 = vpop.f32.mrb[4].mxu1 }
 0x36a   :  { %v177_v53 = vmul.f32 0.35355338, %v170_v51  ;;  %v6705_v54 = vpop.f32.mrb[5].mxu1 }
 0x36b   :  { %v173_v55 = vpop.f32.mrb[6].mxu1 }
 0x36c   :  { %v178_v57 = vmul.f32 0.35355338, %v173_v55  ;;  %v6706_v58 = vpop.f32.mrb[7].mxu1  ;;  %v187_v59 = vadd.f32 %v7785_v52, %v177_v53 }
 0x36e   :  { %v190_v60 = vsel %vm189_vm3, %v187_v59, -inf  ;;  %v188_v61 = vadd.f32 %v7787_v56, %v178_v57 }
 0x36f   :  { %191 = vmax.xlane.f32.xlu0 %v190_v60 }
 0x370   :  { %v193_v62 = vsel %vm189_vm3, %v188_v61, -inf }
 0x371   :  { %194 = vmax.xlane.f32.xlu1 %v193_v62  ;;  %v305_v63 = vpop.f32.mrb[8].mxu1 }
 0x372   :  { %v312_v0 = vmul.f32 0.35355338, %v305_v63  ;;  %v6717_v1 = vpop.f32.mrb[9].mxu1 }
 0x373   :  { %v308_v2 = vpop.f32.mrb[10].mxu1 }
 0x374   :  { %v313_v3 = vmul.f32 0.35355338, %v308_v2  ;;  %v6718_v4 = vpop.f32.mrb[11].mxu1  ;;  %v314_v5 = vadd.f32 %v312_v0, %v7785_v52 }
 0x376   :  { %v316_v6 = vsel %vm189_vm3, %v314_v5, -inf  ;;  %v315_v7 = vadd.f32 %v313_v3, %v7787_v56 }
 0x377   :  { %317 = vmax.xlane.f32.xlu0 %v316_v6 }
 0x378   :  { %v319_v8 = vsel %vm189_vm3, %v315_v7, -inf }
 0x37b   :  { %320 = vmax.xlane.f32.xlu0 %v319_v8 }
 0x3fc   :  { %v192_v9 = vpop.xlane.xlu0 %191 }
 0x3fd   :  { %v196_v10 = vsub.f32 %v187_v59, %v192_v9 }
 0x3fe   :  { %v195_v11 = vpop.xlane.xlu1 %194 }
 0x3ff   :  { %v198_v12 = vmul.f32 1.442695, %v196_v10  ;;  %v197_v13 = vsub.f32 %v188_v61, %v195_v11 }
 0x401   :  { %7350 = vpow2.f32 %v198_v12  ;;  %v200_v14 = vmul.f32 1.442695, %v197_v13 }
 0x403   :  { %7352 = vpow2.f32 %v200_v14 }
 0x404   :  { %v318_v17 = vpop.xlane.xlu0 %317 }
 0x405   :  { %v322_v21 = vsub.f32 %v314_v5, %v318_v17 }
 0x407   :  { %v324_v22 = vmul.f32 1.442695, %v322_v21 }
 0x408   :  { %v321_v23 = vpop.xlane.xlu0 %320 }
 0x409   :  { %7354 = vpow2.f32 %v324_v22  ;;  %v323_v24 = vsub.f32 %v315_v7, %v321_v23 }
 0x40b   :  { %v7351_v25 = vpop.eup %7350  ;;  %v326_v26 = vmul.f32 1.442695, %v323_v24 }
 0x40c   :  { %v202_v27 = vsel %vm189_vm3, %v7351_v25, 0.0 }
 0x40d   :  { %v7353_v28 = vpop.eup %7352  ;;  %7356 = vpow2.f32 %v326_v26  ;;  %203 = vadd.xlane.f32.xlu0 %v202_v27  ;;  %v6334_v26 = vcombine.low %v7717_v15, %v7717_v15 }
 0x40e   :  { %v205_v29 = vsel %vm189_vm3, %v7353_v28, 0.0 }
 0x40f   :  { %206 = vadd.xlane.f32.xlu1 %v205_v29 }
 0x413   :  { %v7355_v30 = vpop.eup %7354 }
 0x414   :  { %v328_v31 = vsel %vm189_vm3, %v7355_v30, 0.0 }
 0x415   :  { %329 = vadd.xlane.f32.xlu0 %v328_v31 }
 0x417   :  { %v7357_v32 = vpop.eup %7356 }
 0x418   :  { %v331_v33 = vsel %vm189_vm3, %v7357_v32, 0.0 }
 0x419   :  { %332 = vadd.xlane.f32.xlu1 %v331_v33 }
 0x42a   :  { %339 = vrot.lane.b32.xlu1 %v7762_v45, %s7661_s5 }
 0x42b   :  { %213 = vrot.lane.b32.xlu0 %v7762_v45, %s7659_s30 }
 0x42e   :  { %388 = vrot.lane.b32.xlu1 %v6332_v34, %s7662_s6 }
 0x42f   :  { %488 = vrot.lane.b32.xlu0 %v7762_v45, %s7663_s7 }
 0x432   :  { %490 = vrot.lane.b32.xlu1 %v7762_v45, %s7664_s8 }
 0x49a   :  { %v204_v37 = vpop.xlane.xlu0 %203 }
 0x49b   :  { %7358 = vrcp.f32 %v204_v37 }
 0x49c   :  { %v207_v16 = vpop.xlane.xlu1 %206 }
 0x49d   :  { %7360 = vrcp.f32 %v207_v16 }
 0x4a2   :  { %v330_v39 = vpop.xlane.xlu0 %329 }
 0x4a3   :  { %7362 = vrcp.f32 %v330_v39 }
 0x4a5   :  { %v7359_v40 = vpop.eup %7358 }
 0x4a6   :  { %v333_v41 = vpop.xlane.xlu1 %332  ;;  %v214_v42 = vpop.permute.xlu0 %213  ;;  %v209_v44 = vmul.f32 %v7359_v40, %v7351_v25 }
 0x4a7   :  { %v7361_v43 = vpop.eup %7360  ;;  %7364 = vrcp.f32 %v333_v41  ;;  %6708 = vmatpush3.bf16.msra.mxu0 %v214_v42 }
 0x4a8   :  { %6719 = vmatprep.subr.bf16.mxu0 %v7656_v18  ;;  %v211_v46 = vmul.f32 %v7361_v43, %v7353_v28 }
 0x4aa   :  { %v340_v47 = vpop.permute.xlu1 %339  ;;  %v212_v48 = vpack.c.bf16 %v211_v46, %v209_v44  ;;  %v489_v6 = vpop.permute.xlu0 %488 }
 0x4ac   :  { %6710 = vmatmul.mubr.msk.bf16.vlgmr.msra.gmra.mrb[0].mxu0 %vm189_vm3, %v212_v48 }
 0x4ad   :  { %6720 = vmatpush3.bf16.msra.mxu0 %v340_v47  ;;  %6721 = vmatprep.mubr.msk.bf16.mxu0 %vm7657_vm1, %v7656_v18  ;;  %v7363_v50 = vpop.eup %7362 }
 0x4ae   :  { %v389_v49 = vpop.permute.xlu1 %388  ;;  %6731 = vmatprep.subr.bf16.mxu0 %v7656_v18  ;;  %v335_v54 = vmul.f32 %v7363_v50, %v7355_v30 }
 0x4af   :  { %v395_v51 = vsel %vm393_vm4, %v389_v49, 0 }
 0x4b0   :  { %6726 = vmatpush3.bf16.msra.mxu1 %v395_v51 }
 0x4b1   :  { %v7365_v53 = vpop.eup %7364  ;;  %6737 = vmatprep.subr.bf16.mxu1 %v7656_v18 }
 0x4b2   :  { %v337_v55 = vmul.f32 %v7365_v53, %v7357_v32  ;;  %v491_v1 = vpop.permute.xlu1 %490 }
 0x4b3   :  { %v496_v5 = vsel %vm129_vm2, %v491_v1, 0 }
 0x4b4   :  { %v338_v57 = vpack.c.bf16 %v337_v55, %v335_v54 }
 0x4b6   :  { %6722 = vmatmul.mubr.msk.bf16.vlgmr.msra.gmra.mrb[4].mxu0 %vm189_vm3, %v338_v57 }
 0x4b7   :  { %6733 = vmatprep.mubr.msk.bf16.mxu0 %vm7657_vm1, %v7656_v18 }
 0x57f   :  { %v253_v58 = vpop.f32.mrb[0].mxu0 }
 0x580   :  { %v6711_v59 = vpop.f32.mrb[1].mxu0 }
 0x581   :  { %v256_v60 = vpop.f32.mrb[2].mxu0 }
 0x582   :  { %v260_v61 = vpack.c.bf16 %v256_v60, %v253_v58  ;;  %v6712_v62 = vpop.f32.mrb[3].mxu0 }
 0x589   :  { %v379_v63 = vpop.f32.mrb[4].mxu0 }
 0x58a   :  { %v6723_v0 = vpop.f32.mrb[5].mxu0 }
 0x58b   :  { %v382_v2 = vpop.f32.mrb[6].mxu0 }
 0x58c   :  { %v386_v3 = vpack.c.bf16 %v382_v2, %v379_v63  ;;  %v6724_v4 = vpop.f32.mrb[7].mxu0 }
 0x58e   :  { %6728 = vmatmul.mubr.msk.bf16.vlgmr.msra.gmra.mrb[12].mxu1 %vm129_vm2, %v386_v3 }
 0x58f   :  { %6738 = vmatpush3.bf16.xpose.msra.mxu1 %v496_v5  ;;  %6739 = vmatprep.mubr.msk.bf16.mxu1 %vm7657_vm1, %v7656_v18 }
 0x590   :  { %6749 = vmatprep.subr.bf16.mxu1 %v7656_v18 }
 0x596   :  { %6740 = vmatmul.mubr.msk.bf16.vlgmr.msra.gmra.mrb[16].mxu1 %vm129_vm2, %v489_v6 }
 0x597   :  { %6751 = vmatprep.mubr.msk.bf16.mxu1 %vm7657_vm1, %v7656_v18 }
 0x661   :  { %v7830_v7 = vpop.f32.mrb[12].mxu1 }
 0x662   :  { %v6729_v8 = vpop.f32.mrb[13].mxu1 }
 0x663   :  { %v7832_v9 = vpop.f32.mrb[14].mxu1 }
 0x664   :  { %v6730_v10 = vpop.f32.mrb[15].mxu1 }
 0x669   :  { %v532_v11 = vpop.f32.mrb[16].mxu1 }
 0x66a   :  { %v539_v12 = vmul.f32 0.35355338, %v532_v11  ;;  %v6741_v13 = vpop.f32.mrb[17].mxu1  ;;  %v6338_v11 = vcombine.low %v7732_v19, %v7732_v19 }
 0x66b   :  { %v535_v14 = vpop.f32.mrb[18].mxu1 }
 0x66c   :  { %v540_v17 = vmul.f32 0.35355338, %v535_v14  ;;  %v6742_v21 = vpop.f32.mrb[19].mxu1  ;;  %v541_v22 = vadd.f32 %v539_v12, %v7785_v52 }
 0x66e   :  { %v543_v23 = vsel %vm189_vm3, %v541_v22, -inf  ;;  %v542_v24 = vadd.f32 %v540_v17, %v7787_v56 }
 0x66f   :  { %544 = vmax.xlane.f32.xlu1 %v543_v23 }
 0x670   :  { %v546_v25 = vsel %vm189_vm3, %v542_v24, -inf }
 0x671   :  { %547 = vmax.xlane.f32.xlu0 %v546_v25 }
 0x680   :  { %439 = vrot.lane.b32.xlu1 %v6334_v26, %s7662_s6 }
 0x684   :  { %668 = vrot.lane.b32.xlu1 %v7762_v45, %s7665_s9 }
 0x688   :  { %666 = vrot.lane.b32.xlu1 %v7762_v45, %s7666_s10 }
 0x6fc   :  { %v545_v27 = vpop.xlane.xlu1 %544 }
 0x6fd   :  { %v549_v28 = vsub.f32 %v541_v22, %v545_v27 }
 0x6fe   :  { %v548_v29 = vpop.xlane.xlu0 %547 }
 0x6ff   :  { %v551_v30 = vmul.f32 1.442695, %v549_v28  ;;  %v550_v31 = vsub.f32 %v542_v24, %v548_v29  ;;  %v6342_v28 = vcombine.low %v7737_v20, %v7737_v20 }
 0x700   :  { %v440_v32 = vpop.permute.xlu1 %439 }
 0x701   :  { %7366 = vpow2.f32 %v551_v30  ;;  %v553_v33 = vmul.f32 1.442695, %v550_v31  ;;  %v445_v15 = vsel %vm393_vm4, %v440_v32, 0 }
 0x702   :  { %6732 = vmatpush3.bf16.msra.mxu0 %v445_v15 }
 0x703   :  { %7368 = vpow2.f32 %v553_v33  ;;  %6743 = vmatprep.subr.bf16.mxu0 %v7656_v18 }
 0x704   :  { %v669_v48 = vpop.permute.xlu1 %668 }
 0x705   :  { %6734 = vmatmul.mubr.msk.bf16.vlgmr.msra.gmra.mrb[8].mxu0 %vm129_vm2, %v260_v61  ;;  %v674_v50 = vsel %vm129_vm2, %v669_v48, 0 }
 0x706   :  { %6745 = vmatprep.mubr.msk.bf16.mxu0 %vm7657_vm1, %v7656_v18 }
 0x708   :  { %v667_v51 = vpop.permute.xlu1 %666 }
 0x70b   :  { %v7367_v34 = vpop.eup %7366 }
 0x70c   :  { %v555_v37 = vsel %vm189_vm3, %v7367_v34, 0.0 }
 0x70d   :  { %v7369_v16 = vpop.eup %7368  ;;  %556 = vadd.xlane.f32.xlu0 %v555_v37 }
 0x70e   :  { %v558_v39 = vsel %vm189_vm3, %v7369_v16, 0.0 }
 0x711   :  { %559 = vadd.xlane.f32.xlu0 %v558_v39 }
 0x727   :  { %566 = vrot.lane.b32.xlu0 %v7762_v45, %s7667_s11 }
 0x79a   :  { %v557_v40 = vpop.xlane.xlu0 %556 }
 0x79b   :  { %7370 = vrcp.f32 %v557_v40 }
 0x79e   :  { %v560_v41 = vpop.xlane.xlu0 %559 }
 0x79f   :  { %7372 = vrcp.f32 %v560_v41 }
 0x7a2   :  { %v567_v42 = vpop.permute.xlu0 %566 }
 0x7a3   :  { %6744 = vmatpush3.bf16.msra.mxu0 %v567_v42 }
 0x7a4   :  { %6755 = vmatprep.subr.bf16.mxu0 %v7656_v18 }
 0x7a5   :  { %v7371_v43 = vpop.eup %7370 }
 0x7a6   :  { %v562_v46 = vmul.f32 %v7371_v43, %v7367_v34 }
 0x7a9   :  { %v7373_v44 = vpop.eup %7372 }
 0x7aa   :  { %v564_v47 = vmul.f32 %v7373_v44, %v7369_v16 }
 0x7ac   :  { %v565_v49 = vpack.c.bf16 %v564_v47, %v562_v46 }
 0x7ae   :  { %6746 = vmatmul.mubr.msk.bf16.vlgmr.msra.gmra.mrb[12].mxu0 %vm189_vm3, %v565_v49 }
 0x7af   :  { %6756 = vmatpush3.bf16.xpose.msra.mxu0 %v674_v50  ;;  %6757 = vmatprep.mubr.msk.bf16.mxu0 %vm7657_vm1, %v7656_v18 }
 0x7b0   :  { %6767 = vmatprep.subr.bf16.mxu0 %v7656_v18 }
 0x7b6   :  { %6758 = vmatmul.mubr.msk.bf16.vlgmr.msra.gmra.mrb[16].mxu0 %vm129_vm2, %v667_v51 }
 0x7b7   :  { %6769 = vmatprep.mubr.msk.bf16.mxu0 %vm7657_vm1, %v7656_v18 }
 0x7d8   :  { %v481_v53 = vpop.f32.mrb[8].mxu0 }
 0x7d9   :  { %v7864_v54 = vadd.f32 %v481_v53, %v7830_v7  ;;  %v6735_v55 = vpop.f32.mrb[9].mxu0 }
 0x7da   :  { %v484_v57 = vpop.f32.mrb[10].mxu0 }
 0x7db   :  { %v7867_v58 = vadd.f32 %v484_v57, %v7832_v9  ;;  %v6736_v59 = vpop.f32.mrb[11].mxu0 }
 0x881   :  { %v606_v60 = vpop.f32.mrb[12].mxu0 }
 0x882   :  { %v6747_v61 = vpop.f32.mrb[13].mxu0 }
 0x883   :  { %v609_v62 = vpop.f32.mrb[14].mxu0 }
 0x884   :  { %v613_v63 = vpack.c.bf16 %v609_v62, %v606_v60  ;;  %v6748_v0 = vpop.f32.mrb[15].mxu0 }
 0x885   :  { %v6344_v0 = vld [vmem:[%s9205_s1 + $0xb] ss:$0 sm:$0xff] }
 0x889   :  { %v710_v1 = vpop.f32.mrb[16].mxu0 }
 0x88a   :  { %v717_v2 = vmul.f32 0.35355338, %v710_v1  ;;  %v6759_v3 = vpop.f32.mrb[17].mxu0 }
 0x88b   :  { %v713_v4 = vpop.f32.mrb[18].mxu0 }
 0x88c   :  { %v718_v5 = vmul.f32 0.35355338, %v713_v4  ;;  %v6760_v6 = vpop.f32.mrb[19].mxu0  ;;  %v719_v7 = vadd.f32 %v717_v2, %v7785_v52 }
 0x88e   :  { %v721_v8 = vsel %vm189_vm3, %v719_v7, -inf  ;;  %v720_v10 = vadd.f32 %v718_v5, %v7787_v56 }
 0x88f   :  { %722 = vmax.xlane.f32.xlu1 %v721_v8 }
 0x890   :  { %v724_v9 = vsel %vm189_vm3, %v720_v10, -inf }
 0x891   :  { %725 = vmax.xlane.f32.xlu0 %v724_v9  ;;  %v7293_v9 = vld [vmem:[%s9204_s0 + $0x68] sm:$0xff]  }
 0x8a0   :  { %615 = vrot.lane.b32.xlu1 %v6338_v11, %s7662_s6  ;;  %v6345_v11 = vld [vmem:[%s9205_s1 + $0x6] ss:$0 sm:$0xff] }
 0x8a4   :  { %793 = vrot.lane.b32.xlu1 %v6342_v28, %s7662_s6 }
 0x8a8   :  { %845 = vrot.lane.b32.xlu1 %v7758_v38, %s7662_s6 }
 0x91c   :  { %v723_v12 = vpop.xlane.xlu1 %722 }
 0x91d   :  { %v727_v13 = vsub.f32 %v719_v7, %v723_v12 }
 0x91e   :  { %v726_v14 = vpop.xlane.xlu0 %725 }
 0x91f   :  { %v729_v17 = vmul.f32 1.442695, %v727_v13  ;;  %v728_v21 = vsub.f32 %v720_v10, %v726_v14  ;;  %v7292_v10 = vld [vmem:[%s9204_s0 + $0x60] sm:$0xff]  }
 0x920   :  { %v616_v22 = vpop.permute.xlu1 %615 }
 0x921   :  { %7374 = vpow2.f32 %v729_v17  ;;  %v731_v23 = vmul.f32 1.442695, %v728_v21  ;;  %v621_v24 = vsel %vm393_vm4, %v616_v22, 0 }
 0x922   :  { %6750 = vmatpush3.bf16.msra.mxu1 %v621_v24 }
 0x923   :  { %7376 = vpow2.f32 %v731_v23  ;;  %6761 = vmatprep.subr.bf16.mxu1 %v7656_v18 }
 0x924   :  { %v794_v20 = vpop.permute.xlu1 %793 }
 0x925   :  { %6752 = vmatmul.mubr.msk.bf16.vlgmr.msra.gmra.mrb[20].mxu1 %vm129_vm2, %v613_v63  ;;  %v799_v38 = vsel %vm393_vm4, %v794_v20, 0 }
 0x926   :  { %6763 = vmatprep.mubr.msk.bf16.mxu1 %vm7657_vm1, %v7656_v18  ;;  %6768 = vmatpush3.bf16.msra.mxu0 %v799_v38 }
 0x927   :  { %6781 = vmatprep.subr.bf16.mxu0 %v7656_v18 }
 0x928   :  { %v846_v50 = vpop.permute.xlu1 %845 }
 0x92b   :  { %v7375_v19 = vpop.eup %7374 }
 0x92c   :  { %v733_v25 = vsel %vm189_vm3, %v7375_v19, 0.0 }
 0x92d   :  { %v7377_v26 = vpop.eup %7376  ;;  %734 = vadd.xlane.f32.xlu0 %v733_v25 }
 0x92e   :  { %v736_v27 = vsel %vm189_vm3, %v7377_v26, 0.0 }
 0x931   :  { %737 = vadd.xlane.f32.xlu0 %v736_v27 }
 0x947   :  { %744 = vrot.lane.b32.xlu0 %v7762_v45, %s7668_s12 }
 0x9ba   :  { %v735_v29 = vpop.xlane.xlu0 %734 }
 0x9bb   :  { %7378 = vrcp.f32 %v735_v29 }
 0x9be   :  { %v738_v30 = vpop.xlane.xlu0 %737 }
 0x9bf   :  { %7380 = vrcp.f32 %v738_v30 }
 0x9c2   :  { %v745_v31 = vpop.permute.xlu0 %744 }
 0x9c3   :  { %6762 = vmatpush3.bf16.msra.mxu1 %v745_v31 }
 0x9c4   :  { %6773 = vmatprep.subr.bf16.mxu1 %v7656_v18 }
 0x9c5   :  { %v7379_v32 = vpop.eup %7378 }
 0x9c6   :  { %v740_v15 = vmul.f32 %v7379_v32, %v7375_v19  ;;  %v7294_v32 = vld [vmem:[%s9204_s0 + $0x70] sm:$0xff]  }
 0x9c9   :  { %v7381_v33 = vpop.eup %7380 }
 0x9ca   :  { %v742_v45 = vmul.f32 %v7381_v33, %v7377_v26  ;;  %v7295_v33 = vld [vmem:[%s9204_s0 + $0x78] sm:$0xff]  }
 0x9cc   :  { %v743_v34 = vpack.c.bf16 %v742_v45, %v740_v15  ;;  %v7296_v15 = vld [vmem:[%s9204_s0 + $0x80] sm:$0xff]   ;;  %v7297_v45 = vld [vmem:[%s9204_s0 + $0x88] sm:$0xff]  }
 0x9ce   :  { %6764 = vmatmul.mubr.msk.bf16.vlgmr.msra.gmra.mrb[24].mxu1 %vm189_vm3, %v743_v34 }
 0x9cf   :  { %6777 = vmatprep.mubr.msk.bf16.mxu1 %vm7657_vm1, %v7656_v18  ;;  %6774 = vmatpush3.bf16.msra.mxu1 %v7292_v10 }
 0x9d0   :  { %6775 = vmatprep.subr.bf16.mxu1 %v7656_v18 }
 0x9d3   :  { %6776 = vmatpush3.bf16.msra.mxu1 %v7293_v9 }
 0x9d4   :  { %6793 = vmatprep.subr.bf16.mxu1 %v7656_v18 }
 0x9f8   :  { %v657_v37 = vpop.f32.mrb[20].mxu1 }
 0x9f9   :  { %v664_v16 = vadd.f32 %v657_v37, %v7864_v54  ;;  %v6753_v39 = vpop.f32.mrb[21].mxu1 }
 0x9fa   :  { %v660_v40 = vpop.f32.mrb[22].mxu1 }
 0x9fb   :  { %v665_v41 = vadd.f32 %v660_v40, %v7867_v58  ;;  %v6754_v42 = vpop.f32.mrb[23].mxu1 }
 0xaa1   :  { %v784_v43 = vpop.f32.mrb[24].mxu1 }
 0xaa2   :  { %v6765_v44 = vpop.f32.mrb[25].mxu1 }
 0xaa3   :  { %v787_v46 = vpop.f32.mrb[26].mxu1 }
 0xaa4   :  { %v791_v47 = vpack.c.bf16 %v787_v46, %v784_v43  ;;  %v6766_v48 = vpop.f32.mrb[27].mxu1 }
 0xaa6   :  { %6770 = vmatmul.mubr.msk.bf16.vlgmr.msra.gmra.mrb[20].mxu0 %vm129_vm2, %v791_v47 }
 0xaa7   :  { %6789 = vmatprep.mubr.msk.bf16.mxu0 %vm7657_vm1, %v7656_v18  ;;  %6782 = vmatpush3.bf16.msra.mxu0 %v7294_v32 }
 0xaa8   :  { %6783 = vmatprep.subr.bf16.mxu0 %v7656_v18 }
 0xaab   :  { %6784 = vmatpush3.bf16.msra.mxu0 %v7295_v33 }
 0xaac   :  { %6785 = vmatprep.subr.bf16.mxu0 %v7656_v18 }
 0xaaf   :  { %6786 = vmatpush3.bf16.msra.mxu0 %v7296_v15 }
 0xab0   :  { %6787 = vmatprep.subr.bf16.mxu0 %v7656_v18 }
 0xab3   :  { %6788 = vmatpush3.bf16.msra.mxu0 %v7297_v45 }
 0xab4   :  { %6807 = vmatprep.subr.bf16.mxu0 %v7656_v18 }
 0xb79   :  { %v835_v49 = vpop.f32.mrb[20].mxu0 }
 0xb7a   :  { %v842_v51 = vadd.f32 %v835_v49, %v664_v16  ;;  %v6771_v53 = vpop.f32.mrb[21].mxu0 }
 0xb7b   :  { %v838_v54 = vpop.f32.mrb[22].mxu0 }
 0xb7c   :  { %v848_v55 = vadd.f32 %v846_v50, %v842_v51  ;;  %v843_v57 = vadd.f32 %v838_v54, %v665_v41  ;;  %v6772_v59 = vpop.f32.mrb[23].mxu0 }
 0xb7e   :  { %v849_v58 = vadd.f32 %v846_v50, %v843_v57  ;;  %v851_v60 = vadd.f32 %v848_v55, %v7746_v35 }
 0xb80   :  { %v853_v61 = vsel %vm19_vm0, %v851_v60, 0.0  ;;  %v852_v62 = vadd.f32 %v849_v58, %v7748_v36 }
 0xb81   :  { %854 = vadd.xlane.f32.xlu1 %v853_v61 }
 0xb82   :  { %v856_v63 = vsel %vm19_vm0, %v852_v62, 0.0 }
 0xb83   :  { %857 = vadd.xlane.f32.xlu0 %v856_v63 }
 0xb92   :  { %886 = vrot.lane.b32.xlu1 %v6344_v0, %s7655_s18 }
 0xc0e   :  { %v855_v1 = vpop.xlane.xlu1 %854 }
 0xc0f   :  { %v859_v2 = vmul.f32 0.03125, %v855_v1 }
 0xc10   :  { %v858_v3 = vpop.xlane.xlu0 %857 }
 0xc11   :  { %v861_v4 = vsub.f32 %v851_v60, %v859_v2  ;;  %v860_v5 = vmul.f32 0.03125, %v858_v3 }
 0xc12   :  { %v887_v27 = vpop.permute.xlu1 %886 }
 0xc13   :  { %v862_v35 = vsub.f32 %v852_v62, %v860_v5  ;;  %v863_v6 = vmul.f32 %v861_v4, %v861_v4 }
 0xc15   :  { %v865_v7 = vsel %vm19_vm0, %v863_v6, 0.0  ;;  %v864_v36 = vmul.f32 %v862_v35, %v862_v35 }
 0xc16   :  { %866 = vadd.xlane.f32.xlu0 %v865_v7 }
 0xc17   :  { %v868_v8 = vsel %vm19_vm0, %v864_v36, 0.0 }
 0xc1a   :  { %869 = vadd.xlane.f32.xlu0 %v868_v8 }
 0xc30   :  { %1009 = vrot.lane.b32.xlu0 %v6345_v11, %s7659_s30 }
 0xca3   :  { %v867_v12 = vpop.xlane.xlu0 %866 }
 0xca4   :  { %v871_v13 = vmul.f32 0.03125, %v867_v12 }
 0xca6   :  { %v873_v14 = vadd.f32 1e-12, %v871_v13 }
 0xca7   :  { %v870_v17 = vpop.xlane.xlu0 %869 }
 0xca8   :  { %7382 = vrsqrt.f32 %v873_v14  ;;  %v872_v21 = vmul.f32 0.03125, %v870_v17 }
 0xcaa   :  { %v874_v22 = vadd.f32 1e-12, %v872_v21 }
 0xcab   :  { %v1010_v62 = vpop.permute.xlu0 %1009 }
 0xcac   :  { %7384 = vrsqrt.f32 %v874_v22  ;;  %v6354_v22 = vld [vmem:[%s9205_s1 + $0xc] ss:$0 sm:$0xff] }
 0xcb2   :  { %v7383_v23 = vpop.eup %7382 }
 0xcb3   :  { %v877_v24 = vmul.f32 %v7383_v23, %v861_v4  ;;  %v7956_v23 = vld [vmem:[%s9204_s0 + $0x10] sm:$0xf] }
 0xcb5   :  { %v883_v26 = vmul.f32 %v6344_v0, %v877_v24  ;;  %v7961_v24 = vld [vmem:[%s9204_s0 + $0x14] sm:$0xf] }
 0xcb6   :  { %v7385_v19 = vpop.eup %7384 }
 0xcb7   :  { %v878_v25 = vmul.f32 %v7385_v19, %v862_v35  ;;  %v889_v29 = vadd.f32 %v887_v27, %v883_v26  ;;  %v6356_v19 = vcombine.low %v7956_v23, %v7961_v24  ;;  %v7974_v26 = vld [vmem:[%s9204_s0 + $0x1c] sm:$0xf] }
 0xcb9   :  { %v884_v28 = vmul.f32 %v6344_v0, %v878_v25  ;;  %v7969_v25 = vld [vmem:[%s9204_s0 + $0x18] sm:$0xf] }
 0xcbb   :  { %v890_v30 = vadd.f32 %v887_v27, %v884_v28  ;;  %v6357_v27 = vcombine.low %v7969_v25, %v7974_v26 }
 0xcbd   :  { %v904_v31 = vpack.c.bf16 %v890_v30, %v889_v29 }
 0xcbf   :  { %6778 = vmatmul.mubr.msk.bf16.vlgmr.msra.gmra.mrb[28].mxu1 %vm19_vm0, %v904_v31 }
 0xcc0   :  { %6797 = vmatprep.mubr.msk.bf16.mxu1 %vm7657_vm1, %v7656_v18  ;;  %6794 = vmatpush3.bf16.msra.mxu1 %v6356_v19 }
 0xcc1   :  { %6795 = vmatprep.subr.bf16.mxu1 %v7656_v18 }
 0xcc4   :  { %6796 = vmatpush3.bf16.msra.mxu1 %v6357_v27 }
 0xcc5   :  { %6801 = vmatprep.subr.bf16.mxu1 %v7656_v18 }
 0xd92   :  { %v958_v34 = vpop.f32.mrb[28].mxu1 }
 0xd93   :  { %v959_v20 = vadd.f32 %v6345_v11, %v958_v34  ;;  %v6779_v38 = vpop.f32.mrb[29].mxu1 }
 0xd94   :  { %v961_v37 = vpop.f32.mrb[30].mxu1 }
 0xd95   :  { %v967_v16 = vmul.f32 0.044715, %v959_v20  ;;  %v962_v39 = vadd.f32 %v6345_v11, %v961_v37  ;;  %v6780_v40 = vpop.f32.mrb[31].mxu1  ;;  %v965_v55 = vmul.f32 0.5, %v959_v20 }
 0xd97   :  { %v969_v41 = vmul.f32 %v967_v16, %v959_v20  ;;  %v968_v42 = vmul.f32 0.044715, %v962_v39  ;;  %v966_v57 = vmul.f32 0.5, %v962_v39 }
 0xd99   :  { %v971_v43 = vmul.f32 %v969_v41, %v959_v20  ;;  %v970_v44 = vmul.f32 %v968_v42, %v962_v39  ;;  %v7991_v42 = vld [vmem:[%s9205_s1 + $0x1] ss:$0 sm:$0xff] }
 0xd9b   :  { %v973_v46 = vadd.f32 %v971_v43, %v959_v20  ;;  %v972_v47 = vmul.f32 %v970_v44, %v962_v39 }
 0xd9d   :  { %v975_v48 = vmul.f32 0.7978846, %v973_v46  ;;  %v974_v49 = vadd.f32 %v972_v47, %v962_v39 }
 0xd9f   :  { %7386 = vtanh.f32 %v975_v48  ;;  %v976_v50 = vmul.f32 0.7978846, %v974_v49 }
 0xda1   :  { %7388 = vtanh.f32 %v976_v50 }
 0xda9   :  { %v7387_v51 = vpop.eup %7386 }
 0xdaa   :  { %v979_v53 = vadd.f32 1.0, %v7387_v51 }
 0xdab   :  { %v7389_v54 = vpop.eup %7388 }
 0xdac   :  { %v980_v59 = vadd.f32 1.0, %v7389_v54  ;;  %v981_v58 = vmul.f32 %v979_v53, %v965_v55 }
 0xdae   :  { %v982_v60 = vmul.f32 %v980_v59, %v966_v57 }
 0xdb0   :  { %v983_v61 = vpack.c.bf16 %v982_v60, %v981_v58 }
 0xdb2   :  { %6790 = vmatmul.mubr.msk.bf16.vlgmr.msra.gmra.mrb[24].mxu0 %vm1012_vm5, %v983_v61 }
 0xdb3   :  { %6809 = vmatprep.mubr.msk.bf16.mxu0 %vm7657_vm1, %v7656_v18 }
 0xe85   :  { %v1050_v63 = vpop.f32.mrb[24].mxu0 }
 0xe86   :  { %v1051_v0 = vadd.f32 %v1050_v63, %v1010_v62  ;;  %v6791_v1 = vpop.f32.mrb[25].mxu0 }
 0xe87   :  { %v1053_v2 = vpop.f32.mrb[26].mxu0 }
 0xe88   :  { %v1054_v3 = vadd.f32 %v1053_v2, %v1010_v62  ;;  %v6792_v4 = vpop.f32.mrb[27].mxu0  ;;  %v1058_v5 = vadd.f32 %v1051_v0, %v889_v29 }
 0xe8a   :  { %v1060_v35 = vsel %vm19_vm0, %v1058_v5, 0.0  ;;  %v1059_v6 = vadd.f32 %v1054_v3, %v890_v30 }
 0xe8b   :  { %1061 = vadd.xlane.f32.xlu1 %v1060_v35 }
 0xe8c   :  { %v1063_v7 = vsel %vm19_vm0, %v1059_v6, 0.0 }
 0xe8d   :  { %1064 = vadd.xlane.f32.xlu0 %v1063_v7 }
 0xf18   :  { %v1062_v36 = vpop.xlane.xlu1 %1061 }
 0xf19   :  { %v1066_v8 = vmul.f32 0.03125, %v1062_v36 }
 0xf1a   :  { %v1065_v10 = vpop.xlane.xlu0 %1064 }
 0xf1b   :  { %v1068_v9 = vsub.f32 %v1058_v5, %v1066_v8  ;;  %v1067_v11 = vmul.f32 0.03125, %v1065_v10 }
 0xf1d   :  { %v1069_v12 = vsub.f32 %v1059_v6, %v1067_v11  ;;  %v1070_v13 = vmul.f32 %v1068_v9, %v1068_v9 }
 0xf1f   :  { %v1072_v14 = vsel %vm19_vm0, %v1070_v13, 0.0  ;;  %v1071_v17 = vmul.f32 %v1069_v12, %v1069_v12 }
 0xf20   :  { %1073 = vadd.xlane.f32.xlu1 %v1072_v14 }
 0xf21   :  { %v1075_v21 = vsel %vm19_vm0, %v1071_v17, 0.0 }
 0xf22   :  { %1076 = vadd.xlane.f32.xlu0 %v1075_v21 }
 0xf31   :  { %1093 = vrot.lane.b32.xlu1 %v6354_v22, %s7655_s18 }
 0xfad   :  { %v1074_v28 = vpop.xlane.xlu1 %1073 }
 0xfae   :  { %v1078_v29 = vmul.f32 0.03125, %v1074_v28 }
 0xfaf   :  { %v1077_v30 = vpop.xlane.xlu0 %1076 }
 0xfb0   :  { %v1080_v31 = vadd.f32 1e-12, %v1078_v29  ;;  %v1079_v32 = vmul.f32 0.03125, %v1077_v30 }
 0xfb1   :  { %v1094_v37 = vpop.permute.xlu1 %1093 }
 0xfb2   :  { %7390 = vrsqrt.f32 %v1080_v31  ;;  %v1081_v33 = vadd.f32 1e-12, %v1079_v32 }
 0xfb4   :  { %7392 = vrsqrt.f32 %v1081_v33 }
 0xfbc   :  { %v7391_v15 = vpop.eup %7390 }
 0xfbd   :  { %v1084_v45 = vmul.f32 %v7391_v15, %v1068_v9 }
 0xfbe   :  { %v7393_v34 = vpop.eup %7392 }
 0xfbf   :  { %v1090_v20 = vmul.f32 %v6354_v22, %v1084_v45  ;;  %v1085_v38 = vmul.f32 %v7393_v34, %v1069_v12 }
 0xfc1   :  { %v1091_v16 = vmul.f32 %v6354_v22, %v1085_v38  ;;  %v7979_v39 = vadd.f32 %v1094_v37, %v1090_v20 }
 0xfc3   :  { %v7981_v40 = vadd.f32 %v1094_v37, %v1091_v16  ;;  %v6363_v16 = vcombine.low %v7961_v24, %v7961_v24 }
 0xfc5   :  { %v1103_v41 = vpack.c.bf16 %v7981_v40, %v7979_v39 }
 0xfc7   :  { %6798 = vmatmul.mubr.msk.bf16.vlgmr.msra.gmra.mrb[32].mxu1 %vm19_vm0, %v1103_v41 }
 0xfc8   :  { %6803 = vmatprep.mubr.msk.bf16.mxu1 %vm7657_vm1, %v7656_v18 }
0x109a   :  { %v1157_v43 = vpop.f32.mrb[32].mxu1 }
0x109b   :  { %v6799_v44 = vpop.f32.mrb[33].mxu1  ;;  %v1158_v47 = vadd.f32 %v7991_v42, %v1157_v43 }
0x109c   :  { %v1160_v46 = vpop.f32.mrb[34].mxu1 }
0x109d   :  { %v1161_v48 = vadd.f32 %v7991_v42, %v1160_v46  ;;  %v6800_v49 = vpop.f32.mrb[35].mxu1 }
0x109f   :  { %v7995_v50 = vpack.c.bf16 %v1161_v48, %v1158_v47 }
0x10a1   :  { %1292 = vrot.lane.b32.xlu1 %v7995_v50, %s7658_s29  ;;  %1166 = vrot.lane.b32.xlu0 %v7995_v50, %s7655_s18 }
0x10a5   :  { %1290 = vrot.lane.b32.xlu1 %v7995_v50, %s7660_s4 }
0x1113   :  { %v1167_v51 = vpop.permute.xlu0 %1166  ;;  %v1293_v54 = vpop.permute.xlu1 %1292 }
0x1114   :  { %v1172_v53 = vsel %vm129_vm2, %v1167_v51, 0  ;;  %v1298_v55 = vsel %vm129_vm2, %v1293_v54, 0 }
0x1115   :  { %6802 = vmatpush3.bf16.xpose.msra.mxu1 %v1172_v53 }
0x1116   :  { %6813 = vmatprep.subr.bf16.mxu1 %v7656_v18 }
0x1117   :  { %v1291_v57 = vpop.permute.xlu1 %1290 }
0x111c   :  { %6804 = vmatmul.mubr.msk.bf16.vlgmr.msra.gmra.mrb[36].mxu1 %vm129_vm2, %v7995_v50 }
0x111d   :  { %6814 = vmatpush3.bf16.xpose.msra.mxu1 %v1298_v55  ;;  %6815 = vmatprep.mubr.msk.bf16.mxu1 %vm7657_vm1, %v7656_v18 }
0x111e   :  { %6825 = vmatprep.subr.bf16.mxu1 %v7656_v18 }
0x1124   :  { %6816 = vmatmul.mubr.msk.bf16.vlgmr.msra.gmra.mrb[40].mxu1 %vm129_vm2, %v1291_v57 }
0x1125   :  { %6827 = vmatprep.mubr.msk.bf16.mxu1 %vm7657_vm1, %v7656_v18 }
0x11ef   :  { %v1208_v59 = vpop.f32.mrb[36].mxu1 }
0x11f0   :  { %v1215_v58 = vmul.f32 0.35355338, %v1208_v59  ;;  %v6805_v60 = vpop.f32.mrb[37].mxu1 }
0x11f1   :  { %v1211_v61 = vpop.f32.mrb[38].mxu1 }
0x11f2   :  { %v1216_v62 = vmul.f32 0.35355338, %v1211_v61  ;;  %v6806_v63 = vpop.f32.mrb[39].mxu1  ;;  %v1217_v0 = vadd.f32 %v1215_v58, %v7785_v52 }
0x11f4   :  { %v1219_v1 = vsel %vm189_vm3, %v1217_v0, -inf  ;;  %v1218_v2 = vadd.f32 %v1216_v62, %v7787_v56 }
0x11f5   :  { %1220 = vmax.xlane.f32.xlu1 %v1219_v1 }
0x11f6   :  { %v1222_v3 = vsel %vm189_vm3, %v1218_v2, -inf }
0x11f7   :  { %1223 = vmax.xlane.f32.xlu0 %v1222_v3  ;;  %v1334_v4 = vpop.f32.mrb[40].mxu1 }
0x11f8   :  { %v1341_v5 = vmul.f32 0.35355338, %v1334_v4  ;;  %v6817_v35 = vpop.f32.mrb[41].mxu1 }
0x11f9   :  { %v1337_v6 = vpop.f32.mrb[42].mxu1 }
0x11fa   :  { %v1342_v7 = vmul.f32 0.35355338, %v1337_v6  ;;  %v6818_v36 = vpop.f32.mrb[43].mxu1  ;;  %v1343_v8 = vadd.f32 %v1341_v5, %v7785_v52 }
0x11fc   :  { %v1345_v10 = vsel %vm189_vm3, %v1343_v8, -inf  ;;  %v1344_v9 = vadd.f32 %v1342_v7, %v7787_v56 }
0x11fd   :  { %1346 = vmax.xlane.f32.xlu0 %v1345_v10 }
0x11fe   :  { %v1348_v11 = vsel %vm189_vm3, %v1344_v9, -inf }
0x1201   :  { %1349 = vmax.xlane.f32.xlu0 %v1348_v11 }
0x1282   :  { %v1221_v12 = vpop.xlane.xlu1 %1220 }
0x1283   :  { %v1225_v13 = vsub.f32 %v1217_v0, %v1221_v12 }
0x1284   :  { %v1224_v14 = vpop.xlane.xlu0 %1223 }
0x1285   :  { %v1227_v17 = vmul.f32 1.442695, %v1225_v13  ;;  %v1226_v21 = vsub.f32 %v1218_v2, %v1224_v14 }
0x1287   :  { %7394 = vpow2.f32 %v1227_v17  ;;  %v1229_v22 = vmul.f32 1.442695, %v1226_v21 }
0x1289   :  { %7396 = vpow2.f32 %v1229_v22 }
0x128a   :  { %v1347_v19 = vpop.xlane.xlu0 %1346 }
0x128b   :  { %v1351_v27 = vsub.f32 %v1343_v8, %v1347_v19 }
0x128d   :  { %v1353_v28 = vmul.f32 1.442695, %v1351_v27 }
0x128e   :  { %v1350_v29 = vpop.xlane.xlu0 %1349 }
0x128f   :  { %7398 = vpow2.f32 %v1353_v28  ;;  %v1352_v30 = vsub.f32 %v1344_v9, %v1350_v29 }
0x1291   :  { %v7395_v31 = vpop.eup %7394  ;;  %v1355_v32 = vmul.f32 1.442695, %v1352_v30 }
0x1292   :  { %v1231_v33 = vsel %vm189_vm3, %v7395_v31, 0.0 }
0x1293   :  { %v7397_v15 = vpop.eup %7396  ;;  %7400 = vpow2.f32 %v1355_v32  ;;  %1232 = vadd.xlane.f32.xlu1 %v1231_v33 }
0x1294   :  { %v1234_v45 = vsel %vm189_vm3, %v7397_v15, 0.0 }
0x1295   :  { %1235 = vadd.xlane.f32.xlu0 %v1234_v45 }
0x1299   :  { %v7399_v34 = vpop.eup %7398 }
0x129a   :  { %v1357_v20 = vsel %vm189_vm3, %v7399_v34, 0.0 }
0x129b   :  { %1358 = vadd.xlane.f32.xlu1 %v1357_v20 }
0x129d   :  { %v7401_v38 = vpop.eup %7400 }
0x129e   :  { %v1360_v37 = vsel %vm189_vm3, %v7401_v38, 0.0 }
0x129f   :  { %1361 = vadd.xlane.f32.xlu0 %v1360_v37 }
0x12ac   :  { %1242 = vrot.lane.b32.xlu1 %v7995_v50, %s7659_s30 }
0x12b0   :  { %1417 = vrot.lane.b32.xlu1 %v6363_v16, %s7662_s6 }
0x12b4   :  { %1518 = vrot.lane.b32.xlu1 %v7995_v50, %s7664_s8 }
0x12b5   :  { %1368 = vrot.lane.b32.xlu0 %v7995_v50, %s7661_s5 }
0x12b8   :  { %1516 = vrot.lane.b32.xlu1 %v7995_v50, %s7663_s7 }
0x1320   :  { %v1233_v41 = vpop.xlane.xlu1 %1232 }
0x1321   :  { %7402 = vrcp.f32 %v1233_v41 }
0x1322   :  { %v1236_v43 = vpop.xlane.xlu0 %1235 }
0x1323   :  { %7404 = vrcp.f32 %v1236_v43  ;;  %v6365_v43 = vcombine.low %v7956_v23, %v7956_v23 }
0x1328   :  { %v1359_v44 = vpop.xlane.xlu1 %1358 }
0x1329   :  { %7406 = vrcp.f32 %v1359_v44 }
0x132b   :  { %v7403_v46 = vpop.eup %7402 }
0x132c   :  { %v1243_v47 = vpop.permute.xlu1 %1242  ;;  %v1362_v24 = vpop.xlane.xlu0 %1361  ;;  %v1238_v49 = vmul.f32 %v7403_v46, %v7395_v31 }
0x132d   :  { %v7405_v48 = vpop.eup %7404  ;;  %7408 = vrcp.f32 %v1362_v24  ;;  %6808 = vmatpush3.bf16.msra.mxu0 %v1243_v47 }
0x132e   :  { %v1240_v51 = vmul.f32 %v7405_v48, %v7397_v15  ;;  %6819 = vmatprep.subr.bf16.mxu0 %v7656_v18 }
0x1330   :  { %v1418_v53 = vpop.permute.xlu1 %1417  ;;  %v1369_v54 = vpop.permute.xlu0 %1368  ;;  %v1241_v55 = vpack.c.bf16 %v1240_v51, %v1238_v49 }
0x1331   :  { %v1423_v57 = vsel %vm393_vm4, %v1418_v53, 0 }
0x1332   :  { %6810 = vmatmul.mubr.msk.bf16.vlgmr.msra.gmra.mrb[28].mxu0 %vm189_vm3, %v1241_v55  ;;  %6826 = vmatpush3.bf16.msra.mxu1 %v1423_v57 }
0x1333   :  { %6820 = vmatpush3.bf16.msra.mxu0 %v1369_v54  ;;  %6821 = vmatprep.mubr.msk.bf16.mxu0 %vm7657_vm1, %v7656_v18  ;;  %v7407_v59 = vpop.eup %7406 }
0x1334   :  { %6837 = vmatprep.subr.bf16.mxu1 %v7656_v18  ;;  %6831 = vmatprep.subr.bf16.mxu0 %v7656_v18  ;;  %v1364_v60 = vmul.f32 %v7407_v59, %v7399_v34  ;;  %v1519_v35 = vpop.permute.xlu1 %1518 }
0x1335   :  { %v1524_v8 = vsel %vm129_vm2, %v1519_v35, 0 }
0x1337   :  { %v7409_v58 = vpop.eup %7408 }
0x1338   :  { %v1366_v61 = vmul.f32 %v7409_v58, %v7401_v38  ;;  %v1517_v10 = vpop.permute.xlu1 %1516 }
0x133a   :  { %v1367_v62 = vpack.c.bf16 %v1366_v61, %v1364_v60 }
0x133c   :  { %6822 = vmatmul.mubr.msk.bf16.vlgmr.msra.gmra.mrb[32].mxu0 %vm189_vm3, %v1367_v62 }
0x133d   :  { %6833 = vmatprep.mubr.msk.bf16.mxu0 %vm7657_vm1, %v7656_v18 }
0x1405   :  { %v8047_v63 = vpop.f32.mrb[28].mxu0 }
0x1406   :  { %v6811_v0 = vpop.f32.mrb[29].mxu0 }
0x1407   :  { %v8049_v1 = vpop.f32.mrb[30].mxu0 }
0x1408   :  { %v1289_v2 = vpack.c.bf16 %v8049_v1, %v8047_v63  ;;  %v6812_v3 = vpop.f32.mrb[31].mxu0 }
0x140f   :  { %v1408_v4 = vpop.f32.mrb[32].mxu0 }
0x1410   :  { %v6823_v5 = vpop.f32.mrb[33].mxu0 }
0x1411   :  { %v1411_v6 = vpop.f32.mrb[34].mxu0 }
0x1412   :  { %v1415_v7 = vpack.c.bf16 %v1411_v6, %v1408_v4  ;;  %v6824_v36 = vpop.f32.mrb[35].mxu0 }
0x1414   :  { %6828 = vmatmul.mubr.msk.bf16.vlgmr.msra.gmra.mrb[44].mxu1 %vm129_vm2, %v1415_v7 }
0x1415   :  { %6838 = vmatpush3.bf16.xpose.msra.mxu1 %v1524_v8  ;;  %6839 = vmatprep.mubr.msk.bf16.mxu1 %vm7657_vm1, %v7656_v18 }
0x1416   :  { %6849 = vmatprep.subr.bf16.mxu1 %v7656_v18 }
0x141c   :  { %6840 = vmatmul.mubr.msk.bf16.vlgmr.msra.gmra.mrb[48].mxu1 %vm129_vm2, %v1517_v10 }
0x141d   :  { %6851 = vmatprep.mubr.msk.bf16.mxu1 %vm7657_vm1, %v7656_v18 }
0x14e7   :  { %v8061_v9 = vpop.f32.mrb[44].mxu1 }
0x14e8   :  { %v6829_v11 = vpop.f32.mrb[45].mxu1 }
0x14e9   :  { %v8063_v12 = vpop.f32.mrb[46].mxu1 }
0x14ea   :  { %v6830_v13 = vpop.f32.mrb[47].mxu1 }
0x14ef   :  { %v1560_v14 = vpop.f32.mrb[48].mxu1 }
0x14f0   :  { %v1567_v17 = vmul.f32 0.35355338, %v1560_v14  ;;  %v6841_v21 = vpop.f32.mrb[49].mxu1  ;;  %v8109_v14 = vld [vmem:[%s9206_s2] sm:$0xff] }
0x14f1   :  { %v1563_v22 = vpop.f32.mrb[50].mxu1 }
0x14f2   :  { %v1568_v19 = vmul.f32 0.35355338, %v1563_v22  ;;  %v6842_v27 = vpop.f32.mrb[51].mxu1  ;;  %v1569_v28 = vadd.f32 %v1567_v17, %v7785_v52 }
0x14f4   :  { %v1571_v29 = vsel %vm189_vm3, %v1569_v28, -inf  ;;  %v1570_v30 = vadd.f32 %v1568_v19, %v7787_v56 }
0x14f5   :  { %1572 = vmax.xlane.f32.xlu0 %v1571_v29 }
0x14f6   :  { %v1574_v31 = vsel %vm189_vm3, %v1570_v30, -inf }
0x14f7   :  { %1575 = vmax.xlane.f32.xlu1 %v1574_v31 }
0x1508   :  { %1594 = vrot.lane.b32.xlu1 %v7995_v50, %s7667_s11 }
0x150c   :  { %1696 = vrot.lane.b32.xlu1 %v7995_v50, %s7665_s9 }
0x1510   :  { %1694 = vrot.lane.b32.xlu1 %v7995_v50, %s7666_s10 }
0x1582   :  { %v1573_v32 = vpop.xlane.xlu0 %1572 }
0x1583   :  { %v1577_v33 = vsub.f32 %v1569_v28, %v1573_v32 }
0x1584   :  { %v1576_v15 = vpop.xlane.xlu1 %1575 }
0x1585   :  { %v1579_v45 = vmul.f32 1.442695, %v1577_v33  ;;  %v1578_v34 = vsub.f32 %v1570_v30, %v1576_v15 }
0x1587   :  { %7410 = vpow2.f32 %v1579_v45  ;;  %v1581_v20 = vmul.f32 1.442695, %v1578_v34  ;;  %v6369_v45 = vcombine.low %v7969_v25, %v7969_v25 }
0x1588   :  { %v1595_v49 = vpop.permute.xlu1 %1594 }
0x1589   :  { %7412 = vpow2.f32 %v1581_v20  ;;  %v6373_v20 = vcombine.low %v7974_v26, %v7974_v26 }
0x158c   :  { %v1697_v55 = vpop.permute.xlu1 %1696 }
0x158d   :  { %v1702_v57 = vsel %vm129_vm2, %v1697_v55, 0 }
0x1590   :  { %v1695_v59 = vpop.permute.xlu1 %1694 }
0x1591   :  { %v7411_v38 = vpop.eup %7410 }
0x1592   :  { %v1583_v37 = vsel %vm189_vm3, %v7411_v38, 0.0 }
0x1593   :  { %v7413_v16 = vpop.eup %7412  ;;  %1584 = vadd.xlane.f32.xlu0 %v1583_v37 }
0x1594   :  { %v1586_v41 = vsel %vm189_vm3, %v7413_v16, 0.0 }
0x1597   :  { %1587 = vadd.xlane.f32.xlu0 %v1586_v41 }
0x15ad   :  { %1467 = vrot.lane.b32.xlu0 %v6365_v43, %s7662_s6 }
0x1620   :  { %v1585_v44 = vpop.xlane.xlu0 %1584 }
0x1621   :  { %7414 = vrcp.f32 %v1585_v44 }
0x1624   :  { %v1588_v46 = vpop.xlane.xlu0 %1587 }
0x1625   :  { %7416 = vrcp.f32 %v1588_v46 }
0x1628   :  { %v1468_v47 = vpop.permute.xlu0 %1467 }
0x1629   :  { %v1473_v24 = vsel %vm393_vm4, %v1468_v47, 0 }
0x162a   :  { %6832 = vmatpush3.bf16.msra.mxu0 %v1473_v24 }
0x162b   :  { %6843 = vmatprep.subr.bf16.mxu0 %v7656_v18  ;;  %v7415_v48 = vpop.eup %7414 }
0x162c   :  { %v1590_v51 = vmul.f32 %v7415_v48, %v7411_v38 }
0x162d   :  { %6834 = vmatmul.mubr.msk.bf16.vlgmr.msra.gmra.mrb[36].mxu0 %vm129_vm2, %v1289_v2 }
0x162e   :  { %6844 = vmatpush3.bf16.msra.mxu0 %v1595_v49  ;;  %6845 = vmatprep.mubr.msk.bf16.mxu0 %vm7657_vm1, %v7656_v18 }
0x162f   :  { %v7417_v23 = vpop.eup %7416  ;;  %6855 = vmatprep.subr.bf16.mxu0 %v7656_v18 }
0x1630   :  { %v1592_v53 = vmul.f32 %v7417_v23, %v7413_v16 }
0x1632   :  { %v1593_v54 = vpack.c.bf16 %v1592_v53, %v1590_v51 }
0x1635   :  { %6846 = vmatmul.mubr.msk.bf16.vlgmr.msra.gmra.mrb[40].mxu0 %vm189_vm3, %v1593_v54 }
0x1636   :  { %6857 = vmatprep.mubr.msk.bf16.mxu0 %vm7657_vm1, %v7656_v18 }
0x1637   :  { %6856 = vmatpush3.bf16.xpose.msra.mxu0 %v1702_v57 }
0x1638   :  { %6867 = vmatprep.subr.bf16.mxu0 %v7656_v18 }
0x163e   :  { %6858 = vmatmul.mubr.msk.bf16.vlgmr.msra.gmra.mrb[44].mxu0 %vm129_vm2, %v1695_v59 }
0x163f   :  { %6869 = vmatprep.mubr.msk.bf16.mxu0 %vm7657_vm1, %v7656_v18 }
0x1700   :  { %v1509_v58 = vpop.f32.mrb[36].mxu0 }
0x1701   :  { %v8095_v60 = vadd.f32 %v1509_v58, %v8061_v9  ;;  %v6835_v61 = vpop.f32.mrb[37].mxu0 }
0x1702   :  { %v1512_v62 = vpop.f32.mrb[38].mxu0  ;;  %v7628_v61 = vld [vmem:[%s9205_s1 + $0xa] ss:$0 sm:$0xff] }
0x1703   :  { %v8098_v63 = vadd.f32 %v1512_v62, %v8063_v12  ;;  %v6836_v0 = vpop.f32.mrb[39].mxu0 }
0x1708   :  { %v1634_v1 = vpop.f32.mrb[40].mxu0 }
0x1709   :  { %v6847_v2 = vpop.f32.mrb[41].mxu0 }
0x170a   :  { %v1637_v3 = vpop.f32.mrb[42].mxu0 }
0x170b   :  { %v1641_v4 = vpack.c.bf16 %v1637_v3, %v1634_v1  ;;  %v6848_v5 = vpop.f32.mrb[43].mxu0 }
0x1711   :  { %v1738_v35 = vpop.f32.mrb[44].mxu0 }
0x1712   :  { %v1745_v6 = vmul.f32 0.35355338, %v1738_v35  ;;  %v6859_v7 = vpop.f32.mrb[45].mxu0 }
0x1713   :  { %v1741_v36 = vpop.f32.mrb[46].mxu0 }
0x1714   :  { %v1746_v8 = vmul.f32 0.35355338, %v1741_v36  ;;  %v6860_v10 = vpop.f32.mrb[47].mxu0  ;;  %v1747_v9 = vadd.f32 %v1745_v6, %v7785_v52  ;;  %v8116_v52 = vld [vmem:[%s9206_s2 + $0x8] sm:$0xff] }
0x1716   :  { %v1749_v11 = vsel %vm189_vm3, %v1747_v9, -inf  ;;  %v1748_v13 = vadd.f32 %v1746_v8, %v7787_v56 }
0x1717   :  { %1750 = vmax.xlane.f32.xlu0 %v1749_v11 }
0x1718   :  { %v1752_v12 = vsel %vm189_vm3, %v1748_v13, -inf }
0x1719   :  { %1753 = vmax.xlane.f32.xlu1 %v1752_v12 }
0x172a   :  { %1772 = vrot.lane.b32.xlu1 %v7995_v50, %s7668_s12 }
0x172e   :  { %2125 = vrot.lane.b32.xlu1 %v8109_v14, %s7655_s18 }
0x1732   :  { %2127 = vrot.lane.b32.xlu1 %v8116_v52, %s7655_s18 }
0x17a4   :  { %v1751_v56 = vpop.xlane.xlu0 %1750 }
0x17a5   :  { %v1755_v17 = vsub.f32 %v1747_v9, %v1751_v56 }
0x17a6   :  { %v1754_v21 = vpop.xlane.xlu1 %1753 }
0x17a7   :  { %v1757_v50 = vmul.f32 1.442695, %v1755_v17  ;;  %v1756_v22 = vsub.f32 %v1748_v13, %v1754_v21 }
0x17a9   :  { %7418 = vpow2.f32 %v1757_v50  ;;  %v1759_v19 = vmul.f32 1.442695, %v1756_v22 }
0x17aa   :  { %v1773_v27 = vpop.permute.xlu1 %1772 }
0x17ab   :  { %7420 = vpow2.f32 %v1759_v19 }
0x17ae   :  { %v2126_v28 = vpop.permute.xlu1 %2125 }
0x17af   :  { %v2131_v34 = vsel %vm19_vm0, %v2126_v28, 0.0 }
0x17b2   :  { %v2128_v29 = vpop.permute.xlu1 %2127 }
0x17b3   :  { %v7419_v30 = vpop.eup %7418  ;;  %v2134_v31 = vsel %vm19_vm0, %v2128_v29, 0.0 }
0x17b4   :  { %2135 = vadd.xlane.f32.xlu1 %v2134_v31  ;;  %v1761_v32 = vsel %vm189_vm3, %v7419_v30, 0.0 }
0x17b5   :  { %v7421_v33 = vpop.eup %7420  ;;  %1762 = vadd.xlane.f32.xlu0 %v1761_v32 }
0x17b6   :  { %v1764_v15 = vsel %vm189_vm3, %v7421_v33, 0.0 }
0x17b9   :  { %1765 = vadd.xlane.f32.xlu0 %v1764_v15 }
0x17cf   :  { %1643 = vrot.lane.b32.xlu0 %v6369_v45, %s7662_s6 }
0x17ee   :  { %2132 = vadd.xlane.f32.xlu0 %v2131_v34 }
0x1804   :  { %1821 = vrot.lane.b32.xlu0 %v6373_v20, %s7662_s6 }
0x1841   :  { %v2136_v38 = vpop.xlane.xlu1 %2135 }
0x1842   :  { %v2138_v37 = vmul.f32 0.03125, %v2136_v38  ;;  %v1763_v16 = vpop.xlane.xlu0 %1762 }
0x1843   :  { %7422 = vrcp.f32 %v1763_v16 }
0x1844   :  { %v2140_v41 = vsub.f32 %v8116_v52, %v2138_v37 }
0x1846   :  { %v1766_v43 = vpop.xlane.xlu0 %1765  ;;  %v2142_v44 = vmul.f32 %v2140_v41, %v2140_v41 }
0x1847   :  { %7424 = vrcp.f32 %v1766_v43 }
0x1848   :  { %2147 = vrot.lane.b32.xlu0 %v2142_v44, %s7655_s18 }
0x184a   :  { %v1644_v25 = vpop.permute.xlu0 %1643 }
0x184b   :  { %v1649_v46 = vsel %vm393_vm4, %v1644_v25, 0 }
0x184c   :  { %6850 = vmatpush3.bf16.msra.mxu1 %v1649_v46 }
0x184d   :  { %6861 = vmatprep.subr.bf16.mxu1 %v7656_v18  ;;  %v7423_v26 = vpop.eup %7422 }
0x184e   :  { %v1768_v24 = vmul.f32 %v7423_v26, %v7419_v30 }
0x184f   :  { %6852 = vmatmul.mubr.msk.bf16.vlgmr.msra.gmra.mrb[52].mxu1 %vm129_vm2, %v1641_v4 }
0x1850   :  { %6862 = vmatpush3.bf16.msra.mxu1 %v1773_v27  ;;  %6863 = vmatprep.mubr.msk.bf16.mxu1 %vm7657_vm1, %v7656_v18 }
0x1851   :  { %v7425_v47 = vpop.eup %7424  ;;  %6873 = vmatprep.subr.bf16.mxu1 %v7656_v18 }
0x1852   :  { %v1770_v48 = vmul.f32 %v7425_v47, %v7421_v33 }
0x1854   :  { %v1771_v49 = vpack.c.bf16 %v1770_v48, %v1768_v24 }
0x1857   :  { %6864 = vmatmul.mubr.msk.bf16.vlgmr.msra.gmra.mrb[56].mxu1 %vm189_vm3, %v1771_v49 }
0x1858   :  { %6877 = vmatprep.mubr.msk.bf16.mxu1 %vm7657_vm1, %v7656_v18 }
0x187b   :  { %v2133_v23 = vpop.xlane.xlu0 %2132 }
0x187c   :  { %v2137_v51 = vmul.f32 0.03125, %v2133_v23 }
0x187e   :  { %v2139_v53 = vsub.f32 %v8109_v14, %v2137_v51 }
0x187f   :  { %v1822_v54 = vpop.permute.xlu0 %1821 }
0x1880   :  { %v2141_v55 = vmul.f32 %v2139_v53, %v2139_v53  ;;  %v1827_v57 = vsel %vm393_vm4, %v1822_v54, 0 }
0x1881   :  { %6868 = vmatpush3.bf16.msra.mxu0 %v1827_v57 }
0x1882   :  { %2145 = vrot.lane.b32.xlu1 %v2141_v55, %s7655_s18  ;;  %6881 = vmatprep.subr.bf16.mxu0 %v7656_v18 }
0x18ba   :  { %v2148_v59 = vpop.permute.xlu0 %2147 }
0x18bb   :  { %v2154_v58 = vsel %vm19_vm0, %v2148_v59, 0.0 }
0x18bc   :  { %2155 = vadd.xlane.f32.xlu0 %v2154_v58 }
0x18d2   :  { %2165 = vrot.lane.b32.xlu0 %v7628_v61, %s7662_s6 }
0x18d6   :  { %1873 = vrot.lane.b32.xlu0 %v7991_v42, %s7662_s6 }
0x18f4   :  { %v2146_v62 = vpop.permute.xlu1 %2145 }
0x18f5   :  { %v2151_v0 = vsel %vm19_vm0, %v2146_v62, 0.0 }
0x18f6   :  { %2152 = vadd.xlane.f32.xlu1 %v2151_v0 }
0x1922   :  { %v1685_v1 = vpop.f32.mrb[52].mxu1 }
0x1923   :  { %v1692_v2 = vadd.f32 %v1685_v1, %v8095_v60  ;;  %v6853_v3 = vpop.f32.mrb[53].mxu1 }
0x1924   :  { %v1688_v4 = vpop.f32.mrb[54].mxu1 }
0x1925   :  { %v1693_v5 = vadd.f32 %v1688_v4, %v8098_v63  ;;  %v6854_v35 = vpop.f32.mrb[55].mxu1 }
0x1926   :  { %v6386_v35 = vld [vmem:[%s9205_s1 + $0xf] ss:$0 sm:$0xff] }
0x192a   :  { %v1812_v6 = vpop.f32.mrb[56].mxu1 }
0x192b   :  { %v6865_v7 = vpop.f32.mrb[57].mxu1 }
0x192c   :  { %v1815_v36 = vpop.f32.mrb[58].mxu1  ;;  %v7305_v7 = vld [vmem:[%s9204_s0 + $0x98] sm:$0xff]  }
0x192d   :  { %v1819_v8 = vpack.c.bf16 %v1815_v36, %v1812_v6  ;;  %v6866_v10 = vpop.f32.mrb[59].mxu1  ;;  %v7304_v6 = vld [vmem:[%s9204_s0 + $0x90] sm:$0xff]  }
0x192e   :  { %6874 = vmatpush3.bf16.msra.mxu1 %v7304_v6 }
0x192f   :  { %6870 = vmatmul.mubr.msk.bf16.vlgmr.msra.gmra.mrb[48].mxu0 %vm129_vm2, %v1819_v8  ;;  %6875 = vmatprep.subr.bf16.mxu1 %v7656_v18 }
0x1930   :  { %6889 = vmatprep.mubr.msk.bf16.mxu0 %vm7657_vm1, %v7656_v18 }
0x1932   :  { %6876 = vmatpush3.bf16.msra.mxu1 %v7305_v7 }
0x1933   :  { %6893 = vmatprep.subr.bf16.mxu1 %v7656_v18 }
0x1949   :  { %v2156_v42 = vpop.xlane.xlu0 %2155 }
0x194a   :  { %v2158_v9 = vmul.f32 0.03125, %v2156_v42 }
0x194c   :  { %v2160_v11 = vadd.f32 1e-12, %v2158_v9 }
0x194d   :  { %v2166_v50 = vpop.permute.xlu0 %2165 }
0x194e   :  { %7426 = vrsqrt.f32 %v2160_v11 }
0x1951   :  { %v1874_v45 = vpop.permute.xlu0 %1873 }
0x1958   :  { %v7427_v63 = vpop.eup %7426 }
0x1959   :  { %v2164_v17 = vmul.f32 %v7427_v63, %v2140_v41 }
0x195b   :  { %v2169_v19 = vmul.f32 %v2166_v50, %v2164_v17 }
0x195d   :  { %v8162_v28 = vadd.f32 %v7628_v61, %v2169_v19 }
0x1983   :  { %v2153_v13 = vpop.xlane.xlu1 %2152 }
0x1984   :  { %v2157_v60 = vmul.f32 0.03125, %v2153_v13 }
0x1986   :  { %v2159_v12 = vadd.f32 1e-12, %v2157_v60 }
0x1988   :  { %7428 = vrsqrt.f32 %v2159_v12 }
0x1992   :  { %v7429_v56 = vpop.eup %7428 }
0x1993   :  { %v2163_v21 = vmul.f32 %v7429_v56, %v2139_v53 }
0x1995   :  { %v2168_v22 = vmul.f32 %v2166_v50, %v2163_v21 }
0x1997   :  { %v8158_v27 = vadd.f32 %v7628_v61, %v2168_v22 }
0x1999   :  { %2175 = vrot.lane.b32.xlu1 %v8158_v27, %s7655_s18 }
0x199d   :  { %2177 = vrot.lane.b32.xlu1 %v8162_v28, %s7655_s18 }
0x1a02   :  { %v1863_v29 = vpop.f32.mrb[48].mxu0 }
0x1a03   :  { %v1870_v30 = vadd.f32 %v1863_v29, %v1692_v2  ;;  %v6871_v31 = vpop.f32.mrb[49].mxu0 }
0x1a04   :  { %v1866_v32 = vpop.f32.mrb[50].mxu0 }
0x1a05   :  { %v1871_v33 = vadd.f32 %v1866_v32, %v1693_v5  ;;  %v6872_v15 = vpop.f32.mrb[51].mxu0  ;;  %v1876_v20 = vadd.f32 %v1874_v45, %v1870_v30  ;;  %v6375_v5 = vld [vmem:[%s9205_s1 + $0xd] ss:$0 sm:$0xff] }
0x1a07   :  { %v1877_v16 = vadd.f32 %v1874_v45, %v1871_v33  ;;  %v1879_v43 = vadd.f32 %v1876_v20, %v7979_v39 }
0x1a09   :  { %v1881_v44 = vsel %vm19_vm0, %v1879_v43, 0.0  ;;  %v1880_v25 = vadd.f32 %v1877_v16, %v7981_v40 }
0x1a0b   :  { %v2176_v34 = vpop.permute.xlu1 %2175  ;;  %v1884_v46 = vsel %vm19_vm0, %v1880_v25, 0.0 }
0x1a0c   :  { %v2181_v38 = vsel %vm19_vm0, %v2176_v34, 0.0 }
0x1a0d   :  { %2182 = vadd.xlane.f32.xlu1 %v2181_v38 }
0x1a0f   :  { %v2178_v37 = vpop.permute.xlu1 %2177 }
0x1a10   :  { %v2184_v41 = vsel %vm19_vm0, %v2178_v37, 0.0 }
0x1a11   :  { %2185 = vadd.xlane.f32.xlu0 %v2184_v41 }
0x1a15   :  { %1882 = vadd.xlane.f32.xlu0 %v1881_v44  ;;  %v8206_v44 = vld [vmem:[%s9204_s0 + $0x24] sm:$0xf] }
0x1a19   :  { %1885 = vadd.xlane.f32.xlu0 %v1884_v46 }
0x1a9a   :  { %v2183_v26 = vpop.xlane.xlu1 %2182 }
0x1a9b   :  { %v2187_v47 = vmul.f32 0.03125, %v2183_v26 }
0x1a9d   :  { %v2189_v24 = vsub.f32 %v8158_v27, %v2187_v47 }
0x1a9e   :  { %v2186_v48 = vpop.xlane.xlu0 %2185 }
0x1a9f   :  { %v2188_v49 = vmul.f32 0.03125, %v2186_v48  ;;  %v2191_v23 = vmul.f32 %v2189_v24, %v2189_v24 }
0x1aa1   :  { %v2190_v51 = vsub.f32 %v8162_v28, %v2188_v49  ;;  %2195 = vrot.lane.b32.xlu1 %v2191_v23, %s7655_s18  ;;  %v8219_v23 = vld [vmem:[%s9204_s0 + $0x28] sm:$0xf] }
0x1aa2   :  { %v1883_v53 = vpop.xlane.xlu0 %1882 }
0x1aa3   :  { %v2192_v39 = vmul.f32 %v2190_v51, %v2190_v51  ;;  %v1887_v40 = vmul.f32 0.03125, %v1883_v53 }
0x1aa5   :  { %2197 = vrot.lane.b32.xlu0 %v2192_v39, %s7655_s18  ;;  %v1889_v55 = vsub.f32 %v1879_v43, %v1887_v40  ;;  %v8201_v43 = vld [vmem:[%s9204_s0 + $0x20] sm:$0xf] }
0x1aa6   :  { %v1886_v54 = vpop.xlane.xlu0 %1885  ;;  %v6388_v47 = vcombine.low %v8201_v43, %v8206_v44 }
0x1aa7   :  { %v1888_v57 = vmul.f32 0.03125, %v1886_v54  ;;  %v1891_v62 = vmul.f32 %v1889_v55, %v1889_v55 }
0x1aa9   :  { %v1890_v58 = vsub.f32 %v1880_v25, %v1888_v57  ;;  %v1893_v1 = vsel %vm19_vm0, %v1891_v62, 0.0 }
0x1aab   :  { %v1892_v3 = vmul.f32 %v1890_v58, %v1890_v58 }
0x1aad   :  { %v1896_v4 = vsel %vm19_vm0, %v1892_v3, 0.0  ;;  %v7311_v3 = vld [vmem:[%s9204_s0 + $0xb8] sm:$0xff]  }
0x1b13   :  { %v2196_v59 = vpop.permute.xlu1 %2195 }
0x1b14   :  { %v2201_v61 = vsel %vm19_vm0, %v2196_v59, 0.0 }
0x1b15   :  { %2202 = vadd.xlane.f32.xlu1 %v2201_v61 }
0x1b17   :  { %v2198_v0 = vpop.permute.xlu0 %2197 }
0x1b18   :  { %v2204_v2 = vsel %vm19_vm0, %v2198_v0, 0.0  ;;  %v7308_v0 = vld [vmem:[%s9204_s0 + $0xa0] sm:$0xff]  }
0x1b19   :  { %1894 = vadd.xlane.f32.xlu1 %v1893_v1  ;;  %2205 = vadd.xlane.f32.xlu0 %v2204_v2  ;;  %v7309_v1 = vld [vmem:[%s9204_s0 + $0xa8] sm:$0xff]   ;;  %v7310_v2 = vld [vmem:[%s9204_s0 + $0xb0] sm:$0xff]  }
0x1b1a   :  { %6882 = vmatpush3.bf16.msra.mxu0 %v7308_v0 }
0x1b1b   :  { %6883 = vmatprep.subr.bf16.mxu0 %v7656_v18 }
0x1b1d   :  { %1897 = vadd.xlane.f32.xlu0 %v1896_v4  ;;  %v8255_v4 = vld [vmem:[%s9205_s1 + $0x7] ss:$0 sm:$0xff] }
0x1b1e   :  { %6884 = vmatpush3.bf16.msra.mxu0 %v7309_v1 }
0x1b1f   :  { %6885 = vmatprep.subr.bf16.mxu0 %v7656_v18 }
0x1b22   :  { %6886 = vmatpush3.bf16.msra.mxu0 %v7310_v2 }
0x1b23   :  { %6887 = vmatprep.subr.bf16.mxu0 %v7656_v18 }
0x1b26   :  { %6888 = vmatpush3.bf16.msra.mxu0 %v7311_v3 }
0x1b27   :  { %6907 = vmatprep.subr.bf16.mxu0 %v7656_v18 }
0x1b2a   :  { %1914 = vrot.lane.b32.xlu1 %v6375_v5, %s7655_s18 }
0x1b2e   :  { %2217 = vrot.lane.b32.xlu1 %v2190_v51, %s7655_s18  ;;  %v8224_v51 = vld [vmem:[%s9204_s0 + $0x2c] sm:$0xf] }
0x1b2f   :  { %v6389_v54 = vcombine.low %v8219_v23, %v8224_v51 }
0x1b32   :  { %2244 = vrot.lane.b32.xlu1 %v6386_v35, %s7655_s18 }
0x1b33   :  { %2215 = vrot.lane.b32.xlu0 %v2189_v24, %s7655_s18 }
0x1ba2   :  { %v2203_v36 = vpop.xlane.xlu1 %2202 }
0x1ba3   :  { %v2207_v8 = vmul.f32 0.032258064, %v2203_v36 }
0x1ba5   :  { %7430 = vrsqrt.f32 %v2207_v8  ;;  %vm2225_vm6 = vcmp.eq.f32.partialorder %v2207_v8, inf  ;;  %v2228_v21 = vand.u32 2147483648, %v2207_v8  ;;  %vm2227_vm7 = vcmp.eq.f32.partialorder %v2207_v8, 0.0 }
0x1ba6   :  { %v1895_v10 = vpop.xlane.xlu1 %1894  ;;  %v2206_v42 = vpop.xlane.xlu0 %2205 }
0x1ba7   :  { %v1899_v9 = vmul.f32 0.03125, %v1895_v10  ;;  %v2208_v11 = vmul.f32 0.032258064, %v2206_v42 }
0x1ba9   :  { %v1901_v13 = vadd.f32 1e-12, %v1899_v9  ;;  %7432 = vrsqrt.f32 %v2208_v11  ;;  %vm2232_vm8 = vcmp.eq.f32.partialorder %v2208_v11, inf  ;;  %v2235_v32 = vand.u32 2147483648, %v2208_v11 }
0x1baa   :  { %v1898_v60 = vpop.xlane.xlu0 %1897  ;;  %vm2234_vm9 = vcmp.eq.f32.partialorder %v2208_v11, 0.0  ;;  %v1915_v37 = vpop.permute.xlu1 %1914 }
0x1bab   :  { %7434 = vrsqrt.f32 %v1901_v13  ;;  %v1900_v12 = vmul.f32 0.03125, %v1898_v60 }
0x1bad   :  { %v1902_v63 = vadd.f32 1e-12, %v1900_v12 }
0x1bae   :  { %v2216_v46 = vpop.permute.xlu0 %2215  ;;  %v2218_v48 = vpop.permute.xlu1 %2217 }
0x1baf   :  { %v7431_v56 = vpop.eup %7430  ;;  %7436 = vrsqrt.f32 %v1902_v63  ;;  %v2221_v39 = vmul.f32 %v6386_v35, %v2216_v46  ;;  %v2222_v53 = vmul.f32 %v6386_v35, %v2218_v48  ;;  %v8262_v63 = vld [vmem:[%s9205_s1 + $0x2] ss:$0 sm:$0xff] }
0x1bb0   :  { %v2224_v17 = vmul.f32 %v7431_v56, %v2207_v8 }
0x1bb2   :  { %v2226_v50 = vsel %vm2225_vm6, %v2207_v8, %v2224_v17  ;;  %v2245_v57 = vpop.permute.xlu1 %2244 }
0x1bb3   :  { %v7433_v22 = vpop.eup %7432  ;;  %v2229_v19 = vsel %vm2227_vm7, %v2228_v21, %v2226_v50 }
0x1bb4   :  { %v2231_v29 = vmul.f32 %v7433_v22, %v2208_v11  ;;  %v2237_v30 = vadd.f32 1e-06, %v2229_v19 }
0x1bb5   :  { %v7435_v31 = vpop.eup %7434 }
0x1bb6   :  { %v1905_v33 = vmul.f32 %v7435_v31, %v1889_v55  ;;  %v2233_v15 = vsel %vm2232_vm8, %v2208_v11, %v2231_v29  ;;  %7438 = vrcp.f32 %v2237_v30 }
0x1bb7   :  { %v2236_v45 = vsel %vm2234_vm9, %v2235_v32, %v2233_v15 }
0x1bb8   :  { %v2238_v34 = vadd.f32 1e-06, %v2236_v45  ;;  %v1911_v38 = vmul.f32 %v6375_v5, %v1905_v33 }
0x1bb9   :  { %v7437_v20 = vpop.eup %7436 }
0x1bba   :  { %v1906_v16 = vmul.f32 %v7437_v20, %v1890_v58  ;;  %7440 = vrcp.f32 %v2238_v34  ;;  %v8208_v25 = vadd.f32 %v1915_v37, %v1911_v38 }
0x1bbc   :  { %v1912_v41 = vmul.f32 %v6375_v5, %v1906_v16 }
0x1bbe   :  { %v8210_v26 = vadd.f32 %v1915_v37, %v1912_v41 }
0x1bc0   :  { %v7439_v24 = vpop.eup %7438  ;;  %v1932_v49 = vpack.c.bf16 %v8210_v26, %v8208_v25 }
0x1bc1   :  { %v2240_v40 = vmul.f32 %v7439_v24, %v2221_v39 }
0x1bc2   :  { %6878 = vmatmul.mubr.msk.bf16.vlgmr.msra.gmra.mrb[60].mxu1 %vm19_vm0, %v1932_v49 }
0x1bc3   :  { %6894 = vmatpush3.bf16.msra.mxu1 %v6388_v47  ;;  %6897 = vmatprep.mubr.msk.bf16.mxu1 %vm7657_vm1, %v7656_v18  ;;  %v2247_v58 = vadd.f32 %v2245_v57, %v2240_v40 }
0x1bc4   :  { %v7441_v55 = vpop.eup %7440  ;;  %6895 = vmatprep.subr.bf16.mxu1 %v7656_v18 }
0x1bc5   :  { %v2242_v59 = vmul.f32 %v7441_v55, %v2222_v53 }
0x1bc7   :  { %v2248_v61 = vadd.f32 %v2245_v57, %v2242_v59  ;;  %6896 = vmatpush3.bf16.msra.mxu1 %v6389_v54 }
0x1bc8   :  { %6901 = vmatprep.subr.bf16.mxu1 %v7656_v18 }
0x1bc9   :  { %v2254_v62 = vpack.c.bf16 %v2248_v61, %v2247_v58 }
0x1bcb   :  { %6898 = vmatmul.mubr.msk.bf16.vlgmr.msra.gmra.mrb[64].mxu1 %vm19_vm0, %v2254_v62 }
0x1bcc   :  { %6903 = vmatprep.mubr.msk.bf16.mxu1 %vm7657_vm1, %v7656_v18 }
0x1c95   :  { %v1986_v5 = vpop.f32.mrb[60].mxu1 }
0x1c96   :  { %v1987_v35 = vadd.f32 %v8255_v4, %v1986_v5  ;;  %v6879_v6 = vpop.f32.mrb[61].mxu1 }
0x1c97   :  { %v1989_v7 = vpop.f32.mrb[62].mxu1 }
0x1c98   :  { %v1995_v36 = vmul.f32 0.044715, %v1987_v35  ;;  %v1990_v8 = vadd.f32 %v8255_v4, %v1989_v7  ;;  %v6880_v10 = vpop.f32.mrb[63].mxu1  ;;  %v1993_v34 = vmul.f32 0.5, %v1987_v35 }
0x1c9a   :  { %v1997_v42 = vmul.f32 %v1995_v36, %v1987_v35  ;;  %v1996_v9 = vmul.f32 0.044715, %v1990_v8  ;;  %v1994_v20 = vmul.f32 0.5, %v1990_v8 }
0x1c9c   :  { %v1999_v11 = vmul.f32 %v1997_v42, %v1987_v35  ;;  %v1998_v13 = vmul.f32 %v1996_v9, %v1990_v8 }
0x1c9e   :  { %v2001_v60 = vadd.f32 %v1999_v11, %v1987_v35  ;;  %v2000_v12 = vmul.f32 %v1998_v13, %v1990_v8  ;;  %v2308_v56 = vpop.f32.mrb[64].mxu1 }
0x1c9f   :  { %v6899_v17 = vpop.f32.mrb[65].mxu1  ;;  %v2309_v19 = vadd.f32 %v8262_v63, %v2308_v56 }
0x1ca0   :  { %v2003_v21 = vmul.f32 0.7978846, %v2001_v60  ;;  %v2002_v50 = vadd.f32 %v2000_v12, %v1990_v8  ;;  %v2311_v22 = vpop.f32.mrb[66].mxu1 }
0x1ca1   :  { %v2312_v29 = vadd.f32 %v8262_v63, %v2311_v22  ;;  %v6900_v30 = vpop.f32.mrb[67].mxu1 }
0x1ca2   :  { %7442 = vtanh.f32 %v2003_v21  ;;  %v2004_v31 = vmul.f32 0.7978846, %v2002_v50 }
0x1ca3   :  { %v8266_v32 = vpack.c.bf16 %v2312_v29, %v2309_v19 }
0x1ca4   :  { %7444 = vtanh.f32 %v2004_v31 }
0x1ca5   :  { %2449 = vrot.lane.b32.xlu0 %v8266_v32, %s7658_s29  ;;  %2317 = vrot.lane.b32.xlu1 %v8266_v32, %s7655_s18 }
0x1ca9   :  { %2447 = vrot.lane.b32.xlu1 %v8266_v32, %s7660_s4  ;;  %2368 = vrot.lane.b32.xlu0 %v8109_v14, %s7662_s6 }
0x1cac   :  { %v7443_v33 = vpop.eup %7442 }
0x1cad   :  { %v2007_v15 = vadd.f32 1.0, %v7443_v33  ;;  %2370 = vrot.lane.b32.xlu1 %v8116_v52, %s7662_s6 }
0x1cae   :  { %v7445_v45 = vpop.eup %7444 }
0x1caf   :  { %v2008_v38 = vadd.f32 1.0, %v7445_v45  ;;  %v2009_v37 = vmul.f32 %v2007_v15, %v1993_v34 }
0x1cb1   :  { %v2010_v16 = vmul.f32 %v2008_v38, %v1994_v20 }
0x1cb3   :  { %v2011_v41 = vpack.c.bf16 %v2010_v16, %v2009_v37 }
0x1cb5   :  { %6890 = vmatmul.mubr.msk.bf16.vlgmr.msra.gmra.mrb[52].mxu0 %vm1012_vm5, %v2011_v41  ;;  %v6395_v41 = vcombine.low %v8206_v44, %v8206_v44 }
0x1cb6   :  { %6909 = vmatprep.mubr.msk.bf16.mxu0 %vm7657_vm1, %v7656_v18 }
0x1d17   :  { %v2318_v46 = vpop.permute.xlu1 %2317  ;;  %v2450_v47 = vpop.permute.xlu0 %2449 }
0x1d18   :  { %v2323_v14 = vsel %vm129_vm2, %v2318_v46, 0  ;;  %v2455_v52 = vsel %vm129_vm2, %v2450_v47, 0 }
0x1d19   :  { %6902 = vmatpush3.bf16.xpose.msra.mxu1 %v2323_v14 }
0x1d1a   :  { %6913 = vmatprep.subr.bf16.mxu1 %v7656_v18 }
0x1d1b   :  { %v2448_v24 = vpop.permute.xlu1 %2447  ;;  %v8296_v54 = vpop.permute.xlu0 %2368 }
0x1d1f   :  { %v8298_v58 = vpop.permute.xlu1 %2370 }
0x1d20   :  { %6904 = vmatmul.mubr.msk.bf16.vlgmr.msra.gmra.mrb[68].mxu1 %vm129_vm2, %v8266_v32 }
0x1d21   :  { %6914 = vmatpush3.bf16.xpose.msra.mxu1 %v2455_v52  ;;  %6915 = vmatprep.mubr.msk.bf16.mxu1 %vm7657_vm1, %v7656_v18 }
0x1d22   :  { %6925 = vmatprep.subr.bf16.mxu1 %v7656_v18 }
0x1d28   :  { %6916 = vmatmul.mubr.msk.bf16.vlgmr.msra.gmra.mrb[72].mxu1 %vm129_vm2, %v2448_v24 }
0x1d29   :  { %6927 = vmatprep.mubr.msk.bf16.mxu1 %vm7657_vm1, %v7656_v18 }
0x1d88   :  { %v8292_v48 = vpop.f32.mrb[52].mxu0 }
0x1d89   :  { %v6891_v49 = vpop.f32.mrb[53].mxu0 }
0x1d8a   :  { %v8294_v39 = vpop.f32.mrb[54].mxu0 }
0x1d8b   :  { %v6892_v53 = vpop.f32.mrb[55].mxu0 }
0x1df3   :  { %v2359_v40 = vpop.f32.mrb[68].mxu1 }
0x1df4   :  { %v2366_v55 = vmul.f32 0.35355338, %v2359_v40  ;;  %v6905_v57 = vpop.f32.mrb[69].mxu1 }
0x1df5   :  { %v2362_v59 = vpop.f32.mrb[70].mxu1 }
0x1df6   :  { %v2367_v61 = vmul.f32 0.35355338, %v2362_v59  ;;  %v6906_v62 = vpop.f32.mrb[71].mxu1  ;;  %v2374_v0 = vadd.f32 %v8296_v54, %v2366_v55 }
0x1df8   :  { %v2376_v1 = vsel %vm189_vm3, %v2374_v0, -inf  ;;  %v2375_v2 = vadd.f32 %v8298_v58, %v2367_v61 }
0x1df9   :  { %2377 = vmax.xlane.f32.xlu0 %v2376_v1 }
0x1dfa   :  { %v2379_v3 = vsel %vm189_vm3, %v2375_v2, -inf }
0x1dfb   :  { %2380 = vmax.xlane.f32.xlu1 %v2379_v3  ;;  %v2491_v5 = vpop.f32.mrb[72].mxu1 }
0x1dfc   :  { %v2498_v35 = vmul.f32 0.35355338, %v2491_v5  ;;  %v6917_v6 = vpop.f32.mrb[73].mxu1 }
0x1dfd   :  { %v2494_v7 = vpop.f32.mrb[74].mxu1 }
0x1dfe   :  { %v2500_v36 = vadd.f32 %v2498_v35, %v8296_v54  ;;  %v2499_v8 = vmul.f32 0.35355338, %v2494_v7  ;;  %v6918_v10 = vpop.f32.mrb[75].mxu1 }
0x1e00   :  { %v2501_v42 = vadd.f32 %v2499_v8, %v8298_v58  ;;  %v2502_v9 = vsel %vm189_vm3, %v2500_v36, -inf }
0x1e01   :  { %2503 = vmax.xlane.f32.xlu0 %v2502_v9 }
0x1e02   :  { %v2505_v11 = vsel %vm189_vm3, %v2501_v42, -inf }
0x1e05   :  { %2506 = vmax.xlane.f32.xlu0 %v2505_v11 }
0x1e86   :  { %v2378_v13 = vpop.xlane.xlu0 %2377 }
0x1e87   :  { %v2382_v60 = vsub.f32 %v2374_v0, %v2378_v13 }
0x1e88   :  { %v2381_v12 = vpop.xlane.xlu1 %2380 }
0x1e89   :  { %v2384_v56 = vmul.f32 1.442695, %v2382_v60  ;;  %v2383_v17 = vsub.f32 %v2375_v2, %v2381_v12 }
0x1e8b   :  { %7446 = vpow2.f32 %v2384_v56  ;;  %v2386_v21 = vmul.f32 1.442695, %v2383_v17 }
0x1e8d   :  { %7448 = vpow2.f32 %v2386_v21 }
0x1e8e   :  { %v2504_v50 = vpop.xlane.xlu0 %2503 }
0x1e8f   :  { %v2508_v22 = vsub.f32 %v2500_v36, %v2504_v50 }
0x1e91   :  { %v2510_v19 = vmul.f32 1.442695, %v2508_v22 }
0x1e92   :  { %v2507_v29 = vpop.xlane.xlu0 %2506 }
0x1e93   :  { %7450 = vpow2.f32 %v2510_v19  ;;  %v2509_v30 = vsub.f32 %v2501_v42, %v2507_v29 }
0x1e95   :  { %v7447_v31 = vpop.eup %7446  ;;  %v2512_v33 = vmul.f32 1.442695, %v2509_v30 }
0x1e96   :  { %v2388_v15 = vsel %vm189_vm3, %v7447_v31, 0.0 }
0x1e97   :  { %v7449_v45 = vpop.eup %7448  ;;  %7452 = vpow2.f32 %v2512_v33  ;;  %2389 = vadd.xlane.f32.xlu0 %v2388_v15 }
0x1e98   :  { %v2391_v34 = vsel %vm189_vm3, %v7449_v45, 0.0 }
0x1e99   :  { %2392 = vadd.xlane.f32.xlu1 %v2391_v34 }
0x1e9d   :  { %v7451_v20 = vpop.eup %7450 }
0x1e9e   :  { %v2514_v38 = vsel %vm189_vm3, %v7451_v20, 0.0 }
0x1e9f   :  { %2515 = vadd.xlane.f32.xlu0 %v2514_v38  ;;  %v6397_v38 = vcombine.low %v8201_v43, %v8201_v43 }
0x1ea1   :  { %v7453_v37 = vpop.eup %7452 }
0x1ea2   :  { %v2517_v16 = vsel %vm189_vm3, %v7453_v37, 0.0 }
0x1ea3   :  { %2518 = vadd.xlane.f32.xlu1 %v2517_v16 }
0x1eb4   :  { %2525 = vrot.lane.b32.xlu1 %v8266_v32, %s7661_s5 }
0x1eb5   :  { %2399 = vrot.lane.b32.xlu0 %v8266_v32, %s7659_s30 }
0x1eb8   :  { %2574 = vrot.lane.b32.xlu1 %v6395_v41, %s7662_s6 }
0x1eb9   :  { %2673 = vrot.lane.b32.xlu0 %v8266_v32, %s7663_s7 }
0x1ebc   :  { %2675 = vrot.lane.b32.xlu1 %v8266_v32, %s7664_s8 }
0x1f24   :  { %v2390_v46 = vpop.xlane.xlu0 %2389 }
0x1f25   :  { %7454 = vrcp.f32 %v2390_v46 }
0x1f26   :  { %v2393_v14 = vpop.xlane.xlu1 %2392 }
0x1f27   :  { %7456 = vrcp.f32 %v2393_v14 }
0x1f2c   :  { %v2516_v47 = vpop.xlane.xlu0 %2515 }
0x1f2d   :  { %7458 = vrcp.f32 %v2516_v47 }
0x1f2f   :  { %v7455_v52 = vpop.eup %7454 }
0x1f30   :  { %v2519_v24 = vpop.xlane.xlu1 %2518  ;;  %v2400_v44 = vpop.permute.xlu0 %2399  ;;  %v2395_v53 = vmul.f32 %v7455_v52, %v7447_v31 }
0x1f31   :  { %v7457_v49 = vpop.eup %7456  ;;  %7460 = vrcp.f32 %v2519_v24  ;;  %6908 = vmatpush3.bf16.msra.mxu0 %v2400_v44 }
0x1f32   :  { %v2397_v40 = vmul.f32 %v7457_v49, %v7449_v45  ;;  %6919 = vmatprep.subr.bf16.mxu0 %v7656_v18 }
0x1f34   :  { %v2526_v55 = vpop.permute.xlu1 %2525  ;;  %v2398_v57 = vpack.c.bf16 %v2397_v40, %v2395_v53  ;;  %v2674_v12 = vpop.permute.xlu0 %2673 }
0x1f36   :  { %6910 = vmatmul.mubr.msk.bf16.vlgmr.msra.gmra.mrb[56].mxu0 %vm189_vm3, %v2398_v57 }
0x1f37   :  { %6920 = vmatpush3.bf16.msra.mxu0 %v2526_v55  ;;  %6921 = vmatprep.mubr.msk.bf16.mxu0 %vm7657_vm1, %v7656_v18  ;;  %v7459_v61 = vpop.eup %7458 }
0x1f38   :  { %v2575_v59 = vpop.permute.xlu1 %2574  ;;  %6931 = vmatprep.subr.bf16.mxu0 %v7656_v18  ;;  %v2521_v1 = vmul.f32 %v7459_v61, %v7451_v20 }
0x1f39   :  { %v2580_v62 = vsel %vm393_vm4, %v2575_v59, 0 }
0x1f3a   :  { %6926 = vmatpush3.bf16.msra.mxu1 %v2580_v62 }
0x1f3b   :  { %v7461_v0 = vpop.eup %7460  ;;  %6937 = vmatprep.subr.bf16.mxu1 %v7656_v18 }
0x1f3c   :  { %v2523_v2 = vmul.f32 %v7461_v0, %v7453_v37  ;;  %v2676_v42 = vpop.permute.xlu1 %2675 }
0x1f3d   :  { %v2681_v60 = vsel %vm129_vm2, %v2676_v42, 0 }
0x1f3e   :  { %v2524_v3 = vpack.c.bf16 %v2523_v2, %v2521_v1 }
0x1f40   :  { %6922 = vmatmul.mubr.msk.bf16.vlgmr.msra.gmra.mrb[60].mxu0 %vm189_vm3, %v2524_v3 }
0x1f41   :  { %6933 = vmatprep.mubr.msk.bf16.mxu0 %vm7657_vm1, %v7656_v18 }
0x2009   :  { %v2439_v5 = vpop.f32.mrb[56].mxu0 }
0x200a   :  { %v6911_v35 = vpop.f32.mrb[57].mxu0 }
0x200b   :  { %v2442_v6 = vpop.f32.mrb[58].mxu0 }
0x200c   :  { %v2446_v7 = vpack.c.bf16 %v2442_v6, %v2439_v5  ;;  %v6912_v36 = vpop.f32.mrb[59].mxu0 }
0x2013   :  { %v2565_v8 = vpop.f32.mrb[60].mxu0 }
0x2014   :  { %v6923_v10 = vpop.f32.mrb[61].mxu0 }
0x2015   :  { %v2568_v9 = vpop.f32.mrb[62].mxu0 }
0x2016   :  { %v2572_v11 = vpack.c.bf16 %v2568_v9, %v2565_v8  ;;  %v6924_v13 = vpop.f32.mrb[63].mxu0 }
0x2018   :  { %6928 = vmatmul.mubr.msk.bf16.vlgmr.msra.gmra.mrb[76].mxu1 %vm129_vm2, %v2572_v11 }
0x2019   :  { %6938 = vmatpush3.bf16.xpose.msra.mxu1 %v2681_v60  ;;  %6939 = vmatprep.mubr.msk.bf16.mxu1 %vm7657_vm1, %v7656_v18 }
0x201a   :  { %6949 = vmatprep.subr.bf16.mxu1 %v7656_v18 }
0x2020   :  { %6940 = vmatmul.mubr.msk.bf16.vlgmr.msra.gmra.mrb[80].mxu1 %vm129_vm2, %v2674_v12 }
0x2021   :  { %6951 = vmatprep.mubr.msk.bf16.mxu1 %vm7657_vm1, %v7656_v18 }
0x20eb   :  { %v8341_v56 = vpop.f32.mrb[76].mxu1 }
0x20ec   :  { %v6929_v17 = vpop.f32.mrb[77].mxu1 }
0x20ed   :  { %v8343_v21 = vpop.f32.mrb[78].mxu1 }
0x20ee   :  { %v6930_v50 = vpop.f32.mrb[79].mxu1 }
0x20f3   :  { %v2717_v22 = vpop.f32.mrb[80].mxu1 }
0x20f4   :  { %v2724_v19 = vmul.f32 0.35355338, %v2717_v22  ;;  %v6941_v29 = vpop.f32.mrb[81].mxu1 }
0x20f5   :  { %v2720_v30 = vpop.f32.mrb[82].mxu1 }
0x20f6   :  { %v2726_v31 = vadd.f32 %v2724_v19, %v8296_v54  ;;  %v2725_v33 = vmul.f32 0.35355338, %v2720_v30  ;;  %v6942_v15 = vpop.f32.mrb[83].mxu1 }
0x20f8   :  { %v2727_v45 = vadd.f32 %v2725_v33, %v8298_v58  ;;  %v2728_v34 = vsel %vm189_vm3, %v2726_v31, -inf  ;;  %v6401_v33 = vcombine.low %v8219_v23, %v8219_v23 }
0x20f9   :  { %2729 = vmax.xlane.f32.xlu1 %v2728_v34 }
0x20fa   :  { %v2731_v20 = vsel %vm189_vm3, %v2727_v45, -inf }
0x20fb   :  { %2732 = vmax.xlane.f32.xlu0 %v2731_v20 }
0x210a   :  { %2624 = vrot.lane.b32.xlu1 %v6397_v38, %s7662_s6 }
0x210e   :  { %2853 = vrot.lane.b32.xlu1 %v8266_v32, %s7665_s9 }
0x2112   :  { %2851 = vrot.lane.b32.xlu1 %v8266_v32, %s7666_s10 }
0x2186   :  { %v2730_v37 = vpop.xlane.xlu1 %2729 }
0x2187   :  { %v2734_v16 = vsub.f32 %v2726_v31, %v2730_v37 }
0x2188   :  { %v2733_v41 = vpop.xlane.xlu0 %2732 }
0x2189   :  { %v2736_v46 = vmul.f32 1.442695, %v2734_v16  ;;  %v2735_v14 = vsub.f32 %v2727_v45, %v2733_v41 }
0x218a   :  { %v2625_v47 = vpop.permute.xlu1 %2624 }
0x218b   :  { %7462 = vpow2.f32 %v2736_v46  ;;  %v2738_v52 = vmul.f32 1.442695, %v2735_v14  ;;  %v2630_v24 = vsel %vm393_vm4, %v2625_v47, 0 }
0x218c   :  { %6932 = vmatpush3.bf16.msra.mxu0 %v2630_v24 }
0x218d   :  { %7464 = vpow2.f32 %v2738_v52  ;;  %6943 = vmatprep.subr.bf16.mxu0 %v7656_v18  ;;  %v6405_v52 = vcombine.low %v8224_v51, %v8224_v51 }
0x218e   :  { %v2854_v1 = vpop.permute.xlu1 %2853 }
0x218f   :  { %6934 = vmatmul.mubr.msk.bf16.vlgmr.msra.gmra.mrb[64].mxu0 %vm129_vm2, %v2446_v7  ;;  %v2859_v3 = vsel %vm129_vm2, %v2854_v1, 0 }
0x2190   :  { %6945 = vmatprep.mubr.msk.bf16.mxu0 %vm7657_vm1, %v7656_v18 }
0x2192   :  { %v2852_v5 = vpop.permute.xlu1 %2851 }
0x2195   :  { %v7463_v43 = vpop.eup %7462 }
0x2196   :  { %v2740_v44 = vsel %vm189_vm3, %v7463_v43, 0.0 }
0x2197   :  { %v7465_v49 = vpop.eup %7464  ;;  %2741 = vadd.xlane.f32.xlu0 %v2740_v44 }
0x2198   :  { %v2743_v53 = vsel %vm189_vm3, %v7465_v49, 0.0 }
0x219b   :  { %2744 = vadd.xlane.f32.xlu0 %v2743_v53 }
0x21b1   :  { %2751 = vrot.lane.b32.xlu0 %v8266_v32, %s7667_s11 }
0x2224   :  { %v2742_v40 = vpop.xlane.xlu0 %2741 }
0x2225   :  { %7466 = vrcp.f32 %v2742_v40 }
0x2228   :  { %v2745_v55 = vpop.xlane.xlu0 %2744 }
0x2229   :  { %7468 = vrcp.f32 %v2745_v55 }
0x222c   :  { %v2752_v57 = vpop.permute.xlu0 %2751 }
0x222d   :  { %6944 = vmatpush3.bf16.msra.mxu0 %v2752_v57 }
0x222e   :  { %6955 = vmatprep.subr.bf16.mxu0 %v7656_v18 }
0x222f   :  { %v7467_v59 = vpop.eup %7466 }
0x2230   :  { %v2747_v62 = vmul.f32 %v7467_v59, %v7463_v43 }
0x2233   :  { %v7469_v61 = vpop.eup %7468 }
0x2234   :  { %v2749_v0 = vmul.f32 %v7469_v61, %v7465_v49 }
0x2236   :  { %v2750_v2 = vpack.c.bf16 %v2749_v0, %v2747_v62 }
0x2238   :  { %6946 = vmatmul.mubr.msk.bf16.vlgmr.msra.gmra.mrb[68].mxu0 %vm189_vm3, %v2750_v2 }
0x2239   :  { %6956 = vmatpush3.bf16.xpose.msra.mxu0 %v2859_v3  ;;  %6957 = vmatprep.mubr.msk.bf16.mxu0 %vm7657_vm1, %v7656_v18 }
0x223a   :  { %6967 = vmatprep.subr.bf16.mxu0 %v7656_v18 }
0x2240   :  { %6958 = vmatmul.mubr.msk.bf16.vlgmr.msra.gmra.mrb[72].mxu0 %vm129_vm2, %v2852_v5 }
0x2241   :  { %6969 = vmatprep.mubr.msk.bf16.mxu0 %vm7657_vm1, %v7656_v18 }
0x2262   :  { %v2666_v35 = vpop.f32.mrb[64].mxu0 }
0x2263   :  { %v8375_v6 = vadd.f32 %v2666_v35, %v8341_v56  ;;  %v6935_v7 = vpop.f32.mrb[65].mxu0 }
0x2264   :  { %v2669_v36 = vpop.f32.mrb[66].mxu0 }
0x2265   :  { %v8378_v8 = vadd.f32 %v2669_v36, %v8343_v21  ;;  %v6936_v10 = vpop.f32.mrb[67].mxu0 }
0x230b   :  { %v2791_v42 = vpop.f32.mrb[68].mxu0 }
0x230c   :  { %v6947_v9 = vpop.f32.mrb[69].mxu0 }
0x230d   :  { %v2794_v11 = vpop.f32.mrb[70].mxu0 }
0x230e   :  { %v2798_v13 = vpack.c.bf16 %v2794_v11, %v2791_v42  ;;  %v6948_v60 = vpop.f32.mrb[71].mxu0 }
0x2313   :  { %v2895_v12 = vpop.f32.mrb[72].mxu0 }
0x2314   :  { %v2902_v17 = vmul.f32 0.35355338, %v2895_v12  ;;  %v6959_v50 = vpop.f32.mrb[73].mxu0 }
0x2315   :  { %v2898_v22 = vpop.f32.mrb[74].mxu0 }
0x2316   :  { %v2904_v19 = vadd.f32 %v2902_v17, %v8296_v54  ;;  %v2903_v29 = vmul.f32 0.35355338, %v2898_v22  ;;  %v6960_v56 = vpop.f32.mrb[75].mxu0 }
0x2318   :  { %v2905_v30 = vadd.f32 %v2903_v29, %v8298_v58  ;;  %v2906_v31 = vsel %vm189_vm3, %v2904_v19, -inf }
0x2319   :  { %2907 = vmax.xlane.f32.xlu1 %v2906_v31 }
0x231a   :  { %v2909_v21 = vsel %vm189_vm3, %v2905_v30, -inf }
0x231b   :  { %2910 = vmax.xlane.f32.xlu0 %v2909_v21 }
0x232a   :  { %2800 = vrot.lane.b32.xlu1 %v6401_v33, %s7662_s6 }
0x232e   :  { %2978 = vrot.lane.b32.xlu1 %v6405_v52, %s7662_s6 }
0x2332   :  { %3030 = vrot.lane.b32.xlu1 %v8262_v63, %s7662_s6 }
0x23a6   :  { %v2908_v15 = vpop.xlane.xlu1 %2907 }
0x23a7   :  { %v2912_v45 = vsub.f32 %v2904_v19, %v2908_v15 }
0x23a8   :  { %v2911_v34 = vpop.xlane.xlu0 %2910 }
0x23a9   :  { %v2914_v20 = vmul.f32 1.442695, %v2912_v45  ;;  %v2913_v38 = vsub.f32 %v2905_v30, %v2911_v34 }
0x23aa   :  { %v2801_v37 = vpop.permute.xlu1 %2800 }
0x23ab   :  { %7470 = vpow2.f32 %v2914_v20  ;;  %v2916_v16 = vmul.f32 1.442695, %v2913_v38  ;;  %v2806_v41 = vsel %vm393_vm4, %v2801_v37, 0 }
0x23ac   :  { %6950 = vmatpush3.bf16.msra.mxu1 %v2806_v41 }
0x23ad   :  { %7472 = vpow2.f32 %v2916_v16  ;;  %6961 = vmatprep.subr.bf16.mxu1 %v7656_v18 }
0x23ae   :  { %v2979_v51 = vpop.permute.xlu1 %2978 }
0x23af   :  { %6952 = vmatmul.mubr.msk.bf16.vlgmr.msra.gmra.mrb[84].mxu1 %vm129_vm2, %v2798_v13  ;;  %v2984_v63 = vsel %vm393_vm4, %v2979_v51, 0 }
0x23b0   :  { %6963 = vmatprep.mubr.msk.bf16.mxu1 %vm7657_vm1, %v7656_v18  ;;  %6968 = vmatpush3.bf16.msra.mxu0 %v2984_v63 }
0x23b1   :  { %6981 = vmatprep.subr.bf16.mxu0 %v7656_v18 }
0x23b2   :  { %v3031_v10 = vpop.permute.xlu1 %3030 }
0x23b5   :  { %v7471_v23 = vpop.eup %7470 }
0x23b6   :  { %v2918_v46 = vsel %vm189_vm3, %v7471_v23, 0.0 }
0x23b7   :  { %v7473_v14 = vpop.eup %7472  ;;  %2919 = vadd.xlane.f32.xlu0 %v2918_v46  ;;  %v8458_v46 = vld [vmem:[%s9204_s0 + $0x3c] sm:$0xf] }
0x23b8   :  { %v2921_v47 = vsel %vm189_vm3, %v7473_v14, 0.0 }
0x23bb   :  { %2922 = vadd.xlane.f32.xlu0 %v2921_v47 }
0x23d1   :  { %2929 = vrot.lane.b32.xlu0 %v8266_v32, %s7668_s12 }
0x2444   :  { %v2920_v24 = vpop.xlane.xlu0 %2919 }
0x2445   :  { %7474 = vrcp.f32 %v2920_v24 }
0x2448   :  { %v2923_v43 = vpop.xlane.xlu0 %2922 }
0x2449   :  { %7476 = vrcp.f32 %v2923_v43 }
0x244c   :  { %v2930_v44 = vpop.permute.xlu0 %2929 }
0x244d   :  { %6962 = vmatpush3.bf16.msra.mxu1 %v2930_v44 }
0x244e   :  { %6973 = vmatprep.subr.bf16.mxu1 %v7656_v18 }
0x244f   :  { %v7475_v49 = vpop.eup %7474 }
0x2450   :  { %v2925_v40 = vmul.f32 %v7475_v49, %v7471_v23  ;;  %v8453_v23 = vld [vmem:[%s9204_s0 + $0x38] sm:$0xf] }
0x2453   :  { %v7477_v53 = vpop.eup %7476 }
0x2454   :  { %v2927_v32 = vmul.f32 %v7477_v53, %v7473_v14  ;;  %v6410_v14 = vcombine.low %v8453_v23, %v8458_v46 }
0x2456   :  { %v2928_v55 = vpack.c.bf16 %v2927_v32, %v2925_v40 }
0x2458   :  { %6964 = vmatmul.mubr.msk.bf16.vlgmr.msra.gmra.mrb[88].mxu1 %vm189_vm3, %v2928_v55 }
0x2459   :  { %6977 = vmatprep.mubr.msk.bf16.mxu1 %vm7657_vm1, %v7656_v18 }
0x2482   :  { %v2842_v57 = vpop.f32.mrb[84].mxu1 }
0x2483   :  { %v2849_v59 = vadd.f32 %v2842_v57, %v8375_v6  ;;  %v6953_v61 = vpop.f32.mrb[85].mxu1 }
0x2484   :  { %v2845_v62 = vpop.f32.mrb[86].mxu1  ;;  %v6385_v61 = vld [vmem:[%s9205_s1 + $0xe] ss:$0 sm:$0xff] }
0x2485   :  { %v2850_v0 = vadd.f32 %v2845_v62, %v8378_v8  ;;  %v6954_v1 = vpop.f32.mrb[87].mxu1  ;;  %v6407_v62 = vld [vmem:[%s9205_s1 + $0x10] ss:$0 sm:$0xff] }
0x252b   :  { %v2969_v2 = vpop.f32.mrb[88].mxu1 }
0x252c   :  { %v6965_v3 = vpop.f32.mrb[89].mxu1 }
0x252d   :  { %v2972_v5 = vpop.f32.mrb[90].mxu1 }
0x252e   :  { %v2976_v35 = vpack.c.bf16 %v2972_v5, %v2969_v2  ;;  %v6966_v7 = vpop.f32.mrb[91].mxu1 }
0x2530   :  { %6970 = vmatmul.mubr.msk.bf16.vlgmr.msra.gmra.mrb[76].mxu0 %vm129_vm2, %v2976_v35 }
0x2531   :  { %6985 = vmatprep.mubr.msk.bf16.mxu0 %vm7657_vm1, %v7656_v18 }
0x2603   :  { %v3020_v36 = vpop.f32.mrb[76].mxu0 }
0x2604   :  { %v3027_v42 = vadd.f32 %v3020_v36, %v2849_v59  ;;  %v6971_v9 = vpop.f32.mrb[77].mxu0 }
0x2605   :  { %v3023_v6 = vpop.f32.mrb[78].mxu0 }
0x2606   :  { %v3033_v11 = vadd.f32 %v3031_v10, %v3027_v42  ;;  %v3028_v13 = vadd.f32 %v3023_v6, %v2850_v0  ;;  %v6972_v60 = vpop.f32.mrb[79].mxu0  ;;  %v8487_v0 = vld [vmem:[%s9205_s1 + $0x3] ss:$0 sm:$0xff] }
0x2608   :  { %v3034_v8 = vadd.f32 %v3031_v10, %v3028_v13  ;;  %3037 = vrot.lane.b32.xlu1 %v3033_v11, %s7662_s6 }
0x260a   :  { %3039 = vrot.lane.b32.xlu0 %v3034_v8, %s7662_s6 }
0x267a   :  { %v3038_v12 = vpop.permute.xlu1 %3037 }
0x267b   :  { %v8415_v17 = vadd.f32 %v3038_v12, %v8158_v27 }
0x267c   :  { %v3040_v50 = vpop.permute.xlu0 %3039 }
0x267d   :  { %v8418_v22 = vadd.f32 %v3040_v50, %v8162_v28  ;;  %3048 = vrot.lane.b32.xlu1 %v8415_v17, %s7655_s18 }
0x267f   :  { %3050 = vrot.lane.b32.xlu0 %v8418_v22, %s7655_s18 }
0x2681   :  { %2037 = vrot.lane.b32.xlu1 %v8255_v4, %s7659_s30 }
0x26ef   :  { %v3049_v19 = vpop.permute.xlu1 %3048 }
0x26f0   :  { %v3054_v29 = vsel %vm19_vm0, %v3049_v19, 0.0 }
0x26f1   :  { %3055 = vadd.xlane.f32.xlu0 %v3054_v29  ;;  %v3051_v56 = vpop.permute.xlu0 %3050 }
0x26f2   :  { %v3057_v27 = vsel %vm19_vm0, %v3051_v56, 0.0 }
0x26f3   :  { %v2038_v30 = vpop.permute.xlu1 %2037  ;;  %3058 = vadd.xlane.f32.xlu1 %v3057_v27 }
0x26f4   :  { %v2078_v28 = vadd.f32 %v8292_v48, %v2038_v30  ;;  %v2081_v31 = vadd.f32 %v8294_v39, %v2038_v30 }
0x26f6   :  { %v2085_v21 = vadd.f32 %v2078_v28, %v8208_v25  ;;  %v2086_v15 = vadd.f32 %v2081_v31, %v8210_v26  ;;  %v8441_v25 = vld [vmem:[%s9204_s0 + $0x30] sm:$0xf]  ;;  %v8446_v26 = vld [vmem:[%s9204_s0 + $0x34] sm:$0xf] }
0x26f7   :  { %v6409_v41 = vcombine.low %v8441_v25, %v8446_v26 }
0x26f8   :  { %v2087_v33 = vsel %vm19_vm0, %v2085_v21, 0.0  ;;  %v2090_v4 = vsel %vm19_vm0, %v2086_v15, 0.0 }
0x26f9   :  { %2088 = vadd.xlane.f32.xlu0 %v2087_v33  ;;  %6974 = vmatpush3.bf16.msra.mxu1 %v6409_v41 }
0x26fa   :  { %6975 = vmatprep.subr.bf16.mxu1 %v7656_v18 }
0x26fd   :  { %2091 = vadd.xlane.f32.xlu0 %v2090_v4  ;;  %6976 = vmatpush3.bf16.msra.mxu1 %v6410_v14 }
0x26fe   :  { %6989 = vmatprep.subr.bf16.mxu1 %v7656_v18 }
0x277e   :  { %v3056_v45 = vpop.xlane.xlu0 %3055 }
0x277f   :  { %v3060_v34 = vmul.f32 0.03125, %v3056_v45 }
0x2780   :  { %v3059_v20 = vpop.xlane.xlu1 %3058 }
0x2781   :  { %v3062_v38 = vsub.f32 %v8415_v17, %v3060_v34  ;;  %v3061_v37 = vmul.f32 0.03125, %v3059_v20 }
0x2783   :  { %v3064_v16 = vmul.f32 %v3062_v38, %v3062_v38  ;;  %v3063_v48 = vsub.f32 %v8418_v22, %v3061_v37 }
0x2785   :  { %v3065_v39 = vmul.f32 %v3063_v48, %v3063_v48  ;;  %3068 = vrot.lane.b32.xlu0 %v3064_v16, %s7655_s18 }
0x2786   :  { %v2089_v47 = vpop.xlane.xlu0 %2088 }
0x2787   :  { %3070 = vrot.lane.b32.xlu1 %v3065_v39, %s7655_s18  ;;  %v2093_v43 = vmul.f32 0.03125, %v2089_v47 }
0x2789   :  { %v8464_v49 = vsub.f32 %v2085_v21, %v2093_v43 }
0x278a   :  { %v2092_v52 = vpop.xlane.xlu0 %2091 }
0x278b   :  { %v2094_v24 = vmul.f32 0.03125, %v2092_v52  ;;  %v2097_v63 = vmul.f32 %v8464_v49, %v8464_v49 }
0x278d   :  { %v2096_v44 = vsub.f32 %v2086_v15, %v2094_v24  ;;  %v2099_v59 = vsel %vm19_vm0, %v2097_v63, 0.0 }
0x278f   :  { %v2098_v32 = vmul.f32 %v2096_v44, %v2096_v44 }
0x2791   :  { %v2102_v57 = vsel %vm19_vm0, %v2098_v32, 0.0 }
0x27f7   :  { %v3069_v53 = vpop.permute.xlu0 %3068 }
0x27f8   :  { %v3074_v40 = vsel %vm19_vm0, %v3069_v53, 0.0 }
0x27f9   :  { %v3071_v55 = vpop.permute.xlu1 %3070  ;;  %3075 = vadd.xlane.f32.xlu1 %v3074_v40 }
0x27fa   :  { %v3077_v51 = vsel %vm19_vm0, %v3071_v55, 0.0 }
0x27fb   :  { %3078 = vadd.xlane.f32.xlu0 %v3077_v51 }
0x27fd   :  { %2103 = vadd.xlane.f32.xlu1 %v2102_v57 }
0x27ff   :  { %2100 = vadd.xlane.f32.xlu0 %v2099_v59 }
0x280e   :  { %2120 = vrot.lane.b32.xlu1 %v6385_v61, %s7655_s18 }
0x2812   :  { %3191 = vrot.lane.b32.xlu1 %v6410_v14, %s7655_s18 }
0x2815   :  { %3189 = vrot.lane.b32.xlu0 %v6409_v41, %s7655_s18 }
0x2816   :  { %3088 = vrot.lane.b32.xlu1 %v3062_v38, %s7655_s18 }
0x2819   :  { %3090 = vrot.lane.b32.xlu0 %v3063_v48, %s7655_s18 }
0x281a   :  { %3117 = vrot.lane.b32.xlu1 %v6407_v62, %s7655_s18 }
0x281d   :  { %3196 = vrot.lane.b32.xlu0 %v8487_v0, %s7655_s18 }
0x2886   :  { %v3076_v1 = vpop.xlane.xlu1 %3075 }
0x2887   :  { %v3080_v2 = vmul.f32 0.032258064, %v3076_v1 }
0x2888   :  { %v3079_v3 = vpop.xlane.xlu0 %3078 }
0x2889   :  { %7478 = vrsqrt.f32 %v3080_v2  ;;  %v3081_v5 = vmul.f32 0.032258064, %v3079_v3  ;;  %vm3098_vm10 = vcmp.eq.f32.partialorder %v3080_v2, inf  ;;  %v3101_v50 = vand.u32 2147483648, %v3080_v2 }
0x288a   :  { %v2104_v35 = vpop.xlane.xlu1 %2103  ;;  %vm3100_vm11 = vcmp.eq.f32.partialorder %v3080_v2, 0.0 }
0x288b   :  { %7480 = vrsqrt.f32 %v3081_v5  ;;  %v2106_v7 = vmul.f32 0.03125, %v2104_v35  ;;  %vm3105_vm12 = vcmp.eq.f32.partialorder %v3081_v5, inf  ;;  %v3108_v56 = vand.u32 2147483648, %v3081_v5  ;;  %v7629_v35 = vld [vmem:[%s9206_s2] sm:$0xff] }
0x288c   :  { %v2101_v36 = vpop.xlane.xlu0 %2100  ;;  %vm3107_vm13 = vcmp.eq.f32.partialorder %v3081_v5, 0.0 }
0x288d   :  { %v2108_v10 = vadd.f32 1e-12, %v2106_v7  ;;  %v2105_v42 = vmul.f32 0.03125, %v2101_v36 }
0x288e   :  { %v2121_v9 = vpop.permute.xlu1 %2120 }
0x288f   :  { %7482 = vrsqrt.f32 %v2108_v10  ;;  %v2107_v6 = vadd.f32 1e-12, %v2105_v42 }
0x2890   :  { %v3190_v11 = vpop.permute.xlu0 %3189 }
0x2891   :  { %7484 = vrsqrt.f32 %v2107_v6  ;;  %6982 = vmatpush3.bf16.msra.mxu0 %v3190_v11 }
0x2892   :  { %6983 = vmatprep.subr.bf16.mxu0 %v7656_v18  ;;  %v3192_v8 = vpop.permute.xlu1 %3191 }
0x2893   :  { %v7479_v13 = vpop.eup %7478 }
0x2894   :  { %v3097_v60 = vmul.f32 %v7479_v13, %v3080_v2  ;;  %v3091_v39 = vpop.permute.xlu0 %3090 }
0x2895   :  { %v7481_v12 = vpop.eup %7480  ;;  %6984 = vmatpush3.bf16.msra.mxu0 %v3192_v8  ;;  %v3095_v47 = vmul.f32 %v6407_v62, %v3091_v39 }
0x2896   :  { %v3104_v19 = vmul.f32 %v7481_v12, %v3081_v5  ;;  %v3099_v29 = vsel %vm3098_vm10, %v3080_v2, %v3097_v60  ;;  %6995 = vmatprep.subr.bf16.mxu0 %v7656_v18  ;;  %v3089_v16 = vpop.permute.xlu1 %3088 }
0x2897   :  { %v3102_v27 = vsel %vm3100_vm11, %v3101_v50, %v3099_v29  ;;  %v3094_v41 = vmul.f32 %v6407_v62, %v3089_v16 }
0x2898   :  { %v3106_v30 = vsel %vm3105_vm12, %v3081_v5, %v3104_v19  ;;  %v3110_v28 = vadd.f32 1e-06, %v3102_v27  ;;  %v3197_v32 = vpop.permute.xlu0 %3196 }
0x2899   :  { %v7483_v31 = vpop.eup %7482  ;;  %v3109_v21 = vsel %vm3107_vm13, %v3108_v56, %v3106_v30 }
0x289a   :  { %v2112_v33 = vmul.f32 %v7483_v31, %v2096_v44  ;;  %v3111_v15 = vadd.f32 1e-06, %v3109_v21  ;;  %7486 = vrcp.f32 %v3110_v28  ;;  %v3118_v43 = vpop.permute.xlu1 %3117 }
0x289b   :  { %v7485_v4 = vpop.eup %7484 }
0x289c   :  { %v2118_v45 = vmul.f32 %v6385_v61, %v2112_v33  ;;  %v2111_v34 = vmul.f32 %v7485_v4, %v8464_v49  ;;  %7488 = vrcp.f32 %v3111_v15 }
0x289e   :  { %v2117_v20 = vmul.f32 %v6385_v61, %v2111_v34  ;;  %v2124_v37 = vadd.f32 %v2121_v9, %v2118_v45 }
0x28a0   :  { %v2123_v38 = vadd.f32 %v2121_v9, %v2117_v20  ;;  %v7630_v9 = vld [vmem:[%s9206_s2 + $0x8] sm:$0xff] }
0x28a2   :  { %v8494_v48 = vpack.c.bf16 %v2124_v37, %v2123_v38 }
0x28a4   :  { %v7487_v14 = vpop.eup %7486  ;;  %6986 = vmatmul.mubr.msk.bf16.vlgmr.msra.gmra.mrb[80].mxu0 %vm19_vm0, %v8494_v48 }
0x28a5   :  { %v3113_v52 = vmul.f32 %v7487_v14, %v3094_v41  ;;  %6997 = vmatprep.mubr.msk.bf16.mxu0 %vm7657_vm1, %v7656_v18 }
0x28a6   :  { %v7489_v24 = vpop.eup %7488 }
0x28a7   :  { %v3115_v44 = vmul.f32 %v7489_v24, %v3095_v47  ;;  %v3120_v49 = vadd.f32 %v3118_v43, %v3113_v52 }
0x28a9   :  { %v3121_v53 = vadd.f32 %v3118_v43, %v3115_v44 }
0x28ab   :  { %v3127_v40 = vpack.c.bf16 %v3121_v53, %v3120_v49 }
0x28ad   :  { %6978 = vmatmul.mubr.msk.bf16.vlgmr.msra.gmra.mrb[92].mxu1 %vm19_vm0, %v3127_v40 }
0x28ae   :  { %6991 = vmatprep.mubr.msk.bf16.mxu1 %vm7657_vm1, %v7656_v18 }
0x2977   :  { %v3236_v55 = vpop.f32.mrb[80].mxu0 }
0x2978   :  { %v6987_v51 = vpop.f32.mrb[81].mxu0  ;;  %v3237_v57 = vadd.f32 %v3236_v55, %v3197_v32 }
0x2979   :  { %v3239_v63 = vpop.f32.mrb[82].mxu0 }
0x297a   :  { %v3240_v59 = vadd.f32 %v3239_v63, %v3197_v32  ;;  %v6988_v61 = vpop.f32.mrb[83].mxu0 }
0x297c   :  { %v8503_v62 = vpack.c.bf16 %v3240_v59, %v3237_v57 }
0x297e   :  { %3377 = vrot.lane.b32.xlu1 %v8503_v62, %s7660_s4  ;;  %v3249_v1 = vsel %vm129_vm2, %v8503_v62, 0 }
0x297f   :  { %6990 = vmatpush3.bf16.xpose.msra.mxu1 %v3249_v1 }
0x2980   :  { %v3181_v2 = vpop.f32.mrb[92].mxu1  ;;  %7001 = vmatprep.subr.bf16.mxu1 %v7656_v18 }
0x2981   :  { %v6979_v3 = vpop.f32.mrb[93].mxu1  ;;  %v3182_v7 = vadd.f32 %v8487_v0, %v3181_v2 }
0x2982   :  { %v3184_v5 = vpop.f32.mrb[94].mxu1  ;;  %3294 = vrot.lane.b32.xlu1 %v7629_v35, %s7667_s11 }
0x2983   :  { %v3185_v36 = vadd.f32 %v8487_v0, %v3184_v5  ;;  %v6980_v10 = vpop.f32.mrb[95].mxu1  ;;  %v6417_v5 = vcombine.low %v8446_v26, %v8446_v26 }
0x2985   :  { %v8516_v42 = vpack.c.bf16 %v3185_v36, %v3182_v7 }
0x2987   :  { %3375 = vrot.lane.b32.xlu0 %v8516_v42, %s7660_s4  ;;  %6992 = vmatmul.mubr.msk.bf16.vlgmr.msra.gmra.mrb[96].mxu1 %vm129_vm2, %v8516_v42 }
0x2988   :  { %7003 = vmatprep.mubr.msk.bf16.mxu1 %vm7657_vm1, %v7656_v18 }
0x298b   :  { %3296 = vrot.lane.b32.xlu0 %v7630_v9, %s7667_s11 }
0x29f0   :  { %v3378_v6 = vpop.permute.xlu1 %3377 }
0x29f1   :  { %v3383_v11 = vsel %vm129_vm2, %v3378_v6, 0 }
0x29f2   :  { %7002 = vmatpush3.bf16.xpose.msra.mxu1 %v3383_v11 }
0x29f3   :  { %7013 = vmatprep.subr.bf16.mxu1 %v7656_v18 }
0x29f4   :  { %v8533_v8 = vpop.permute.xlu1 %3294 }
0x29f9   :  { %v3376_v13 = vpop.permute.xlu0 %3375 }
0x29fa   :  { %7004 = vmatmul.mubr.msk.bf16.vlgmr.msra.gmra.mrb[100].mxu1 %vm129_vm2, %v3376_v13 }
0x29fb   :  { %7015 = vmatprep.mubr.msk.bf16.mxu1 %vm7657_vm1, %v7656_v18 }
0x29fd   :  { %v8535_v29 = vpop.permute.xlu0 %3296 }
0x2a5a   :  { %v3285_v60 = vpop.f32.mrb[96].mxu1 }
0x2a5b   :  { %v3292_v12 = vmul.f32 0.35355338, %v3285_v60  ;;  %v6993_v50 = vpop.f32.mrb[97].mxu1 }
0x2a5c   :  { %v3288_v19 = vpop.f32.mrb[98].mxu1 }
0x2a5d   :  { %v3293_v56 = vmul.f32 0.35355338, %v3288_v19  ;;  %v6994_v27 = vpop.f32.mrb[99].mxu1  ;;  %v3300_v30 = vadd.f32 %v8533_v8, %v3292_v12 }
0x2a5f   :  { %v3302_v28 = vsel %vm189_vm3, %v3300_v30, -inf  ;;  %v3301_v31 = vadd.f32 %v8535_v29, %v3293_v56 }
0x2a60   :  { %3303 = vmax.xlane.f32.xlu1 %v3302_v28 }
0x2a61   :  { %v3305_v21 = vsel %vm189_vm3, %v3301_v31, -inf }
0x2a62   :  { %3306 = vmax.xlane.f32.xlu0 %v3305_v21 }
0x2acd   :  { %v3419_v33 = vpop.f32.mrb[100].mxu1 }
0x2ace   :  { %v3426_v15 = vmul.f32 0.35355338, %v3419_v33  ;;  %v7005_v4 = vpop.f32.mrb[101].mxu1 }
0x2acf   :  { %v3422_v45 = vpop.f32.mrb[102].mxu1 }
0x2ad0   :  { %v3428_v34 = vadd.f32 %v3426_v15, %v8533_v8  ;;  %v3427_v20 = vmul.f32 0.35355338, %v3422_v45  ;;  %v7006_v38 = vpop.f32.mrb[103].mxu1 }
0x2ad2   :  { %v3429_v37 = vadd.f32 %v3427_v20, %v8535_v29  ;;  %v3430_v16 = vsel %vm189_vm3, %v3428_v34, -inf }
0x2ad3   :  { %3431 = vmax.xlane.f32.xlu0 %v3430_v16 }
0x2ad4   :  { %v3433_v39 = vsel %vm189_vm3, %v3429_v37, -inf }
0x2ad7   :  { %3434 = vmax.xlane.f32.xlu0 %v3433_v39 }
0x2aed   :  { %v3304_v41 = vpop.xlane.xlu1 %3303 }
0x2aee   :  { %v3308_v14 = vsub.f32 %v3300_v30, %v3304_v41 }
0x2aef   :  { %v3307_v47 = vpop.xlane.xlu0 %3306 }
0x2af0   :  { %v3310_v52 = vmul.f32 1.442695, %v3308_v14  ;;  %v3309_v24 = vsub.f32 %v3301_v31, %v3307_v47 }
0x2af2   :  { %7490 = vpow2.f32 %v3310_v52  ;;  %v3312_v43 = vmul.f32 1.442695, %v3309_v24 }
0x2af4   :  { %7492 = vpow2.f32 %v3312_v43 }
0x2afc   :  { %v7491_v44 = vpop.eup %7490 }
0x2afd   :  { %v3314_v49 = vsel %vm189_vm3, %v7491_v44, 0.0 }
0x2afe   :  { %v7493_v53 = vpop.eup %7492  ;;  %3315 = vadd.xlane.f32.xlu1 %v3314_v49 }
0x2aff   :  { %v3317_v40 = vsel %vm189_vm3, %v7493_v53, 0.0 }
0x2b00   :  { %3318 = vadd.xlane.f32.xlu0 %v3317_v40 }
0x2b60   :  { %v3432_v32 = vpop.xlane.xlu0 %3431 }
0x2b61   :  { %v3436_v55 = vsub.f32 %v3428_v34, %v3432_v32 }
0x2b63   :  { %v3438_v51 = vmul.f32 1.442695, %v3436_v55 }
0x2b64   :  { %v3435_v63 = vpop.xlane.xlu0 %3434 }
0x2b65   :  { %7494 = vpow2.f32 %v3438_v51  ;;  %v3437_v57 = vsub.f32 %v3429_v37, %v3435_v63 }
0x2b67   :  { %v3440_v59 = vmul.f32 1.442695, %v3437_v57 }
0x2b69   :  { %7496 = vpow2.f32 %v3440_v59 }
0x2b6f   :  { %v7495_v61 = vpop.eup %7494 }
0x2b70   :  { %v3442_v1 = vsel %vm189_vm3, %v7495_v61, 0.0 }
0x2b71   :  { %3443 = vadd.xlane.f32.xlu1 %v3442_v1 }
0x2b73   :  { %v7497_v2 = vpop.eup %7496 }
0x2b74   :  { %v3445_v3 = vsel %vm189_vm3, %v7497_v2, 0.0 }
0x2b75   :  { %3446 = vadd.xlane.f32.xlu0 %v3445_v3 }
0x2b82   :  { %3326 = vrot.lane.b32.xlu1 %v8503_v62, %s7655_s18 }
0x2b86   :  { %3502 = vrot.lane.b32.xlu1 %v6417_v5, %s7662_s6 }
0x2b8a   :  { %3603 = vrot.lane.b32.xlu1 %v8503_v62, %s7663_s7 }
0x2b8b   :  { %3453 = vrot.lane.b32.xlu0 %v8503_v62, %s7658_s29  ;;  %v3316_v7 = vpop.xlane.xlu1 %3315 }
0x2b8d   :  { %v3319_v35 = vpop.xlane.xlu0 %3318 }
0x2b8e   :  { %3601 = vrot.lane.b32.xlu1 %v8516_v42, %s7663_s7  ;;  %7498 = vrcp.f32 %v3319_v35 }
0x2b8f   :  { %7500 = vrcp.f32 %v3316_v7 }
0x2b98   :  { %v7499_v36 = vpop.eup %7498 }
0x2b99   :  { %v7501_v9 = vpop.eup %7500  ;;  %v3323_v6 = vmul.f32 %v7499_v36, %v7493_v53 }
0x2b9a   :  { %v3321_v26 = vmul.f32 %v7501_v9, %v7491_v44 }
0x2b9c   :  { %v3324_v60 = vpack.c.bf16 %v3323_v6, %v3321_v26  ;;  %v6419_v6 = vcombine.low %v8441_v25, %v8441_v25 }
0x2bfe   :  { %v3444_v10 = vpop.xlane.xlu1 %3443 }
0x2bff   :  { %7502 = vrcp.f32 %v3444_v10 }
0x2c02   :  { %v3327_v11 = vpop.permute.xlu1 %3326  ;;  %v3447_v13 = vpop.xlane.xlu0 %3446 }
0x2c03   :  { %7504 = vrcp.f32 %v3447_v13  ;;  %6996 = vmatpush3.bf16.msra.mxu0 %v3327_v11 }
0x2c04   :  { %7007 = vmatprep.subr.bf16.mxu0 %v7656_v18 }
0x2c06   :  { %v3503_v12 = vpop.permute.xlu1 %3502  ;;  %6998 = vmatmul.mubr.msk.bf16.vlgmr.msra.gmra.mrb[84].mxu0 %vm189_vm3, %v3324_v60  ;;  %v3454_v50 = vpop.permute.xlu0 %3453 }
0x2c07   :  { %v3508_v19 = vsel %vm393_vm4, %v3503_v12, 0  ;;  %7008 = vmatpush3.bf16.msra.mxu0 %v3454_v50  ;;  %7009 = vmatprep.mubr.msk.bf16.mxu0 %vm7657_vm1, %v7656_v18 }
0x2c08   :  { %7014 = vmatpush3.bf16.msra.mxu1 %v3508_v19  ;;  %7019 = vmatprep.subr.bf16.mxu0 %v7656_v18 }
0x2c09   :  { %7025 = vmatprep.subr.bf16.mxu1 %v7656_v18  ;;  %v7503_v56 = vpop.eup %7502 }
0x2c0a   :  { %v3449_v30 = vmul.f32 %v7503_v56, %v7495_v61  ;;  %v3604_v38 = vpop.permute.xlu1 %3603 }
0x2c0b   :  { %v3609_v41 = vsel %vm129_vm2, %v3604_v38, 0 }
0x2c0d   :  { %v7505_v27 = vpop.eup %7504 }
0x2c0e   :  { %v3451_v28 = vmul.f32 %v7505_v27, %v7497_v2  ;;  %v3602_v14 = vpop.permute.xlu1 %3601 }
0x2c10   :  { %v3452_v31 = vpack.c.bf16 %v3451_v28, %v3449_v30 }
0x2c12   :  { %7010 = vmatmul.mubr.msk.bf16.vlgmr.msra.gmra.mrb[88].mxu0 %vm189_vm3, %v3452_v31 }
0x2c13   :  { %7021 = vmatprep.mubr.msk.bf16.mxu0 %vm7657_vm1, %v7656_v18 }
0x2cd9   :  { %v8570_v21 = vpop.f32.mrb[84].mxu0 }
0x2cda   :  { %v6999_v33 = vpop.f32.mrb[85].mxu0 }
0x2cdb   :  { %v8572_v15 = vpop.f32.mrb[86].mxu0 }
0x2cdc   :  { %v3373_v4 = vpack.c.bf16 %v8572_v15, %v8570_v21  ;;  %v7000_v45 = vpop.f32.mrb[87].mxu0 }
0x2ce5   :  { %v3493_v34 = vpop.f32.mrb[88].mxu0 }
0x2ce6   :  { %v7011_v20 = vpop.f32.mrb[89].mxu0 }
0x2ce7   :  { %v3496_v37 = vpop.f32.mrb[90].mxu0 }
0x2ce8   :  { %v3500_v16 = vpack.c.bf16 %v3496_v37, %v3493_v34  ;;  %v7012_v39 = vpop.f32.mrb[91].mxu0 }
0x2cea   :  { %7016 = vmatmul.mubr.msk.bf16.vlgmr.msra.gmra.mrb[104].mxu1 %vm129_vm2, %v3500_v16 }
0x2ceb   :  { %7026 = vmatpush3.bf16.xpose.msra.mxu1 %v3609_v41  ;;  %7027 = vmatprep.mubr.msk.bf16.mxu1 %vm7657_vm1, %v7656_v18 }
0x2cec   :  { %7037 = vmatprep.subr.bf16.mxu1 %v7656_v18 }
0x2cf2   :  { %7028 = vmatmul.mubr.msk.bf16.vlgmr.msra.gmra.mrb[108].mxu1 %vm129_vm2, %v3602_v14 }
0x2cf3   :  { %7039 = vmatprep.mubr.msk.bf16.mxu1 %vm7657_vm1, %v7656_v18 }
0x2dbd   :  { %v8584_v47 = vpop.f32.mrb[104].mxu1 }
0x2dbe   :  { %v7017_v52 = vpop.f32.mrb[105].mxu1 }
0x2dbf   :  { %v8586_v24 = vpop.f32.mrb[106].mxu1 }
0x2dc0   :  { %v7018_v43 = vpop.f32.mrb[107].mxu1 }
0x2dc5   :  { %v3645_v44 = vpop.f32.mrb[108].mxu1 }
0x2dc6   :  { %v3652_v49 = vmul.f32 0.35355338, %v3645_v44  ;;  %v7029_v53 = vpop.f32.mrb[109].mxu1 }
0x2dc7   :  { %v3648_v40 = vpop.f32.mrb[110].mxu1 }
0x2dc8   :  { %v3654_v32 = vadd.f32 %v3652_v49, %v8533_v8  ;;  %v3653_v55 = vmul.f32 0.35355338, %v3648_v40  ;;  %v7030_v51 = vpop.f32.mrb[111].mxu1 }
0x2dca   :  { %v3655_v63 = vadd.f32 %v3653_v55, %v8535_v29  ;;  %v3656_v57 = vsel %vm189_vm3, %v3654_v32, -inf }
0x2dcb   :  { %3657 = vmax.xlane.f32.xlu0 %v3656_v57 }
0x2dcc   :  { %v3659_v59 = vsel %vm189_vm3, %v3655_v63, -inf }
0x2dcd   :  { %3660 = vmax.xlane.f32.xlu1 %v3659_v59 }
0x2dde   :  { %3679 = vrot.lane.b32.xlu1 %v8503_v62, %s7664_s8 }
0x2de2   :  { %3781 = vrot.lane.b32.xlu1 %v8503_v62, %s7666_s10 }
0x2de6   :  { %3779 = vrot.lane.b32.xlu1 %v8516_v42, %s7666_s10 }
0x2e58   :  { %v3658_v61 = vpop.xlane.xlu0 %3657 }
0x2e59   :  { %v3662_v1 = vsub.f32 %v3654_v32, %v3658_v61 }
0x2e5a   :  { %v3661_v2 = vpop.xlane.xlu1 %3660 }
0x2e5b   :  { %v3664_v3 = vmul.f32 1.442695, %v3662_v1  ;;  %v3663_v5 = vsub.f32 %v3655_v63, %v3661_v2 }
0x2e5d   :  { %7506 = vpow2.f32 %v3664_v3  ;;  %v3666_v35 = vmul.f32 1.442695, %v3663_v5  ;;  %v6423_v3 = vcombine.low %v8453_v23, %v8453_v23 }
0x2e5e   :  { %v3680_v12 = vpop.permute.xlu1 %3679 }
0x2e5f   :  { %7508 = vpow2.f32 %v3666_v35 }
0x2e62   :  { %v3782_v27 = vpop.permute.xlu1 %3781 }
0x2e63   :  { %v3787_v30 = vsel %vm129_vm2, %v3782_v27, 0 }
0x2e66   :  { %v3780_v28 = vpop.permute.xlu1 %3779 }
0x2e67   :  { %v7507_v7 = vpop.eup %7506 }
0x2e68   :  { %v3668_v36 = vsel %vm189_vm3, %v7507_v7, 0.0 }
0x2e69   :  { %v7509_v10 = vpop.eup %7508  ;;  %3669 = vadd.xlane.f32.xlu0 %v3668_v36 }
0x2e6a   :  { %v3671_v9 = vsel %vm189_vm3, %v7509_v10, 0.0 }
0x2e6d   :  { %3672 = vadd.xlane.f32.xlu0 %v3671_v9 }
0x2e83   :  { %3552 = vrot.lane.b32.xlu0 %v6419_v6, %s7662_s6 }
0x2ef6   :  { %v3670_v42 = vpop.xlane.xlu0 %3669 }
0x2ef7   :  { %7510 = vrcp.f32 %v3670_v42 }
0x2efa   :  { %v3673_v26 = vpop.xlane.xlu0 %3672 }
0x2efb   :  { %7512 = vrcp.f32 %v3673_v26 }
0x2efe   :  { %v3553_v11 = vpop.permute.xlu0 %3552 }
0x2eff   :  { %v3558_v13 = vsel %vm393_vm4, %v3553_v11, 0 }
0x2f00   :  { %7020 = vmatpush3.bf16.msra.mxu0 %v3558_v13 }
0x2f01   :  { %7031 = vmatprep.subr.bf16.mxu0 %v7656_v18  ;;  %v7511_v60 = vpop.eup %7510 }
0x2f02   :  { %v3675_v50 = vmul.f32 %v7511_v60, %v7507_v7 }
0x2f03   :  { %7022 = vmatmul.mubr.msk.bf16.vlgmr.msra.gmra.mrb[92].mxu0 %vm129_vm2, %v3373_v4 }
0x2f04   :  { %7032 = vmatpush3.bf16.msra.mxu0 %v3680_v12  ;;  %7033 = vmatprep.mubr.msk.bf16.mxu0 %vm7657_vm1, %v7656_v18 }
0x2f05   :  { %v7513_v25 = vpop.eup %7512  ;;  %7043 = vmatprep.subr.bf16.mxu0 %v7656_v18 }
0x2f06   :  { %v3677_v19 = vmul.f32 %v7513_v25, %v7509_v10 }
0x2f08   :  { %v3678_v56 = vpack.c.bf16 %v3677_v19, %v3675_v50 }
0x2f0b   :  { %7034 = vmatmul.mubr.msk.bf16.vlgmr.msra.gmra.mrb[96].mxu0 %vm189_vm3, %v3678_v56 }
0x2f0c   :  { %7045 = vmatprep.mubr.msk.bf16.mxu0 %vm7657_vm1, %v7656_v18 }
0x2f0d   :  { %7044 = vmatpush3.bf16.xpose.msra.mxu0 %v3787_v30 }
0x2f0e   :  { %7055 = vmatprep.subr.bf16.mxu0 %v7656_v18 }
0x2f14   :  { %7046 = vmatmul.mubr.msk.bf16.vlgmr.msra.gmra.mrb[100].mxu0 %vm129_vm2, %v3780_v28 }
0x2f15   :  { %7057 = vmatprep.mubr.msk.bf16.mxu0 %vm7657_vm1, %v7656_v18 }
0x2fd6   :  { %v3594_v31 = vpop.f32.mrb[92].mxu0 }
0x2fd7   :  { %v8618_v21 = vadd.f32 %v3594_v31, %v8584_v47  ;;  %v7023_v33 = vpop.f32.mrb[93].mxu0 }
0x2fd8   :  { %v3597_v15 = vpop.f32.mrb[94].mxu0 }
0x2fd9   :  { %v8621_v4 = vadd.f32 %v3597_v15, %v8586_v24  ;;  %v7024_v45 = vpop.f32.mrb[95].mxu0 }
0x2fde   :  { %v3719_v34 = vpop.f32.mrb[96].mxu0 }
0x2fdf   :  { %v7035_v20 = vpop.f32.mrb[97].mxu0 }
0x2fe0   :  { %v3722_v38 = vpop.f32.mrb[98].mxu0 }
0x2fe1   :  { %v3726_v37 = vpack.c.bf16 %v3722_v38, %v3719_v34  ;;  %v7036_v16 = vpop.f32.mrb[99].mxu0 }
0x2fe7   :  { %v3823_v39 = vpop.f32.mrb[100].mxu0 }
0x2fe8   :  { %v3830_v41 = vmul.f32 0.35355338, %v3823_v39  ;;  %v7047_v14 = vpop.f32.mrb[101].mxu0 }
0x2fe9   :  { %v3826_v52 = vpop.f32.mrb[102].mxu0 }
0x2fea   :  { %v3832_v43 = vadd.f32 %v3830_v41, %v8533_v8  ;;  %v3831_v44 = vmul.f32 0.35355338, %v3826_v52  ;;  %v7048_v47 = vpop.f32.mrb[103].mxu0 }
0x2fec   :  { %v3833_v49 = vadd.f32 %v3831_v44, %v8535_v29  ;;  %v3834_v53 = vsel %vm189_vm3, %v3832_v43, -inf }
0x2fed   :  { %3835 = vmax.xlane.f32.xlu0 %v3834_v53 }
0x2fee   :  { %v3837_v24 = vsel %vm189_vm3, %v3833_v49, -inf }
0x2fef   :  { %3838 = vmax.xlane.f32.xlu1 %v3837_v24 }
0x3000   :  { %3857 = vrot.lane.b32.xlu1 %v8503_v62, %s7665_s9  ;;  %v6427_v62 = vcombine.low %v8458_v46, %v8458_v46 }
0x3004   :  { %3906 = vrot.lane.b32.xlu1 %v6427_v62, %s7662_s6  ;;  %v7325_v62 = vld [vmem:[%s9204_s0 + $0xd8] sm:$0xff]  }
0x3008   :  { %3957 = vrot.lane.b32.xlu1 %v8487_v0, %s7662_s6 }
0x307a   :  { %v3836_v40 = vpop.xlane.xlu0 %3835 }
0x307b   :  { %v3840_v32 = vsub.f32 %v3832_v43, %v3836_v40 }
0x307c   :  { %v3839_v55 = vpop.xlane.xlu1 %3838 }
0x307d   :  { %v3842_v51 = vmul.f32 1.442695, %v3840_v32  ;;  %v3841_v63 = vsub.f32 %v3833_v49, %v3839_v55 }
0x307f   :  { %7514 = vpow2.f32 %v3842_v51  ;;  %v3844_v57 = vmul.f32 1.442695, %v3841_v63 }
0x3080   :  { %v3858_v10 = vpop.permute.xlu1 %3857 }
0x3081   :  { %7516 = vpow2.f32 %v3844_v57 }
0x3084   :  { %v3907_v42 = vpop.permute.xlu1 %3906 }
0x3085   :  { %v3912_v26 = vsel %vm393_vm4, %v3907_v42, 0 }
0x3086   :  { %7056 = vmatpush3.bf16.msra.mxu0 %v3912_v26 }
0x3087   :  { %7069 = vmatprep.subr.bf16.mxu0 %v7656_v18 }
0x3088   :  { %v3958_v33 = vpop.permute.xlu1 %3957 }
0x3089   :  { %v7515_v59 = vpop.eup %7514 }
0x308a   :  { %v3846_v61 = vsel %vm189_vm3, %v7515_v59, 0.0 }
0x308b   :  { %v7517_v1 = vpop.eup %7516  ;;  %3847 = vadd.xlane.f32.xlu0 %v3846_v61  ;;  %v7322_v61 = vld [vmem:[%s9204_s0 + $0xc0] sm:$0xff]  }
0x308c   :  { %v3849_v2 = vsel %vm189_vm3, %v7517_v1, 0.0 }
0x308f   :  { %3850 = vadd.xlane.f32.xlu0 %v3849_v2  ;;  %v7324_v2 = vld [vmem:[%s9204_s0 + $0xd0] sm:$0xff]  }
0x30a5   :  { %3728 = vrot.lane.b32.xlu0 %v6423_v3, %s7662_s6  ;;  %v6430_v3 = vld [vmem:[%s9205_s1 + $0x8] ss:$0 sm:$0xff] }
0x3118   :  { %v3848_v5 = vpop.xlane.xlu0 %3847 }
0x3119   :  { %7518 = vrcp.f32 %v3848_v5 }
0x311c   :  { %v3851_v35 = vpop.xlane.xlu0 %3850 }
0x311d   :  { %7520 = vrcp.f32 %v3851_v35 }
0x3120   :  { %v3729_v7 = vpop.permute.xlu0 %3728 }
0x3121   :  { %v3734_v36 = vsel %vm393_vm4, %v3729_v7, 0 }
0x3122   :  { %7038 = vmatpush3.bf16.msra.mxu1 %v3734_v36 }
0x3123   :  { %7049 = vmatprep.subr.bf16.mxu1 %v7656_v18  ;;  %v7519_v23 = vpop.eup %7518 }
0x3124   :  { %v3853_v0 = vmul.f32 %v7519_v23, %v7515_v59  ;;  %v6429_v59 = vld [vmem:[%s9205_s1 + $0x11] ss:$0 sm:$0xff] }
0x3125   :  { %7040 = vmatmul.mubr.msk.bf16.vlgmr.msra.gmra.mrb[112].mxu1 %vm129_vm2, %v3726_v37 }
0x3126   :  { %7050 = vmatpush3.bf16.msra.mxu1 %v3858_v10  ;;  %7051 = vmatprep.mubr.msk.bf16.mxu1 %vm7657_vm1, %v7656_v18 }
0x3127   :  { %v7521_v46 = vpop.eup %7520  ;;  %7061 = vmatprep.subr.bf16.mxu1 %v7656_v18 }
0x3128   :  { %v3855_v9 = vmul.f32 %v7521_v46, %v7517_v1  ;;  %v7323_v1 = vld [vmem:[%s9204_s0 + $0xc8] sm:$0xff]  }
0x312a   :  { %v3856_v6 = vpack.c.bf16 %v3855_v9, %v3853_v0 }
0x312d   :  { %7052 = vmatmul.mubr.msk.bf16.vlgmr.msra.gmra.mrb[116].mxu1 %vm189_vm3, %v3856_v6 }
0x312e   :  { %7065 = vmatprep.mubr.msk.bf16.mxu1 %vm7657_vm1, %v7656_v18  ;;  %7062 = vmatpush3.bf16.msra.mxu1 %v7322_v61 }
0x312f   :  { %7063 = vmatprep.subr.bf16.mxu1 %v7656_v18 }
0x3132   :  { %7064 = vmatpush3.bf16.msra.mxu1 %v7323_v1 }
0x3133   :  { %7081 = vmatprep.subr.bf16.mxu1 %v7656_v18 }
0x31f8   :  { %v3770_v11 = vpop.f32.mrb[112].mxu1 }
0x31f9   :  { %v3777_v13 = vadd.f32 %v3770_v11, %v8618_v21  ;;  %v7041_v60 = vpop.f32.mrb[113].mxu1 }
0x31fa   :  { %v3773_v12 = vpop.f32.mrb[114].mxu1 }
0x31fb   :  { %v3778_v25 = vadd.f32 %v3773_v12, %v8621_v4  ;;  %v7042_v50 = vpop.f32.mrb[115].mxu1 }
0x3200   :  { %v3897_v19 = vpop.f32.mrb[116].mxu1 }
0x3201   :  { %v7053_v56 = vpop.f32.mrb[117].mxu1 }
0x3202   :  { %v3900_v27 = vpop.f32.mrb[118].mxu1 }
0x3203   :  { %v3904_v30 = vpack.c.bf16 %v3900_v27, %v3897_v19  ;;  %v7054_v28 = vpop.f32.mrb[119].mxu1 }
0x3205   :  { %7058 = vmatmul.mubr.msk.bf16.vlgmr.msra.gmra.mrb[104].mxu0 %vm129_vm2, %v3904_v30 }
0x3206   :  { %7077 = vmatprep.mubr.msk.bf16.mxu0 %vm7657_vm1, %v7656_v18  ;;  %7070 = vmatpush3.bf16.msra.mxu0 %v7324_v2 }
0x3207   :  { %7071 = vmatprep.subr.bf16.mxu0 %v7656_v18 }
0x320a   :  { %7072 = vmatpush3.bf16.msra.mxu0 %v7325_v62 }
0x320b   :  { %7073 = vmatprep.subr.bf16.mxu0 %v7656_v18 }
0x32d8   :  { %v3948_v31 = vpop.f32.mrb[104].mxu0 }
0x32d9   :  { %v3955_v15 = vadd.f32 %v3948_v31, %v3777_v13  ;;  %v7059_v45 = vpop.f32.mrb[105].mxu0 }
0x32da   :  { %v3951_v21 = vpop.f32.mrb[106].mxu0 }
0x32db   :  { %v3960_v34 = vadd.f32 %v3958_v33, %v3955_v15  ;;  %v3956_v20 = vadd.f32 %v3951_v21, %v3778_v25  ;;  %v7060_v38 = vpop.f32.mrb[107].mxu0 }
0x32dd   :  { %v3961_v4 = vadd.f32 %v3958_v33, %v3956_v20  ;;  %3964 = vrot.lane.b32.xlu0 %v3960_v34, %s7662_s6  ;;  %v7326_v34 = vld [vmem:[%s9204_s0 + $0xe0] sm:$0xff]   ;;  %v7327_v20 = vld [vmem:[%s9204_s0 + $0xe8] sm:$0xff]  }
0x32de   :  { %7074 = vmatpush3.bf16.msra.mxu0 %v7326_v34 }
0x32df   :  { %3966 = vrot.lane.b32.xlu1 %v3961_v4, %s7662_s6  ;;  %7075 = vmatprep.subr.bf16.mxu0 %v7656_v18 }
0x32e2   :  { %7076 = vmatpush3.bf16.msra.mxu0 %v7327_v20 }
0x32e3   :  { %7095 = vmatprep.subr.bf16.mxu0 %v7656_v18 }
0x334f   :  { %v3965_v37 = vpop.permute.xlu0 %3964 }
0x3350   :  { %v8658_v16 = vadd.f32 %v3965_v37, %v8415_v17 }
0x3351   :  { %v3967_v39 = vpop.permute.xlu1 %3966 }
0x3352   :  { %v8661_v41 = vadd.f32 %v3967_v39, %v8418_v22  ;;  %3975 = vrot.lane.b32.xlu0 %v8658_v16, %s7655_s18 }
0x3354   :  { %3977 = vrot.lane.b32.xlu1 %v8661_v41, %s7655_s18 }
0x33c4   :  { %v3976_v14 = vpop.permute.xlu0 %3975 }
0x33c5   :  { %v3981_v52 = vsel %vm19_vm0, %v3976_v14, 0.0 }
0x33c6   :  { %3982 = vadd.xlane.f32.xlu0 %v3981_v52  ;;  %v3978_v43 = vpop.permute.xlu1 %3977 }
0x33c7   :  { %v3984_v44 = vsel %vm19_vm0, %v3978_v43, 0.0 }
0x33c8   :  { %3985 = vadd.xlane.f32.xlu1 %v3984_v44 }
0x3453   :  { %v3983_v17 = vpop.xlane.xlu0 %3982 }
0x3454   :  { %v3987_v47 = vmul.f32 0.03125, %v3983_v17 }
0x3455   :  { %v3986_v49 = vpop.xlane.xlu1 %3985 }
0x3456   :  { %v3989_v22 = vsub.f32 %v8658_v16, %v3987_v47  ;;  %v3988_v53 = vmul.f32 0.03125, %v3986_v49 }
0x3458   :  { %v3991_v24 = vmul.f32 %v3989_v22, %v3989_v22  ;;  %v3990_v40 = vsub.f32 %v8661_v41, %v3988_v53 }
0x345a   :  { %v3992_v32 = vmul.f32 %v3990_v40, %v3990_v40  ;;  %3995 = vrot.lane.b32.xlu0 %v3991_v24, %s7655_s18 }
0x345c   :  { %3997 = vrot.lane.b32.xlu1 %v3992_v32, %s7655_s18 }
0x34cc   :  { %v3996_v55 = vpop.permute.xlu0 %3995 }
0x34cd   :  { %v4001_v51 = vsel %vm19_vm0, %v3996_v55, 0.0 }
0x34ce   :  { %4002 = vadd.xlane.f32.xlu0 %v4001_v51  ;;  %v3998_v63 = vpop.permute.xlu1 %3997 }
0x34cf   :  { %v4004_v57 = vsel %vm19_vm0, %v3998_v63, 0.0 }
0x34d0   :  { %4005 = vadd.xlane.f32.xlu1 %v4004_v57 }
0x34e1   :  { %4017 = vrot.lane.b32.xlu1 %v3990_v40, %s7655_s18 }
0x34e4   :  { %4015 = vrot.lane.b32.xlu0 %v3989_v22, %s7655_s18 }
0x34e5   :  { %4151 = vrot.lane.b32.xlu1 %v6430_v3, %s7659_s30 }
0x34e8   :  { %4044 = vrot.lane.b32.xlu0 %v6429_v59, %s7655_s18 }
0x355b   :  { %v4003_v5 = vpop.xlane.xlu0 %4002 }
0x355c   :  { %v4007_v35 = vmul.f32 0.032258064, %v4003_v5 }
0x355d   :  { %v4006_v7 = vpop.xlane.xlu1 %4005 }
0x355e   :  { %7522 = vrsqrt.f32 %v4007_v35  ;;  %v4008_v36 = vmul.f32 0.032258064, %v4006_v7  ;;  %vm4025_vm14 = vcmp.eq.f32.partialorder %v4007_v35, inf  ;;  %v4028_v0 = vand.u32 2147483648, %v4007_v35 }
0x355f   :  { %vm4027_vm15 = vcmp.eq.f32.partialorder %v4007_v35, 0.0  ;;  %v4016_v25 = vpop.permute.xlu0 %4015 }
0x3560   :  { %7524 = vrsqrt.f32 %v4008_v36  ;;  %vm4032_vm6 = vcmp.eq.f32.partialorder %v4008_v36, inf  ;;  %v4035_v42 = vand.u32 2147483648, %v4008_v36  ;;  %vm4034_vm7 = vcmp.eq.f32.partialorder %v4008_v36, 0.0 }
0x3561   :  { %v4018_v50 = vpop.permute.xlu1 %4017  ;;  %v4021_v19 = vmul.f32 %v6429_v59, %v4016_v25 }
0x3562   :  { %v4022_v30 = vmul.f32 %v6429_v59, %v4018_v50 }
0x3563   :  { %v4045_v31 = vpop.permute.xlu0 %4044 }
0x3565   :  { %v4152_v47 = vpop.permute.xlu1 %4151 }
0x3568   :  { %v7523_v23 = vpop.eup %7522 }
0x3569   :  { %v4024_v10 = vmul.f32 %v7523_v23, %v4007_v35 }
0x356a   :  { %v7525_v46 = vpop.eup %7524 }
0x356b   :  { %v4031_v9 = vmul.f32 %v7525_v46, %v4008_v36  ;;  %v4026_v6 = vsel %vm4025_vm14, %v4007_v35, %v4024_v10 }
0x356c   :  { %v4029_v26 = vsel %vm4027_vm15, %v4028_v0, %v4026_v6  ;;  %v8744_v6 = vld [vmem:[%s9204_s0 + $0x40] sm:$0xf] }
0x356d   :  { %v4037_v11 = vadd.f32 1e-06, %v4029_v26  ;;  %v4033_v13 = vsel %vm4032_vm6, %v4008_v36, %v4031_v9  ;;  %v6439_v9 = vld [vmem:[%s9205_s1 + $0x12] ss:$0 sm:$0xff] }
0x356e   :  { %v4036_v60 = vsel %vm4034_vm7, %v4035_v42, %v4033_v13  ;;  %v8749_v42 = vld [vmem:[%s9204_s0 + $0x44] sm:$0xf]  ;;  %v8762_v13 = vld [vmem:[%s9204_s0 + $0x4c] sm:$0xf] }
0x356f   :  { %7526 = vrcp.f32 %v4037_v11  ;;  %v4038_v12 = vadd.f32 1e-06, %v4036_v60  ;;  %v6441_v26 = vcombine.low %v8744_v6, %v8749_v42  ;;  %v8757_v11 = vld [vmem:[%s9204_s0 + $0x48] sm:$0xf] }
0x3570   :  { %v6442_v60 = vcombine.low %v8757_v11, %v8762_v13 }
0x3571   :  { %7528 = vrcp.f32 %v4038_v12 }
0x3579   :  { %v7527_v56 = vpop.eup %7526 }
0x357a   :  { %v4040_v27 = vmul.f32 %v7527_v56, %v4021_v19 }
0x357b   :  { %v7529_v28 = vpop.eup %7528 }
0x357c   :  { %v4042_v33 = vmul.f32 %v7529_v28, %v4022_v30  ;;  %v4047_v15 = vadd.f32 %v4045_v31, %v4040_v27 }
0x357e   :  { %v4048_v45 = vadd.f32 %v4045_v31, %v4042_v33 }
0x3580   :  { %v4062_v21 = vpack.c.bf16 %v4048_v45, %v4047_v15 }
0x3582   :  { %7066 = vmatmul.mubr.msk.bf16.vlgmr.msra.gmra.mrb[120].mxu1 %vm19_vm0, %v4062_v21 }
0x3583   :  { %7085 = vmatprep.mubr.msk.bf16.mxu1 %vm7657_vm1, %v7656_v18  ;;  %7082 = vmatpush3.bf16.msra.mxu1 %v6441_v26 }
0x3584   :  { %7083 = vmatprep.subr.bf16.mxu1 %v7656_v18 }
0x3587   :  { %7084 = vmatpush3.bf16.msra.mxu1 %v6442_v60 }
0x3588   :  { %7089 = vmatprep.subr.bf16.mxu1 %v7656_v18 }
0x3655   :  { %v4116_v38 = vpop.f32.mrb[120].mxu1 }
0x3656   :  { %v4117_v4 = vadd.f32 %v6430_v3, %v4116_v38  ;;  %v7067_v37 = vpop.f32.mrb[121].mxu1 }
0x3657   :  { %v4119_v39 = vpop.f32.mrb[122].mxu1 }
0x3658   :  { %v4120_v14 = vadd.f32 %v6430_v3, %v4119_v39  ;;  %v7068_v52 = vpop.f32.mrb[123].mxu1  ;;  %v4123_v43 = vmax.f32 %v4117_v4, 0.0 }
0x365a   :  { %v4124_v44 = vmax.f32 %v4120_v14, 0.0 }
0x365c   :  { %v4125_v17 = vpack.c.bf16 %v4124_v44, %v4123_v43 }
0x365e   :  { %7078 = vmatmul.mubr.msk.bf16.vlgmr.msra.gmra.mrb[108].mxu0 %vm1012_vm5, %v4125_v17 }
0x365f   :  { %7097 = vmatprep.mubr.msk.bf16.mxu0 %vm7657_vm1, %v7656_v18 }
0x3731   :  { %v4191_v49 = vpop.f32.mrb[108].mxu0 }
0x3732   :  { %v4192_v22 = vadd.f32 %v4191_v49, %v4152_v47  ;;  %v7079_v53 = vpop.f32.mrb[109].mxu0 }
0x3733   :  { %v4194_v24 = vpop.f32.mrb[110].mxu0 }
0x3734   :  { %v4195_v40 = vadd.f32 %v4194_v24, %v4152_v47  ;;  %4200 = vrot.lane.b32.xlu0 %v4192_v22, %s7662_s6  ;;  %v7080_v32 = vpop.f32.mrb[111].mxu0  ;;  %v8773_v24 = vld [vmem:[%s9205_s1 + $0x4] ss:$0 sm:$0xff] }
0x3736   :  { %4202 = vrot.lane.b32.xlu1 %v4195_v40, %s7662_s6 }
0x37a6   :  { %v4201_v55 = vpop.permute.xlu0 %4200 }
0x37a7   :  { %v8718_v51 = vadd.f32 %v4201_v55, %v8658_v16 }
0x37a8   :  { %v4203_v63 = vpop.permute.xlu1 %4202 }
0x37a9   :  { %v8721_v57 = vadd.f32 %v4203_v63, %v8661_v41  ;;  %4211 = vrot.lane.b32.xlu0 %v8718_v51, %s7655_s18 }
0x37ab   :  { %4213 = vrot.lane.b32.xlu1 %v8721_v57, %s7655_s18 }
0x381b   :  { %v4212_v59 = vpop.permute.xlu0 %4211 }
0x381c   :  { %v4217_v61 = vsel %vm19_vm0, %v4212_v59, 0.0 }
0x381d   :  { %4218 = vadd.xlane.f32.xlu0 %v4217_v61  ;;  %v4214_v1 = vpop.permute.xlu1 %4213 }
0x381e   :  { %v4220_v2 = vsel %vm19_vm0, %v4214_v1, 0.0 }
0x381f   :  { %4221 = vadd.xlane.f32.xlu1 %v4220_v2 }
0x38aa   :  { %v4219_v16 = vpop.xlane.xlu0 %4218 }
0x38ab   :  { %v4223_v3 = vmul.f32 0.03125, %v4219_v16 }
0x38ac   :  { %v4222_v62 = vpop.xlane.xlu1 %4221 }
0x38ad   :  { %v4225_v41 = vsub.f32 %v8718_v51, %v4223_v3  ;;  %v4224_v5 = vmul.f32 0.03125, %v4222_v62 }
0x38af   :  { %v4227_v35 = vmul.f32 %v4225_v41, %v4225_v41  ;;  %v4226_v7 = vsub.f32 %v8721_v57, %v4224_v5 }
0x38b1   :  { %v4228_v36 = vmul.f32 %v4226_v7, %v4226_v7  ;;  %4231 = vrot.lane.b32.xlu0 %v4227_v35, %s7655_s18 }
0x38b3   :  { %4233 = vrot.lane.b32.xlu1 %v4228_v36, %s7655_s18 }
0x3923   :  { %v4232_v23 = vpop.permute.xlu0 %4231 }
0x3924   :  { %v4237_v10 = vsel %vm19_vm0, %v4232_v23, 0.0 }
0x3925   :  { %4238 = vadd.xlane.f32.xlu0 %v4237_v10  ;;  %v4234_v46 = vpop.permute.xlu1 %4233 }
0x3926   :  { %v4240_v0 = vsel %vm19_vm0, %v4234_v46, 0.0 }
0x3927   :  { %4241 = vadd.xlane.f32.xlu1 %v4240_v0 }
0x3938   :  { %4253 = vrot.lane.b32.xlu1 %v4226_v7, %s7655_s18 }
0x393b   :  { %4251 = vrot.lane.b32.xlu0 %v4225_v41, %s7655_s18 }
0x393f   :  { %4280 = vrot.lane.b32.xlu0 %v6439_v9, %s7655_s18 }
0x39b2   :  { %v4239_v12 = vpop.xlane.xlu0 %4238 }
0x39b3   :  { %v4243_v25 = vmul.f32 0.032258064, %v4239_v12 }
0x39b4   :  { %v4242_v50 = vpop.xlane.xlu1 %4241 }
0x39b5   :  { %7530 = vrsqrt.f32 %v4243_v25  ;;  %v4244_v19 = vmul.f32 0.032258064, %v4242_v50  ;;  %vm4261_vm8 = vcmp.eq.f32.partialorder %v4243_v25, inf  ;;  %v4264_v28 = vand.u32 2147483648, %v4243_v25 }
0x39b6   :  { %vm4263_vm9 = vcmp.eq.f32.partialorder %v4243_v25, 0.0  ;;  %v4252_v4 = vpop.permute.xlu0 %4251 }
0x39b7   :  { %7532 = vrsqrt.f32 %v4244_v19  ;;  %vm4268_vm10 = vcmp.eq.f32.partialorder %v4244_v19, inf  ;;  %v4271_v15 = vand.u32 2147483648, %v4244_v19  ;;  %vm4270_vm11 = vcmp.eq.f32.partialorder %v4244_v19, 0.0 }
0x39b8   :  { %v4254_v37 = vpop.permute.xlu1 %4253  ;;  %v4257_v39 = vmul.f32 %v6439_v9, %v4252_v4 }
0x39b9   :  { %v4258_v43 = vmul.f32 %v6439_v9, %v4254_v37 }
0x39ba   :  { %v4281_v17 = vpop.permute.xlu0 %4280 }
0x39bf   :  { %v7531_v56 = vpop.eup %7530 }
0x39c0   :  { %v4260_v27 = vmul.f32 %v7531_v56, %v4243_v25 }
0x39c1   :  { %v7533_v30 = vpop.eup %7532 }
0x39c2   :  { %v4267_v31 = vmul.f32 %v7533_v30, %v4244_v19  ;;  %v4262_v33 = vsel %vm4261_vm8, %v4243_v25, %v4260_v27 }
0x39c3   :  { %v4265_v45 = vsel %vm4263_vm9, %v4264_v28, %v4262_v33 }
0x39c4   :  { %v4273_v21 = vadd.f32 1e-06, %v4265_v45  ;;  %v4269_v34 = vsel %vm4268_vm10, %v4244_v19, %v4267_v31 }
0x39c5   :  { %v4272_v20 = vsel %vm4270_vm11, %v4271_v15, %v4269_v34 }
0x39c6   :  { %7534 = vrcp.f32 %v4273_v21  ;;  %v4274_v38 = vadd.f32 1e-06, %v4272_v20 }
0x39c8   :  { %7536 = vrcp.f32 %v4274_v38 }
0x39d0   :  { %v7535_v14 = vpop.eup %7534 }
0x39d1   :  { %v4276_v52 = vmul.f32 %v7535_v14, %v4257_v39 }
0x39d2   :  { %v7537_v44 = vpop.eup %7536 }
0x39d3   :  { %v4278_v47 = vmul.f32 %v7537_v44, %v4258_v43  ;;  %v4283_v49 = vadd.f32 %v4281_v17, %v4276_v52 }
0x39d5   :  { %v4284_v22 = vadd.f32 %v4281_v17, %v4278_v47 }
0x39d7   :  { %v4290_v53 = vpack.c.bf16 %v4284_v22, %v4283_v49 }
0x39d9   :  { %7086 = vmatmul.mubr.msk.bf16.vlgmr.msra.gmra.mrb[124].mxu1 %vm19_vm0, %v4290_v53 }
0x39da   :  { %7091 = vmatprep.mubr.msk.bf16.mxu1 %vm7657_vm1, %v7656_v18 }
0x3aac   :  { %v4344_v40 = vpop.f32.mrb[124].mxu1 }
0x3aad   :  { %v7087_v32 = vpop.f32.mrb[125].mxu1  ;;  %v4345_v63 = vadd.f32 %v8773_v24, %v4344_v40 }
0x3aae   :  { %v4347_v55 = vpop.f32.mrb[126].mxu1  ;;  %v6448_v32 = vcombine.low %v8749_v42, %v8749_v42 }
0x3aaf   :  { %v4348_v59 = vadd.f32 %v8773_v24, %v4347_v55  ;;  %v7088_v61 = vpop.f32.mrb[127].mxu1 }
0x3ab1   :  { %v8777_v1 = vpack.c.bf16 %v4348_v59, %v4345_v63 }
0x3ab3   :  { %4479 = vrot.lane.b32.xlu0 %v8777_v1, %s7658_s29  ;;  %4353 = vrot.lane.b32.xlu1 %v8777_v1, %s7655_s18 }
0x3ab7   :  { %4477 = vrot.lane.b32.xlu1 %v8777_v1, %s7660_s4 }
0x3b25   :  { %v4354_v2 = vpop.permute.xlu1 %4353  ;;  %v4480_v3 = vpop.permute.xlu0 %4479 }
0x3b26   :  { %v4359_v16 = vsel %vm129_vm2, %v4354_v2, 0  ;;  %v4485_v62 = vsel %vm129_vm2, %v4480_v3, 0 }
0x3b27   :  { %7090 = vmatpush3.bf16.xpose.msra.mxu1 %v4359_v16 }
0x3b28   :  { %7101 = vmatprep.subr.bf16.mxu1 %v7656_v18 }
0x3b29   :  { %v4478_v41 = vpop.permute.xlu1 %4477 }
0x3b2e   :  { %7092 = vmatmul.mubr.msk.bf16.vlgmr.msra.gmra.mrb[128].mxu1 %vm129_vm2, %v8777_v1 }
0x3b2f   :  { %7102 = vmatpush3.bf16.xpose.msra.mxu1 %v4485_v62  ;;  %7103 = vmatprep.mubr.msk.bf16.mxu1 %vm7657_vm1, %v7656_v18 }
0x3b30   :  { %7113 = vmatprep.subr.bf16.mxu1 %v7656_v18 }
0x3b36   :  { %7104 = vmatmul.mubr.msk.bf16.vlgmr.msra.gmra.mrb[132].mxu1 %vm129_vm2, %v4478_v41 }
0x3b37   :  { %7115 = vmatprep.mubr.msk.bf16.mxu1 %vm7657_vm1, %v7656_v18 }
0x3c01   :  { %v4395_v5 = vpop.f32.mrb[128].mxu1 }
0x3c02   :  { %v4402_v35 = vmul.f32 0.35355338, %v4395_v5  ;;  %v7093_v7 = vpop.f32.mrb[129].mxu1 }
0x3c03   :  { %v4398_v36 = vpop.f32.mrb[130].mxu1 }
0x3c04   :  { %v4404_v23 = vadd.f32 %v4402_v35, %v8296_v54  ;;  %v4403_v10 = vmul.f32 0.35355338, %v4398_v36  ;;  %v7094_v46 = vpop.f32.mrb[131].mxu1 }
0x3c06   :  { %v4405_v0 = vadd.f32 %v4403_v10, %v8298_v58  ;;  %v4406_v9 = vsel %vm189_vm3, %v4404_v23, -inf }
0x3c07   :  { %4407 = vmax.xlane.f32.xlu0 %v4406_v9 }
0x3c08   :  { %v4409_v26 = vsel %vm189_vm3, %v4405_v0, -inf }
0x3c09   :  { %4410 = vmax.xlane.f32.xlu1 %v4409_v26  ;;  %v4521_v60 = vpop.f32.mrb[132].mxu1 }
0x3c0a   :  { %v4528_v12 = vmul.f32 0.35355338, %v4521_v60  ;;  %v7105_v25 = vpop.f32.mrb[133].mxu1 }
0x3c0b   :  { %v4524_v50 = vpop.f32.mrb[134].mxu1 }
0x3c0c   :  { %v4530_v19 = vadd.f32 %v4528_v12, %v8296_v54  ;;  %v4529_v56 = vmul.f32 0.35355338, %v4524_v50  ;;  %v7106_v27 = vpop.f32.mrb[135].mxu1 }
0x3c0e   :  { %v4531_v30 = vadd.f32 %v4529_v56, %v8298_v58  ;;  %v4532_v28 = vsel %vm189_vm3, %v4530_v19, -inf }
0x3c0f   :  { %4533 = vmax.xlane.f32.xlu0 %v4532_v28 }
0x3c10   :  { %v4535_v31 = vsel %vm189_vm3, %v4531_v30, -inf }
0x3c13   :  { %4536 = vmax.xlane.f32.xlu0 %v4535_v31 }
0x3c94   :  { %v4408_v33 = vpop.xlane.xlu0 %4407 }
0x3c95   :  { %v4412_v15 = vsub.f32 %v4404_v23, %v4408_v33 }
0x3c96   :  { %v4411_v45 = vpop.xlane.xlu1 %4410 }
0x3c97   :  { %v4414_v21 = vmul.f32 1.442695, %v4412_v15  ;;  %v4413_v34 = vsub.f32 %v4405_v0, %v4411_v45 }
0x3c99   :  { %7538 = vpow2.f32 %v4414_v21  ;;  %v4416_v20 = vmul.f32 1.442695, %v4413_v34 }
0x3c9b   :  { %7540 = vpow2.f32 %v4416_v20 }
0x3c9c   :  { %v4534_v38 = vpop.xlane.xlu0 %4533 }
0x3c9d   :  { %v4538_v4 = vsub.f32 %v4530_v19, %v4534_v38 }
0x3c9f   :  { %v4540_v37 = vmul.f32 1.442695, %v4538_v4 }
0x3ca0   :  { %v4537_v39 = vpop.xlane.xlu0 %4536 }
0x3ca1   :  { %7542 = vpow2.f32 %v4540_v37  ;;  %v4539_v14 = vsub.f32 %v4531_v30, %v4537_v39 }
0x3ca3   :  { %v7539_v52 = vpop.eup %7538  ;;  %v4542_v43 = vmul.f32 1.442695, %v4539_v14 }
0x3ca4   :  { %v4418_v44 = vsel %vm189_vm3, %v7539_v52, 0.0 }
0x3ca5   :  { %v7541_v17 = vpop.eup %7540  ;;  %7544 = vpow2.f32 %v4542_v43  ;;  %4419 = vadd.xlane.f32.xlu0 %v4418_v44 }
0x3ca6   :  { %v4421_v47 = vsel %vm189_vm3, %v7541_v17, 0.0 }
0x3ca7   :  { %4422 = vadd.xlane.f32.xlu1 %v4421_v47  ;;  %v6450_v47 = vcombine.low %v8744_v6, %v8744_v6 }
0x3cab   :  { %v7543_v49 = vpop.eup %7542 }
0x3cac   :  { %v4544_v22 = vsel %vm189_vm3, %v7543_v49, 0.0 }
0x3cad   :  { %4545 = vadd.xlane.f32.xlu0 %v4544_v22 }
0x3caf   :  { %v7545_v53 = vpop.eup %7544 }
0x3cb0   :  { %v4547_v40 = vsel %vm189_vm3, %v7545_v53, 0.0 }
0x3cb1   :  { %4548 = vadd.xlane.f32.xlu1 %v4547_v40 }
0x3cc2   :  { %4555 = vrot.lane.b32.xlu1 %v8777_v1, %s7661_s5 }
0x3cc3   :  { %4429 = vrot.lane.b32.xlu0 %v8777_v1, %s7659_s30 }
0x3cc6   :  { %4604 = vrot.lane.b32.xlu1 %v6448_v32, %s7662_s6 }
0x3cc7   :  { %4703 = vrot.lane.b32.xlu0 %v8777_v1, %s7663_s7 }
0x3cca   :  { %4705 = vrot.lane.b32.xlu1 %v8777_v1, %s7664_s8 }
0x3d32   :  { %v4420_v55 = vpop.xlane.xlu0 %4419 }
0x3d33   :  { %7546 = vrcp.f32 %v4420_v55 }
0x3d34   :  { %v4423_v63 = vpop.xlane.xlu1 %4422 }
0x3d35   :  { %7548 = vrcp.f32 %v4423_v63 }
0x3d3a   :  { %v4546_v59 = vpop.xlane.xlu0 %4545 }
0x3d3b   :  { %7550 = vrcp.f32 %v4546_v59 }
0x3d3d   :  { %v7547_v61 = vpop.eup %7546 }
0x3d3e   :  { %v4549_v2 = vpop.xlane.xlu1 %4548  ;;  %v4430_v42 = vpop.permute.xlu0 %4429  ;;  %v4425_v3 = vmul.f32 %v7547_v61, %v7539_v52 }
0x3d3f   :  { %v7549_v16 = vpop.eup %7548  ;;  %7552 = vrcp.f32 %v4549_v2  ;;  %7096 = vmatpush3.bf16.msra.mxu0 %v4430_v42 }
0x3d40   :  { %v4427_v62 = vmul.f32 %v7549_v16, %v7541_v17  ;;  %7107 = vmatprep.subr.bf16.mxu0 %v7656_v18 }
0x3d42   :  { %v4556_v41 = vpop.permute.xlu1 %4555  ;;  %v4428_v5 = vpack.c.bf16 %v4427_v62, %v4425_v3  ;;  %v4704_v33 = vpop.permute.xlu0 %4703 }
0x3d44   :  { %7098 = vmatmul.mubr.msk.bf16.vlgmr.msra.gmra.mrb[112].mxu0 %vm189_vm3, %v4428_v5 }
0x3d45   :  { %7108 = vmatpush3.bf16.msra.mxu0 %v4556_v41  ;;  %7109 = vmatprep.mubr.msk.bf16.mxu0 %vm7657_vm1, %v7656_v18  ;;  %v7551_v7 = vpop.eup %7550 }
0x3d46   :  { %v4605_v35 = vpop.permute.xlu1 %4604  ;;  %7119 = vmatprep.subr.bf16.mxu0 %v7656_v18  ;;  %v4551_v10 = vmul.f32 %v7551_v7, %v7543_v49 }
0x3d47   :  { %v4610_v36 = vsel %vm393_vm4, %v4605_v35, 0 }
0x3d48   :  { %7114 = vmatpush3.bf16.msra.mxu1 %v4610_v36 }
0x3d49   :  { %v7553_v23 = vpop.eup %7552  ;;  %7125 = vmatprep.subr.bf16.mxu1 %v7656_v18 }
0x3d4a   :  { %v4553_v46 = vmul.f32 %v7553_v23, %v7545_v53  ;;  %v4706_v56 = vpop.permute.xlu1 %4705 }
0x3d4b   :  { %v4711_v31 = vsel %vm129_vm2, %v4706_v56, 0 }
0x3d4c   :  { %v4554_v0 = vpack.c.bf16 %v4553_v46, %v4551_v10 }
0x3d4e   :  { %7110 = vmatmul.mubr.msk.bf16.vlgmr.msra.gmra.mrb[116].mxu0 %vm189_vm3, %v4554_v0 }
0x3d4f   :  { %7121 = vmatprep.mubr.msk.bf16.mxu0 %vm7657_vm1, %v7656_v18 }
0x3e17   :  { %v4469_v9 = vpop.f32.mrb[112].mxu0 }
0x3e18   :  { %v7099_v26 = vpop.f32.mrb[113].mxu0 }
0x3e19   :  { %v4472_v60 = vpop.f32.mrb[114].mxu0 }
0x3e1a   :  { %v4476_v12 = vpack.c.bf16 %v4472_v60, %v4469_v9  ;;  %v7100_v25 = vpop.f32.mrb[115].mxu0 }
0x3e21   :  { %v4595_v50 = vpop.f32.mrb[116].mxu0 }
0x3e22   :  { %v7111_v19 = vpop.f32.mrb[117].mxu0 }
0x3e23   :  { %v4598_v27 = vpop.f32.mrb[118].mxu0 }
0x3e24   :  { %v4602_v30 = vpack.c.bf16 %v4598_v27, %v4595_v50  ;;  %v7112_v28 = vpop.f32.mrb[119].mxu0 }
0x3e26   :  { %7116 = vmatmul.mubr.msk.bf16.vlgmr.msra.gmra.mrb[136].mxu1 %vm129_vm2, %v4602_v30 }
0x3e27   :  { %7126 = vmatpush3.bf16.xpose.msra.mxu1 %v4711_v31  ;;  %7127 = vmatprep.mubr.msk.bf16.mxu1 %vm7657_vm1, %v7656_v18 }
0x3e28   :  { %7137 = vmatprep.subr.bf16.mxu1 %v7656_v18 }
0x3e2e   :  { %7128 = vmatmul.mubr.msk.bf16.vlgmr.msra.gmra.mrb[140].mxu1 %vm129_vm2, %v4704_v33 }
0x3e2f   :  { %7139 = vmatprep.mubr.msk.bf16.mxu1 %vm7657_vm1, %v7656_v18 }
0x3ef9   :  { %v8837_v15 = vpop.f32.mrb[136].mxu1 }
0x3efa   :  { %v7117_v45 = vpop.f32.mrb[137].mxu1 }
0x3efb   :  { %v8839_v21 = vpop.f32.mrb[138].mxu1 }
0x3efc   :  { %v7118_v34 = vpop.f32.mrb[139].mxu1 }
0x3f01   :  { %v4747_v20 = vpop.f32.mrb[140].mxu1 }
0x3f02   :  { %v4754_v38 = vmul.f32 0.35355338, %v4747_v20  ;;  %v7129_v4 = vpop.f32.mrb[141].mxu1 }
0x3f03   :  { %v4750_v37 = vpop.f32.mrb[142].mxu1 }
0x3f04   :  { %v4756_v39 = vadd.f32 %v4754_v38, %v8296_v54  ;;  %v4755_v14 = vmul.f32 0.35355338, %v4750_v37  ;;  %v7130_v52 = vpop.f32.mrb[143].mxu1  ;;  %v6454_v37 = vcombine.low %v8757_v11, %v8757_v11 }
0x3f06   :  { %v4757_v43 = vadd.f32 %v4755_v14, %v8298_v58  ;;  %v4758_v44 = vsel %vm189_vm3, %v4756_v39, -inf }
0x3f07   :  { %4759 = vmax.xlane.f32.xlu1 %v4758_v44 }
0x3f08   :  { %v4761_v17 = vsel %vm189_vm3, %v4757_v43, -inf }
0x3f09   :  { %4762 = vmax.xlane.f32.xlu0 %v4761_v17 }
0x3f18   :  { %4654 = vrot.lane.b32.xlu1 %v6450_v47, %s7662_s6 }
0x3f1c   :  { %4883 = vrot.lane.b32.xlu1 %v8777_v1, %s7665_s9 }
0x3f20   :  { %4881 = vrot.lane.b32.xlu1 %v8777_v1, %s7666_s10 }
0x3f94   :  { %v4760_v49 = vpop.xlane.xlu1 %4759 }
0x3f95   :  { %v4764_v22 = vsub.f32 %v4756_v39, %v4760_v49 }
0x3f96   :  { %v4763_v53 = vpop.xlane.xlu0 %4762 }
0x3f97   :  { %v4766_v40 = vmul.f32 1.442695, %v4764_v22  ;;  %v4765_v32 = vsub.f32 %v4757_v43, %v4763_v53  ;;  %v6458_v53 = vcombine.low %v8762_v13, %v8762_v13 }
0x3f98   :  { %v4655_v55 = vpop.permute.xlu1 %4654 }
0x3f99   :  { %7554 = vpow2.f32 %v4766_v40  ;;  %v4768_v63 = vmul.f32 1.442695, %v4765_v32  ;;  %v4660_v59 = vsel %vm393_vm4, %v4655_v55, 0 }
0x3f9a   :  { %7120 = vmatpush3.bf16.msra.mxu0 %v4660_v59 }
0x3f9b   :  { %7556 = vpow2.f32 %v4768_v63  ;;  %7131 = vmatprep.subr.bf16.mxu0 %v7656_v18 }
0x3f9c   :  { %v4884_v36 = vpop.permute.xlu1 %4883 }
0x3f9d   :  { %7122 = vmatmul.mubr.msk.bf16.vlgmr.msra.gmra.mrb[120].mxu0 %vm129_vm2, %v4476_v12  ;;  %v4889_v10 = vsel %vm129_vm2, %v4884_v36, 0 }
0x3f9e   :  { %7133 = vmatprep.mubr.msk.bf16.mxu0 %vm7657_vm1, %v7656_v18 }
0x3fa0   :  { %v4882_v46 = vpop.permute.xlu1 %4881 }
0x3fa3   :  { %v7555_v6 = vpop.eup %7554 }
0x3fa4   :  { %v4770_v61 = vsel %vm189_vm3, %v7555_v6, 0.0 }
0x3fa5   :  { %v7557_v2 = vpop.eup %7556  ;;  %4771 = vadd.xlane.f32.xlu0 %v4770_v61 }
0x3fa6   :  { %v4773_v42 = vsel %vm189_vm3, %v7557_v2, 0.0 }
0x3fa9   :  { %4774 = vadd.xlane.f32.xlu0 %v4773_v42 }
0x3fbf   :  { %4781 = vrot.lane.b32.xlu0 %v8777_v1, %s7667_s11 }
0x4032   :  { %v4772_v16 = vpop.xlane.xlu0 %4771 }
0x4033   :  { %7558 = vrcp.f32 %v4772_v16 }
0x4036   :  { %v4775_v3 = vpop.xlane.xlu0 %4774 }
0x4037   :  { %7560 = vrcp.f32 %v4775_v3 }
0x403a   :  { %v4782_v62 = vpop.permute.xlu0 %4781 }
0x403b   :  { %7132 = vmatpush3.bf16.msra.mxu0 %v4782_v62 }
0x403c   :  { %7143 = vmatprep.subr.bf16.mxu0 %v7656_v18 }
0x403d   :  { %v7559_v41 = vpop.eup %7558 }
0x403e   :  { %v4777_v35 = vmul.f32 %v7559_v41, %v7555_v6 }
0x4041   :  { %v7561_v5 = vpop.eup %7560 }
0x4042   :  { %v4779_v7 = vmul.f32 %v7561_v5, %v7557_v2 }
0x4044   :  { %v4780_v23 = vpack.c.bf16 %v4779_v7, %v4777_v35 }
0x4046   :  { %7134 = vmatmul.mubr.msk.bf16.vlgmr.msra.gmra.mrb[124].mxu0 %vm189_vm3, %v4780_v23 }
0x4047   :  { %7144 = vmatpush3.bf16.xpose.msra.mxu0 %v4889_v10  ;;  %7145 = vmatprep.mubr.msk.bf16.mxu0 %vm7657_vm1, %v7656_v18 }
0x4048   :  { %7155 = vmatprep.subr.bf16.mxu0 %v7656_v18 }
0x404e   :  { %7146 = vmatmul.mubr.msk.bf16.vlgmr.msra.gmra.mrb[128].mxu0 %vm129_vm2, %v4882_v46 }
0x404f   :  { %7157 = vmatprep.mubr.msk.bf16.mxu0 %vm7657_vm1, %v7656_v18 }
0x4070   :  { %v4696_v0 = vpop.f32.mrb[120].mxu0 }
0x4071   :  { %v8871_v9 = vadd.f32 %v4696_v0, %v8837_v15  ;;  %v7123_v26 = vpop.f32.mrb[121].mxu0 }
0x4072   :  { %v4699_v60 = vpop.f32.mrb[122].mxu0 }
0x4073   :  { %v8874_v12 = vadd.f32 %v4699_v60, %v8839_v21  ;;  %v7124_v25 = vpop.f32.mrb[123].mxu0 }
0x4119   :  { %v4821_v50 = vpop.f32.mrb[124].mxu0 }
0x411a   :  { %v7135_v19 = vpop.f32.mrb[125].mxu0 }
0x411b   :  { %v4824_v56 = vpop.f32.mrb[126].mxu0 }
0x411c   :  { %v4828_v27 = vpack.c.bf16 %v4824_v56, %v4821_v50  ;;  %v7136_v30 = vpop.f32.mrb[127].mxu0 }
0x4121   :  { %v4925_v28 = vpop.f32.mrb[128].mxu0 }
0x4122   :  { %v4932_v31 = vmul.f32 0.35355338, %v4925_v28  ;;  %v7147_v33 = vpop.f32.mrb[129].mxu0 }
0x4123   :  { %v4928_v45 = vpop.f32.mrb[130].mxu0 }
0x4124   :  { %v4934_v34 = vadd.f32 %v4932_v31, %v8296_v54  ;;  %v4933_v20 = vmul.f32 0.35355338, %v4928_v45  ;;  %v7148_v15 = vpop.f32.mrb[131].mxu0 }
0x4126   :  { %v4935_v38 = vadd.f32 %v4933_v20, %v8298_v58  ;;  %v4936_v4 = vsel %vm189_vm3, %v4934_v34, -inf }
0x4127   :  { %4937 = vmax.xlane.f32.xlu1 %v4936_v4 }
0x4128   :  { %v4939_v21 = vsel %vm189_vm3, %v4935_v38, -inf }
0x4129   :  { %4940 = vmax.xlane.f32.xlu0 %v4939_v21 }
0x4138   :  { %4830 = vrot.lane.b32.xlu1 %v6454_v37, %s7662_s6  ;;  %v8929_v37 = vld [vmem:[%s9204_s0 + $0x50] sm:$0xf] }
0x413c   :  { %5008 = vrot.lane.b32.xlu1 %v6458_v53, %s7662_s6 }
0x4140   :  { %5060 = vrot.lane.b32.xlu1 %v8773_v24, %s7662_s6 }
0x41b4   :  { %v4938_v39 = vpop.xlane.xlu1 %4937 }
0x41b5   :  { %v4942_v14 = vsub.f32 %v4934_v34, %v4938_v39  ;;  %v8934_v39 = vld [vmem:[%s9204_s0 + $0x54] sm:$0xf] }
0x41b6   :  { %v4941_v52 = vpop.xlane.xlu0 %4940 }
0x41b7   :  { %v4944_v43 = vmul.f32 1.442695, %v4942_v14  ;;  %v4943_v54 = vsub.f32 %v4935_v38, %v4941_v52  ;;  %v6462_v14 = vcombine.low %v8929_v37, %v8934_v39  ;;  %v8941_v52 = vld [vmem:[%s9204_s0 + $0x58] sm:$0xf] }
0x41b8   :  { %v4831_v44 = vpop.permute.xlu1 %4830 }
0x41b9   :  { %7562 = vpow2.f32 %v4944_v43  ;;  %v4946_v17 = vmul.f32 1.442695, %v4943_v54  ;;  %v4836_v58 = vsel %vm393_vm4, %v4831_v44, 0  ;;  %v8946_v43 = vld [vmem:[%s9204_s0 + $0x5c] sm:$0xf] }
0x41ba   :  { %7138 = vmatpush3.bf16.msra.mxu1 %v4836_v58  ;;  %v6463_v54 = vcombine.low %v8941_v52, %v8946_v43 }
0x41bb   :  { %7564 = vpow2.f32 %v4946_v17  ;;  %7149 = vmatprep.subr.bf16.mxu1 %v7656_v18 }
0x41bc   :  { %v5009_v13 = vpop.permute.xlu1 %5008 }
0x41bd   :  { %7140 = vmatmul.mubr.msk.bf16.vlgmr.msra.gmra.mrb[144].mxu1 %vm129_vm2, %v4828_v27  ;;  %v5014_v24 = vsel %vm393_vm4, %v5009_v13, 0 }
0x41be   :  { %7151 = vmatprep.mubr.msk.bf16.mxu1 %vm7657_vm1, %v7656_v18  ;;  %7156 = vmatpush3.bf16.msra.mxu0 %v5014_v24 }
0x41bf   :  { %7169 = vmatprep.subr.bf16.mxu0 %v7656_v18 }
0x41c0   :  { %v5061_v46 = vpop.permute.xlu1 %5060 }
0x41c3   :  { %v7563_v11 = vpop.eup %7562 }
0x41c4   :  { %v4948_v47 = vsel %vm189_vm3, %v7563_v11, 0.0 }
0x41c5   :  { %v7565_v49 = vpop.eup %7564  ;;  %4949 = vadd.xlane.f32.xlu0 %v4948_v47  ;;  %v6460_v47 = vld [vmem:[%s9205_s1 + $0x13] ss:$0 sm:$0xff] }
0x41c6   :  { %v4951_v22 = vsel %vm189_vm3, %v7565_v49, 0.0 }
0x41c9   :  { %4952 = vadd.xlane.f32.xlu0 %v4951_v22 }
0x41df   :  { %4959 = vrot.lane.b32.xlu0 %v8777_v1, %s7668_s12 }
0x4252   :  { %v4950_v40 = vpop.xlane.xlu0 %4949 }
0x4253   :  { %7566 = vrcp.f32 %v4950_v40 }
0x4256   :  { %v4953_v32 = vpop.xlane.xlu0 %4952 }
0x4257   :  { %7568 = vrcp.f32 %v4953_v32 }
0x425a   :  { %v4960_v55 = vpop.permute.xlu0 %4959 }
0x425b   :  { %7150 = vmatpush3.bf16.msra.mxu1 %v4960_v55 }
0x425c   :  { %7161 = vmatprep.subr.bf16.mxu1 %v7656_v18 }
0x425d   :  { %v7567_v63 = vpop.eup %7566 }
0x425e   :  { %v4955_v6 = vmul.f32 %v7567_v63, %v7563_v11 }
0x4261   :  { %v7569_v59 = vpop.eup %7568 }
0x4262   :  { %v4957_v1 = vmul.f32 %v7569_v59, %v7565_v49  ;;  %v8965_v49 = vld [vmem:[%s9205_s1 + $0x5] ss:$0 sm:$0xff] }
0x4264   :  { %v4958_v61 = vpack.c.bf16 %v4957_v1, %v4955_v6 }
0x4266   :  { %7152 = vmatmul.mubr.msk.bf16.vlgmr.msra.gmra.mrb[148].mxu1 %vm189_vm3, %v4958_v61 }
0x4267   :  { %7165 = vmatprep.mubr.msk.bf16.mxu1 %vm7657_vm1, %v7656_v18  ;;  %7162 = vmatpush3.bf16.msra.mxu1 %v6462_v14 }
0x4268   :  { %7163 = vmatprep.subr.bf16.mxu1 %v7656_v18 }
0x426b   :  { %7164 = vmatpush3.bf16.msra.mxu1 %v6463_v54 }
0x426c   :  { %7177 = vmatprep.subr.bf16.mxu1 %v7656_v18 }
0x4290   :  { %v4872_v2 = vpop.f32.mrb[144].mxu1 }
0x4291   :  { %v4879_v42 = vadd.f32 %v4872_v2, %v8871_v9  ;;  %v7141_v16 = vpop.f32.mrb[145].mxu1 }
0x4292   :  { %v4875_v3 = vpop.f32.mrb[146].mxu1 }
0x4293   :  { %v4880_v62 = vadd.f32 %v4875_v3, %v8874_v12  ;;  %v7142_v41 = vpop.f32.mrb[147].mxu1 }
0x4339   :  { %v4999_v5 = vpop.f32.mrb[148].mxu1 }
0x433a   :  { %v7153_v35 = vpop.f32.mrb[149].mxu1 }
0x433b   :  { %v5002_v7 = vpop.f32.mrb[150].mxu1 }
0x433c   :  { %v5006_v36 = vpack.c.bf16 %v5002_v7, %v4999_v5  ;;  %v7154_v23 = vpop.f32.mrb[151].mxu1 }
0x433e   :  { %7158 = vmatmul.mubr.msk.bf16.vlgmr.msra.gmra.mrb[132].mxu0 %vm129_vm2, %v5006_v36 }
0x433f   :  { %7173 = vmatprep.mubr.msk.bf16.mxu0 %vm7657_vm1, %v7656_v18 }
0x4411   :  { %v5050_v10 = vpop.f32.mrb[132].mxu0 }
0x4412   :  { %v5057_v0 = vadd.f32 %v5050_v10, %v4879_v42  ;;  %v7159_v26 = vpop.f32.mrb[133].mxu0 }
0x4413   :  { %v5053_v9 = vpop.f32.mrb[134].mxu0 }
0x4414   :  { %v5063_v60 = vadd.f32 %v5061_v46, %v5057_v0  ;;  %v5058_v25 = vadd.f32 %v5053_v9, %v4880_v62  ;;  %v7160_v50 = vpop.f32.mrb[135].mxu0 }
0x4416   :  { %v5064_v12 = vadd.f32 %v5061_v46, %v5058_v25  ;;  %5067 = vrot.lane.b32.xlu1 %v5063_v60, %s7662_s6 }
0x4418   :  { %5069 = vrot.lane.b32.xlu0 %v5064_v12, %s7662_s6 }
0x4488   :  { %v5068_v19 = vpop.permute.xlu1 %5067 }
0x4489   :  { %v8911_v56 = vadd.f32 %v5068_v19, %v8718_v51 }
0x448a   :  { %v5070_v27 = vpop.permute.xlu0 %5069 }
0x448b   :  { %v8914_v30 = vadd.f32 %v5070_v27, %v8721_v57  ;;  %5078 = vrot.lane.b32.xlu1 %v8911_v56, %s7655_s18 }
0x448d   :  { %5080 = vrot.lane.b32.xlu0 %v8914_v30, %s7655_s18 }
0x44fd   :  { %v5079_v28 = vpop.permute.xlu1 %5078 }
0x44fe   :  { %v5084_v31 = vsel %vm19_vm0, %v5079_v28, 0.0 }
0x44ff   :  { %5085 = vadd.xlane.f32.xlu1 %v5084_v31  ;;  %v5081_v33 = vpop.permute.xlu0 %5080 }
0x4500   :  { %v5087_v45 = vsel %vm19_vm0, %v5081_v33, 0.0 }
0x4501   :  { %5088 = vadd.xlane.f32.xlu0 %v5087_v45 }
0x458c   :  { %v5086_v51 = vpop.xlane.xlu1 %5085 }
0x458d   :  { %v5090_v34 = vmul.f32 0.03125, %v5086_v51 }
0x458e   :  { %v5089_v20 = vpop.xlane.xlu0 %5088 }
0x458f   :  { %v5092_v57 = vsub.f32 %v8911_v56, %v5090_v34  ;;  %v5091_v15 = vmul.f32 0.03125, %v5089_v20 }
0x4591   :  { %v5094_v38 = vmul.f32 %v5092_v57, %v5092_v57  ;;  %v5093_v4 = vsub.f32 %v8914_v30, %v5091_v15 }
0x4593   :  { %v5095_v21 = vmul.f32 %v5093_v4, %v5093_v4  ;;  %5098 = vrot.lane.b32.xlu0 %v5094_v38, %s7655_s18 }
0x4595   :  { %5100 = vrot.lane.b32.xlu1 %v5095_v21, %s7655_s18 }
0x4605   :  { %v5099_v44 = vpop.permute.xlu0 %5098 }
0x4606   :  { %v5104_v17 = vsel %vm19_vm0, %v5099_v44, 0.0 }
0x4607   :  { %v5101_v58 = vpop.permute.xlu1 %5100  ;;  %5105 = vadd.xlane.f32.xlu1 %v5104_v17 }
0x4608   :  { %v5107_v11 = vsel %vm19_vm0, %v5101_v58, 0.0 }
0x4609   :  { %5108 = vadd.xlane.f32.xlu0 %v5107_v11 }
0x4618   :  { %5220 = vrot.lane.b32.xlu1 %v6463_v54, %s7655_s18 }
0x461c   :  { %5118 = vrot.lane.b32.xlu1 %v5092_v57, %s7655_s18 }
0x461f   :  { %5218 = vrot.lane.b32.xlu0 %v6462_v14, %s7655_s18 }
0x4620   :  { %5147 = vrot.lane.b32.xlu1 %v6460_v47, %s7655_s18 }
0x4623   :  { %5120 = vrot.lane.b32.xlu0 %v5093_v4, %s7655_s18 }
0x4627   :  { %5225 = vrot.lane.b32.xlu0 %v8965_v49, %s7655_s18 }
0x4694   :  { %v5106_v22 = vpop.xlane.xlu1 %5105 }
0x4695   :  { %v5110_v53 = vmul.f32 0.032258064, %v5106_v22 }
0x4696   :  { %v5109_v40 = vpop.xlane.xlu0 %5108 }
0x4697   :  { %7570 = vrsqrt.f32 %v5110_v53  ;;  %v5111_v32 = vmul.f32 0.032258064, %v5109_v40  ;;  %vm5128_vm12 = vcmp.eq.f32.partialorder %v5110_v53, inf  ;;  %v5131_v61 = vand.u32 2147483648, %v5110_v53 }
0x4698   :  { %v5221_v63 = vpop.permute.xlu1 %5220  ;;  %vm5130_vm13 = vcmp.eq.f32.partialorder %v5110_v53, 0.0 }
0x4699   :  { %7572 = vrsqrt.f32 %v5111_v32  ;;  %vm5135_vm14 = vcmp.eq.f32.partialorder %v5111_v32, inf  ;;  %v5138_v2 = vand.u32 2147483648, %v5111_v32  ;;  %vm5137_vm15 = vcmp.eq.f32.partialorder %v5111_v32, 0.0 }
0x469a   :  { %v5219_v55 = vpop.permute.xlu0 %5218 }
0x469b   :  { %7170 = vmatpush3.bf16.msra.mxu0 %v5219_v55 }
0x469c   :  { %7171 = vmatprep.subr.bf16.mxu0 %v7656_v18 }
0x469e   :  { %v5121_v5 = vpop.permute.xlu0 %5120 }
0x469f   :  { %7172 = vmatpush3.bf16.msra.mxu0 %v5221_v63  ;;  %v5125_v23 = vmul.f32 %v6460_v47, %v5121_v5 }
0x46a0   :  { %7183 = vmatprep.subr.bf16.mxu0 %v7656_v18 }
0x46a1   :  { %v7571_v59 = vpop.eup %7570 }
0x46a2   :  { %v5127_v6 = vmul.f32 %v7571_v59, %v5110_v53  ;;  %7174 = vmatmul.mubr.msk.bf16.vlgmr.msra.gmra.mrb[136].mxu0 %vm19_vm0, %v8494_v48  ;;  %v5119_v48 = vpop.permute.xlu1 %5118  ;;  %v5226_v25 = vpop.permute.xlu0 %5225 }
0x46a3   :  { %v7573_v1 = vpop.eup %7572  ;;  %7185 = vmatprep.mubr.msk.bf16.mxu0 %vm7657_vm1, %v7656_v18  ;;  %v5124_v35 = vmul.f32 %v6460_v47, %v5119_v48 }
0x46a4   :  { %v5134_v13 = vmul.f32 %v7573_v1, %v5111_v32  ;;  %v5129_v24 = vsel %vm5128_vm12, %v5110_v53, %v5127_v6 }
0x46a5   :  { %v5132_v42 = vsel %vm5130_vm13, %v5131_v61, %v5129_v24 }
0x46a6   :  { %v5140_v16 = vadd.f32 1e-06, %v5132_v42  ;;  %v5136_v3 = vsel %vm5135_vm14, %v5111_v32, %v5134_v13  ;;  %v5148_v46 = vpop.permute.xlu1 %5147 }
0x46a7   :  { %v5139_v62 = vsel %vm5137_vm15, %v5138_v2, %v5136_v3 }
0x46a8   :  { %7574 = vrcp.f32 %v5140_v16  ;;  %v5141_v41 = vadd.f32 1e-06, %v5139_v62 }
0x46aa   :  { %7576 = vrcp.f32 %v5141_v41 }
0x46b2   :  { %v7575_v7 = vpop.eup %7574 }
0x46b3   :  { %v5143_v36 = vmul.f32 %v7575_v7, %v5124_v35 }
0x46b4   :  { %v7577_v10 = vpop.eup %7576 }
0x46b5   :  { %v5145_v0 = vmul.f32 %v7577_v10, %v5125_v23  ;;  %v5150_v26 = vadd.f32 %v5148_v46, %v5143_v36 }
0x46b7   :  { %v5151_v9 = vadd.f32 %v5148_v46, %v5145_v0 }
0x46b9   :  { %v5157_v60 = vpack.c.bf16 %v5151_v9, %v5150_v26 }
0x46bb   :  { %7166 = vmatmul.mubr.msk.bf16.vlgmr.msra.gmra.mrb[152].mxu1 %vm19_vm0, %v5157_v60 }
0x46bc   :  { %7179 = vmatprep.mubr.msk.bf16.mxu1 %vm7657_vm1, %v7656_v18 }
0x4775   :  { %v5262_v50 = vpop.f32.mrb[136].mxu0 }
0x4776   :  { %v7175_v12 = vpop.f32.mrb[137].mxu0  ;;  %v5263_v27 = vadd.f32 %v5262_v50, %v5226_v25 }
0x4777   :  { %v5265_v19 = vpop.f32.mrb[138].mxu0 }
0x4778   :  { %v5266_v28 = vadd.f32 %v5265_v19, %v5226_v25  ;;  %v7176_v31 = vpop.f32.mrb[139].mxu0 }
0x477a   :  { %v8978_v33 = vpack.c.bf16 %v5266_v28, %v5263_v27  ;;  %v6470_v28 = vcombine.low %v8934_v39, %v8934_v39 }
0x477c   :  { %5397 = vrot.lane.b32.xlu1 %v8978_v33, %s7660_s4  ;;  %v5275_v45 = vsel %vm129_vm2, %v8978_v33, 0 }
0x477d   :  { %7178 = vmatpush3.bf16.xpose.msra.mxu1 %v5275_v45 }
0x477e   :  { %7189 = vmatprep.subr.bf16.mxu1 %v7656_v18 }
0x478e   :  { %v5211_v51 = vpop.f32.mrb[152].mxu1 }
0x478f   :  { %v7167_v34 = vpop.f32.mrb[153].mxu1  ;;  %v5212_v57 = vadd.f32 %v8965_v49, %v5211_v51 }
0x4790   :  { %v5214_v20 = vpop.f32.mrb[154].mxu1 }
0x4791   :  { %v5215_v15 = vadd.f32 %v8965_v49, %v5214_v20  ;;  %v7168_v38 = vpop.f32.mrb[155].mxu1 }
0x4793   :  { %v8987_v4 = vpack.c.bf16 %v5215_v15, %v5212_v57 }
0x4795   :  { %5395 = vrot.lane.b32.xlu0 %v8987_v4, %s7660_s4  ;;  %7180 = vmatmul.mubr.msk.bf16.vlgmr.msra.gmra.mrb[156].mxu1 %vm129_vm2, %v8987_v4 }
0x4796   :  { %7191 = vmatprep.mubr.msk.bf16.mxu1 %vm7657_vm1, %v7656_v18 }
0x47ee   :  { %v5398_v21 = vpop.permute.xlu1 %5397 }
0x47ef   :  { %v5403_v14 = vsel %vm129_vm2, %v5398_v21, 0 }
0x47f0   :  { %7190 = vmatpush3.bf16.xpose.msra.mxu1 %v5403_v14 }
0x47f1   :  { %7201 = vmatprep.subr.bf16.mxu1 %v7656_v18 }
0x4807   :  { %v5396_v54 = vpop.permute.xlu0 %5395 }
0x4808   :  { %7192 = vmatmul.mubr.msk.bf16.vlgmr.msra.gmra.mrb[160].mxu1 %vm129_vm2, %v5396_v54 }
0x4809   :  { %7203 = vmatprep.mubr.msk.bf16.mxu1 %vm7657_vm1, %v7656_v18 }
0x4868   :  { %v5311_v44 = vpop.f32.mrb[156].mxu1 }
0x4869   :  { %v5318_v17 = vmul.f32 0.35355338, %v5311_v44  ;;  %v7181_v58 = vpop.f32.mrb[157].mxu1 }
0x486a   :  { %v5314_v11 = vpop.f32.mrb[158].mxu1 }
0x486b   :  { %v5320_v47 = vadd.f32 %v5318_v17, %v8533_v8  ;;  %v5319_v22 = vmul.f32 0.35355338, %v5314_v11  ;;  %v7182_v53 = vpop.f32.mrb[159].mxu1 }
0x486d   :  { %v5321_v40 = vadd.f32 %v5319_v22, %v8535_v29  ;;  %v5322_v32 = vsel %vm189_vm3, %v5320_v47, -inf }
0x486e   :  { %5323 = vmax.xlane.f32.xlu1 %v5322_v32 }
0x486f   :  { %v5325_v55 = vsel %vm189_vm3, %v5321_v40, -inf }
0x4870   :  { %5326 = vmax.xlane.f32.xlu0 %v5325_v55 }
0x48db   :  { %v5439_v63 = vpop.f32.mrb[160].mxu1 }
0x48dc   :  { %v5446_v59 = vmul.f32 0.35355338, %v5439_v63  ;;  %v7193_v6 = vpop.f32.mrb[161].mxu1 }
0x48dd   :  { %v5442_v1 = vpop.f32.mrb[162].mxu1 }
0x48de   :  { %v5448_v61 = vadd.f32 %v5446_v59, %v8533_v8  ;;  %v5447_v13 = vmul.f32 0.35355338, %v5442_v1  ;;  %v7194_v24 = vpop.f32.mrb[163].mxu1 }
0x48e0   :  { %v5449_v2 = vadd.f32 %v5447_v13, %v8535_v29  ;;  %v5450_v42 = vsel %vm189_vm3, %v5448_v61, -inf }
0x48e1   :  { %5451 = vmax.xlane.f32.xlu0 %v5450_v42 }
0x48e2   :  { %v5453_v16 = vsel %vm189_vm3, %v5449_v2, -inf }
0x48e5   :  { %5454 = vmax.xlane.f32.xlu0 %v5453_v16 }
0x48fb   :  { %v5324_v3 = vpop.xlane.xlu1 %5323 }
0x48fc   :  { %v5328_v62 = vsub.f32 %v5320_v47, %v5324_v3 }
0x48fd   :  { %v5327_v41 = vpop.xlane.xlu0 %5326 }
0x48fe   :  { %v5330_v48 = vmul.f32 1.442695, %v5328_v62  ;;  %v5329_v5 = vsub.f32 %v5321_v40, %v5327_v41 }
0x4900   :  { %7578 = vpow2.f32 %v5330_v48  ;;  %v5332_v35 = vmul.f32 1.442695, %v5329_v5 }
0x4902   :  { %7580 = vpow2.f32 %v5332_v35 }
0x490a   :  { %v7579_v7 = vpop.eup %7578 }
0x490b   :  { %v5334_v36 = vsel %vm189_vm3, %v7579_v7, 0.0 }
0x490c   :  { %v7581_v23 = vpop.eup %7580  ;;  %5335 = vadd.xlane.f32.xlu1 %v5334_v36 }
0x490d   :  { %v5337_v10 = vsel %vm189_vm3, %v7581_v23, 0.0 }
0x490e   :  { %5338 = vadd.xlane.f32.xlu0 %v5337_v10 }
0x496e   :  { %v5452_v46 = vpop.xlane.xlu0 %5451 }
0x496f   :  { %v5456_v0 = vsub.f32 %v5448_v61, %v5452_v46 }
0x4971   :  { %v5458_v26 = vmul.f32 1.442695, %v5456_v0 }
0x4972   :  { %v5455_v9 = vpop.xlane.xlu0 %5454 }
0x4973   :  { %7582 = vpow2.f32 %v5458_v26  ;;  %v5457_v60 = vsub.f32 %v5449_v2, %v5455_v9 }
0x4975   :  { %v5460_v25 = vmul.f32 1.442695, %v5457_v60 }
0x4977   :  { %7584 = vpow2.f32 %v5460_v25 }
0x497d   :  { %v7583_v50 = vpop.eup %7582 }
0x497e   :  { %v5462_v12 = vsel %vm189_vm3, %v7583_v50, 0.0 }
0x497f   :  { %5463 = vadd.xlane.f32.xlu1 %v5462_v12 }
0x4981   :  { %v7585_v19 = vpop.eup %7584 }
0x4982   :  { %v5465_v27 = vsel %vm189_vm3, %v7585_v19, 0.0 }
0x4983   :  { %5466 = vadd.xlane.f32.xlu0 %v5465_v27 }
0x4990   :  { %5346 = vrot.lane.b32.xlu1 %v8978_v33, %s7655_s18 }
0x4994   :  { %5522 = vrot.lane.b32.xlu1 %v6470_v28, %s7662_s6 }
0x4998   :  { %5623 = vrot.lane.b32.xlu1 %v8978_v33, %s7663_s7 }
0x4999   :  { %5473 = vrot.lane.b32.xlu0 %v8978_v33, %s7658_s29  ;;  %v5336_v45 = vpop.xlane.xlu1 %5335 }
0x499b   :  { %v5339_v31 = vpop.xlane.xlu0 %5338 }
0x499c   :  { %5621 = vrot.lane.b32.xlu1 %v8987_v4, %s7663_s7  ;;  %7586 = vrcp.f32 %v5339_v31 }
0x499d   :  { %7588 = vrcp.f32 %v5336_v45 }
0x49a6   :  { %v7587_v51 = vpop.eup %7586 }
0x49a7   :  { %v7589_v20 = vpop.eup %7588  ;;  %v5343_v57 = vmul.f32 %v7587_v51, %v7581_v23  ;;  %v6472_v51 = vcombine.low %v8929_v37, %v8929_v37 }
0x49a8   :  { %v5341_v39 = vmul.f32 %v7589_v20, %v7579_v7 }
0x49aa   :  { %v5344_v21 = vpack.c.bf16 %v5343_v57, %v5341_v39 }
0x4a0c   :  { %v5464_v34 = vpop.xlane.xlu1 %5463 }
0x4a0d   :  { %7590 = vrcp.f32 %v5464_v34 }
0x4a10   :  { %v5347_v15 = vpop.permute.xlu1 %5346  ;;  %v5467_v38 = vpop.xlane.xlu0 %5466 }
0x4a11   :  { %7592 = vrcp.f32 %v5467_v38  ;;  %7184 = vmatpush3.bf16.msra.mxu0 %v5347_v15 }
0x4a12   :  { %7195 = vmatprep.subr.bf16.mxu0 %v7656_v18 }
0x4a14   :  { %v5523_v14 = vpop.permute.xlu1 %5522  ;;  %7186 = vmatmul.mubr.msk.bf16.vlgmr.msra.gmra.mrb[140].mxu0 %vm189_vm3, %v5344_v21  ;;  %v5474_v54 = vpop.permute.xlu0 %5473 }
0x4a15   :  { %v5528_v44 = vsel %vm393_vm4, %v5523_v14, 0  ;;  %7196 = vmatpush3.bf16.msra.mxu0 %v5474_v54  ;;  %7197 = vmatprep.mubr.msk.bf16.mxu0 %vm7657_vm1, %v7656_v18 }
0x4a16   :  { %7202 = vmatpush3.bf16.msra.mxu1 %v5528_v44  ;;  %7207 = vmatprep.subr.bf16.mxu0 %v7656_v18 }
0x4a17   :  { %7213 = vmatprep.subr.bf16.mxu1 %v7656_v18  ;;  %v7591_v17 = vpop.eup %7590 }
0x4a18   :  { %v5469_v11 = vmul.f32 %v7591_v17, %v7583_v50  ;;  %v5624_v1 = vpop.permute.xlu1 %5623 }
0x4a19   :  { %v5629_v2 = vsel %vm129_vm2, %v5624_v1, 0 }
0x4a1b   :  { %v7593_v58 = vpop.eup %7592 }
0x4a1c   :  { %v5471_v47 = vmul.f32 %v7593_v58, %v7585_v19  ;;  %v5622_v42 = vpop.permute.xlu1 %5621 }
0x4a1e   :  { %v5472_v22 = vpack.c.bf16 %v5471_v47, %v5469_v11 }
0x4a20   :  { %7198 = vmatmul.mubr.msk.bf16.vlgmr.msra.gmra.mrb[144].mxu0 %vm189_vm3, %v5472_v22 }
0x4a21   :  { %7209 = vmatprep.mubr.msk.bf16.mxu0 %vm7657_vm1, %v7656_v18 }
0x4ae7   :  { %v9033_v53 = vpop.f32.mrb[140].mxu0 }
0x4ae8   :  { %v7187_v40 = vpop.f32.mrb[141].mxu0 }
0x4ae9   :  { %v9035_v32 = vpop.f32.mrb[142].mxu0 }
0x4aea   :  { %v5393_v55 = vpack.c.bf16 %v9035_v32, %v9033_v53  ;;  %v7188_v63 = vpop.f32.mrb[143].mxu0 }
0x4af3   :  { %v5513_v59 = vpop.f32.mrb[144].mxu0 }
0x4af4   :  { %v7199_v6 = vpop.f32.mrb[145].mxu0 }
0x4af5   :  { %v5516_v61 = vpop.f32.mrb[146].mxu0 }
0x4af6   :  { %v5520_v13 = vpack.c.bf16 %v5516_v61, %v5513_v59  ;;  %v7200_v24 = vpop.f32.mrb[147].mxu0 }
0x4af8   :  { %7204 = vmatmul.mubr.msk.bf16.vlgmr.msra.gmra.mrb[164].mxu1 %vm129_vm2, %v5520_v13 }
0x4af9   :  { %7214 = vmatpush3.bf16.xpose.msra.mxu1 %v5629_v2  ;;  %7215 = vmatprep.mubr.msk.bf16.mxu1 %vm7657_vm1, %v7656_v18 }
0x4afa   :  { %7225 = vmatprep.subr.bf16.mxu1 %v7656_v18 }
0x4b00   :  { %7216 = vmatmul.mubr.msk.bf16.vlgmr.msra.gmra.mrb[168].mxu1 %vm129_vm2, %v5622_v42 }
0x4b01   :  { %7227 = vmatprep.mubr.msk.bf16.mxu1 %vm7657_vm1, %v7656_v18 }
0x4bcb   :  { %v9047_v16 = vpop.f32.mrb[164].mxu1 }
0x4bcc   :  { %v7205_v3 = vpop.f32.mrb[165].mxu1 }
0x4bcd   :  { %v9049_v62 = vpop.f32.mrb[166].mxu1 }
0x4bce   :  { %v7206_v41 = vpop.f32.mrb[167].mxu1 }
0x4bd3   :  { %v5665_v48 = vpop.f32.mrb[168].mxu1 }
0x4bd4   :  { %v5672_v5 = vmul.f32 0.35355338, %v5665_v48  ;;  %v7217_v35 = vpop.f32.mrb[169].mxu1 }
0x4bd5   :  { %v5668_v7 = vpop.f32.mrb[170].mxu1 }
0x4bd6   :  { %v5674_v36 = vadd.f32 %v5672_v5, %v8533_v8  ;;  %v5673_v23 = vmul.f32 0.35355338, %v5668_v7  ;;  %v7218_v10 = vpop.f32.mrb[171].mxu1 }
0x4bd8   :  { %v5675_v46 = vadd.f32 %v5673_v23, %v8535_v29  ;;  %v5676_v0 = vsel %vm189_vm3, %v5674_v36, -inf }
0x4bd9   :  { %5677 = vmax.xlane.f32.xlu0 %v5676_v0  ;;  %v6476_v0 = vcombine.low %v8941_v52, %v8941_v52 }
0x4bda   :  { %v5679_v26 = vsel %vm189_vm3, %v5675_v46, -inf }
0x4bdb   :  { %5680 = vmax.xlane.f32.xlu1 %v5679_v26 }
0x4bec   :  { %5699 = vrot.lane.b32.xlu1 %v8978_v33, %s7664_s8 }
0x4bf0   :  { %5801 = vrot.lane.b32.xlu1 %v8978_v33, %s7666_s10 }
0x4bf4   :  { %5799 = vrot.lane.b32.xlu1 %v8987_v4, %s7666_s10 }
0x4c66   :  { %v5678_v9 = vpop.xlane.xlu0 %5677 }
0x4c67   :  { %v5682_v60 = vsub.f32 %v5674_v36, %v5678_v9 }
0x4c68   :  { %v5681_v25 = vpop.xlane.xlu1 %5680 }
0x4c69   :  { %v5684_v50 = vmul.f32 1.442695, %v5682_v60  ;;  %v5683_v12 = vsub.f32 %v5675_v46, %v5681_v25 }
0x4c6b   :  { %7594 = vpow2.f32 %v5684_v50  ;;  %v5686_v19 = vmul.f32 1.442695, %v5683_v12 }
0x4c6c   :  { %v5700_v15 = vpop.permute.xlu1 %5699 }
0x4c6d   :  { %7596 = vpow2.f32 %v5686_v19 }
0x4c70   :  { %v5802_v54 = vpop.permute.xlu1 %5801 }
0x4c71   :  { %v5807_v44 = vsel %vm129_vm2, %v5802_v54, 0 }
0x4c74   :  { %v5800_v17 = vpop.permute.xlu1 %5799 }
0x4c75   :  { %v7595_v27 = vpop.eup %7594 }
0x4c76   :  { %v5688_v28 = vsel %vm189_vm3, %v7595_v27, 0.0 }
0x4c77   :  { %v7597_v31 = vpop.eup %7596  ;;  %5689 = vadd.xlane.f32.xlu0 %v5688_v28 }
0x4c78   :  { %v5691_v45 = vsel %vm189_vm3, %v7597_v31, 0.0 }
0x4c7b   :  { %5692 = vadd.xlane.f32.xlu0 %v5691_v45 }
0x4c91   :  { %5572 = vrot.lane.b32.xlu0 %v6472_v51, %s7662_s6 }
0x4d04   :  { %v5690_v4 = vpop.xlane.xlu0 %5689 }
0x4d05   :  { %7598 = vrcp.f32 %v5690_v4 }
0x4d08   :  { %v5693_v34 = vpop.xlane.xlu0 %5692 }
0x4d09   :  { %7600 = vrcp.f32 %v5693_v34 }
0x4d0c   :  { %v5573_v20 = vpop.permute.xlu0 %5572 }
0x4d0d   :  { %v5578_v57 = vsel %vm393_vm4, %v5573_v20, 0 }
0x4d0e   :  { %7208 = vmatpush3.bf16.msra.mxu0 %v5578_v57 }
0x4d0f   :  { %7219 = vmatprep.subr.bf16.mxu0 %v7656_v18  ;;  %v7599_v39 = vpop.eup %7598 }
0x4d10   :  { %v5695_v38 = vmul.f32 %v7599_v39, %v7595_v27 }
0x4d11   :  { %7210 = vmatmul.mubr.msk.bf16.vlgmr.msra.gmra.mrb[148].mxu0 %vm129_vm2, %v5393_v55 }
0x4d12   :  { %7220 = vmatpush3.bf16.msra.mxu0 %v5700_v15  ;;  %7221 = vmatprep.mubr.msk.bf16.mxu0 %vm7657_vm1, %v7656_v18 }
0x4d13   :  { %v7601_v37 = vpop.eup %7600  ;;  %7231 = vmatprep.subr.bf16.mxu0 %v7656_v18 }
0x4d14   :  { %v5697_v21 = vmul.f32 %v7601_v37, %v7597_v31 }
0x4d16   :  { %v5698_v14 = vpack.c.bf16 %v5697_v21, %v5695_v38 }
0x4d19   :  { %7222 = vmatmul.mubr.msk.bf16.vlgmr.msra.gmra.mrb[152].mxu0 %vm189_vm3, %v5698_v14 }
0x4d1a   :  { %7233 = vmatprep.mubr.msk.bf16.mxu0 %vm7657_vm1, %v7656_v18 }
0x4d1b   :  { %7232 = vmatpush3.bf16.xpose.msra.mxu0 %v5807_v44 }
0x4d1c   :  { %7243 = vmatprep.subr.bf16.mxu0 %v7656_v18 }
0x4d22   :  { %7234 = vmatmul.mubr.msk.bf16.vlgmr.msra.gmra.mrb[156].mxu0 %vm129_vm2, %v5800_v17 }
0x4d23   :  { %7245 = vmatprep.mubr.msk.bf16.mxu0 %vm7657_vm1, %v7656_v18 }
0x4de4   :  { %v5614_v58 = vpop.f32.mrb[148].mxu0 }
0x4de5   :  { %v9081_v11 = vadd.f32 %v5614_v58, %v9047_v16  ;;  %v7211_v47 = vpop.f32.mrb[149].mxu0 }
0x4de6   :  { %v5617_v22 = vpop.f32.mrb[150].mxu0 }
0x4de7   :  { %v9084_v53 = vadd.f32 %v5617_v22, %v9049_v62  ;;  %v7212_v40 = vpop.f32.mrb[151].mxu0 }
0x4dec   :  { %v5739_v32 = vpop.f32.mrb[152].mxu0 }
0x4ded   :  { %v7223_v55 = vpop.f32.mrb[153].mxu0 }
0x4dee   :  { %v5742_v63 = vpop.f32.mrb[154].mxu0 }
0x4def   :  { %v5746_v59 = vpack.c.bf16 %v5742_v63, %v5739_v32  ;;  %v7224_v6 = vpop.f32.mrb[155].mxu0 }
0x4df5   :  { %v5843_v1 = vpop.f32.mrb[156].mxu0 }
0x4df6   :  { %v5850_v61 = vmul.f32 0.35355338, %v5843_v1  ;;  %v7235_v13 = vpop.f32.mrb[157].mxu0 }
0x4df7   :  { %v5846_v24 = vpop.f32.mrb[158].mxu0 }
0x4df8   :  { %v5852_v2 = vadd.f32 %v5850_v61, %v8533_v8  ;;  %v5851_v42 = vmul.f32 0.35355338, %v5846_v24  ;;  %v7236_v16 = vpop.f32.mrb[159].mxu0 }
0x4dfa   :  { %v5853_v3 = vadd.f32 %v5851_v42, %v8535_v29  ;;  %v5854_v41 = vsel %vm189_vm3, %v5852_v2, -inf }
0x4dfb   :  { %5855 = vmax.xlane.f32.xlu0 %v5854_v41 }
0x4dfc   :  { %v5857_v62 = vsel %vm189_vm3, %v5853_v3, -inf }
0x4dfd   :  { %5858 = vmax.xlane.f32.xlu1 %v5857_v62 }
0x4e0e   :  { %5877 = vrot.lane.b32.xlu1 %v8978_v33, %s7665_s9  ;;  %v6480_v33 = vcombine.low %v8946_v43, %v8946_v43 }
0x4e12   :  { %5926 = vrot.lane.b32.xlu1 %v6480_v33, %s7662_s6 }
0x4e16   :  { %5977 = vrot.lane.b32.xlu1 %v8965_v49, %s7662_s6 }
0x4e88   :  { %v5856_v48 = vpop.xlane.xlu0 %5855 }
0x4e89   :  { %v5860_v5 = vsub.f32 %v5852_v2, %v5856_v48 }
0x4e8a   :  { %v5859_v35 = vpop.xlane.xlu1 %5858 }
0x4e8b   :  { %v5862_v7 = vmul.f32 1.442695, %v5860_v5  ;;  %v5861_v36 = vsub.f32 %v5853_v3, %v5859_v35  ;;  %v6482_v5 = vld [vmem:[%s9205_s1 + $0x14] ss:$0 sm:$0xff] }
0x4e8c   :  { %v7340_v35 = vld [vmem:[%s9204_s0 + $0xf0] sm:$0xff]  }
0x4e8d   :  { %7602 = vpow2.f32 %v5862_v7  ;;  %v5864_v8 = vmul.f32 1.442695, %v5861_v36  ;;  %v7341_v7 = vld [vmem:[%s9204_s0 + $0xf8] sm:$0xff]   ;;  %v7342_v36 = vld [vmem:[%s9204_s0 + $0x100] sm:$0xff]  }
0x4e8e   :  { %v5878_v50 = vpop.permute.xlu1 %5877 }
0x4e8f   :  { %7604 = vpow2.f32 %v5864_v8  ;;  %v6483_v8 = vld [vmem:[%s9205_s1 + $0x9] ss:$0 sm:$0xff] }
0x4e92   :  { %v5927_v27 = vpop.permute.xlu1 %5926 }
0x4e93   :  { %v5932_v28 = vsel %vm393_vm4, %v5927_v27, 0 }
0x4e94   :  { %7244 = vmatpush3.bf16.msra.mxu0 %v5932_v28 }
0x4e95   :  { %7257 = vmatprep.subr.bf16.mxu0 %v7656_v18 }
0x4e96   :  { %v5978_v14 = vpop.permute.xlu1 %5977 }
0x4e97   :  { %v7603_v23 = vpop.eup %7602 }
0x4e98   :  { %v5866_v29 = vsel %vm189_vm3, %v7603_v23, 0.0 }
0x4e99   :  { %v7605_v10 = vpop.eup %7604  ;;  %5867 = vadd.xlane.f32.xlu0 %v5866_v29 }
0x4e9a   :  { %v5869_v46 = vsel %vm189_vm3, %v7605_v10, 0.0 }
0x4e9d   :  { %5870 = vadd.xlane.f32.xlu0 %v5869_v46 }
0x4eb3   :  { %5748 = vrot.lane.b32.xlu0 %v6476_v0, %s7662_s6 }
0x4f26   :  { %v5868_v26 = vpop.xlane.xlu0 %5867 }
0x4f27   :  { %7606 = vrcp.f32 %v5868_v26 }
0x4f2a   :  { %v5871_v9 = vpop.xlane.xlu0 %5870 }
0x4f2b   :  { %7608 = vrcp.f32 %v5871_v9 }
0x4f2e   :  { %v5749_v60 = vpop.permute.xlu0 %5748 }
0x4f2f   :  { %v5754_v25 = vsel %vm393_vm4, %v5749_v60, 0 }
0x4f30   :  { %7226 = vmatpush3.bf16.msra.mxu1 %v5754_v25 }
0x4f31   :  { %7237 = vmatprep.subr.bf16.mxu1 %v7656_v18  ;;  %v7607_v52 = vpop.eup %7606 }
0x4f32   :  { %v5873_v49 = vmul.f32 %v7607_v52, %v7603_v23  ;;  %v7343_v23 = vld [vmem:[%s9204_s0 + $0x108] sm:$0xff]  }
0x4f33   :  { %7228 = vmatmul.mubr.msk.bf16.vlgmr.msra.gmra.mrb[172].mxu1 %vm129_vm2, %v5746_v59 }
0x4f34   :  { %7238 = vmatpush3.bf16.msra.mxu1 %v5878_v50  ;;  %7239 = vmatprep.mubr.msk.bf16.mxu1 %vm7657_vm1, %v7656_v18 }
0x4f35   :  { %v7609_v43 = vpop.eup %7608  ;;  %7249 = vmatprep.subr.bf16.mxu1 %v7656_v18 }
0x4f36   :  { %v5875_v12 = vmul.f32 %v7609_v43, %v7605_v10 }
0x4f38   :  { %v5876_v19 = vpack.c.bf16 %v5875_v12, %v5873_v49 }
0x4f3b   :  { %7240 = vmatmul.mubr.msk.bf16.vlgmr.msra.gmra.mrb[176].mxu1 %vm189_vm3, %v5876_v19 }
0x4f3c   :  { %7253 = vmatprep.mubr.msk.bf16.mxu1 %vm7657_vm1, %v7656_v18  ;;  %7250 = vmatpush3.bf16.msra.mxu1 %v7340_v35 }
0x4f3d   :  { %7251 = vmatprep.subr.bf16.mxu1 %v7656_v18 }
0x4f40   :  { %7252 = vmatpush3.bf16.msra.mxu1 %v7341_v7 }
0x5006   :  { %v5790_v31 = vpop.f32.mrb[172].mxu1 }
0x5007   :  { %v5797_v45 = vadd.f32 %v5790_v31, %v9081_v11  ;;  %v7229_v51 = vpop.f32.mrb[173].mxu1 }
0x5008   :  { %v5793_v4 = vpop.f32.mrb[174].mxu1 }
0x5009   :  { %v5798_v34 = vadd.f32 %v5793_v4, %v9084_v53  ;;  %v7230_v20 = vpop.f32.mrb[175].mxu1 }
0x500e   :  { %v5917_v57 = vpop.f32.mrb[176].mxu1 }
0x500f   :  { %v7241_v39 = vpop.f32.mrb[177].mxu1 }
0x5010   :  { %v5920_v15 = vpop.f32.mrb[178].mxu1 }
0x5011   :  { %v5924_v37 = vpack.c.bf16 %v5920_v15, %v5917_v57  ;;  %v7242_v38 = vpop.f32.mrb[179].mxu1 }
0x5013   :  { %7246 = vmatmul.mubr.msk.bf16.vlgmr.msra.gmra.mrb[160].mxu0 %vm129_vm2, %v5924_v37 }
0x5014   :  { %7265 = vmatprep.mubr.msk.bf16.mxu0 %vm7657_vm1, %v7656_v18  ;;  %7258 = vmatpush3.bf16.msra.mxu0 %v7342_v36 }
0x5015   :  { %7259 = vmatprep.subr.bf16.mxu0 %v7656_v18 }
0x5018   :  { %7260 = vmatpush3.bf16.msra.mxu0 %v7343_v23 }
0x5019   :  { %7261 = vmatprep.subr.bf16.mxu0 %v7656_v18 }
0x50e6   :  { %v5968_v21 = vpop.f32.mrb[160].mxu0 }
0x50e7   :  { %v5975_v54 = vadd.f32 %v5968_v21, %v5797_v45  ;;  %v7247_v44 = vpop.f32.mrb[161].mxu0  ;;  %v7344_v21 = vld [vmem:[%s9204_s0 + $0x110] sm:$0xff]  }
0x50e8   :  { %v5971_v17 = vpop.f32.mrb[162].mxu0  ;;  %7262 = vmatpush3.bf16.msra.mxu0 %v7344_v21 }
0x50e9   :  { %v5980_v58 = vadd.f32 %v5978_v14, %v5975_v54  ;;  %v5976_v11 = vadd.f32 %v5971_v17, %v5798_v34  ;;  %v7248_v47 = vpop.f32.mrb[163].mxu0  ;;  %7263 = vmatprep.subr.bf16.mxu0 %v7656_v18 }
0x50eb   :  { %v5981_v22 = vadd.f32 %v5978_v14, %v5976_v11  ;;  %5984 = vrot.lane.b32.xlu0 %v5980_v58, %s7662_s6  ;;  %v7345_v14 = vld [vmem:[%s9204_s0 + $0x118] sm:$0xff]  }
0x50ec   :  { %7264 = vmatpush3.bf16.msra.mxu0 %v7345_v14 }
0x50ed   :  { %5986 = vrot.lane.b32.xlu1 %v5981_v22, %s7662_s6 }
0x515d   :  { %v5985_v53 = vpop.permute.xlu0 %5984 }
0x515e   :  { %v9121_v40 = vadd.f32 %v5985_v53, %v8911_v56 }
0x515f   :  { %v5987_v32 = vpop.permute.xlu1 %5986 }
0x5160   :  { %v9124_v55 = vadd.f32 %v5987_v32, %v8914_v30  ;;  %5995 = vrot.lane.b32.xlu0 %v9121_v40, %s7655_s18 }
0x5162   :  { %5997 = vrot.lane.b32.xlu1 %v9124_v55, %s7655_s18 }
0x51d2   :  { %v5996_v63 = vpop.permute.xlu0 %5995 }
0x51d3   :  { %v6001_v59 = vsel %vm19_vm0, %v5996_v63, 0.0 }
0x51d4   :  { %6002 = vadd.xlane.f32.xlu0 %v6001_v59  ;;  %v5998_v6 = vpop.permute.xlu1 %5997 }
0x51d5   :  { %v6004_v1 = vsel %vm19_vm0, %v5998_v6, 0.0 }
0x51d6   :  { %6005 = vadd.xlane.f32.xlu1 %v6004_v1 }
0x5261   :  { %v6003_v56 = vpop.xlane.xlu0 %6002 }
0x5262   :  { %v6007_v61 = vmul.f32 0.03125, %v6003_v56 }
0x5263   :  { %v6006_v13 = vpop.xlane.xlu1 %6005 }
0x5264   :  { %v6009_v30 = vsub.f32 %v9121_v40, %v6007_v61  ;;  %v6008_v24 = vmul.f32 0.03125, %v6006_v13 }
0x5266   :  { %v6011_v2 = vmul.f32 %v6009_v30, %v6009_v30  ;;  %v6010_v42 = vsub.f32 %v9124_v55, %v6008_v24 }
0x5268   :  { %v6012_v16 = vmul.f32 %v6010_v42, %v6010_v42  ;;  %6015 = vrot.lane.b32.xlu0 %v6011_v2, %s7655_s18 }
0x526a   :  { %6017 = vrot.lane.b32.xlu1 %v6012_v16, %s7655_s18 }
0x52da   :  { %v6016_v3 = vpop.permute.xlu0 %6015 }
0x52db   :  { %v6021_v41 = vsel %vm19_vm0, %v6016_v3, 0.0 }
0x52dc   :  { %6022 = vadd.xlane.f32.xlu0 %v6021_v41  ;;  %v6018_v62 = vpop.permute.xlu1 %6017 }
0x52dd   :  { %v6024_v48 = vsel %vm19_vm0, %v6018_v62, 0.0 }
0x52de   :  { %6025 = vadd.xlane.f32.xlu1 %v6024_v48 }
0x52ef   :  { %6037 = vrot.lane.b32.xlu1 %v6010_v42, %s7655_s18 }
0x52f2   :  { %6035 = vrot.lane.b32.xlu0 %v6009_v30, %s7655_s18 }
0x52f3   :  { %6171 = vrot.lane.b32.xlu1 %v6483_v8, %s7659_s30 }
0x52f6   :  { %6064 = vrot.lane.b32.xlu0 %v6482_v5, %s7655_s18 }
0x5369   :  { %v6023_v29 = vpop.xlane.xlu0 %6022 }
0x536a   :  { %v6027_v10 = vmul.f32 0.032258064, %v6023_v29 }
0x536b   :  { %v6026_v46 = vpop.xlane.xlu1 %6025 }
0x536c   :  { %7610 = vrsqrt.f32 %v6027_v10  ;;  %v6028_v0 = vmul.f32 0.032258064, %v6026_v46  ;;  %vm6045_vm1 = vcmp.eq.f32.partialorder %v6027_v10, inf  ;;  %v6048_v60 = vand.u32 2147483648, %v6027_v10  ;;  %v6492_v46 = vld [vmem:[%s9205_s1 + $0x15] ss:$0 sm:$0xff] }
0x536d   :  { %vm6047_vm2 = vcmp.eq.f32.partialorder %v6027_v10, 0.0  ;;  %v6036_v28 = vpop.permute.xlu0 %6035  ;;  %s7669_s1 = smov [#allocation2]  }
0x536e   :  { %7612 = vrsqrt.f32 %v6028_v0  ;;  %vm6052_vm3 = vcmp.eq.f32.partialorder %v6028_v0, inf  ;;  %v6055_v50 = vand.u32 2147483648, %v6028_v0  ;;  %vm6054_vm4 = vcmp.eq.f32.partialorder %v6028_v0, 0.0 }
0x536f   :  { %v6038_v31 = vpop.permute.xlu1 %6037  ;;  %v6041_v45 = vmul.f32 %v6482_v5, %v6036_v28 }
0x5370   :  { %v6042_v34 = vmul.f32 %v6482_v5, %v6038_v31 }
0x5371   :  { %v6065_v57 = vpop.permute.xlu0 %6064 }
0x5373   :  { %v6172_v63 = vpop.permute.xlu1 %6171 }
0x5376   :  { %v7611_v33 = vpop.eup %7610 }
0x5377   :  { %v6044_v26 = vmul.f32 %v7611_v33, %v6027_v10 }
0x5378   :  { %v7613_v9 = vpop.eup %7612 }
0x5379   :  { %v6051_v25 = vmul.f32 %v7613_v9, %v6028_v0  ;;  %v6046_v52 = vsel %vm6045_vm1, %v6027_v10, %v6044_v26 }
0x537a   :  { %v6049_v43 = vsel %vm6047_vm2, %v6048_v60, %v6046_v52 }
0x537b   :  { %v6057_v49 = vadd.f32 1e-06, %v6049_v43  ;;  %v6053_v12 = vsel %vm6052_vm3, %v6028_v0, %v6051_v25 }
0x537c   :  { %v6056_v19 = vsel %vm6054_vm4, %v6055_v50, %v6053_v12 }
0x537d   :  { %7614 = vrcp.f32 %v6057_v49  ;;  %v6058_v27 = vadd.f32 1e-06, %v6056_v19 }
0x537f   :  { %7616 = vrcp.f32 %v6058_v27 }
0x5387   :  { %v7615_v51 = vpop.eup %7614 }
0x5388   :  { %v6060_v4 = vmul.f32 %v7615_v51, %v6041_v45 }
0x5389   :  { %v7617_v20 = vpop.eup %7616 }
0x538a   :  { %v6062_v39 = vmul.f32 %v7617_v20, %v6042_v34  ;;  %v6067_v15 = vadd.f32 %v6065_v57, %v6060_v4 }
0x538c   :  { %v6068_v37 = vadd.f32 %v6065_v57, %v6062_v39 }
0x538e   :  { %v6082_v38 = vpack.c.bf16 %v6068_v37, %v6067_v15 }
0x5390   :  { %7254 = vmatmul.mubr.msk.bf16.vlgmr.msra.gmra.mrb[180].mxu1 %vm19_vm0, %v6082_v38 }
0x5463   :  { %v6136_v54 = vpop.f32.mrb[180].mxu1 }
0x5464   :  { %v6137_v44 = vadd.f32 %v6483_v8, %v6136_v54  ;;  %v7255_v17 = vpop.f32.mrb[181].mxu1 }
0x5465   :  { %v6139_v58 = vpop.f32.mrb[182].mxu1 }
0x5466   :  { %v6140_v11 = vadd.f32 %v6483_v8, %v6139_v58  ;;  %v7256_v47 = vpop.f32.mrb[183].mxu1  ;;  %v6143_v22 = vmax.f32 %v6137_v44, 0.0 }
0x5468   :  { %v6144_v53 = vmax.f32 %v6140_v11, 0.0 }
0x546a   :  { %v6145_v32 = vpack.c.bf16 %v6144_v53, %v6143_v22 }
0x546c   :  { %7266 = vmatmul.mubr.msk.bf16.vlgmr.msra.gmra.mrb[164].mxu0 %vm1012_vm5, %v6145_v32 }
0x553f   :  { %v6211_v59 = vpop.f32.mrb[164].mxu0 }
0x5540   :  { %v6212_v6 = vadd.f32 %v6211_v59, %v6172_v63  ;;  %v7267_v18 = vpop.f32.mrb[165].mxu0 }
0x5541   :  { %v6214_v1 = vpop.f32.mrb[166].mxu0 }
0x5542   :  { %v6215_v56 = vadd.f32 %v6214_v1, %v6172_v63  ;;  %6220 = vrot.lane.b32.xlu0 %v6212_v6, %s7662_s6  ;;  %v7268_v61 = vpop.f32.mrb[167].mxu0 }
0x5544   :  { %6222 = vrot.lane.b32.xlu1 %v6215_v56, %s7662_s6 }
0x55b4   :  { %v6221_v13 = vpop.permute.xlu0 %6220 }
0x55b5   :  { %v6226_v30 = vadd.f32 %v6221_v13, %v9121_v40 }
0x55b6   :  { %v6223_v24 = vpop.permute.xlu1 %6222 }
0x55b7   :  { %v6227_v2 = vadd.f32 %v6223_v24, %v9124_v55  ;;  %6231 = vrot.lane.b32.xlu0 %v6226_v30, %s7655_s18 }
0x55b9   :  { %6233 = vrot.lane.b32.xlu1 %v6227_v2, %s7655_s18 }
0x5629   :  { %v6232_v42 = vpop.permute.xlu0 %6231 }
0x562a   :  { %v6237_v16 = vsel %vm19_vm0, %v6232_v42, 0.0 }
0x562b   :  { %6238 = vadd.xlane.f32.xlu0 %v6237_v16  ;;  %v6234_v3 = vpop.permute.xlu1 %6233 }
0x562c   :  { %v6240_v41 = vsel %vm19_vm0, %v6234_v3, 0.0 }
0x562d   :  { %6241 = vadd.xlane.f32.xlu1 %v6240_v41 }
0x56b8   :  { %v6239_v62 = vpop.xlane.xlu0 %6238 }
0x56b9   :  { %v6243_v48 = vmul.f32 0.03125, %v6239_v62 }
0x56ba   :  { %v6242_v5 = vpop.xlane.xlu1 %6241 }
0x56bb   :  { %v6245_v35 = vsub.f32 %v6226_v30, %v6243_v48  ;;  %v6244_v40 = vmul.f32 0.03125, %v6242_v5 }
0x56bd   :  { %v6247_v7 = vmul.f32 %v6245_v35, %v6245_v35  ;;  %v6246_v36 = vsub.f32 %v6227_v2, %v6244_v40 }
0x56bf   :  { %v6248_v55 = vmul.f32 %v6246_v36, %v6246_v36  ;;  %6251 = vrot.lane.b32.xlu0 %v6247_v7, %s7655_s18 }
0x56c1   :  { %6253 = vrot.lane.b32.xlu1 %v6248_v55, %s7655_s18 }
0x5731   :  { %v6252_v8 = vpop.permute.xlu0 %6251 }
0x5732   :  { %v6257_v23 = vsel %vm19_vm0, %v6252_v8, 0.0 }
0x5733   :  { %6258 = vadd.xlane.f32.xlu0 %v6257_v23  ;;  %v6254_v29 = vpop.permute.xlu1 %6253 }
0x5734   :  { %v6260_v10 = vsel %vm19_vm0, %v6254_v29, 0.0 }
0x5735   :  { %6261 = vadd.xlane.f32.xlu1 %v6260_v10 }
0x5746   :  { %6273 = vrot.lane.b32.xlu1 %v6246_v36, %s7655_s18 }
0x5749   :  { %6271 = vrot.lane.b32.xlu0 %v6245_v35, %s7655_s18 }
0x574d   :  { %6300 = vrot.lane.b32.xlu0 %v6492_v46, %s7655_s18  ;;  %s6312_s18 = sshll.u32 %s7669_s1, 4  ;;  %s6313_s18 = int_to_ptr.vmem [resolvable:$true] %s6312_s18 }
0x574e   :  { %s7631_s12 = scalar_lea.vmem %s6313_s18, 256  ;;  %p7636_p1 = scmp.lt.s32.totalorder %s6313_s18, %s6313_s18 }
0x574f   :  { %p7632_p0 = scmp.ne.s32.totalorder %s6313_s18, %s7631_s12  ;;  %p7637_p2 = scmp.lt.s32.totalorder %s7631_s12, %s7631_s12 }
0x5751   :  { %p7638_p3 = por %p7637_p2, %p7636_p1 }
0x5753   :  { %p7639_p4 = pnand %p7638_p3, %p7632_p0 }
0x57c0   :  { %v6259_v0 = vpop.xlane.xlu0 %6258 }
0x57c1   :  { %v6263_v33 = vmul.f32 0.032258064, %v6259_v0 }
0x57c2   :  { %v6262_v26 = vpop.xlane.xlu1 %6261 }
0x57c3   :  { %7618 = vrsqrt.f32 %v6263_v33  ;;  %v6264_v9 = vmul.f32 0.032258064, %v6262_v26  ;;  %vm6281_vm5 = vcmp.eq.f32.partialorder %v6263_v33, inf  ;;  %v6284_v50 = vand.u32 2147483648, %v6263_v33 }
0x57c4   :  { %vm6283_vm6 = vcmp.eq.f32.partialorder %v6263_v33, 0.0  ;;  %v6272_v51 = vpop.permute.xlu0 %6271 }
0x57c5   :  { %7620 = vrsqrt.f32 %v6264_v9  ;;  %vm6288_vm7 = vcmp.eq.f32.partialorder %v6264_v9, inf  ;;  %v6291_v12 = vand.u32 2147483648, %v6264_v9  ;;  %vm6290_vm8 = vcmp.eq.f32.partialorder %v6264_v9, 0.0 }
0x57c6   :  { %v6274_v4 = vpop.permute.xlu1 %6273  ;;  %v6277_v34 = vmul.f32 %v6492_v46, %v6272_v51 }
0x57c7   :  { %v6278_v39 = vmul.f32 %v6492_v46, %v6274_v4 }
0x57c8   :  { %v6301_v57 = vpop.permute.xlu0 %6300 }
0x57cd   :  { %v7619_v60 = vpop.eup %7618 }
0x57ce   :  { %v6280_v25 = vmul.f32 %v7619_v60, %v6263_v33 }
0x57cf   :  { %v7621_v52 = vpop.eup %7620 }
0x57d0   :  { %v6287_v43 = vmul.f32 %v7621_v52, %v6264_v9  ;;  %v6282_v49 = vsel %vm6281_vm5, %v6263_v33, %v6280_v25 }
0x57d1   :  { %v6285_v19 = vsel %vm6283_vm6, %v6284_v50, %v6282_v49 }
0x57d2   :  { %v6293_v27 = vadd.f32 1e-06, %v6285_v19  ;;  %v6289_v28 = vsel %vm6288_vm7, %v6264_v9, %v6287_v43 }
0x57d3   :  { %v6292_v31 = vsel %vm6290_vm8, %v6291_v12, %v6289_v28 }
0x57d4   :  { %7622 = vrcp.f32 %v6293_v27  ;;  %v6294_v45 = vadd.f32 1e-06, %v6292_v31 }
0x57d6   :  { %7624 = vrcp.f32 %v6294_v45 }
0x57de   :  { %v7623_v20 = vpop.eup %7622 }
0x57df   :  { %v6296_v15 = vmul.f32 %v7623_v20, %v6277_v34 }
0x57e0   :  { %v7625_v37 = vpop.eup %7624 }
0x57e1   :  { %v6298_v38 = vmul.f32 %v7625_v37, %v6278_v39  ;;  %v6303_v21 = vadd.f32 %v6301_v57, %v6296_v15 }
0x57e3   :  { %v6304_v14 = vadd.f32 %v6301_v57, %v6298_v38  ;;  %6305 = vst.msk [vmem:[#allocation2] sm:$0xff] %vm19_vm0, %v6303_v21 }
0x57e5   :  { %6306 = vst.msk [vmem:[#allocation2 + $0x8] sm:$0xff] %vm19_vm0, %v6304_v14 }
0x57e6   :  { %7642 = shalt.err (!%p7639_p4)
}
0x57e7   :  { %s7643_s16 = scalar_lea.hbm %s9207_s3, 256 }
0x57e8   :  { %p7644_p5 = scmp.ne.s32.totalorder %s9207_s3, %s7643_s16  ;;  %p7647_p6 = scmp.lt.u32.totalorder %s7643_s16, %s9207_s3 }
0x57ea   :  { %p7649_p7 = pnand %p7647_p6, %p7644_p5 }
0x57ec   :  { %7652 = shalt.err (!%p7649_p7)
}
0x57ed   :  { %s7670_s21 = smov 128   ;;  %s7671_s22 = smov 8  }
0x57ee   :  { %6318 = dma.vmem_to_hbm [thread:$0]  %s6313_s18, 256, %s9207_s3, [#allocation3], %s7670_s21, %s7670_s21, %s7671_s22  }
0x57ef   :  { %7653 = dma.done.wait [#allocation3], 256  }
0x57f0   :  { %7654 = vsyncadd [#allocation3], 4294967040 }
0x57f1   :  { %6322 = vsyncpa [#allocation3], 1 }

</bundles_post_ra>
